<compile_context>
chip_gen: v7x
topology: tpu7x:2x2x1
jax: 0.10.0
libtpu: 0.0.40
codegen_flags: <defaults>
</compile_context>

<pallas_src>
import jax
import jax.numpy as jnp
from jax.experimental import pallas as pl
from jax.experimental.pallas import tpu as pltpu

EPS = 1e-5
LANES = 128

# MXU operand dtype. On v5e (and for ~2x MXU headroom on v6e/v7x) set this to
# jnp.bfloat16 — accumulation stays f32 via preferred_element_type, BN/residual
# math stays f32 — at the cost of ~1e-2 absolute deviation vs. the f32 PyTorch
# module (the test below loosens its tolerance automatically in that case).
MXU_DTYPE = jnp.float32


def _round_up(x, m):
    return (x + m - 1) // m * m


def _resblock_kernel(patches_ref, xres_ref, w1_ref, w2_ref, gamma_ref, beta_ref,
                     out_ref, fxpad_ref):
    N, Hp, Wp, Cp = fxpad_ref.shape
    H, W = Hp - 2, Wp - 2
    M = N * H * W

    gamma = gamma_ref[...]            # (1, Cp) f32, zero-padded past the real C
    beta = beta_ref[...]              # (1, Cp) f32

    def bn_fold(acc):
        """Training-mode BatchNorm folded into one FMA: acc * scale + shift.

        Biased per-channel moments over all M = N*H*W rows. The conv bias only
        shifts the mean and is subtracted straight back out by BN, so it is
        omitted from the conv accumulators entirely. Padded channels have
        gamma = beta = 0, so they stay exactly zero.
        """
        mean = jnp.mean(acc, axis=0, keepdims=True)                      # (1, Cp)
        var = jnp.mean(acc * acc, axis=0, keepdims=True) - mean * mean   # biased
        scale = gamma * jax.lax.rsqrt(var + EPS)                         # EUP rsqrt
        shift = beta - mean * scale
        return acc * scale + shift

    # ---- conv1: one lane-dense im2col matmul, K = 9*C zero-padded to Kp. ----
    acc1 = jnp.dot(patches_ref[...], w1_ref[...],
                   preferred_element_type=jnp.float32)                   # (M, Cp)
    fx = jnp.maximum(bn_fold(acc1), 0.0)                                 # BN + ReLU

    # ---- stage fx with a 1-px spatial halo for conv2 (padding=1). -----------
    # Only the border is zeroed (not the whole scratch); the interior is
    # written once. Padded channels of fx are already exactly zero.
    zrow = jnp.zeros((N, 1, Wp, Cp), fxpad_ref.dtype)
    zcol = jnp.zeros((N, Hp, 1, Cp), fxpad_ref.dtype)
    fxpad_ref[:, 0:1, :, :] = zrow
    fxpad_ref[:, Hp - 1:Hp, :, :] = zrow
    fxpad_ref[:, :, 0:1, :] = zcol
    fxpad_ref[:, :, Wp - 1:Wp, :] = zcol
    fxpad_ref[:, 1:1 + H, 1:1 + W, :] = (
        fx.reshape(N, H, W, Cp).astype(fxpad_ref.dtype))

    # ---- conv2: 9 taps, each a dense (M, Cp) x (Cp, Cp) MXU matmul. ---------
    # Read one contiguous row-slab per dy; slice the dx shift from the loaded
    # value so the halo scratch is only re-read 3 times instead of 9.
    acc2 = jnp.zeros((M, Cp), jnp.float32)
    for dy in range(3):
        slab = fxpad_ref[:, dy:dy + H, :, :]                  # (N, H, Wp, Cp)
        for dx in range(3):
            patch = slab[:, :, dx:dx + W, :].reshape(M, Cp)
            acc2 = acc2 + jnp.dot(patch, w2_ref[3 * dy + dx],
                                  preferred_element_type=jnp.float32)

    # ---- BN + residual add; output last dim = 128 lanes -> unmasked stores. --
    out_ref[...] = (bn_fold(acc2) + xres_ref[...]).astype(out_ref.dtype)


def resblock_forward_nhwc(x_nhwc, w_oihw, b_conv, gamma, beta,
                          *, mxu_dtype=MXU_DTYPE):
    """ResBlock forward on an NHWC activation (preferred TPU layout).

    x_nhwc: (N, H, W, C); w_oihw: (C, C, 3, 3) shared by both convs;
    b_conv / gamma / beta: (C,). Returns (N, H, W, C) float32.

    b_conv is accepted for API parity but cancels exactly inside training-mode
    BatchNorm, so it is not passed to the kernel.
    """
    del b_conv
    N, H, W, C = x_nhwc.shape
    Cp = _round_up(max(C, 1), LANES)     # lane-dense channel dim
    K = 9 * C
    Kp = _round_up(K, LANES)             # lane-dense contraction dim for conv1
    M = N * H * W

    x32 = x_nhwc.astype(jnp.float32)

    # im2col for conv1 (cheap here: 9*C <= 128, so the padded patch matrix is
    # no bigger than channel-padded x itself). Tuned for small C.
    xp = jnp.pad(x32, ((0, 0), (1, 1), (1, 1), (0, 0)))
    taps = [xp[:, dy:dy + H, dx:dx + W, :] for dy in range(3) for dx in range(3)]
    patches = jnp.concatenate(taps, axis=-1).reshape(M, K)
    patches = jnp.pad(patches, ((0, 0), (0, Kp - K))).astype(mxu_dtype)

    # Weights: (Cout, Cin, 3, 3) -> (tap, Cin, Cout), tap = 3*ky + kx.
    w_t = jnp.transpose(w_oihw, (2, 3, 1, 0)).reshape(9, C, C).astype(jnp.float32)
    w1 = jnp.pad(w_t.reshape(K, C), ((0, Kp - K), (0, Cp - C))).astype(mxu_dtype)
    w2 = jnp.pad(w_t, ((0, 0), (0, Cp - C), (0, Cp - C))).astype(mxu_dtype)

    # Residual input, channel-padded: avoids an in-kernel strided re-slice.
    x_res = jnp.pad(x32, ((0, 0), (0, 0), (0, 0), (0, Cp - C))).reshape(M, Cp)

    gamma_p = jnp.pad(gamma.astype(jnp.float32), (0, Cp - C)).reshape(1, Cp)
    beta_p = jnp.pad(beta.astype(jnp.float32), (0, Cp - C)).reshape(1, Cp)

    mxu_bytes = jnp.finfo(mxu_dtype).bits // 8
    footprint = (M * Kp * mxu_bytes                       # patches
                 + M * Cp * 4                             # x_res (f32)
                 + Kp * Cp * mxu_bytes                    # w1
                 + 9 * Cp * Cp * mxu_bytes                # w2 taps
                 + 2 * Cp * 4                             # gamma, beta
                 + M * Cp * 4                             # output
                 + N * (H + 2) * (W + 2) * Cp * mxu_bytes)  # fx halo scratch
    # Generous headroom for the large f32 value temporaries (acc1/fx/acc2/tap
    # copies), clamped to stay well inside every generation's physical VMEM
    # (v7x has only 64 MiB per TensorCore).
    vmem_limit = int(min(max(8 * footprint, 16 * 2**20), 48 * 2**20))

    flops = 2 * M * Kp * Cp + 9 * 2 * M * Cp * Cp + 12 * M * Cp
    cost = pl.CostEstimate(flops=int(flops), transcendentals=int(2 * Cp),
                           bytes_accessed=int(footprint))

    out2d = pl.pallas_call(
        _resblock_kernel,
        out_shape=jax.ShapeDtypeStruct((M, Cp), jnp.float32),
        in_specs=[pl.BlockSpec(memory_space=pltpu.MemorySpace.VMEM)] * 6,
        out_specs=pl.BlockSpec(memory_space=pltpu.MemorySpace.VMEM),
        scratch_shapes=[pltpu.VMEM((N, H + 2, W + 2, Cp), mxu_dtype)],
        compiler_params=pltpu.CompilerParams(vmem_limit_bytes=vmem_limit),
        cost_estimate=cost,
    )(patches, x_res, w1, w2, gamma_p, beta_p)

    return out2d.reshape(N, H, W, Cp)[..., :C]


def resblock_forward(x_nchw, w_oihw, b_conv, gamma, beta):
    """PyTorch-layout adapter: NCHW in / NCHW out (keep activations NHWC when
    chaining blocks to avoid the boundary transposes)."""
    x_nhwc = jnp.transpose(x_nchw, (0, 2, 3, 1))
    out = resblock_forward_nhwc(x_nhwc, w_oihw, b_conv, gamma, beta)
    return jnp.transpose(out, (0, 3, 1, 2))


def _reference(x, w, b, gamma, beta):
    """Pure-JAX reference in NCHW, matching PyTorch semantics."""
    def conv_bn(h):
        y = jax.lax.conv_general_dilated(
            h, w, window_strides=(1, 1), padding=((1, 1), (1, 1)),
            dimension_numbers=("NCHW", "OIHW", "NCHW"),
            precision=jax.lax.Precision.HIGHEST)
        y = y + b[None, :, None, None]
        mean = jnp.mean(y, axis=(0, 2, 3), keepdims=True)
        var = jnp.mean((y - mean) ** 2, axis=(0, 2, 3), keepdims=True)
        y = (y - mean) / jnp.sqrt(var + EPS)
        return y * gamma[None, :, None, None] + beta[None, :, None, None]

    fx = jax.nn.relu(conv_bn(x))
    return conv_bn(fx) + x


if __name__ == "__main__":
    key = jax.random.PRNGKey(0)
    k_x, k_w, k_b = jax.random.split(key, 3)

    N, C, H, W = 2, 4, 16, 16          # in_channels == out_channels == 4
    x = jax.random.normal(k_x, (N, C, H, W), jnp.float32)

    # Deterministic parameter init (shapes per nn.Conv2d / nn.BatchNorm2d __init__).
    fan_in = C * 3 * 3
    bound = 1.0 / (fan_in ** 0.5)
    w = jax.random.uniform(k_w, (C, C, 3, 3), jnp.float32, -bound, bound)
    b = jax.random.uniform(k_b, (C,), jnp.float32, -bound, bound)
    gamma = jnp.ones((C,), jnp.float32)   # BatchNorm weight default
    beta = jnp.zeros((C,), jnp.float32)   # BatchNorm bias default

    out = jax.block_until_ready(resblock_forward(x, w, b, gamma, beta))
    ref = _reference(x, w, b, gamma, beta)

    assert out.shape == x.shape, (out.shape, x.shape)
    tol = 5e-4 if MXU_DTYPE == jnp.float32 else 5e-2  # bf16 MXU operands are lossier
    assert jnp.allclose(out, ref, atol=tol, rtol=tol), float(
        jnp.max(jnp.abs(out - ref)))
    print("KERNEL_OK")
</pallas_src>

<mosaic_0001>
module attributes {stable_mosaic.version = 11 : i64} {
  func.func @_resblock_kernel(%arg0: memref<512x128xf32, #tpu.memory_space<vmem>>, %arg1: memref<512x128xf32, #tpu.memory_space<vmem>>, %arg2: memref<128x128xf32, #tpu.memory_space<vmem>>, %arg3: memref<9x128x128xf32, #tpu.memory_space<vmem>>, %arg4: memref<1x128xf32, #tpu.memory_space<vmem>>, %arg5: memref<1x128xf32, #tpu.memory_space<vmem>>, %arg6: memref<512x128xf32, #tpu.memory_space<vmem>>, %arg7: memref<2x18x18x128xf32, #tpu.memory_space<vmem>>) attributes {dimension_semantics = [], scalar_prefetch = 0 : i64, scratch_operands = 1 : i64, tpu.core_type = #tpu.core_type<tc>} {
    %c0 = arith.constant 0 : index
    %c0_0 = arith.constant 0 : index
    %0 = vector.load %arg4[%c0, %c0_0] : memref<1x128xf32, #tpu.memory_space<vmem>>, vector<1x128xf32>
    %c0_1 = arith.constant 0 : index
    %c0_2 = arith.constant 0 : index
    %1 = vector.load %arg5[%c0_1, %c0_2] : memref<1x128xf32, #tpu.memory_space<vmem>>, vector<1x128xf32>
    %c0_3 = arith.constant 0 : index
    %c0_4 = arith.constant 0 : index
    %2 = vector.load %arg0[%c0_3, %c0_4] : memref<512x128xf32, #tpu.memory_space<vmem>>, vector<512x128xf32>
    %c0_5 = arith.constant 0 : index
    %c0_6 = arith.constant 0 : index
    %3 = vector.load %arg2[%c0_5, %c0_6] : memref<128x128xf32, #tpu.memory_space<vmem>>, vector<128x128xf32>
    %cst = arith.constant dense<0.000000e+00> : vector<512x128xf32>
    %4 = tpu.matmul %2, %3, %cst {dimension_numbers = #tpu.dot_dimension_numbers<[1], [0], [0], [1], [0, 0, 1, 1], [], []>} : vector<512x128xf32>, vector<128x128xf32>, vector<512x128xf32> -> vector<512x128xf32>
    %cst_7 = arith.constant dense<0.000000e+00> : vector<128xf32>
    %5 = vector.multi_reduction <add>, %4, %cst_7 [0] : vector<512x128xf32> to vector<128xf32>
    %6 = vector.shape_cast %5 : vector<128xf32> to vector<1x128xf32>
    %cst_8 = arith.constant 5.120000e+02 : f32
    %7 = vector.broadcast %cst_8 : f32 to vector<1x128xf32>
    %8 = arith.divf %6, %7 : vector<1x128xf32>
    %9 = arith.mulf %4, %4 : vector<512x128xf32>
    %cst_9 = arith.constant dense<0.000000e+00> : vector<128xf32>
    %10 = vector.multi_reduction <add>, %9, %cst_9 [0] : vector<512x128xf32> to vector<128xf32>
    %11 = vector.shape_cast %10 : vector<128xf32> to vector<1x128xf32>
    %cst_10 = arith.constant 5.120000e+02 : f32
    %12 = vector.broadcast %cst_10 : f32 to vector<1x128xf32>
    %13 = arith.divf %11, %12 : vector<1x128xf32>
    %14 = arith.mulf %8, %8 : vector<1x128xf32>
    %15 = arith.subf %13, %14 : vector<1x128xf32>
    %cst_11 = arith.constant 9.99999974E-6 : f32
    %16 = vector.broadcast %cst_11 : f32 to vector<1x128xf32>
    %17 = arith.addf %15, %16 : vector<1x128xf32>
    %18 = math.rsqrt %17 : vector<1x128xf32>
    %19 = arith.mulf %0, %18 : vector<1x128xf32>
    %20 = arith.mulf %8, %19 : vector<1x128xf32>
    %21 = arith.subf %1, %20 : vector<1x128xf32>
    %22 = vector.broadcast %19 : vector<1x128xf32> to vector<512x128xf32>
    %23 = arith.mulf %4, %22 : vector<512x128xf32>
    %24 = vector.broadcast %21 : vector<1x128xf32> to vector<512x128xf32>
    %25 = arith.addf %23, %24 : vector<512x128xf32>
    %cst_12 = arith.constant 0.000000e+00 : f32
    %26 = vector.broadcast %cst_12 : f32 to vector<512x128xf32>
    %27 = arith.maximumf %25, %26 : vector<512x128xf32>
    %cst_13 = arith.constant 0.000000e+00 : f32
    %28 = vector.broadcast %cst_13 : f32 to vector<2x1x18x128xf32>
    %cst_14 = arith.constant 0.000000e+00 : f32
    %29 = vector.broadcast %cst_14 : f32 to vector<2x18x1x128xf32>
    %c0_15 = arith.constant 0 : index
    %c0_16 = arith.constant 0 : index
    %c0_17 = arith.constant 0 : index
    %c0_18 = arith.constant 0 : index
    %30 = vector.load %arg7[%c0_15, %c0_16, %c0_17, %c0_18] : memref<2x18x18x128xf32, #tpu.memory_space<vmem>>, vector<2x1x18x128xf32>
    tpu.vector_store %arg7[%c0_15, %c0_16, %c0_17, %c0_18], %28 {strides = array<i32>} : memref<2x18x18x128xf32, #tpu.memory_space<vmem>>, vector<2x1x18x128xf32>,
    %c0_19 = arith.constant 0 : index
    %c17 = arith.constant 17 : index
    %c0_20 = arith.constant 0 : index
    %c0_21 = arith.constant 0 : index
    %31 = vector.load %arg7[%c0_19, %c17, %c0_20, %c0_21] : memref<2x18x18x128xf32, #tpu.memory_space<vmem>>, vector<2x1x18x128xf32>
    tpu.vector_store %arg7[%c0_19, %c17, %c0_20, %c0_21], %28 {strides = array<i32>} : memref<2x18x18x128xf32, #tpu.memory_space<vmem>>, vector<2x1x18x128xf32>,
    %c0_22 = arith.constant 0 : index
    %c0_23 = arith.constant 0 : index
    %c0_24 = arith.constant 0 : index
    %c0_25 = arith.constant 0 : index
    %32 = vector.load %arg7[%c0_22, %c0_23, %c0_24, %c0_25] : memref<2x18x18x128xf32, #tpu.memory_space<vmem>>, vector<2x18x1x128xf32>
    tpu.vector_store %arg7[%c0_22, %c0_23, %c0_24, %c0_25], %29 {strides = array<i32>} : memref<2x18x18x128xf32, #tpu.memory_space<vmem>>, vector<2x18x1x128xf32>,
    %c0_26 = arith.constant 0 : index
    %c0_27 = arith.constant 0 : index
    %c17_28 = arith.constant 17 : index
    %c0_29 = arith.constant 0 : index
    %33 = vector.load %arg7[%c0_26, %c0_27, %c17_28, %c0_29] : memref<2x18x18x128xf32, #tpu.memory_space<vmem>>, vector<2x18x1x128xf32>
    tpu.vector_store %arg7[%c0_26, %c0_27, %c17_28, %c0_29], %29 {strides = array<i32>} : memref<2x18x18x128xf32, #tpu.memory_space<vmem>>, vector<2x18x1x128xf32>,
    %34 = vector.shape_cast %27 : vector<512x128xf32> to vector<2x16x16x128xf32>
    %c0_30 = arith.constant 0 : index
    %c1 = arith.constant 1 : index
    %c1_31 = arith.constant 1 : index
    %c0_32 = arith.constant 0 : index
    %35 = vector.load %arg7[%c0_30, %c1, %c1_31, %c0_32] : memref<2x18x18x128xf32, #tpu.memory_space<vmem>>, vector<2x16x16x128xf32>
    tpu.vector_store %arg7[%c0_30, %c1, %c1_31, %c0_32], %34 {strides = array<i32>} : memref<2x18x18x128xf32, #tpu.memory_space<vmem>>, vector<2x16x16x128xf32>,
    %cst_33 = arith.constant 0.000000e+00 : f32
    %36 = vector.broadcast %cst_33 : f32 to vector<512x128xf32>
    %c0_34 = arith.constant 0 : index
    %c0_35 = arith.constant 0 : index
    %c0_36 = arith.constant 0 : index
    %c0_37 = arith.constant 0 : index
    %37 = vector.load %arg7[%c0_34, %c0_35, %c0_36, %c0_37] : memref<2x18x18x128xf32, #tpu.memory_space<vmem>>, vector<2x16x18x128xf32>
    %38 = vector.extract_strided_slice %37 {offsets = [0, 0, 0, 0], sizes = [2, 16, 16, 128], strides = [1, 1, 1, 1]} : vector<2x16x18x128xf32> to vector<2x16x16x128xf32>
    %39 = vector.shape_cast %38 : vector<2x16x16x128xf32> to vector<512x128xf32>
    %c0_38 = arith.constant 0 : index
    %c0_39 = arith.constant 0 : index
    %c0_40 = arith.constant 0 : index
    %40 = vector.load %arg3[%c0_38, %c0_39, %c0_40] : memref<9x128x128xf32, #tpu.memory_space<vmem>>, vector<1x128x128xf32>
    %41 = vector.shape_cast %40 : vector<1x128x128xf32> to vector<128x128xf32>
    %cst_41 = arith.constant dense<0.000000e+00> : vector<512x128xf32>
    %42 = tpu.matmul %39, %41, %cst_41 {dimension_numbers = #tpu.dot_dimension_numbers<[1], [0], [0], [1], [0, 0, 1, 1], [], []>} : vector<512x128xf32>, vector<128x128xf32>, vector<512x128xf32> -> vector<512x128xf32>
    %43 = arith.addf %36, %42 : vector<512x128xf32>
    %44 = vector.extract_strided_slice %37 {offsets = [0, 0, 1, 0], sizes = [2, 16, 16, 128], strides = [1, 1, 1, 1]} : vector<2x16x18x128xf32> to vector<2x16x16x128xf32>
    %45 = vector.shape_cast %44 : vector<2x16x16x128xf32> to vector<512x128xf32>
    %c1_42 = arith.constant 1 : index
    %c0_43 = arith.constant 0 : index
    %c0_44 = arith.constant 0 : index
    %46 = vector.load %arg3[%c1_42, %c0_43, %c0_44] : memref<9x128x128xf32, #tpu.memory_space<vmem>>, vector<1x128x128xf32>
    %47 = vector.shape_cast %46 : vector<1x128x128xf32> to vector<128x128xf32>
    %cst_45 = arith.constant dense<0.000000e+00> : vector<512x128xf32>
    %48 = tpu.matmul %45, %47, %cst_45 {dimension_numbers = #tpu.dot_dimension_numbers<[1], [0], [0], [1], [0, 0, 1, 1], [], []>} : vector<512x128xf32>, vector<128x128xf32>, vector<512x128xf32> -> vector<512x128xf32>
    %49 = arith.addf %43, %48 : vector<512x128xf32>
    %50 = vector.extract_strided_slice %37 {offsets = [0, 0, 2, 0], sizes = [2, 16, 16, 128], strides = [1, 1, 1, 1]} : vector<2x16x18x128xf32> to vector<2x16x16x128xf32>
    %51 = vector.shape_cast %50 : vector<2x16x16x128xf32> to vector<512x128xf32>
    %c2 = arith.constant 2 : index
    %c0_46 = arith.constant 0 : index
    %c0_47 = arith.constant 0 : index
    %52 = vector.load %arg3[%c2, %c0_46, %c0_47] : memref<9x128x128xf32, #tpu.memory_space<vmem>>, vector<1x128x128xf32>
    %53 = vector.shape_cast %52 : vector<1x128x128xf32> to vector<128x128xf32>
    %cst_48 = arith.constant dense<0.000000e+00> : vector<512x128xf32>
    %54 = tpu.matmul %51, %53, %cst_48 {dimension_numbers = #tpu.dot_dimension_numbers<[1], [0], [0], [1], [0, 0, 1, 1], [], []>} : vector<512x128xf32>, vector<128x128xf32>, vector<512x128xf32> -> vector<512x128xf32>
    %55 = arith.addf %49, %54 : vector<512x128xf32>
    %c0_49 = arith.constant 0 : index
    %c1_50 = arith.constant 1 : index
    %c0_51 = arith.constant 0 : index
    %c0_52 = arith.constant 0 : index
    %56 = vector.load %arg7[%c0_49, %c1_50, %c0_51, %c0_52] : memref<2x18x18x128xf32, #tpu.memory_space<vmem>>, vector<2x16x18x128xf32>
    %57 = vector.extract_strided_slice %56 {offsets = [0, 0, 0, 0], sizes = [2, 16, 16, 128], strides = [1, 1, 1, 1]} : vector<2x16x18x128xf32> to vector<2x16x16x128xf32>
    %58 = vector.shape_cast %57 : vector<2x16x16x128xf32> to vector<512x128xf32>
    %c3 = arith.constant 3 : index
    %c0_53 = arith.constant 0 : index
    %c0_54 = arith.constant 0 : index
    %59 = vector.load %arg3[%c3, %c0_53, %c0_54] : memref<9x128x128xf32, #tpu.memory_space<vmem>>, vector<1x128x128xf32>
    %60 = vector.shape_cast %59 : vector<1x128x128xf32> to vector<128x128xf32>
    %cst_55 = arith.constant dense<0.000000e+00> : vector<512x128xf32>
    %61 = tpu.matmul %58, %60, %cst_55 {dimension_numbers = #tpu.dot_dimension_numbers<[1], [0], [0], [1], [0, 0, 1, 1], [], []>} : vector<512x128xf32>, vector<128x128xf32>, vector<512x128xf32> -> vector<512x128xf32>
    %62 = arith.addf %55, %61 : vector<512x128xf32>
    %63 = vector.extract_strided_slice %56 {offsets = [0, 0, 1, 0], sizes = [2, 16, 16, 128], strides = [1, 1, 1, 1]} : vector<2x16x18x128xf32> to vector<2x16x16x128xf32>
    %64 = vector.shape_cast %63 : vector<2x16x16x128xf32> to vector<512x128xf32>
    %c4 = arith.constant 4 : index
    %c0_56 = arith.constant 0 : index
    %c0_57 = arith.constant 0 : index
    %65 = vector.load %arg3[%c4, %c0_56, %c0_57] : memref<9x128x128xf32, #tpu.memory_space<vmem>>, vector<1x128x128xf32>
    %66 = vector.shape_cast %65 : vector<1x128x128xf32> to vector<128x128xf32>
    %cst_58 = arith.constant dense<0.000000e+00> : vector<512x128xf32>
    %67 = tpu.matmul %64, %66, %cst_58 {dimension_numbers = #tpu.dot_dimension_numbers<[1], [0], [0], [1], [0, 0, 1, 1], [], []>} : vector<512x128xf32>, vector<128x128xf32>, vector<512x128xf32> -> vector<512x128xf32>
    %68 = arith.addf %62, %67 : vector<512x128xf32>
    %69 = vector.extract_strided_slice %56 {offsets = [0, 0, 2, 0], sizes = [2, 16, 16, 128], strides = [1, 1, 1, 1]} : vector<2x16x18x128xf32> to vector<2x16x16x128xf32>
    %70 = vector.shape_cast %69 : vector<2x16x16x128xf32> to vector<512x128xf32>
    %c5 = arith.constant 5 : index
    %c0_59 = arith.constant 0 : index
    %c0_60 = arith.constant 0 : index
    %71 = vector.load %arg3[%c5, %c0_59, %c0_60] : memref<9x128x128xf32, #tpu.memory_space<vmem>>, vector<1x128x128xf32>
    %72 = vector.shape_cast %71 : vector<1x128x128xf32> to vector<128x128xf32>
    %cst_61 = arith.constant dense<0.000000e+00> : vector<512x128xf32>
    %73 = tpu.matmul %70, %72, %cst_61 {dimension_numbers = #tpu.dot_dimension_numbers<[1], [0], [0], [1], [0, 0, 1, 1], [], []>} : vector<512x128xf32>, vector<128x128xf32>, vector<512x128xf32> -> vector<512x128xf32>
    %74 = arith.addf %68, %73 : vector<512x128xf32>
    %c0_62 = arith.constant 0 : index
    %c2_63 = arith.constant 2 : index
    %c0_64 = arith.constant 0 : index
    %c0_65 = arith.constant 0 : index
    %75 = vector.load %arg7[%c0_62, %c2_63, %c0_64, %c0_65] : memref<2x18x18x128xf32, #tpu.memory_space<vmem>>, vector<2x16x18x128xf32>
    %76 = vector.extract_strided_slice %75 {offsets = [0, 0, 0, 0], sizes = [2, 16, 16, 128], strides = [1, 1, 1, 1]} : vector<2x16x18x128xf32> to vector<2x16x16x128xf32>
    %77 = vector.shape_cast %76 : vector<2x16x16x128xf32> to vector<512x128xf32>
    %c6 = arith.constant 6 : index
    %c0_66 = arith.constant 0 : index
    %c0_67 = arith.constant 0 : index
    %78 = vector.load %arg3[%c6, %c0_66, %c0_67] : memref<9x128x128xf32, #tpu.memory_space<vmem>>, vector<1x128x128xf32>
    %79 = vector.shape_cast %78 : vector<1x128x128xf32> to vector<128x128xf32>
    %cst_68 = arith.constant dense<0.000000e+00> : vector<512x128xf32>
    %80 = tpu.matmul %77, %79, %cst_68 {dimension_numbers = #tpu.dot_dimension_numbers<[1], [0], [0], [1], [0, 0, 1, 1], [], []>} : vector<512x128xf32>, vector<128x128xf32>, vector<512x128xf32> -> vector<512x128xf32>
    %81 = arith.addf %74, %80 : vector<512x128xf32>
    %82 = vector.extract_strided_slice %75 {offsets = [0, 0, 1, 0], sizes = [2, 16, 16, 128], strides = [1, 1, 1, 1]} : vector<2x16x18x128xf32> to vector<2x16x16x128xf32>
    %83 = vector.shape_cast %82 : vector<2x16x16x128xf32> to vector<512x128xf32>
    %c7 = arith.constant 7 : index
    %c0_69 = arith.constant 0 : index
    %c0_70 = arith.constant 0 : index
    %84 = vector.load %arg3[%c7, %c0_69, %c0_70] : memref<9x128x128xf32, #tpu.memory_space<vmem>>, vector<1x128x128xf32>
    %85 = vector.shape_cast %84 : vector<1x128x128xf32> to vector<128x128xf32>
    %cst_71 = arith.constant dense<0.000000e+00> : vector<512x128xf32>
    %86 = tpu.matmul %83, %85, %cst_71 {dimension_numbers = #tpu.dot_dimension_numbers<[1], [0], [0], [1], [0, 0, 1, 1], [], []>} : vector<512x128xf32>, vector<128x128xf32>, vector<512x128xf32> -> vector<512x128xf32>
    %87 = arith.addf %81, %86 : vector<512x128xf32>
    %88 = vector.extract_strided_slice %75 {offsets = [0, 0, 2, 0], sizes = [2, 16, 16, 128], strides = [1, 1, 1, 1]} : vector<2x16x18x128xf32> to vector<2x16x16x128xf32>
    %89 = vector.shape_cast %88 : vector<2x16x16x128xf32> to vector<512x128xf32>
    %c8 = arith.constant 8 : index
    %c0_72 = arith.constant 0 : index
    %c0_73 = arith.constant 0 : index
    %90 = vector.load %arg3[%c8, %c0_72, %c0_73] : memref<9x128x128xf32, #tpu.memory_space<vmem>>, vector<1x128x128xf32>
    %91 = vector.shape_cast %90 : vector<1x128x128xf32> to vector<128x128xf32>
    %cst_74 = arith.constant dense<0.000000e+00> : vector<512x128xf32>
    %92 = tpu.matmul %89, %91, %cst_74 {dimension_numbers = #tpu.dot_dimension_numbers<[1], [0], [0], [1], [0, 0, 1, 1], [], []>} : vector<512x128xf32>, vector<128x128xf32>, vector<512x128xf32> -> vector<512x128xf32>
    %93 = arith.addf %87, %92 : vector<512x128xf32>
    %cst_75 = arith.constant dense<0.000000e+00> : vector<128xf32>
    %94 = vector.multi_reduction <add>, %93, %cst_75 [0] : vector<512x128xf32> to vector<128xf32>
    %95 = vector.shape_cast %94 : vector<128xf32> to vector<1x128xf32>
    %cst_76 = arith.constant 5.120000e+02 : f32
    %96 = vector.broadcast %cst_76 : f32 to vector<1x128xf32>
    %97 = arith.divf %95, %96 : vector<1x128xf32>
    %98 = arith.mulf %93, %93 : vector<512x128xf32>
    %cst_77 = arith.constant dense<0.000000e+00> : vector<128xf32>
    %99 = vector.multi_reduction <add>, %98, %cst_77 [0] : vector<512x128xf32> to vector<128xf32>
    %100 = vector.shape_cast %99 : vector<128xf32> to vector<1x128xf32>
    %cst_78 = arith.constant 5.120000e+02 : f32
    %101 = vector.broadcast %cst_78 : f32 to vector<1x128xf32>
    %102 = arith.divf %100, %101 : vector<1x128xf32>
    %103 = arith.mulf %97, %97 : vector<1x128xf32>
    %104 = arith.subf %102, %103 : vector<1x128xf32>
    %cst_79 = arith.constant 9.99999974E-6 : f32
    %105 = vector.broadcast %cst_79 : f32 to vector<1x128xf32>
    %106 = arith.addf %104, %105 : vector<1x128xf32>
    %107 = math.rsqrt %106 : vector<1x128xf32>
    %108 = arith.mulf %0, %107 : vector<1x128xf32>
    %109 = arith.mulf %97, %108 : vector<1x128xf32>
    %110 = arith.subf %1, %109 : vector<1x128xf32>
    %111 = vector.broadcast %108 : vector<1x128xf32> to vector<512x128xf32>
    %112 = arith.mulf %93, %111 : vector<512x128xf32>
    %113 = vector.broadcast %110 : vector<1x128xf32> to vector<512x128xf32>
    %114 = arith.addf %112, %113 : vector<512x128xf32>
    %c0_80 = arith.constant 0 : index
    %c0_81 = arith.constant 0 : index
    %115 = vector.load %arg1[%c0_80, %c0_81] : memref<512x128xf32, #tpu.memory_space<vmem>>, vector<512x128xf32>
    %116 = arith.addf %114, %115 : vector<512x128xf32>
    %c0_82 = arith.constant 0 : index
    %c0_83 = arith.constant 0 : index
    %117 = vector.load %arg6[%c0_82, %c0_83] : memref<512x128xf32, #tpu.memory_space<vmem>>, vector<512x128xf32>
    tpu.vector_store %arg6[%c0_82, %c0_83], %116 {strides = array<i32>} : memref<512x128xf32, #tpu.memory_space<vmem>>, vector<512x128xf32>,
    return
  }
}

</mosaic_0001>

<bundles_post_ra>
// kernel: tpu_custom_call.1
= control target key start
LH: loop header
LB: loop body
LE: loop exit
PB: predicated region body
PF: predicated region fallthrough
CT: control target
= control target key end

     0   :  { %11 = vsyncpa [#allocation4], 0  ;;  %s14403_s0 = inlined_call_operand.hbm [shape: f32[512,128], index: 0, kind: input, shape index: {}]   ;;  %s14404_s1 = inlined_call_operand.hbm [shape: f32[512,128], index: 1, kind: input, shape index: {}]   ;;  %s14405_s2 = inlined_call_operand.hbm [shape: f32[128,128], index: 2, kind: input, shape index: {}]   ;;  %s14406_s3 = inlined_call_operand.hbm [shape: f32[9,128,128], index: 3, kind: input, shape index: {}]   ;;  %s14407_s4 = inlined_call_operand.vmem [shape: f32[1,128], index: 4, kind: input, shape index: {}]   ;;  %s14408_s5 = inlined_call_operand.vmem [shape: f32[1,128], index: 5, kind: input, shape index: {}]   ;;  %s14409_s6 = inlined_call_operand.hbm [shape: f32[512,128], index: 6, kind: output, shape index: {}]  }
   0x1   :  { %12 = vsyncpa [#allocation7], 0 }
   0x2   :  { %13 = vsyncpa [#allocation10], 0 }
   0x3   :  { %14 = vsyncpa [#allocation5], 0  ;;  %s10913_s21 = smov [#allocation6]   ;;  %s10914_s23 = smov [#allocation3]  }
   0x4   :  { %s32_s22 = sshll.u32 %s10913_s21, 4  ;;  %s20_s24 = sshll.u32 %s10914_s23, 4  ;;  %s33_s22 = int_to_ptr.vmem [resolvable:$true] %s32_s22  ;;  %s10956_s24 = int_to_ptr.vmem [resolvable:$true] %s20_s24 }
   0x5   :  { %s10795_s27 = scalar_lea.hbm %s14404_s1, 8192 }
   0x6   :  { %p10796_p0 = scmp.ne.s32.totalorder %s14404_s1, %s10795_s27  ;;  %p10799_p1 = scmp.lt.u32.totalorder %s10795_s27, %s14404_s1 }
   0x8   :  { %p10801_p2 = pnand %p10799_p1, %p10796_p0 }
   0xa   :  { %10804 = shalt.err (!%p10801_p2)
}
   0xb   :  { %s10805_s8 = scalar_lea.vmem %s33_s22, 8192  ;;  %p10810_p4 = scmp.lt.s32.totalorder %s33_s22, %s33_s22 }
   0xc   :  { %p10806_p3 = scmp.ne.s32.totalorder %s33_s22, %s10805_s8  ;;  %p10811_p5 = scmp.lt.s32.totalorder %s10805_s8, %s10805_s8 }
   0xe   :  { %p10812_p6 = por %p10811_p5, %p10810_p4 }
  0x10   :  { %p10813_p7 = pnand %p10812_p6, %p10806_p3 }
  0x12   :  { %10816 = shalt.err (!%p10813_p7)
}
  0x13   :  { %s10915_s9 = smov 128   ;;  %s10916_s10 = smov 8  }
  0x14   :  { %38 = dma.hbm_to_vmem [thread:$0]  %s14404_s1, 8192, %s33_s22, [#allocation7], %s10915_s9, %s10915_s9, %s10916_s10  }
  0x15   :  { %s10817_s15 = scalar_lea.hbm %s14403_s0, 8192 }
  0x16   :  { %p10818_p8 = scmp.ne.s32.totalorder %s14403_s0, %s10817_s15  ;;  %p10821_p9 = scmp.lt.u32.totalorder %s10817_s15, %s14403_s0 }
  0x18   :  { %p10823_p10 = pnand %p10821_p9, %p10818_p8 }
  0x1a   :  { %10826 = shalt.err (!%p10823_p10)
}
  0x1b   :  { %s10827_s20 = scalar_lea.vmem %s10956_s24, 8192  ;;  %p10832_p12 = scmp.lt.s32.totalorder %s10956_s24, %s10956_s24 }
  0x1c   :  { %p10828_p11 = scmp.ne.s32.totalorder %s10956_s24, %s10827_s20  ;;  %p10833_p13 = scmp.lt.s32.totalorder %s10827_s20, %s10827_s20 }
  0x1e   :  { %p10834_p0 = por %p10833_p13, %p10832_p12 }
  0x20   :  { %p10835_p1 = pnand %p10834_p0, %p10828_p11 }
  0x22   :  { %10838 = shalt.err (!%p10835_p1)
}
  0x23   :  { %26 = dma.hbm_to_vmem [thread:$0]  %s14403_s0, 8192, %s10956_s24, [#allocation4], %s10915_s9, %s10915_s9, %s10916_s10  }
  0x24   :  { %s10917_s22 = smov [#allocation8]   ;;  %s10918_s25 = smov [#allocation9]  }
  0x25   :  { %s44_s23 = sshll.u32 %s10917_s22, 4  ;;  %s56_s26 = sshll.u32 %s10918_s25, 4  ;;  %s45_s23 = int_to_ptr.vmem [resolvable:$true] %s44_s23  ;;  %s10993_s26 = int_to_ptr.vmem [resolvable:$true] %s56_s26 }
  0x26   :  { %s10839_s29 = scalar_lea.hbm %s14405_s2, 2048 }
  0x27   :  { %p10840_p2 = scmp.ne.s32.totalorder %s14405_s2, %s10839_s29  ;;  %p10843_p3 = scmp.lt.u32.totalorder %s10839_s29, %s14405_s2 }
  0x29   :  { %p10845_p4 = pnand %p10843_p3, %p10840_p2 }
  0x2b   :  { %10848 = shalt.err (!%p10845_p4)
}
  0x2c   :  { %s10849_s0 = scalar_lea.vmem %s45_s23, 2048  ;;  %p10854_p6 = scmp.lt.s32.totalorder %s45_s23, %s45_s23 }
  0x2d   :  { %p10850_p5 = scmp.ne.s32.totalorder %s45_s23, %s10849_s0  ;;  %p10855_p7 = scmp.lt.s32.totalorder %s10849_s0, %s10849_s0 }
  0x2f   :  { %p10856_p8 = por %p10855_p7, %p10854_p6 }
  0x31   :  { %p10857_p9 = pnand %p10856_p8, %p10850_p5 }
  0x33   :  { %10860 = shalt.err (!%p10857_p9)
}
  0x34   :  { %50 = dma.hbm_to_vmem [thread:$0]  %s14405_s2, 2048, %s45_s23, [#allocation7], %s10915_s9, %s10915_s9, %s10916_s10  }
  0x35   :  { %s10861_s15 = scalar_lea.hbm %s14406_s3, 18432 }
  0x36   :  { %p10862_p10 = scmp.ne.s32.totalorder %s14406_s3, %s10861_s15  ;;  %p10865_p11 = scmp.lt.u32.totalorder %s10861_s15, %s14406_s3 }
  0x38   :  { %p10867_p12 = pnand %p10865_p11, %p10862_p10 }
  0x3a   :  { %10870 = shalt.err (!%p10867_p12)
}
  0x3b   :  { %s10871_s20 = scalar_lea.vmem %s10993_s26, 18432  ;;  %p10876_p0 = scmp.lt.s32.totalorder %s10993_s26, %s10993_s26 }
  0x3c   :  { %p10872_p13 = scmp.ne.s32.totalorder %s10993_s26, %s10871_s20  ;;  %p10877_p1 = scmp.lt.s32.totalorder %s10871_s20, %s10871_s20 }
  0x3e   :  { %p10878_p2 = por %p10877_p1, %p10876_p0 }
  0x40   :  { %p10879_p3 = pnand %p10878_p2, %p10872_p13 }
  0x42   :  { %10882 = shalt.err (!%p10879_p3)
}
  0x43   :  { %62 = dma.hbm_to_vmem [thread:$0]  %s14406_s3, 18432, %s10993_s26, [#allocation10], %s10915_s9, %s10915_s9, %s10916_s10  }
  0x44   :  { %10905 = dma.done.wait [#allocation4], 8192  }
  0x45   :  { %10906 = vsyncadd [#allocation4], 4294959104 }
  0x46   :  { %10907 = dma.done.wait [#allocation7], 10240  }
  0x47   :  { %10908 = vsyncadd [#allocation7], 4294957056 }
  0x48   :  { %10909 = dma.done.wait [#allocation10], 18432  }
  0x49   :  { %10910 = vsyncadd [#allocation10], 4294948864  ;;  %v145_v0 = vld [vmem:[#allocation8] sm:$0xff]  ;;  %v146_v1 = vld [vmem:[#allocation8 + $0x8] sm:$0xff]  ;;  %vm1320_vm0 = vcmask 1046528   ;;  %vm2332_vm1 = vcmask 1045504  }
  0x4a   :  { %v147_v2 = vld [vmem:[#allocation8 + $0x10] sm:$0xff]  ;;  %v9742_v3 = vpack.c.bf16 %v146_v1, %v145_v0  ;;  %v148_v4 = vld [vmem:[#allocation8 + $0x18] sm:$0xff]  ;;  %v149_v6 = vld [vmem:[#allocation8 + $0x20] sm:$0xff] }
  0x4b   :  { %v9746_v5 = vpack.c.bf16 %v148_v4, %v147_v2  ;;  %v150_v7 = vld [vmem:[#allocation8 + $0x28] sm:$0xff]  ;;  %v81_v9 = vld [vmem:[#allocation3] sm:$0xff]  ;;  %v151_v10 = vld [vmem:[#allocation8 + $0x30] sm:$0xff] }
  0x4c   :  { %9743 = vmatprep.subr.bf16.mxu0 %v9742_v3  ;;  %v9750_v8 = vpack.c.bf16 %v150_v7, %v149_v6  ;;  %v152_v11 = vld [vmem:[#allocation8 + $0x38] sm:$0xff]  ;;  %8494 = vmatprep.mubr.f32.mxu0 %v81_v9  ;;  %v153_v13 = vld [vmem:[#allocation8 + $0x40] sm:$0xff]  ;;  %v154_v14 = vld [vmem:[#allocation8 + $0x48] sm:$0xff] }
  0x4d   :  { %9745 = vmatpush3.bf16.msra.mxu0 %v9742_v3  ;;  %v9754_v12 = vpack.c.bf16 %v152_v11, %v151_v10  ;;  %v9758_v15 = vpack.c.bf16 %v154_v14, %v153_v13  ;;  %v155_v16 = vld [vmem:[#allocation8 + $0x50] sm:$0xff]  ;;  %v156_v17 = vld [vmem:[#allocation8 + $0x58] sm:$0xff]  ;;  %v157_v19 = vld [vmem:[#allocation8 + $0x60] sm:$0xff] }
  0x4e   :  { %9747 = vmatprep.subr.bf16.mxu0 %v9746_v5  ;;  %v9762_v18 = vpack.c.bf16 %v156_v17, %v155_v16  ;;  %v158_v20 = vld [vmem:[#allocation8 + $0x68] sm:$0xff]  ;;  %v159_v22 = vld [vmem:[#allocation8 + $0x70] sm:$0xff]  ;;  %v160_v23 = vld [vmem:[#allocation8 + $0x78] sm:$0xff] }
  0x4f   :  { %v9766_v21 = vpack.c.bf16 %v158_v20, %v157_v19  ;;  %v9770_v24 = vpack.c.bf16 %v160_v23, %v159_v22  ;;  %v82_v25 = vld [vmem:[#allocation3 + $0x8] sm:$0xff]  ;;  %v83_v26 = vld [vmem:[#allocation3 + $0x10] sm:$0xff]  ;;  %v84_v27 = vld [vmem:[#allocation3 + $0x18] sm:$0xff] }
  0x50   :  { %v85_v28 = vld [vmem:[#allocation3 + $0x20] sm:$0xff]  ;;  %v86_v29 = vld [vmem:[#allocation3 + $0x28] sm:$0xff]  ;;  %v87_v30 = vld [vmem:[#allocation3 + $0x30] sm:$0xff] }
  0x51   :  { %9749 = vmatpush3.bf16.msra.mxu0 %v9746_v5  ;;  %v88_v31 = vld [vmem:[#allocation3 + $0x38] sm:$0xff]  ;;  %v89_v32 = vld [vmem:[#allocation3 + $0x40] sm:$0xff]  ;;  %v90_v33 = vld [vmem:[#allocation3 + $0x48] sm:$0xff] }
  0x52   :  { %9751 = vmatprep.subr.bf16.mxu0 %v9750_v8  ;;  %v91_v34 = vld [vmem:[#allocation3 + $0x50] sm:$0xff]  ;;  %v92_v35 = vld [vmem:[#allocation3 + $0x58] sm:$0xff]  ;;  %v93_v36 = vld [vmem:[#allocation3 + $0x60] sm:$0xff] }
  0x53   :  { %v94_v37 = vld [vmem:[#allocation3 + $0x68] sm:$0xff]  ;;  %v95_v38 = vld [vmem:[#allocation3 + $0x70] sm:$0xff]  ;;  %v96_v39 = vld [vmem:[#allocation3 + $0x78] sm:$0xff] }
  0x54   :  { %v97_v40 = vld [vmem:[#allocation3 + $0x80] sm:$0xff]  ;;  %v98_v41 = vld [vmem:[#allocation3 + $0x88] sm:$0xff]  ;;  %v99_v42 = vld [vmem:[#allocation3 + $0x90] sm:$0xff] }
  0x55   :  { %9753 = vmatpush3.bf16.msra.mxu0 %v9750_v8  ;;  %v100_v43 = vld [vmem:[#allocation3 + $0x98] sm:$0xff]  ;;  %v101_v44 = vld [vmem:[#allocation3 + $0xa0] sm:$0xff]  ;;  %v102_v45 = vld [vmem:[#allocation3 + $0xa8] sm:$0xff] }
  0x56   :  { %9755 = vmatprep.subr.bf16.mxu0 %v9754_v12  ;;  %v103_v46 = vld [vmem:[#allocation3 + $0xb0] sm:$0xff]  ;;  %v104_v47 = vld [vmem:[#allocation3 + $0xb8] sm:$0xff]  ;;  %v105_v48 = vld [vmem:[#allocation3 + $0xc0] sm:$0xff] }
  0x57   :  { %v106_v49 = vld [vmem:[#allocation3 + $0xc8] sm:$0xff]  ;;  %v107_v50 = vld [vmem:[#allocation3 + $0xd0] sm:$0xff]  ;;  %v108_v51 = vld [vmem:[#allocation3 + $0xd8] sm:$0xff] }
  0x58   :  { %v109_v52 = vld [vmem:[#allocation3 + $0xe0] sm:$0xff]  ;;  %v110_v53 = vld [vmem:[#allocation3 + $0xe8] sm:$0xff]  ;;  %v111_v54 = vld [vmem:[#allocation3 + $0xf0] sm:$0xff] }
  0x59   :  { %9757 = vmatpush3.bf16.msra.mxu0 %v9754_v12  ;;  %v112_v55 = vld [vmem:[#allocation3 + $0xf8] sm:$0xff]  ;;  %v113_v56 = vld [vmem:[#allocation3 + $0x100] sm:$0xff]  ;;  %v114_v57 = vld [vmem:[#allocation3 + $0x108] sm:$0xff] }
  0x5a   :  { %9759 = vmatprep.subr.bf16.mxu0 %v9758_v15  ;;  %v115_v58 = vld [vmem:[#allocation3 + $0x110] sm:$0xff]  ;;  %v116_v59 = vld [vmem:[#allocation3 + $0x118] sm:$0xff]  ;;  %v117_v60 = vld [vmem:[#allocation3 + $0x120] sm:$0xff] }
  0x5b   :  { %v118_v61 = vld [vmem:[#allocation3 + $0x128] sm:$0xff]  ;;  %v119_v62 = vld [vmem:[#allocation3 + $0x130] sm:$0xff]  ;;  %v120_v63 = vld [vmem:[#allocation3 + $0x138] sm:$0xff] }
  0x5c   :  { %v121_v0 = vld [vmem:[#allocation3 + $0x140] sm:$0xff]  ;;  %v122_v1 = vld [vmem:[#allocation3 + $0x148] sm:$0xff]  ;;  %v123_v2 = vld [vmem:[#allocation3 + $0x150] sm:$0xff] }
  0x5d   :  { %9761 = vmatpush3.bf16.msra.mxu0 %v9758_v15  ;;  %v124_v3 = vld [vmem:[#allocation3 + $0x158] sm:$0xff]  ;;  %v125_v4 = vld [vmem:[#allocation3 + $0x160] sm:$0xff]  ;;  %v126_v5 = vld [vmem:[#allocation3 + $0x168] sm:$0xff] }
  0x5e   :  { %9763 = vmatprep.subr.bf16.mxu0 %v9762_v18  ;;  %v127_v6 = vld [vmem:[#allocation3 + $0x170] sm:$0xff]  ;;  %v128_v7 = vld [vmem:[#allocation3 + $0x178] sm:$0xff]  ;;  %v129_v8 = vld [vmem:[#allocation3 + $0x180] sm:$0xff] }
  0x5f   :  { %v130_v9 = vld [vmem:[#allocation3 + $0x188] sm:$0xff]  ;;  %v131_v10 = vld [vmem:[#allocation3 + $0x190] sm:$0xff]  ;;  %v132_v11 = vld [vmem:[#allocation3 + $0x198] sm:$0xff] }
  0x60   :  { %v133_v12 = vld [vmem:[#allocation3 + $0x1a0] sm:$0xff]  ;;  %v134_v13 = vld [vmem:[#allocation3 + $0x1a8] sm:$0xff]  ;;  %v135_v14 = vld [vmem:[#allocation3 + $0x1b0] sm:$0xff] }
  0x61   :  { %9765 = vmatpush3.bf16.msra.mxu0 %v9762_v18  ;;  %v136_v15 = vld [vmem:[#allocation3 + $0x1b8] sm:$0xff]  ;;  %v137_v16 = vld [vmem:[#allocation3 + $0x1c0] sm:$0xff]  ;;  %v138_v17 = vld [vmem:[#allocation3 + $0x1c8] sm:$0xff] }
  0x62   :  { %9767 = vmatprep.subr.bf16.mxu0 %v9766_v21  ;;  %v139_v18 = vld [vmem:[#allocation3 + $0x1d0] sm:$0xff]  ;;  %v140_v19 = vld [vmem:[#allocation3 + $0x1d8] sm:$0xff]  ;;  %v141_v20 = vld [vmem:[#allocation3 + $0x1e0] sm:$0xff] }
  0x63   :  { %v143_v22 = vld [vmem:[#allocation3 + $0x1f0] sm:$0xff]  ;;  %v144_v23 = vld [vmem:[#allocation3 + $0x1f8] sm:$0xff] }
  0x65   :  { %9769 = vmatpush3.bf16.msra.mxu0 %v9766_v21  ;;  %v142_v21 = vld [vmem:[#allocation3 + $0x1e8] sm:$0xff] }
  0x66   :  { %9771 = vmatprep.subr.bf16.mxu0 %v9770_v24 }
  0x69   :  { %9773 = vmatpush3.bf16.msra.mxu0 %v9770_v24 }
  0x6c   :  { %8495 = vmatmul.mubr.f32.vlgmr.msra.gmra.mrb[0].mxu0 %v82_v25 }
  0x6d   :  { %8497 = vmatprep.mubr.f32.mxu0 %v83_v26 }
  0x70   :  { %8498 = vmatmul.mubr.f32.gmra.mrb[2].mxu0 %v84_v27 }
  0x71   :  { %8500 = vmatprep.mubr.f32.mxu0 %v85_v28 }
  0x74   :  { %8501 = vmatmul.mubr.f32.gmra.mrb[4].mxu0 %v86_v29 }
  0x75   :  { %8503 = vmatprep.mubr.f32.mxu0 %v87_v30 }
  0x78   :  { %8504 = vmatmul.mubr.f32.gmra.mrb[6].mxu0 %v88_v31 }
  0x79   :  { %8506 = vmatprep.mubr.f32.mxu0 %v89_v32 }
  0x7c   :  { %8507 = vmatmul.mubr.f32.gmra.mrb[8].mxu0 %v90_v33 }
  0x7d   :  { %8509 = vmatprep.mubr.f32.mxu0 %v91_v34 }
  0x80   :  { %8510 = vmatmul.mubr.f32.gmra.mrb[10].mxu0 %v92_v35 }
  0x81   :  { %8512 = vmatprep.mubr.f32.mxu0 %v93_v36 }
  0x84   :  { %8513 = vmatmul.mubr.f32.gmra.mrb[12].mxu0 %v94_v37 }
  0x85   :  { %8515 = vmatprep.mubr.f32.mxu0 %v95_v38 }
  0x88   :  { %8516 = vmatmul.mubr.f32.gmra.mrb[14].mxu0 %v96_v39 }
  0x89   :  { %8518 = vmatprep.mubr.f32.mxu0 %v97_v40 }
  0x8c   :  { %8519 = vmatmul.mubr.f32.gmra.mrb[16].mxu0 %v98_v41 }
  0x8d   :  { %8521 = vmatprep.mubr.f32.mxu0 %v99_v42 }
  0x90   :  { %8522 = vmatmul.mubr.f32.gmra.mrb[18].mxu0 %v100_v43 }
  0x91   :  { %8524 = vmatprep.mubr.f32.mxu0 %v101_v44 }
  0x94   :  { %8525 = vmatmul.mubr.f32.gmra.mrb[20].mxu0 %v102_v45 }
  0x95   :  { %8527 = vmatprep.mubr.f32.mxu0 %v103_v46 }
  0x98   :  { %8528 = vmatmul.mubr.f32.gmra.mrb[22].mxu0 %v104_v47 }
  0x99   :  { %8530 = vmatprep.mubr.f32.mxu0 %v105_v48 }
  0x9c   :  { %8531 = vmatmul.mubr.f32.gmra.mrb[24].mxu0 %v106_v49 }
  0x9d   :  { %8533 = vmatprep.mubr.f32.mxu0 %v107_v50 }
  0xa0   :  { %8534 = vmatmul.mubr.f32.gmra.mrb[26].mxu0 %v108_v51 }
  0xa1   :  { %8536 = vmatprep.mubr.f32.mxu0 %v109_v52 }
  0xa4   :  { %8537 = vmatmul.mubr.f32.gmra.mrb[28].mxu0 %v110_v53 }
  0xa5   :  { %8539 = vmatprep.mubr.f32.mxu0 %v111_v54 }
  0xa8   :  { %8540 = vmatmul.mubr.f32.gmra.mrb[30].mxu0 %v112_v55 }
  0xa9   :  { %8542 = vmatprep.mubr.f32.mxu0 %v113_v56 }
  0xac   :  { %8543 = vmatmul.mubr.f32.gmra.mrb[32].mxu0 %v114_v57 }
  0xad   :  { %8545 = vmatprep.mubr.f32.mxu0 %v115_v58 }
  0xb0   :  { %8546 = vmatmul.mubr.f32.gmra.mrb[34].mxu0 %v116_v59 }
  0xb1   :  { %8548 = vmatprep.mubr.f32.mxu0 %v117_v60 }
  0xb4   :  { %8549 = vmatmul.mubr.f32.gmra.mrb[36].mxu0 %v118_v61 }
  0xb5   :  { %8551 = vmatprep.mubr.f32.mxu0 %v119_v62 }
  0xb8   :  { %8552 = vmatmul.mubr.f32.gmra.mrb[38].mxu0 %v120_v63 }
  0xb9   :  { %8554 = vmatprep.mubr.f32.mxu0 %v121_v0 }
  0xbc   :  { %8555 = vmatmul.mubr.f32.gmra.mrb[40].mxu0 %v122_v1 }
  0xbd   :  { %8557 = vmatprep.mubr.f32.mxu0 %v123_v2 }
  0xc0   :  { %8558 = vmatmul.mubr.f32.gmra.mrb[42].mxu0 %v124_v3 }
  0xc1   :  { %8560 = vmatprep.mubr.f32.mxu0 %v125_v4 }
  0xc4   :  { %8561 = vmatmul.mubr.f32.gmra.mrb[44].mxu0 %v126_v5 }
  0xc5   :  { %8563 = vmatprep.mubr.f32.mxu0 %v127_v6 }
  0xc8   :  { %8564 = vmatmul.mubr.f32.gmra.mrb[46].mxu0 %v128_v7 }
  0xc9   :  { %8566 = vmatprep.mubr.f32.mxu0 %v129_v8 }
  0xcc   :  { %8567 = vmatmul.mubr.f32.gmra.mrb[48].mxu0 %v130_v9 }
  0xcd   :  { %8569 = vmatprep.mubr.f32.mxu0 %v131_v10 }
  0xd0   :  { %8570 = vmatmul.mubr.f32.gmra.mrb[50].mxu0 %v132_v11 }
  0xd1   :  { %8572 = vmatprep.mubr.f32.mxu0 %v133_v12 }
  0xd4   :  { %8573 = vmatmul.mubr.f32.gmra.mrb[52].mxu0 %v134_v13 }
  0xd5   :  { %8575 = vmatprep.mubr.f32.mxu0 %v135_v14 }
  0xd8   :  { %8576 = vmatmul.mubr.f32.gmra.mrb[54].mxu0 %v136_v15 }
  0xd9   :  { %8578 = vmatprep.mubr.f32.mxu0 %v137_v16 }
  0xdc   :  { %8579 = vmatmul.mubr.f32.gmra.mrb[56].mxu0 %v138_v17 }
  0xdd   :  { %8581 = vmatprep.mubr.f32.mxu0 %v139_v18 }
  0xe0   :  { %8582 = vmatmul.mubr.f32.gmra.mrb[58].mxu0 %v140_v19 }
  0xe1   :  { %8584 = vmatprep.mubr.f32.mxu0 %v141_v20 }
  0xe4   :  { %8585 = vmatmul.mubr.f32.gmra.mrb[60].mxu0 %v142_v21 }
  0xe5   :  { %8587 = vmatprep.mubr.f32.mxu0 %v143_v22 }
  0xe8   :  { %8588 = vmatmul.mubr.f32.gmra.mrb[62].mxu0 %v144_v23 }
 0x13f   :  { %v11030_v24 = vpop.f32.mrb[0].mxu0 }
 0x140   :  { %v618_v25 = vmul.f32 %v11030_v24, %v11030_v24  ;;  %v11034_v26 = vpop.f32.mrb[1].mxu0 }
 0x141   :  { %v546_v27 = vadd.f32 %v11030_v24, %v11034_v26  ;;  %v617_v28 = vmul.f32 %v11034_v26, %v11034_v26 }
 0x143   :  { %v681_v29 = vadd.f32 %v618_v25, %v617_v28  ;;  %v11040_v30 = vpop.f32.mrb[2].mxu0 }
 0x144   :  { %v11042_v31 = vpop.f32.mrb[3].mxu0  ;;  %v620_v34 = vmul.f32 %v11040_v30, %v11040_v30 }
 0x145   :  { %v547_v32 = vadd.f32 %v546_v27, %v11042_v31  ;;  %v619_v33 = vmul.f32 %v11042_v31, %v11042_v31 }
 0x147   :  { %v548_v35 = vadd.f32 %v11040_v30, %v547_v32  ;;  %v682_v36 = vadd.f32 %v681_v29, %v619_v33  ;;  %v11050_v37 = vpop.f32.mrb[4].mxu0 }
 0x148   :  { %v11052_v38 = vpop.f32.mrb[5].mxu0  ;;  %v622_v42 = vmul.f32 %v11050_v37, %v11050_v37 }
 0x149   :  { %v683_v39 = vadd.f32 %v682_v36, %v620_v34  ;;  %v549_v40 = vadd.f32 %v548_v35, %v11052_v38  ;;  %v621_v41 = vmul.f32 %v11052_v38, %v11052_v38 }
 0x14b   :  { %v684_v43 = vadd.f32 %v683_v39, %v621_v41  ;;  %v11059_v44 = vpop.f32.mrb[6].mxu0  ;;  %v550_v45 = vadd.f32 %v11050_v37, %v549_v40 }
 0x14c   :  { %v11062_v46 = vpop.f32.mrb[7].mxu0  ;;  %v624_v50 = vmul.f32 %v11059_v44, %v11059_v44 }
 0x14d   :  { %v551_v47 = vadd.f32 %v550_v45, %v11062_v46  ;;  %v623_v48 = vmul.f32 %v11062_v46, %v11062_v46  ;;  %v685_v49 = vadd.f32 %v684_v43, %v622_v42 }
 0x14f   :  { %v686_v51 = vadd.f32 %v685_v49, %v623_v48  ;;  %v11069_v52 = vpop.f32.mrb[8].mxu0  ;;  %v552_v53 = vadd.f32 %v11059_v44, %v551_v47 }
 0x150   :  { %v11072_v54 = vpop.f32.mrb[9].mxu0  ;;  %v626_v58 = vmul.f32 %v11069_v52, %v11069_v52 }
 0x151   :  { %v553_v55 = vadd.f32 %v552_v53, %v11072_v54  ;;  %v625_v56 = vmul.f32 %v11072_v54, %v11072_v54  ;;  %v687_v57 = vadd.f32 %v686_v51, %v624_v50 }
 0x153   :  { %v688_v59 = vadd.f32 %v687_v57, %v625_v56  ;;  %v11079_v60 = vpop.f32.mrb[10].mxu0  ;;  %v554_v61 = vadd.f32 %v11069_v52, %v553_v55 }
 0x154   :  { %v11082_v62 = vpop.f32.mrb[11].mxu0  ;;  %v628_v2 = vmul.f32 %v11079_v60, %v11079_v60 }
 0x155   :  { %v555_v63 = vadd.f32 %v554_v61, %v11082_v62  ;;  %v627_v0 = vmul.f32 %v11082_v62, %v11082_v62  ;;  %v689_v1 = vadd.f32 %v688_v59, %v626_v58 }
 0x157   :  { %v690_v3 = vadd.f32 %v689_v1, %v627_v0  ;;  %v11089_v4 = vpop.f32.mrb[12].mxu0  ;;  %v556_v5 = vadd.f32 %v11079_v60, %v555_v63 }
 0x158   :  { %v11092_v6 = vpop.f32.mrb[13].mxu0  ;;  %v630_v10 = vmul.f32 %v11089_v4, %v11089_v4 }
 0x159   :  { %v557_v7 = vadd.f32 %v556_v5, %v11092_v6  ;;  %v629_v8 = vmul.f32 %v11092_v6, %v11092_v6  ;;  %v691_v9 = vadd.f32 %v690_v3, %v628_v2 }
 0x15b   :  { %v692_v11 = vadd.f32 %v691_v9, %v629_v8  ;;  %v11099_v12 = vpop.f32.mrb[14].mxu0  ;;  %v558_v13 = vadd.f32 %v11089_v4, %v557_v7 }
 0x15c   :  { %v11102_v14 = vpop.f32.mrb[15].mxu0  ;;  %v632_v18 = vmul.f32 %v11099_v12, %v11099_v12 }
 0x15d   :  { %v559_v15 = vadd.f32 %v558_v13, %v11102_v14  ;;  %v631_v16 = vmul.f32 %v11102_v14, %v11102_v14  ;;  %v693_v17 = vadd.f32 %v692_v11, %v630_v10 }
 0x15f   :  { %v694_v19 = vadd.f32 %v693_v17, %v631_v16  ;;  %v11109_v20 = vpop.f32.mrb[16].mxu0  ;;  %v560_v21 = vadd.f32 %v11099_v12, %v559_v15 }
 0x160   :  { %v11112_v22 = vpop.f32.mrb[17].mxu0  ;;  %v634_v28 = vmul.f32 %v11109_v20, %v11109_v20 }
 0x161   :  { %v561_v23 = vadd.f32 %v560_v21, %v11112_v22  ;;  %v633_v25 = vmul.f32 %v11112_v22, %v11112_v22  ;;  %v695_v27 = vadd.f32 %v694_v19, %v632_v18 }
 0x163   :  { %v696_v29 = vadd.f32 %v695_v27, %v633_v25  ;;  %v11119_v32 = vpop.f32.mrb[18].mxu0  ;;  %v562_v33 = vadd.f32 %v11109_v20, %v561_v23 }
 0x164   :  { %v11122_v34 = vpop.f32.mrb[19].mxu0  ;;  %v636_v40 = vmul.f32 %v11119_v32, %v11119_v32 }
 0x165   :  { %v563_v35 = vadd.f32 %v562_v33, %v11122_v34  ;;  %v635_v36 = vmul.f32 %v11122_v34, %v11122_v34  ;;  %v697_v39 = vadd.f32 %v696_v29, %v634_v28 }
 0x167   :  { %v698_v41 = vadd.f32 %v697_v39, %v635_v36  ;;  %v11129_v42 = vpop.f32.mrb[20].mxu0  ;;  %v564_v43 = vadd.f32 %v11119_v32, %v563_v35 }
 0x168   :  { %v11132_v45 = vpop.f32.mrb[21].mxu0  ;;  %v638_v50 = vmul.f32 %v11129_v42, %v11129_v42 }
 0x169   :  { %v565_v47 = vadd.f32 %v564_v43, %v11132_v45  ;;  %v637_v48 = vmul.f32 %v11132_v45, %v11132_v45  ;;  %v699_v49 = vadd.f32 %v698_v41, %v636_v40  ;;  %v1546_v40 = vld [vmem:[#allocation9 + $0x80] sm:$0xff]  ;;  %v1547_v41 = vld [vmem:[#allocation9 + $0x88] sm:$0xff] }
 0x16b   :  { %v700_v51 = vadd.f32 %v699_v49, %v637_v48  ;;  %v11139_v53 = vpop.f32.mrb[22].mxu0  ;;  %v566_v55 = vadd.f32 %v11129_v42, %v565_v47  ;;  %v9774_v47 = vpack.c.bf16 %v1547_v41, %v1546_v40 }
 0x16c   :  { %v11142_v56 = vpop.f32.mrb[23].mxu0  ;;  %v640_v61 = vmul.f32 %v11139_v53, %v11139_v53 }
 0x16d   :  { %v567_v57 = vadd.f32 %v566_v55, %v11142_v56  ;;  %v639_v58 = vmul.f32 %v11142_v56, %v11142_v56  ;;  %v701_v59 = vadd.f32 %v700_v51, %v638_v50  ;;  %9775 = vmatprep.subr.bf16.mxu0 %v9774_v47 }
 0x16e   :  { %9777 = vmatpush3.bf16.msra.mxu0 %v9774_v47 }
 0x16f   :  { %v702_v63 = vadd.f32 %v701_v59, %v639_v58  ;;  %v11149_v0 = vpop.f32.mrb[24].mxu0  ;;  %v568_v1 = vadd.f32 %v11139_v53, %v567_v57  ;;  %v3906_v59 = vld [vmem:[#allocation9 + $0x200] sm:$0xff] }
 0x170   :  { %v11152_v2 = vpop.f32.mrb[25].mxu0  ;;  %v642_v8 = vmul.f32 %v11149_v0, %v11149_v0 }
 0x171   :  { %v569_v3 = vadd.f32 %v568_v1, %v11152_v2  ;;  %v641_v5 = vmul.f32 %v11152_v2, %v11152_v2  ;;  %v703_v7 = vadd.f32 %v702_v63, %v640_v61  ;;  %v3907_v61 = vld [vmem:[#allocation9 + $0x208] sm:$0xff]  ;;  %v1548_v63 = vld [vmem:[#allocation9 + $0x90] sm:$0xff] }
 0x173   :  { %v704_v9 = vadd.f32 %v703_v7, %v641_v5  ;;  %v11159_v10 = vpop.f32.mrb[26].mxu0  ;;  %v570_v11 = vadd.f32 %v11149_v0, %v569_v3  ;;  %v9902_v3 = vpack.c.bf16 %v3907_v61, %v3906_v59  ;;  %v1549_v5 = vld [vmem:[#allocation9 + $0x98] sm:$0xff] }
 0x174   :  { %v11162_v13 = vpop.f32.mrb[27].mxu0  ;;  %v644_v18 = vmul.f32 %v11159_v10, %v11159_v10 }
 0x175   :  { %v571_v15 = vadd.f32 %v570_v11, %v11162_v13  ;;  %v643_v16 = vmul.f32 %v11162_v13, %v11162_v13  ;;  %v705_v17 = vadd.f32 %v704_v9, %v642_v8  ;;  %v9778_v11 = vpack.c.bf16 %v1549_v5, %v1548_v63  ;;  %9903 = vmatprep.subr.bf16.mxu1 %v9902_v3  ;;  %v1553_v63 = vld [vmem:[#allocation9 + $0xb8] sm:$0xff] }
 0x176   :  { %9905 = vmatpush3.bf16.msra.mxu1 %v9902_v3 }
 0x177   :  { %v706_v19 = vadd.f32 %v705_v17, %v643_v16  ;;  %v11169_v21 = vpop.f32.mrb[28].mxu0  ;;  %v572_v23 = vadd.f32 %v11159_v10, %v571_v15  ;;  %9779 = vmatprep.subr.bf16.mxu0 %v9778_v11 }
 0x178   :  { %v11172_v25 = vpop.f32.mrb[29].mxu0  ;;  %v646_v33 = vmul.f32 %v11169_v21, %v11169_v21  ;;  %9781 = vmatpush3.bf16.msra.mxu0 %v9778_v11 }
 0x179   :  { %v573_v27 = vadd.f32 %v572_v23, %v11172_v25  ;;  %v645_v28 = vmul.f32 %v11172_v25, %v11172_v25  ;;  %v707_v29 = vadd.f32 %v706_v19, %v644_v18  ;;  %v3908_v19 = vld [vmem:[#allocation9 + $0x210] sm:$0xff]  ;;  %v3909_v23 = vld [vmem:[#allocation9 + $0x218] sm:$0xff] }
 0x17b   :  { %v708_v35 = vadd.f32 %v707_v29, %v645_v28  ;;  %v11179_v36 = vpop.f32.mrb[30].mxu0  ;;  %v574_v39 = vadd.f32 %v11169_v21, %v573_v27  ;;  %v1550_v27 = vld [vmem:[#allocation9 + $0xa0] sm:$0xff]  ;;  %v9906_v29 = vpack.c.bf16 %v3909_v23, %v3908_v19  ;;  %v3913_v19 = vld [vmem:[#allocation9 + $0x238] sm:$0xff] }
 0x17c   :  { %v11182_v43 = vpop.f32.mrb[31].mxu0  ;;  %v648_v51 = vmul.f32 %v11179_v36, %v11179_v36  ;;  %v1554_v23 = vld [vmem:[#allocation9 + $0xc0] sm:$0xff] }
 0x17d   :  { %v575_v48 = vadd.f32 %v574_v39, %v11182_v43  ;;  %v647_v49 = vmul.f32 %v11182_v43, %v11182_v43  ;;  %v709_v50 = vadd.f32 %v708_v35, %v646_v33  ;;  %v1551_v33 = vld [vmem:[#allocation9 + $0xa8] sm:$0xff]  ;;  %9907 = vmatprep.subr.bf16.mxu1 %v9906_v29 }
 0x17e   :  { %v9782_v41 = vpack.c.bf16 %v1551_v33, %v1550_v27  ;;  %9909 = vmatpush3.bf16.msra.mxu1 %v9906_v29  ;;  %v1555_v33 = vld [vmem:[#allocation9 + $0xc8] sm:$0xff] }
 0x17f   :  { %v710_v55 = vadd.f32 %v709_v50, %v647_v49  ;;  %v11189_v57 = vpop.f32.mrb[32].mxu0  ;;  %v576_v58 = vadd.f32 %v11179_v36, %v575_v48 }
 0x180   :  { %v11192_v1 = vpop.f32.mrb[33].mxu0  ;;  %v650_v15 = vmul.f32 %v11189_v57, %v11189_v57  ;;  %9783 = vmatprep.subr.bf16.mxu0 %v9782_v41 }
 0x181   :  { %v577_v7 = vadd.f32 %v576_v58, %v11192_v1  ;;  %v649_v8 = vmul.f32 %v11192_v1, %v11192_v1  ;;  %v711_v9 = vadd.f32 %v710_v55, %v648_v51  ;;  %v3910_v51 = vld [vmem:[#allocation9 + $0x220] sm:$0xff]  ;;  %v3911_v55 = vld [vmem:[#allocation9 + $0x228] sm:$0xff]  ;;  %v1552_v58 = vld [vmem:[#allocation9 + $0xb0] sm:$0xff]  ;;  %9785 = vmatpush3.bf16.msra.mxu0 %v9782_v41  ;;  %v9790_v41 = vpack.c.bf16 %v1555_v33, %v1554_v23 }
 0x182   :  { %v9910_v61 = vpack.c.bf16 %v3911_v55, %v3910_v51  ;;  %v3914_v55 = vld [vmem:[#allocation9 + $0x240] sm:$0xff]  ;;  %v3916_v33 = vld [vmem:[#allocation9 + $0x250] sm:$0xff] }
 0x183   :  { %v712_v16 = vadd.f32 %v711_v9, %v649_v8  ;;  %v11199_v17 = vpop.f32.mrb[34].mxu0  ;;  %v578_v18 = vadd.f32 %v11189_v57, %v577_v7  ;;  %v9786_v8 = vpack.c.bf16 %v1553_v63, %v1552_v58  ;;  %v3915_v58 = vld [vmem:[#allocation9 + $0x248] sm:$0xff] }
 0x184   :  { %v11202_v28 = vpop.f32.mrb[35].mxu0  ;;  %v652_v47 = vmul.f32 %v11199_v17, %v11199_v17  ;;  %9911 = vmatprep.subr.bf16.mxu1 %v9910_v61 }
 0x185   :  { %v579_v35 = vadd.f32 %v578_v18, %v11202_v28  ;;  %v651_v39 = vmul.f32 %v11202_v28, %v11202_v28  ;;  %v713_v40 = vadd.f32 %v712_v16, %v650_v15  ;;  %9787 = vmatprep.subr.bf16.mxu0 %v9786_v8  ;;  %9913 = vmatpush3.bf16.msra.mxu1 %v9910_v61  ;;  %v3912_v18 = vld [vmem:[#allocation9 + $0x230] sm:$0xff] }
 0x186   :  { %9789 = vmatpush3.bf16.msra.mxu0 %v9786_v8  ;;  %v9914_v29 = vpack.c.bf16 %v3913_v19, %v3912_v18  ;;  %v1556_v61 = vld [vmem:[#allocation9 + $0xd0] sm:$0xff] }
 0x187   :  { %v714_v48 = vadd.f32 %v713_v40, %v651_v39  ;;  %v11209_v49 = vpop.f32.mrb[36].mxu0  ;;  %v580_v50 = vadd.f32 %v11199_v17, %v579_v35  ;;  %9791 = vmatprep.subr.bf16.mxu0 %v9790_v41 }
 0x188   :  { %v11212_v59 = vpop.f32.mrb[37].mxu0  ;;  %v654_v9 = vmul.f32 %v11209_v49, %v11209_v49  ;;  %9915 = vmatprep.subr.bf16.mxu1 %v9914_v29 }
 0x189   :  { %v581_v3 = vadd.f32 %v580_v50, %v11212_v59  ;;  %v653_v5 = vmul.f32 %v11212_v59, %v11212_v59  ;;  %v715_v7 = vadd.f32 %v714_v48, %v652_v47  ;;  %9917 = vmatpush3.bf16.msra.mxu1 %v9914_v29 }
 0x18a   :  { %9793 = vmatpush3.bf16.msra.mxu0 %v9790_v41 }
 0x18b   :  { %v716_v11 = vadd.f32 %v715_v7, %v653_v5  ;;  %v11219_v15 = vpop.f32.mrb[38].mxu0  ;;  %v582_v16 = vadd.f32 %v11209_v49, %v581_v3  ;;  %v11234_v3 = vpack.c.bf16 %v3915_v58, %v3914_v55  ;;  %v1557_v5 = vld [vmem:[#allocation9 + $0xd8] sm:$0xff] }
 0x18c   :  { %14535 = vst [vmem:[#allocation16_spill] sm:$0xff] %v11219_v15  ;;  %v11222_v27 = vpop.f32.mrb[39].mxu0  ;;  %v656_v47 = vmul.f32 %v11219_v15, %v11219_v15 }
 0x18d   :  { %14536 = vst [vmem:[#allocation17_spill] sm:$0xff] %v11222_v27  ;;  %v583_v35 = vadd.f32 %v582_v16, %v11222_v27  ;;  %v655_v39 = vmul.f32 %v11222_v27, %v11222_v27  ;;  %v717_v40 = vadd.f32 %v716_v11, %v654_v9  ;;  %v11245_v11 = vpack.c.bf16 %v1557_v5, %v1556_v61  ;;  %v3919_v5 = vld [vmem:[#allocation9 + $0x268] sm:$0xff] }
 0x18e   :  { %v14410_v16 = vmov 0.0   ;;  %9919 = vmatprep.subr.bf16.mxu1 %v11234_v3 }
 0x18f   :  { %v718_v48 = vadd.f32 %v717_v40, %v655_v39  ;;  %v11229_v50 = vpop.f32.mrb[40].mxu0  ;;  %v584_v51 = vadd.f32 %v11219_v15, %v583_v35  ;;  %962 = vst [vmem:[#allocation2] sm:$0xff] %v14410_v16  ;;  %963 = vst [vmem:[#allocation2 + $0x8] sm:$0xff] %v14410_v16  ;;  %9795 = vmatprep.subr.bf16.mxu0 %v11245_v11  ;;  %9921 = vmatpush3.bf16.msra.mxu1 %v11234_v3  ;;  %v3917_v35 = vld [vmem:[#allocation9 + $0x258] sm:$0xff]  ;;  %v1558_v39 = vld [vmem:[#allocation9 + $0xe0] sm:$0xff] }
 0x190   :  { %14537 = vst [vmem:[#allocation18_spill] sm:$0xff] %v11229_v50  ;;  %v11232_v63 = vpop.f32.mrb[41].mxu0  ;;  %964 = vst [vmem:[#allocation2 + $0x10] sm:$0x3] %v14410_v16  ;;  %v658_v18 = vmul.f32 %v11229_v50, %v11229_v50  ;;  %9797 = vmatpush3.bf16.msra.mxu0 %v11245_v11  ;;  %v9922_v41 = vpack.c.bf16 %v3917_v35, %v3916_v33  ;;  %v3918_v3 = vld [vmem:[#allocation9 + $0x260] sm:$0xff]  ;;  %v1561_v33 = vld [vmem:[#allocation9 + $0xf8] sm:$0xff] }
 0x191   :  { %14538 = vst [vmem:[#allocation19_spill] sm:$0xff] %v11232_v63  ;;  %v11237_v7 = vadd.f32 %v584_v51, %v11232_v63  ;;  %v11241_v8 = vmul.f32 %v11232_v63, %v11232_v63  ;;  %v11243_v9 = vadd.f32 %v718_v48, %v656_v47  ;;  %965 = vst [vmem:[#allocation2 + $0x1b0] sm:$0xff] %v14410_v16  ;;  %v1559_v47 = vld [vmem:[#allocation9 + $0xe8] sm:$0xff]  ;;  %v3920_v35 = vld [vmem:[#allocation9 + $0x270] sm:$0xff] }
 0x192   :  { %967 = vst [vmem:[#allocation2 + $0x1c0] sm:$0x3] %v14410_v16  ;;  %969 = vst [vmem:[#allocation2 + $0x198] sm:$0xff] %v14410_v16  ;;  %v9798_v58 = vpack.c.bf16 %v1559_v47, %v1558_v39  ;;  %9923 = vmatprep.subr.bf16.mxu1 %v9922_v41  ;;  %v14543_v39 = vmov 0.0  }
 0x193   :  { %971 = vst [vmem:[#allocation2 + $0x1a8] sm:$0x3] %v14410_v16  ;;  %972 = vst [vmem:[#allocation2 + $0x348] sm:$0xff] %v14410_v16  ;;  %v720_v19 = vadd.f32 %v11243_v9, %v11241_v8  ;;  %v11333_v23 = vpop.f32.mrb[42].mxu0  ;;  %v586_v29 = vadd.f32 %v11229_v50, %v11237_v7  ;;  %v1560_v7 = vld [vmem:[#allocation9 + $0xf0] sm:$0xff]  ;;  %9925 = vmatpush3.bf16.msra.mxu1 %v9922_v41  ;;  %v11353_v47 = vrot.slane %v14543_v39, 1 }
 0x194   :  { %974 = vst [vmem:[#allocation2 + $0x358] sm:$0x3] %v14410_v16  ;;  %976 = vst [vmem:[#allocation2 + $0x18] sm:$0x1] %v14410_v16  ;;  %v11339_v40 = vpop.f32.mrb[43].mxu0  ;;  %v660_v61 = vmul.f32 %v11333_v23, %v11333_v23  ;;  %9799 = vmatprep.subr.bf16.mxu0 %v9798_v58  ;;  %v4596_v50 = vld [vmem:[#allocation9 + $0x280] sm:$0xff] }
 0x195   :  { %977 = vst [vmem:[#allocation2 + $0x30] sm:$0x1] %v14410_v16  ;;  %978 = vst [vmem:[#allocation2 + $0x48] sm:$0x1] %v14410_v16  ;;  %v587_v48 = vadd.f32 %v586_v29, %v11339_v40  ;;  %v659_v51 = vmul.f32 %v11339_v40, %v11339_v40  ;;  %v721_v55 = vadd.f32 %v720_v19, %v658_v18  ;;  %9801 = vmatpush3.bf16.msra.mxu0 %v9798_v58 }
 0x196   :  { %979 = vst [vmem:[#allocation2 + $0x60] sm:$0x1] %v14410_v16  ;;  %980 = vst [vmem:[#allocation2 + $0x78] sm:$0x1] %v14410_v16  ;;  %v9926_v29 = vpack.c.bf16 %v3919_v5, %v3918_v3  ;;  %v9802_v19 = vpack.c.bf16 %v1561_v33, %v1560_v7  ;;  %v4597_v5 = vld [vmem:[#allocation9 + $0x288] sm:$0xff] }
 0x197   :  { %981 = vst [vmem:[#allocation2 + $0x90] sm:$0x1] %v14410_v16  ;;  %982 = vst [vmem:[#allocation2 + $0xa8] sm:$0x1] %v14410_v16  ;;  %v722_v8 = vadd.f32 %v721_v55, %v659_v51  ;;  %v11347_v9 = vpop.f32.mrb[44].mxu0  ;;  %v588_v11 = vadd.f32 %v11333_v23, %v587_v48  ;;  %v11369_v39 = vpack.c.bf16 %v4597_v5, %v4596_v50 }
 0x198   :  { %983 = vst [vmem:[#allocation2 + $0xc0] sm:$0x1] %v14410_v16  ;;  %984 = vst [vmem:[#allocation2 + $0xd8] sm:$0x1] %v14410_v16  ;;  %v11350_v18 = vpop.f32.mrb[45].mxu0  ;;  %9927 = vmatprep.subr.bf16.mxu1 %v9926_v29  ;;  %9803 = vmatprep.subr.bf16.mxu0 %v9802_v19  ;;  %v662_v7 = vmul.f32 %v11347_v9, %v11347_v9 }
 0x199   :  { %985 = vst [vmem:[#allocation2 + $0xf0] sm:$0x1] %v14410_v16  ;;  %986 = vst [vmem:[#allocation2 + $0x108] sm:$0x1] %v14410_v16  ;;  %v589_v51 = vadd.f32 %v588_v11, %v11350_v18  ;;  %v661_v48 = vmul.f32 %v11350_v18, %v11350_v18  ;;  %v723_v55 = vadd.f32 %v722_v8, %v660_v61  ;;  %9929 = vmatpush3.bf16.msra.mxu1 %v9926_v29 }
 0x19a   :  { %987 = vst [vmem:[#allocation2 + $0x120] sm:$0x1] %v14410_v16  ;;  %988 = vst [vmem:[#allocation2 + $0x138] sm:$0x1] %v14410_v16  ;;  %9805 = vmatpush3.bf16.msra.mxu0 %v9802_v19 }
 0x19b   :  { %989 = vst [vmem:[#allocation2 + $0x150] sm:$0x1] %v14410_v16  ;;  %990 = vst [vmem:[#allocation2 + $0x168] sm:$0x1] %v14410_v16  ;;  %v724_v33 = vadd.f32 %v723_v55, %v661_v48  ;;  %v590_v11 = vadd.f32 %v11347_v9, %v589_v51 }
 0x19c   :  { %991 = vst [vmem:[#allocation2 + $0x180] sm:$0x1] %v14410_v16  ;;  %994 = vst [vmem:[#allocation2 + $0x1c8] sm:$0x1] %v14410_v16 }
 0x19d   :  { %995 = vst [vmem:[#allocation2 + $0x1e0] sm:$0x1] %v14410_v16  ;;  %996 = vst [vmem:[#allocation2 + $0x1f8] sm:$0x1] %v14410_v16  ;;  %v725_v55 = vadd.f32 %v724_v33, %v662_v7 }
 0x19e   :  { %997 = vst [vmem:[#allocation2 + $0x210] sm:$0x1] %v14410_v16  ;;  %998 = vst [vmem:[#allocation2 + $0x228] sm:$0x1] %v14410_v16 }
 0x19f   :  { %999 = vst [vmem:[#allocation2 + $0x240] sm:$0x1] %v14410_v16  ;;  %1000 = vst [vmem:[#allocation2 + $0x258] sm:$0x1] %v14410_v16 }
 0x1a0   :  { %1001 = vst [vmem:[#allocation2 + $0x270] sm:$0x1] %v14410_v16  ;;  %1002 = vst [vmem:[#allocation2 + $0x288] sm:$0x1] %v14410_v16 }
 0x1a1   :  { %1003 = vst [vmem:[#allocation2 + $0x2a0] sm:$0x1] %v14410_v16  ;;  %1004 = vst [vmem:[#allocation2 + $0x2b8] sm:$0x1] %v14410_v16 }
 0x1a2   :  { %1005 = vst [vmem:[#allocation2 + $0x2d0] sm:$0x1] %v14410_v16  ;;  %1006 = vst [vmem:[#allocation2 + $0x2e8] sm:$0x1] %v14410_v16 }
 0x1a3   :  { %1007 = vst [vmem:[#allocation2 + $0x300] sm:$0x1] %v14410_v16  ;;  %1008 = vst [vmem:[#allocation2 + $0x318] sm:$0x1] %v14410_v16 }
 0x1a4   :  { %1009 = vst [vmem:[#allocation2 + $0x330] sm:$0x1] %v14410_v16  ;;  %1012 = vst [vmem:[#allocation2 + $0x29] sm:$0x1] %v14410_v16 }
 0x1a5   :  { %1013 = vst [vmem:[#allocation2 + $0x41] sm:$0x1] %v14410_v16  ;;  %1014 = vst [vmem:[#allocation2 + $0x59] sm:$0x1] %v14410_v16 }
 0x1a6   :  { %1015 = vst [vmem:[#allocation2 + $0x71] sm:$0x1] %v14410_v16  ;;  %1016 = vst [vmem:[#allocation2 + $0x89] sm:$0x1] %v14410_v16 }
 0x1a7   :  { %1017 = vst [vmem:[#allocation2 + $0xa1] sm:$0x1] %v14410_v16  ;;  %1018 = vst [vmem:[#allocation2 + $0xb9] sm:$0x1] %v14410_v16 }
 0x1a8   :  { %1019 = vst [vmem:[#allocation2 + $0xd1] sm:$0x1] %v14410_v16  ;;  %1020 = vst [vmem:[#allocation2 + $0xe9] sm:$0x1] %v14410_v16 }
 0x1a9   :  { %1021 = vst [vmem:[#allocation2 + $0x101] sm:$0x1] %v14410_v16  ;;  %1022 = vst [vmem:[#allocation2 + $0x119] sm:$0x1] %v14410_v16 }
 0x1aa   :  { %1023 = vst [vmem:[#allocation2 + $0x131] sm:$0x1] %v14410_v16  ;;  %1024 = vst [vmem:[#allocation2 + $0x149] sm:$0x1] %v14410_v16 }
 0x1ab   :  { %1025 = vst [vmem:[#allocation2 + $0x161] sm:$0x1] %v14410_v16  ;;  %1026 = vst [vmem:[#allocation2 + $0x179] sm:$0x1] %v14410_v16 }
 0x1ac   :  { %1027 = vst [vmem:[#allocation2 + $0x191] sm:$0x1] %v14410_v16  ;;  %1030 = vst [vmem:[#allocation2 + $0x1d9] sm:$0x1] %v14410_v16 }
 0x1ad   :  { %1031 = vst [vmem:[#allocation2 + $0x1f1] sm:$0x1] %v14410_v16  ;;  %1032 = vst [vmem:[#allocation2 + $0x209] sm:$0x1] %v14410_v16 }
 0x1ae   :  { %1033 = vst [vmem:[#allocation2 + $0x221] sm:$0x1] %v14410_v16  ;;  %1034 = vst [vmem:[#allocation2 + $0x239] sm:$0x1] %v14410_v16 }
 0x1af   :  { %1035 = vst [vmem:[#allocation2 + $0x251] sm:$0x1] %v14410_v16  ;;  %1036 = vst [vmem:[#allocation2 + $0x269] sm:$0x1] %v14410_v16 }
 0x1b0   :  { %1037 = vst [vmem:[#allocation2 + $0x281] sm:$0x1] %v14410_v16  ;;  %1038 = vst [vmem:[#allocation2 + $0x299] sm:$0x1] %v14410_v16 }
 0x1b1   :  { %1039 = vst [vmem:[#allocation2 + $0x2b1] sm:$0x1] %v14410_v16  ;;  %1040 = vst [vmem:[#allocation2 + $0x2c9] sm:$0x1] %v14410_v16 }
 0x1b2   :  { %1041 = vst [vmem:[#allocation2 + $0x2e1] sm:$0x1] %v14410_v16  ;;  %1042 = vst [vmem:[#allocation2 + $0x2f9] sm:$0x1] %v14410_v16 }
 0x1b3   :  { %1043 = vst [vmem:[#allocation2 + $0x311] sm:$0x1] %v14410_v16  ;;  %1044 = vst [vmem:[#allocation2 + $0x329] sm:$0x1] %v14410_v16 }
 0x1b4   :  { %1045 = vst [vmem:[#allocation2 + $0x341] sm:$0x1] %v14410_v16  ;;  %975 = vst [vmem:[#allocation2] sm:$0x1] %v14410_v16 }
 0x1b5   :  { %992 = vst [vmem:[#allocation2 + $0x198] sm:$0x1] %v14410_v16  ;;  %993 = vst [vmem:[#allocation2 + $0x1b0] sm:$0x1] %v14410_v16 }
 0x1b6   :  { %1010 = vst [vmem:[#allocation2 + $0x348] sm:$0x1] %v14410_v16  ;;  %1011 = vst [vmem:[#allocation2 + $0x11] sm:$0x1] %v14410_v16 }
 0x1b7   :  { %1028 = vst [vmem:[#allocation2 + $0x1a9] sm:$0x1] %v14410_v16  ;;  %1029 = vst [vmem:[#allocation2 + $0x1c1] sm:$0x1] %v14410_v16 }
 0x1b8   :  { %1046 = vst [vmem:[#allocation2 + $0x359] sm:$0x1] %v14410_v16  ;;  %14539 = vst [vmem:[#allocation20_spill] sm:$0xff] %v11333_v23  ;;  %v3921_v16 = vld [vmem:[#allocation9 + $0x278] sm:$0xff] }
 0x1b9   :  { %14540 = vst [vmem:[#allocation21_spill] sm:$0xff] %v11339_v40  ;;  %14541 = vst [vmem:[#allocation22_spill] sm:$0xff] %v11347_v9  ;;  %v9930_v40 = vpack.c.bf16 %v3921_v16, %v3920_v35  ;;  %v11360_v16 = vpop.f32.mrb[46].mxu0 }
 0x1ba   :  { %14542 = vst [vmem:[#allocation23_spill] sm:$0xff] %v11350_v18  ;;  %14544 = vst [vmem:[#allocation24_spill] sm:$0xff] %v11353_v47  ;;  %v11363_v35 = vpop.f32.mrb[47].mxu0  ;;  %v664_v29 = vmul.f32 %v11360_v16, %v11360_v16 }
 0x1bb   :  { %v1112_v41 = vld [vmem:[#allocation2] sm:$0xff]  ;;  %14545 = vst [vmem:[#allocation25_spill] sm:$0xff] %v11360_v16  ;;  %14546 = vst [vmem:[#allocation26_spill] sm:$0xff] %v11363_v35  ;;  %9931 = vmatprep.subr.bf16.mxu1 %v9930_v40  ;;  %v663_v48 = vmul.f32 %v11363_v35, %v11363_v35  ;;  %v11376_v51 = vpop.f32.mrb[48].mxu0 }
 0x1bc   :  { %v1321_v23 = vrot.slane %v1112_v41, 1  ;;  %14547 = vst [vmem:[#allocation27_spill] sm:$0xff] %v11369_v39  ;;  %v591_v41 = vadd.f32 %v590_v11, %v11363_v35  ;;  %14548 = vst [vmem:[#allocation28_spill] sm:$0xff] %v11376_v51  ;;  %9933 = vmatpush3.bf16.msra.mxu1 %v9930_v40  ;;  %v666_v7 = vmul.f32 %v11376_v51, %v11376_v51 }
 0x1bd   :  { %v1114_v3 = vld [vmem:[#allocation2 + $0x10] sm:$0x3]  ;;  %v726_v19 = vadd.f32 %v725_v55, %v663_v48  ;;  %9935 = vmatprep.subr.bf16.mxu1 %v11369_v39 }
 0x1be   :  { %v1324_v58 = vrot.slane %v1114_v3, 1  ;;  %v1323_v61 = vsel %vm1320_vm0, %v1321_v23, %v11353_v47  ;;  %v592_v23 = vadd.f32 %v11360_v16, %v591_v41  ;;  %v11379_v3 = vpop.f32.mrb[49].mxu0 }
 0x1bf   :  { %8622 = vmatprep.mubr.f32.mxu0 %v1323_v61  ;;  %14549 = vst [vmem:[#allocation29_spill] sm:$0xff] %v11379_v3  ;;  %v665_v5 = vmul.f32 %v11379_v3, %v11379_v3  ;;  %v11387_v11 = vpop.f32.mrb[50].mxu0 }
 0x1c0   :  { %v1325_v8 = vsel %vm1320_vm0, %v11353_v47, %v1324_v58  ;;  %v593_v50 = vadd.f32 %v592_v23, %v11379_v3  ;;  %v727_v58 = vadd.f32 %v726_v19, %v664_v29  ;;  %14550 = vst [vmem:[#allocation30_spill] sm:$0xff] %v11387_v11  ;;  %v668_v55 = vmul.f32 %v11387_v11, %v11387_v11 }
 0x1c1   :  { %8623 = vmatmul.mubr.f32.vlgmr.msra.gmra.mrb[64].mxu0 %v1325_v8  ;;  %v11390_v8 = vpop.f32.mrb[51].mxu0 }
 0x1c2   :  { %v728_v33 = vadd.f32 %v727_v58, %v665_v5  ;;  %v594_v61 = vadd.f32 %v11376_v51, %v593_v50  ;;  %14551 = vst [vmem:[#allocation31_spill] sm:$0xff] %v11390_v8  ;;  %v667_v41 = vmul.f32 %v11390_v8, %v11390_v8  ;;  %v11397_v19 = vpop.f32.mrb[52].mxu0 }
 0x1c3   :  { %14552 = vst [vmem:[#allocation32_spill] sm:$0xff] %v11397_v19  ;;  %v11400_v5 = vpop.f32.mrb[53].mxu0  ;;  %v670_v47 = vmul.f32 %v11397_v19, %v11397_v19 }
 0x1c4   :  { %v595_v40 = vadd.f32 %v594_v61, %v11390_v8  ;;  %v729_v48 = vadd.f32 %v728_v33, %v666_v7  ;;  %14553 = vst [vmem:[#allocation33_spill] sm:$0xff] %v11400_v5  ;;  %v669_v58 = vmul.f32 %v11400_v5, %v11400_v5  ;;  %v11407_v33 = vpop.f32.mrb[54].mxu0 }
 0x1c5   :  { %14554 = vst [vmem:[#allocation34_spill] sm:$0xff] %v11407_v33 }
 0x1c6   :  { %v730_v29 = vadd.f32 %v729_v48, %v667_v41  ;;  %v596_v23 = vadd.f32 %v11387_v11, %v595_v40  ;;  %v11410_v48 = vpop.f32.mrb[55].mxu0 }
 0x1c7   :  { %14555 = vst [vmem:[#allocation35_spill] sm:$0xff] %v11410_v48  ;;  %v671_v39 = vmul.f32 %v11410_v48, %v11410_v48 }
 0x1c8   :  { %v597_v50 = vadd.f32 %v596_v23, %v11400_v5  ;;  %v731_v61 = vadd.f32 %v730_v29, %v668_v55  ;;  %v672_v5 = vmul.f32 %v11407_v33, %v11407_v33  ;;  %v11417_v29 = vpop.f32.mrb[56].mxu0 }
 0x1c9   :  { %14556 = vst [vmem:[#allocation36_spill] sm:$0xff] %v11417_v29 }
 0x1ca   :  { %v732_v7 = vadd.f32 %v731_v61, %v669_v58  ;;  %v598_v41 = vadd.f32 %v11397_v19, %v597_v50  ;;  %v11420_v61 = vpop.f32.mrb[57].mxu0 }
 0x1cb   :  { %14557 = vst [vmem:[#allocation37_spill] sm:$0xff] %v11420_v61  ;;  %v673_v19 = vmul.f32 %v11420_v61, %v11420_v61 }
 0x1cc   :  { %v599_v40 = vadd.f32 %v598_v41, %v11410_v48  ;;  %v733_v23 = vadd.f32 %v732_v7, %v670_v47  ;;  %v674_v48 = vmul.f32 %v11417_v29, %v11417_v29  ;;  %v11427_v7 = vpop.f32.mrb[58].mxu0 }
 0x1cd   :  { %14558 = vst [vmem:[#allocation38_spill] sm:$0xff] %v11427_v7 }
 0x1ce   :  { %v734_v55 = vadd.f32 %v733_v23, %v671_v39  ;;  %v600_v58 = vadd.f32 %v11407_v33, %v599_v40  ;;  %v11430_v23 = vpop.f32.mrb[59].mxu0 }
 0x1cf   :  { %14559 = vst [vmem:[#allocation39_spill] sm:$0xff] %v11430_v23  ;;  %v675_v33 = vmul.f32 %v11430_v23, %v11430_v23 }
 0x1d0   :  { %v601_v50 = vadd.f32 %v600_v58, %v11420_v61  ;;  %v735_v41 = vadd.f32 %v734_v55, %v672_v5  ;;  %v676_v61 = vmul.f32 %v11427_v7, %v11427_v7  ;;  %v11437_v55 = vpop.f32.mrb[60].mxu0 }
 0x1d1   :  { %14560 = vst [vmem:[#allocation40_spill] sm:$0xff] %v11437_v55 }
 0x1d2   :  { %v736_v47 = vadd.f32 %v735_v41, %v673_v19  ;;  %v602_v39 = vadd.f32 %v11417_v29, %v601_v50  ;;  %v11440_v41 = vpop.f32.mrb[61].mxu0 }
 0x1d3   :  { %14561 = vst [vmem:[#allocation41_spill] sm:$0xff] %v11440_v41  ;;  %v677_v29 = vmul.f32 %v11440_v41, %v11440_v41 }
 0x1d4   :  { %v603_v40 = vadd.f32 %v602_v39, %v11430_v23  ;;  %v737_v58 = vadd.f32 %v736_v47, %v674_v48  ;;  %v678_v23 = vmul.f32 %v11437_v55, %v11437_v55  ;;  %v11447_v47 = vpop.f32.mrb[62].mxu0 }
 0x1d6   :  { %v738_v5 = vadd.f32 %v737_v58, %v675_v33  ;;  %v604_v19 = vadd.f32 %v11427_v7, %v603_v40  ;;  %v537_v58 = vpop.f32.mrb[63].mxu0  ;;  %v680_v7 = vmul.f32 %v11447_v47, %v11447_v47 }
 0x1d7   :  { %v679_v8 = vmul.f32 %v537_v58, %v537_v58 }
 0x1d8   :  { %v605_v50 = vadd.f32 %v604_v19, %v11440_v41  ;;  %v739_v39 = vadd.f32 %v738_v5, %v676_v61 }
 0x1da   :  { %v740_v48 = vadd.f32 %v739_v39, %v677_v29  ;;  %v606_v33 = vadd.f32 %v11437_v55, %v605_v50 }
 0x1dc   :  { %v607_v11 = vadd.f32 %v606_v33, %v537_v58  ;;  %v741_v40 = vadd.f32 %v740_v48, %v678_v23 }
 0x1de   :  { %v608_v19 = vadd.f32 %v11447_v47, %v607_v11  ;;  %v742_v51 = vadd.f32 %v741_v40, %v679_v8  ;;  %v759_v11 = vlaneseq }
 0x1e0   :  { %v609_v41 = vrot.slane %v608_v19, 4  ;;  %v743_v61 = vadd.f32 %v742_v51, %v680_v7  ;;  %v760_v8 = vshrl.u32 %v759_v11, 7  ;;  %v79_v51 = vld [vmem:[%s14407_s4] sm:$0x1] }
 0x1e2   :  { %v610_v5 = vadd.f32 %v609_v41, %v608_v19  ;;  %v744_v3 = vrot.slane %v743_v61, 4 }
 0x1e4   :  { %v611_v16 = vrot.slane %v610_v5, 2  ;;  %v745_v29 = vadd.f32 %v744_v3, %v743_v61  ;;  %v11456_v3 = vsub.s32 0, %v760_v8  ;;  %v14569_v8 = vld [vmem:[#allocation23_spill] sm:$0xff] }
 0x1e6   :  { %v612_v39 = vadd.f32 %v611_v16, %v610_v5  ;;  %v746_v35 = vrot.slane %v745_v29, 2  ;;  %14562 = vst [vmem:[#allocation42_spill] sm:$0xff] %v11456_v3 }
 0x1e8   :  { %v613_v9 = vrot.slane %v612_v39, 1  ;;  %v747_v50 = vadd.f32 %v746_v35, %v745_v29  ;;  %v14563_v29 = vld [vmem:[#allocation17_spill] sm:$0xff] }
 0x1ea   :  { %v614_v55 = vadd.f32 %v613_v9, %v612_v39  ;;  %v748_v33 = vrot.slane %v747_v50, 1  ;;  %v80_v9 = vld [vmem:[%s14408_s5] sm:$0x1] }
 0x1eb   :  { %v14564_v39 = vld [vmem:[#allocation16_spill] sm:$0xff] }
 0x1ec   :  { %v616_v18 = vmul.f32 0.001953125, %v614_v55  ;;  %v749_v23 = vadd.f32 %v748_v33, %v747_v50  ;;  %v14565_v50 = vld [vmem:[#allocation19_spill] sm:$0xff]  ;;  %v14566_v33 = vld [vmem:[#allocation18_spill] sm:$0xff] }
 0x1ee   :  { %v750_v48 = vmul.f32 0.001953125, %v749_v23  ;;  %v751_v63 = vmul.f32 %v616_v18, %v616_v18  ;;  %v14567_v23 = vld [vmem:[#allocation21_spill] sm:$0xff] }
 0x1f0   :  { %v752_v15 = vsub.f32 %v750_v48, %v751_v63  ;;  %v14568_v48 = vld [vmem:[#allocation20_spill] sm:$0xff] }
 0x1f2   :  { %v753_v27 = vadd.f32 1e-05, %v752_v15 }
 0x1f4   :  { %10582 = vrsqrt.f32 %v753_v27 }
 0x1fe   :  { %v10583_v16 = vpop.eup %10582 }
 0x1ff   :  { %v755_v7 = vmul.f32 %v10583_v16, %v79_v51  ;;  %v14570_v16 = vld [vmem:[#allocation22_spill] sm:$0xff] }
 0x201   :  { %v756_v35 = vmul.f32 %v755_v7, %v616_v18  ;;  %v11462_v55 = vrot.slane %v755_v7, %v11456_v3 }
 0x203   :  { %v757_v15 = vsub.f32 %v80_v9, %v756_v35  ;;  %v826_v27 = vmul.f32 %v11462_v55, %v537_v58  ;;  %v11467_v63 = vmul.f32 %v11462_v55, %v11034_v26  ;;  %v11471_v41 = vmul.f32 %v11030_v24, %v11462_v55  ;;  %v14571_v9 = vld [vmem:[#allocation26_spill] sm:$0xff] }
 0x204   :  { %v11475_v40 = vmul.f32 %v11462_v55, %v11042_v31  ;;  %v11479_v18 = vmul.f32 %v11040_v30, %v11462_v55  ;;  %v11483_v19 = vmul.f32 %v11462_v55, %v11052_v38  ;;  %v11487_v26 = vmul.f32 %v11050_v37, %v11462_v55 }
 0x205   :  { %v11490_v58 = vrot.slane %v757_v15, %v11456_v3  ;;  %v11494_v24 = vmul.f32 %v11462_v55, %v11062_v46  ;;  %v11498_v31 = vmul.f32 %v11059_v44, %v11462_v55  ;;  %v11502_v30 = vmul.f32 %v11462_v55, %v11072_v54  ;;  %v14572_v15 = vld [vmem:[#allocation25_spill] sm:$0xff]  ;;  %v14585_v3 = vld [vmem:[#allocation34_spill] sm:$0xff] }
 0x206   :  { %v11506_v38 = vmul.f32 %v11069_v52, %v11462_v55  ;;  %v11510_v37 = vmul.f32 %v11462_v55, %v11082_v62  ;;  %v11514_v46 = vmul.f32 %v11079_v60, %v11462_v55  ;;  %v11518_v44 = vmul.f32 %v11462_v55, %v11092_v6 }
 0x207   :  { %v896_v61 = vadd.f32 %v11490_v58, %v826_v27  ;;  %v11523_v54 = vmul.f32 %v11089_v4, %v11462_v55  ;;  %v11527_v52 = vmul.f32 %v11462_v55, %v11102_v14  ;;  %v11531_v62 = vmul.f32 %v11099_v12, %v11462_v55 }
 0x208   :  { %v11535_v60 = vmul.f32 %v11462_v55, %v11112_v22  ;;  %v11539_v6 = vmul.f32 %v11109_v20, %v11462_v55  ;;  %v11543_v4 = vmul.f32 %v11462_v55, %v11122_v34  ;;  %v11547_v14 = vmul.f32 %v11119_v32, %v11462_v55 }
 0x209   :  { %v960_v5 = vmax.f32 %v896_v61, 0.0  ;;  %v11551_v12 = vmul.f32 %v11462_v55, %v11132_v45  ;;  %v11555_v22 = vmul.f32 %v11129_v42, %v11462_v55  ;;  %v11559_v20 = vmul.f32 %v11462_v55, %v11142_v56  ;;  %v14573_v61 = vld [vmem:[#allocation29_spill] sm:$0xff] }
 0x20a   :  { %v11563_v34 = vmul.f32 %v11139_v53, %v11462_v55  ;;  %v11567_v32 = vmul.f32 %v11462_v55, %v11152_v2  ;;  %v11571_v45 = vmul.f32 %v11149_v0, %v11462_v55  ;;  %v11575_v42 = vmul.f32 %v11462_v55, %v11162_v13 }
 0x20b   :  { %1110 = vst [vmem:[#allocation2 + $0x331] sm:$0xff] %v960_v5  ;;  %v11579_v56 = vmul.f32 %v11159_v10, %v11462_v55  ;;  %v11583_v53 = vmul.f32 %v11462_v55, %v11172_v25  ;;  %v11587_v2 = vmul.f32 %v11169_v21, %v11462_v55  ;;  %v11591_v0 = vmul.f32 %v11462_v55, %v11182_v43 }
 0x20c   :  { %v11595_v13 = vmul.f32 %v11179_v36, %v11462_v55  ;;  %v11599_v10 = vmul.f32 %v11462_v55, %v11192_v1  ;;  %v11603_v25 = vmul.f32 %v11189_v57, %v11462_v55  ;;  %v11607_v21 = vmul.f32 %v11462_v55, %v11202_v28 }
 0x20d   :  { %v11611_v43 = vmul.f32 %v11199_v17, %v11462_v55  ;;  %v11615_v36 = vmul.f32 %v11462_v55, %v11212_v59  ;;  %v11619_v1 = vmul.f32 %v11209_v49, %v11462_v55  ;;  %v11623_v57 = vmul.f32 %v11462_v55, %v14563_v29  ;;  %v14574_v29 = vld [vmem:[#allocation28_spill] sm:$0xff] }
 0x20e   :  { %v11627_v28 = vmul.f32 %v14564_v39, %v11462_v55  ;;  %v11631_v17 = vmul.f32 %v11462_v55, %v14565_v50  ;;  %v11635_v59 = vmul.f32 %v14566_v33, %v11462_v55  ;;  %v11639_v49 = vmul.f32 %v11462_v55, %v14567_v23  ;;  %v14575_v50 = vld [vmem:[#allocation31_spill] sm:$0xff]  ;;  %v14577_v23 = vld [vmem:[#allocation30_spill] sm:$0xff] }
 0x20f   :  { %v11643_v11 = vmul.f32 %v14568_v48, %v11462_v55  ;;  %v11647_v51 = vmul.f32 %v11462_v55, %v14569_v8  ;;  %v11651_v7 = vmul.f32 %v14570_v16, %v11462_v55  ;;  %v11655_v35 = vmul.f32 %v11462_v55, %v14571_v9  ;;  %v14579_v8 = vld [vmem:[#allocation33_spill] sm:$0xff]  ;;  %v14581_v9 = vld [vmem:[#allocation32_spill] sm:$0xff] }
 0x210   :  { %v11659_v27 = vmul.f32 %v14572_v15, %v11462_v55  ;;  %v11663_v5 = vmul.f32 %v11462_v55, %v14573_v61  ;;  %v11667_v39 = vmul.f32 %v14574_v29, %v11462_v55  ;;  %v11671_v33 = vmul.f32 %v11462_v55, %v14575_v50  ;;  %v14583_v61 = vld [vmem:[#allocation35_spill] sm:$0xff] }
 0x211   :  { %v11675_v48 = vmul.f32 %v14577_v23, %v11462_v55  ;;  %v11679_v16 = vmul.f32 %v11462_v55, %v14579_v8  ;;  %v11683_v15 = vmul.f32 %v14581_v9, %v11462_v55  ;;  %v11687_v29 = vmul.f32 %v11462_v55, %v14583_v61 }
 0x212   :  { %14576 = vst [vmem:[#allocation17_spill] sm:$0xff] %v11671_v33  ;;  %v11691_v50 = vmul.f32 %v14585_v3, %v11462_v55  ;;  %v14587_v33 = vld [vmem:[#allocation37_spill] sm:$0xff] }
 0x213   :  { %14578 = vst [vmem:[#allocation16_spill] sm:$0xff] %v11675_v48  ;;  %14580 = vst [vmem:[#allocation19_spill] sm:$0xff] %v11679_v16  ;;  %v11695_v23 = vmul.f32 %v11462_v55, %v14587_v33  ;;  %v14588_v48 = vld [vmem:[#allocation36_spill] sm:$0xff]  ;;  %v14589_v16 = vld [vmem:[#allocation39_spill] sm:$0xff] }
 0x214   :  { %14582 = vst [vmem:[#allocation18_spill] sm:$0xff] %v11683_v15  ;;  %14584 = vst [vmem:[#allocation21_spill] sm:$0xff] %v11687_v29  ;;  %v11699_v8 = vmul.f32 %v14588_v48, %v11462_v55  ;;  %v11703_v9 = vmul.f32 %v11462_v55, %v14589_v16  ;;  %v14590_v15 = vld [vmem:[#allocation38_spill] sm:$0xff]  ;;  %v14591_v29 = vld [vmem:[#allocation41_spill] sm:$0xff]  ;;  %v11719_v48 = vmul.f32 %v11447_v47, %v11462_v55 }
 0x215   :  { %14586 = vst [vmem:[#allocation20_spill] sm:$0xff] %v11691_v50  ;;  %v11707_v61 = vmul.f32 %v14590_v15, %v11462_v55  ;;  %v11711_v3 = vmul.f32 %v11462_v55, %v14591_v29  ;;  %v14592_v50 = vld [vmem:[#allocation40_spill] sm:$0xff]  ;;  %v11723_v16 = vadd.f32 %v11490_v58, %v11467_v63  ;;  %v11727_v15 = vadd.f32 %v11490_v58, %v11471_v41 }
 0x216   :  { %v11715_v33 = vmul.f32 %v14592_v50, %v11462_v55  ;;  %v11731_v29 = vadd.f32 %v11490_v58, %v11475_v40  ;;  %v11735_v50 = vadd.f32 %v11490_v58, %v11479_v18  ;;  %v11739_v47 = vadd.f32 %v11490_v58, %v11483_v19 }
 0x217   :  { %v11743_v55 = vadd.f32 %v11490_v58, %v11487_v26  ;;  %v11747_v63 = vadd.f32 %v11490_v58, %v11494_v24  ;;  %v11751_v41 = vadd.f32 %v11490_v58, %v11498_v31  ;;  %v11755_v40 = vadd.f32 %v11490_v58, %v11502_v30 }
 0x218   :  { %v11759_v18 = vadd.f32 %v11490_v58, %v11506_v38  ;;  %v11763_v19 = vadd.f32 %v11490_v58, %v11510_v37  ;;  %v11767_v26 = vadd.f32 %v11490_v58, %v11514_v46  ;;  %v11771_v24 = vadd.f32 %v11490_v58, %v11518_v44 }
 0x219   :  { %v11775_v31 = vadd.f32 %v11490_v58, %v11523_v54  ;;  %v11779_v30 = vadd.f32 %v11490_v58, %v11527_v52  ;;  %v11783_v38 = vadd.f32 %v11490_v58, %v11531_v62  ;;  %v11787_v37 = vadd.f32 %v11490_v58, %v11535_v60 }
 0x21a   :  { %v11791_v46 = vadd.f32 %v11490_v58, %v11539_v6  ;;  %v11795_v44 = vadd.f32 %v11490_v58, %v11543_v4  ;;  %v11799_v54 = vadd.f32 %v11490_v58, %v11547_v14  ;;  %v11803_v52 = vadd.f32 %v11490_v58, %v11551_v12 }
 0x21b   :  { %v11807_v62 = vadd.f32 %v11490_v58, %v11555_v22  ;;  %v11811_v60 = vadd.f32 %v11490_v58, %v11559_v20  ;;  %v11815_v6 = vadd.f32 %v11490_v58, %v11563_v34  ;;  %v11819_v4 = vadd.f32 %v11490_v58, %v11567_v32 }
 0x21c   :  { %v11823_v14 = vadd.f32 %v11490_v58, %v11571_v45  ;;  %v11827_v12 = vadd.f32 %v11490_v58, %v11575_v42  ;;  %v11831_v22 = vadd.f32 %v11490_v58, %v11579_v56  ;;  %v11835_v20 = vadd.f32 %v11490_v58, %v11583_v53 }
 0x21d   :  { %v11839_v34 = vadd.f32 %v11490_v58, %v11587_v2  ;;  %v11843_v32 = vadd.f32 %v11490_v58, %v11591_v0  ;;  %v11847_v45 = vadd.f32 %v11490_v58, %v11595_v13  ;;  %v11851_v42 = vadd.f32 %v11490_v58, %v11599_v10 }
 0x21e   :  { %v11855_v56 = vadd.f32 %v11490_v58, %v11603_v25  ;;  %v11859_v53 = vadd.f32 %v11490_v58, %v11607_v21  ;;  %v11863_v2 = vadd.f32 %v11490_v58, %v11611_v43  ;;  %v11867_v0 = vadd.f32 %v11490_v58, %v11615_v36 }
 0x21f   :  { %v11871_v13 = vadd.f32 %v11490_v58, %v11619_v1  ;;  %v11875_v10 = vadd.f32 %v11490_v58, %v11623_v57  ;;  %v11879_v25 = vadd.f32 %v11490_v58, %v11627_v28  ;;  %v11883_v21 = vadd.f32 %v11490_v58, %v11631_v17 }
 0x220   :  { %v11887_v43 = vadd.f32 %v11490_v58, %v11635_v59  ;;  %v11891_v36 = vadd.f32 %v11490_v58, %v11639_v49  ;;  %v11895_v1 = vadd.f32 %v11490_v58, %v11643_v11  ;;  %v11899_v57 = vadd.f32 %v11490_v58, %v11647_v51  ;;  %v14598_v51 = vld [vmem:[#allocation17_spill] sm:$0xff] }
 0x221   :  { %v11903_v28 = vadd.f32 %v11490_v58, %v11651_v7  ;;  %v11907_v17 = vadd.f32 %v11490_v58, %v11655_v35  ;;  %v11911_v59 = vadd.f32 %v11490_v58, %v11659_v27  ;;  %v11915_v49 = vadd.f32 %v11490_v58, %v11663_v5 }
 0x222   :  { %v11919_v11 = vadd.f32 %v11490_v58, %v11667_v39  ;;  %v11923_v7 = vadd.f32 %v11490_v58, %v14598_v51 }
 0x223   :  { %14593 = vst [vmem:[#allocation23_spill] sm:$0xff] %v11903_v28  ;;  %14594 = vst [vmem:[#allocation22_spill] sm:$0xff] %v11907_v17  ;;  %v14599_v28 = vld [vmem:[#allocation16_spill] sm:$0xff]  ;;  %v14600_v17 = vld [vmem:[#allocation19_spill] sm:$0xff] }
 0x224   :  { %14595 = vst [vmem:[#allocation26_spill] sm:$0xff] %v11911_v59  ;;  %14596 = vst [vmem:[#allocation25_spill] sm:$0xff] %v11915_v49  ;;  %v11927_v35 = vadd.f32 %v11490_v58, %v14599_v28  ;;  %v11931_v27 = vadd.f32 %v11490_v58, %v14600_v17  ;;  %v14601_v59 = vld [vmem:[#allocation18_spill] sm:$0xff]  ;;  %v14602_v49 = vld [vmem:[#allocation21_spill] sm:$0xff]  ;;  %v11947_v28 = vadd.f32 %v11490_v58, %v11695_v23 }
 0x225   :  { %14597 = vst [vmem:[#allocation29_spill] sm:$0xff] %v11919_v11  ;;  %v11935_v5 = vadd.f32 %v11490_v58, %v14601_v59  ;;  %v11939_v39 = vadd.f32 %v11490_v58, %v14602_v49  ;;  %v14603_v11 = vld [vmem:[#allocation20_spill] sm:$0xff]  ;;  %v11951_v17 = vadd.f32 %v11490_v58, %v11699_v8  ;;  %v11955_v59 = vadd.f32 %v11490_v58, %v11703_v9 }
 0x226   :  { %v11943_v51 = vadd.f32 %v11490_v58, %v14603_v11  ;;  %v11959_v49 = vadd.f32 %v11490_v58, %v11707_v61  ;;  %v11963_v11 = vadd.f32 %v11490_v58, %v11711_v3  ;;  %v11967_v23 = vadd.f32 %v11490_v58, %v11715_v33 }
 0x227   :  { %14604 = vst [vmem:[#allocation28_spill] sm:$0xff] %v11951_v17  ;;  %14605 = vst [vmem:[#allocation31_spill] sm:$0xff] %v11955_v59  ;;  %v11971_v8 = vadd.f32 %v11490_v58, %v11719_v48  ;;  %v898_v17 = vmax.f32 %v11723_v16, 0.0  ;;  %v899_v9 = vmax.f32 %v11727_v15, 0.0  ;;  %v900_v59 = vmax.f32 %v11731_v29, 0.0 }
 0x228   :  { %14606 = vst [vmem:[#allocation30_spill] sm:$0xff] %v11959_v49  ;;  %14607 = vst [vmem:[#allocation33_spill] sm:$0xff] %v11963_v11  ;;  %v901_v61 = vmax.f32 %v11735_v50, 0.0  ;;  %v902_v49 = vmax.f32 %v11739_v47, 0.0  ;;  %v903_v3 = vmax.f32 %v11743_v55, 0.0  ;;  %v904_v11 = vmax.f32 %v11747_v63, 0.0 }
 0x229   :  { %14608 = vst [vmem:[#allocation32_spill] sm:$0xff] %v11967_v23  ;;  %v905_v33 = vmax.f32 %v11751_v41, 0.0  ;;  %v906_v23 = vmax.f32 %v11755_v40, 0.0  ;;  %1048 = vst [vmem:[#allocation2 + $0x19] sm:$0xff] %v898_v17  ;;  %v907_v58 = vmax.f32 %v11759_v18, 0.0  ;;  %v908_v48 = vmax.f32 %v11763_v19, 0.0 }
 0x22a   :  { %v909_v16 = vmax.f32 %v11767_v26, 0.0  ;;  %v910_v15 = vmax.f32 %v11771_v24, 0.0  ;;  %1049 = vst [vmem:[#allocation2 + $0x21] sm:$0xff] %v899_v9  ;;  %1050 = vst [vmem:[#allocation2 + $0x31] sm:$0xff] %v900_v59  ;;  %v911_v29 = vmax.f32 %v11775_v31, 0.0  ;;  %v912_v50 = vmax.f32 %v11779_v30, 0.0 }
 0x22b   :  { %1051 = vst [vmem:[#allocation2 + $0x39] sm:$0xff] %v901_v61  ;;  %1052 = vst [vmem:[#allocation2 + $0x49] sm:$0xff] %v902_v49  ;;  %v913_v47 = vmax.f32 %v11783_v38, 0.0  ;;  %v914_v55 = vmax.f32 %v11787_v37, 0.0  ;;  %v915_v63 = vmax.f32 %v11791_v46, 0.0  ;;  %v916_v41 = vmax.f32 %v11795_v44, 0.0 }
 0x22c   :  { %1053 = vst [vmem:[#allocation2 + $0x51] sm:$0xff] %v903_v3  ;;  %1054 = vst [vmem:[#allocation2 + $0x61] sm:$0xff] %v904_v11  ;;  %v917_v40 = vmax.f32 %v11799_v54, 0.0  ;;  %v918_v18 = vmax.f32 %v11803_v52, 0.0  ;;  %v919_v19 = vmax.f32 %v11807_v62, 0.0  ;;  %v920_v26 = vmax.f32 %v11811_v60, 0.0 }
 0x22d   :  { %1055 = vst [vmem:[#allocation2 + $0x69] sm:$0xff] %v905_v33  ;;  %1056 = vst [vmem:[#allocation2 + $0x79] sm:$0xff] %v906_v23  ;;  %v921_v24 = vmax.f32 %v11815_v6, 0.0  ;;  %v922_v31 = vmax.f32 %v11819_v4, 0.0  ;;  %v923_v30 = vmax.f32 %v11823_v14, 0.0  ;;  %v924_v38 = vmax.f32 %v11827_v12, 0.0 }
 0x22e   :  { %1057 = vst [vmem:[#allocation2 + $0x81] sm:$0xff] %v907_v58  ;;  %1058 = vst [vmem:[#allocation2 + $0x91] sm:$0xff] %v908_v48  ;;  %v925_v37 = vmax.f32 %v11831_v22, 0.0  ;;  %v926_v46 = vmax.f32 %v11835_v20, 0.0  ;;  %v927_v44 = vmax.f32 %v11839_v34, 0.0  ;;  %v928_v54 = vmax.f32 %v11843_v32, 0.0 }
 0x22f   :  { %1059 = vst [vmem:[#allocation2 + $0x99] sm:$0xff] %v909_v16  ;;  %1060 = vst [vmem:[#allocation2 + $0xa9] sm:$0xff] %v910_v15  ;;  %v929_v52 = vmax.f32 %v11847_v45, 0.0  ;;  %v930_v62 = vmax.f32 %v11851_v42, 0.0  ;;  %v931_v60 = vmax.f32 %v11855_v56, 0.0  ;;  %v932_v6 = vmax.f32 %v11859_v53, 0.0 }
 0x230   :  { %1061 = vst [vmem:[#allocation2 + $0xb1] sm:$0xff] %v911_v29  ;;  %1062 = vst [vmem:[#allocation2 + $0xc1] sm:$0xff] %v912_v50  ;;  %v933_v4 = vmax.f32 %v11863_v2, 0.0  ;;  %v934_v14 = vmax.f32 %v11867_v0, 0.0  ;;  %v935_v12 = vmax.f32 %v11871_v13, 0.0  ;;  %v936_v22 = vmax.f32 %v11875_v10, 0.0 }
 0x231   :  { %1063 = vst [vmem:[#allocation2 + $0xc9] sm:$0xff] %v913_v47  ;;  %1064 = vst [vmem:[#allocation2 + $0xd9] sm:$0xff] %v914_v55  ;;  %v937_v20 = vmax.f32 %v11879_v25, 0.0  ;;  %v938_v34 = vmax.f32 %v11883_v21, 0.0  ;;  %v939_v32 = vmax.f32 %v11887_v43, 0.0  ;;  %v940_v45 = vmax.f32 %v11891_v36, 0.0 }
 0x232   :  { %1065 = vst [vmem:[#allocation2 + $0xe1] sm:$0xff] %v915_v63  ;;  %1066 = vst [vmem:[#allocation2 + $0xf1] sm:$0xff] %v916_v41  ;;  %v941_v42 = vmax.f32 %v11895_v1, 0.0  ;;  %v942_v56 = vmax.f32 %v11899_v57, 0.0  ;;  %v12018_v53 = vld [vmem:[#allocation2 + $0x18] sm:$0xff]  ;;  %v1116_v2 = vld [vmem:[#allocation2 + $0x20] sm:$0xff] }
 0x233   :  { %1067 = vst [vmem:[#allocation2 + $0xf9] sm:$0xff] %v917_v40  ;;  %1068 = vst [vmem:[#allocation2 + $0x109] sm:$0xff] %v918_v18  ;;  %v14609_v0 = vld [vmem:[#allocation23_spill] sm:$0xff]  ;;  %v14610_v10 = vld [vmem:[#allocation22_spill] sm:$0xff]  ;;  %v948_v49 = vmax.f32 %v11923_v7, 0.0  ;;  %v949_v11 = vmax.f32 %v11927_v35, 0.0 }
 0x234   :  { %1069 = vst [vmem:[#allocation2 + $0x111] sm:$0xff] %v919_v19  ;;  %1070 = vst [vmem:[#allocation2 + $0x121] sm:$0xff] %v920_v26  ;;  %v943_v13 = vmax.f32 %v14609_v0, 0.0  ;;  %v944_v25 = vmax.f32 %v14610_v10, 0.0  ;;  %v14611_v21 = vld [vmem:[#allocation26_spill] sm:$0xff]  ;;  %v14612_v43 = vld [vmem:[#allocation25_spill] sm:$0xff] }
 0x235   :  { %1071 = vst [vmem:[#allocation2 + $0x129] sm:$0xff] %v921_v24  ;;  %1072 = vst [vmem:[#allocation2 + $0x139] sm:$0xff] %v922_v31  ;;  %v945_v17 = vmax.f32 %v14611_v21, 0.0  ;;  %v946_v59 = vmax.f32 %v14612_v43, 0.0  ;;  %v1117_v36 = vld [vmem:[#allocation2 + $0x28] sm:$0x3] }
 0x236   :  { %1073 = vst [vmem:[#allocation2 + $0x141] sm:$0xff] %v923_v30  ;;  %1074 = vst [vmem:[#allocation2 + $0x151] sm:$0xff] %v924_v38  ;;  %v14613_v1 = vld [vmem:[#allocation29_spill] sm:$0xff]  ;;  %v950_v23 = vmax.f32 %v11931_v27, 0.0  ;;  %v4598_v61 = vld [vmem:[#allocation9 + $0x290] sm:$0xff]  ;;  %v951_v33 = vmax.f32 %v11935_v5, 0.0 }
 0x237   :  { %1075 = vst [vmem:[#allocation2 + $0x159] sm:$0xff] %v925_v37  ;;  %1076 = vst [vmem:[#allocation2 + $0x169] sm:$0xff] %v926_v46  ;;  %v947_v57 = vmax.f32 %v14613_v1, 0.0  ;;  %v3025_v9 = vld [vmem:[#allocation2 + $0x28] sm:$0x3]  ;;  %v4599_v3 = vld [vmem:[#allocation9 + $0x298] sm:$0xff] }
 0x238   :  { %1077 = vst [vmem:[#allocation2 + $0x171] sm:$0xff] %v927_v44  ;;  %1078 = vst [vmem:[#allocation2 + $0x181] sm:$0xff] %v928_v54  ;;  %v952_v58 = vmax.f32 %v11939_v39, 0.0  ;;  %v953_v48 = vmax.f32 %v11943_v51, 0.0  ;;  %v954_v16 = vmax.f32 %v11947_v28, 0.0  ;;  %v1118_v7 = vld [vmem:[#allocation2 + $0x30] sm:$0xff]  ;;  %v9938_v46 = vpack.c.bf16 %v4599_v3, %v4598_v61 }
 0x239   :  { %1079 = vst [vmem:[#allocation2 + $0x189] sm:$0xff] %v929_v52  ;;  %1080 = vst [vmem:[#allocation2 + $0x1c9] sm:$0xff] %v930_v62  ;;  %v1119_v35 = vld [vmem:[#allocation2 + $0x38] sm:$0xff]  ;;  %v14614_v27 = vld [vmem:[#allocation28_spill] sm:$0xff]  ;;  %v961_v41 = vmax.f32 %v11971_v8, 0.0  ;;  %v1326_v40 = vrot.slane %v12018_v53, 1 }
 0x23a   :  { %1081 = vst [vmem:[#allocation2 + $0x1d1] sm:$0xff] %v931_v60  ;;  %1082 = vst [vmem:[#allocation2 + $0x1e1] sm:$0xff] %v932_v6  ;;  %v955_v15 = vmax.f32 %v14614_v27, 0.0  ;;  %v14615_v29 = vld [vmem:[#allocation31_spill] sm:$0xff]  ;;  %v14616_v47 = vld [vmem:[#allocation30_spill] sm:$0xff]  ;;  %v1327_v18 = vrot.slane %v1116_v2, 1 }
 0x23b   :  { %1083 = vst [vmem:[#allocation2 + $0x1e9] sm:$0xff] %v933_v4  ;;  %1084 = vst [vmem:[#allocation2 + $0x1f9] sm:$0xff] %v934_v14  ;;  %v956_v50 = vmax.f32 %v14615_v29, 0.0  ;;  %v957_v55 = vmax.f32 %v14616_v47, 0.0  ;;  %v14617_v63 = vld [vmem:[#allocation33_spill] sm:$0xff]  ;;  %v14618_v51 = vld [vmem:[#allocation32_spill] sm:$0xff] }
 0x23c   :  { %1085 = vst [vmem:[#allocation2 + $0x201] sm:$0xff] %v935_v12  ;;  %1086 = vst [vmem:[#allocation2 + $0x211] sm:$0xff] %v936_v22  ;;  %v958_v5 = vmax.f32 %v14617_v63, 0.0  ;;  %v1120_v39 = vld [vmem:[#allocation2 + $0x40] sm:$0x3]  ;;  %v959_v28 = vmax.f32 %v14618_v51, 0.0  ;;  %v1328_v8 = vsel %vm1320_vm0, %v1326_v40, %v1327_v18 }
 0x23d   :  { %1087 = vst [vmem:[#allocation2 + $0x219] sm:$0xff] %v937_v20  ;;  %1088 = vst [vmem:[#allocation2 + $0x229] sm:$0xff] %v938_v34  ;;  %v3028_v19 = vld [vmem:[#allocation2 + $0x40] sm:$0x3]  ;;  %v1329_v26 = vrot.slane %v1117_v36, 1  ;;  %v3684_v24 = vrot.slane %v3025_v9, 1  ;;  %8625 = vmatprep.mubr.f32.mxu0 %v1328_v8  ;;  %9134 = vmatprep.mubr.f32.mxu1 %v1328_v8 }
 0x23e   :  { %1089 = vst [vmem:[#allocation2 + $0x231] sm:$0xff] %v939_v32  ;;  %1090 = vst [vmem:[#allocation2 + $0x241] sm:$0xff] %v940_v45  ;;  %v1331_v31 = vrot.slane %v1118_v7, 1  ;;  %v1121_v30 = vld [vmem:[#allocation2 + $0x48] sm:$0xff]  ;;  %v1122_v38 = vld [vmem:[#allocation2 + $0x50] sm:$0xff]  ;;  %v1332_v37 = vrot.slane %v1119_v35, 1 }
 0x23f   :  { %1091 = vst [vmem:[#allocation2 + $0x249] sm:$0xff] %v941_v42  ;;  %1092 = vst [vmem:[#allocation2 + $0x259] sm:$0xff] %v942_v56  ;;  %v1330_v44 = vsel %vm1320_vm0, %v1327_v18, %v1329_v26  ;;  %v3685_v54 = vsel %vm1320_vm0, %v1327_v18, %v3684_v24  ;;  %v1334_v52 = vrot.slane %v1120_v39, 1  ;;  %v3689_v62 = vrot.slane %v3028_v19, 1  ;;  %v4600_v60 = vld [vmem:[#allocation9 + $0x2a0] sm:$0xff]  ;;  %v4601_v6 = vld [vmem:[#allocation9 + $0x2a8] sm:$0xff] }
 0x240   :  { %1093 = vst [vmem:[#allocation2 + $0x261] sm:$0xff] %v943_v13  ;;  %1094 = vst [vmem:[#allocation2 + $0x271] sm:$0xff] %v944_v25  ;;  %8626 = vmatmul.mubr.f32.gmra.mrb[66].mxu0 %v1330_v44  ;;  %9135 = vmatmul.mubr.f32.vlgmr.msra.gmra.mrb[0].mxu1 %v3685_v54  ;;  %v1333_v4 = vsel %vm1320_vm0, %v1331_v31, %v1332_v37  ;;  %v1336_v14 = vrot.slane %v1121_v30, 1  ;;  %v1337_v12 = vrot.slane %v1122_v38, 1  ;;  %v1123_v22 = vld [vmem:[#allocation2 + $0x58] sm:$0x3] }
 0x241   :  { %1095 = vst [vmem:[#allocation2 + $0x279] sm:$0xff] %v945_v17  ;;  %1096 = vst [vmem:[#allocation2 + $0x289] sm:$0xff] %v946_v59  ;;  %v3031_v20 = vld [vmem:[#allocation2 + $0x58] sm:$0x3]  ;;  %8628 = vmatprep.mubr.f32.mxu0 %v1333_v4  ;;  %v1124_v32 = vld [vmem:[#allocation2 + $0x60] sm:$0xff]  ;;  %9137 = vmatprep.mubr.f32.mxu1 %v1333_v4  ;;  %v9942_v42 = vpack.c.bf16 %v4601_v6, %v4600_v60  ;;  %v1335_v56 = vsel %vm1320_vm0, %v1332_v37, %v1334_v52  ;;  %v1339_v2 = vrot.slane %v1123_v22, 1 }
 0x242   :  { %1097 = vst [vmem:[#allocation2 + $0x291] sm:$0xff] %v947_v57  ;;  %1098 = vst [vmem:[#allocation2 + $0x2a1] sm:$0xff] %v948_v49  ;;  %v14619_v34 = vld [vmem:[#allocation27_spill] sm:$0xff]  ;;  %v1125_v45 = vld [vmem:[#allocation2 + $0x68] sm:$0xff]  ;;  %v3690_v53 = vsel %vm1320_vm0, %v1332_v37, %v3689_v62  ;;  %v3694_v0 = vrot.slane %v3031_v20, 1  ;;  %v1338_v25 = vsel %vm1320_vm0, %v1336_v14, %v1337_v12  ;;  %v1341_v21 = vrot.slane %v1124_v32, 1 }
 0x243   :  { %1099 = vst [vmem:[#allocation2 + $0x2a9] sm:$0xff] %v949_v11  ;;  %1100 = vst [vmem:[#allocation2 + $0x2b9] sm:$0xff] %v950_v23  ;;  %9937 = vmatpush3.bf16.msra.mxu1 %v14619_v34  ;;  %v4602_v13 = vld [vmem:[#allocation9 + $0x2b0] sm:$0xff]  ;;  %v4603_v10 = vld [vmem:[#allocation9 + $0x2b8] sm:$0xff]  ;;  %v1342_v17 = vrot.slane %v1125_v45, 1  ;;  %v1340_v49 = vsel %vm1320_vm0, %v1337_v12, %v1339_v2 }
 0x244   :  { %1101 = vst [vmem:[#allocation2 + $0x2c1] sm:$0xff] %v951_v33  ;;  %1102 = vst [vmem:[#allocation2 + $0x2d1] sm:$0xff] %v952_v58  ;;  %9939 = vmatprep.subr.bf16.mxu1 %v9938_v46  ;;  %8629 = vmatmul.mubr.f32.gmra.mrb[68].mxu0 %v1335_v56  ;;  %v1126_v43 = vld [vmem:[#allocation2 + $0x70] sm:$0x3]  ;;  %v1127_v36 = vld [vmem:[#allocation2 + $0x78] sm:$0xff]  ;;  %v9946_v57 = vpack.c.bf16 %v4603_v10, %v4602_v13  ;;  %v3695_v11 = vsel %vm1320_vm0, %v1337_v12, %v3694_v0 }
 0x245   :  { %1103 = vst [vmem:[#allocation2 + $0x2d9] sm:$0xff] %v953_v48  ;;  %1104 = vst [vmem:[#allocation2 + $0x2e9] sm:$0xff] %v954_v16  ;;  %9138 = vmatmul.mubr.f32.gmra.mrb[2].mxu1 %v3690_v53  ;;  %v3034_v59 = vld [vmem:[#allocation2 + $0x70] sm:$0x3]  ;;  %8631 = vmatprep.mubr.f32.mxu0 %v1338_v25  ;;  %v1128_v1 = vld [vmem:[#allocation2 + $0x80] sm:$0xff]  ;;  %v1344_v23 = vrot.slane %v1126_v43, 1  ;;  %v1343_v33 = vsel %vm1320_vm0, %v1341_v21, %v1342_v17 }
 0x246   :  { %1105 = vst [vmem:[#allocation2 + $0x2f1] sm:$0xff] %v955_v15  ;;  %1106 = vst [vmem:[#allocation2 + $0x301] sm:$0xff] %v956_v50  ;;  %9140 = vmatprep.mubr.f32.mxu1 %v1338_v25  ;;  %v3699_v9 = vrot.slane %v3034_v59, 1  ;;  %v4604_v61 = vld [vmem:[#allocation9 + $0x2c0] sm:$0xff]  ;;  %v4605_v3 = vld [vmem:[#allocation9 + $0x2c8] sm:$0xff]  ;;  %v1346_v58 = vrot.slane %v1127_v36, 1 }
 0x247   :  { %1107 = vst [vmem:[#allocation2 + $0x309] sm:$0xff] %v957_v55  ;;  %1108 = vst [vmem:[#allocation2 + $0x319] sm:$0xff] %v958_v5  ;;  %9941 = vmatpush3.bf16.msra.mxu1 %v9938_v46  ;;  %v1347_v48 = vrot.slane %v1128_v1, 1  ;;  %v1129_v16 = vld [vmem:[#allocation2 + $0x88] sm:$0x3]  ;;  %v1130_v35 = vld [vmem:[#allocation2 + $0x90] sm:$0xff]  ;;  %v9950_v15 = vpack.c.bf16 %v4605_v3, %v4604_v61  ;;  %v1345_v29 = vsel %vm1320_vm0, %v1342_v17, %v1344_v23 }
 0x248   :  { %1109 = vst [vmem:[#allocation2 + $0x321] sm:$0xff] %v959_v28  ;;  %1111 = vst [vmem:[#allocation2 + $0x339] sm:$0xff] %v961_v41  ;;  %9943 = vmatprep.subr.bf16.mxu1 %v9942_v42  ;;  %8632 = vmatmul.mubr.f32.gmra.mrb[70].mxu0 %v1340_v49  ;;  %v3037_v7 = vld [vmem:[#allocation2 + $0x88] sm:$0x3]  ;;  %v1131_v27 = vld [vmem:[#allocation2 + $0x98] sm:$0xff]  ;;  %v3700_v50 = vsel %vm1320_vm0, %v1342_v17, %v3699_v9  ;;  %v1349_v47 = vrot.slane %v1129_v16, 1 }
 0x249   :  { %9141 = vmatmul.mubr.f32.gmra.mrb[4].mxu1 %v3695_v11  ;;  %8634 = vmatprep.mubr.f32.mxu0 %v1343_v33  ;;  %v3704_v55 = vrot.slane %v3037_v7, 1  ;;  %v1348_v63 = vsel %vm1320_vm0, %v1346_v58, %v1347_v48  ;;  %v1351_v5 = vrot.slane %v1130_v35, 1  ;;  %v1352_v39 = vrot.slane %v1131_v27, 1  ;;  %v1132_v51 = vld [vmem:[#allocation2 + $0xa0] sm:$0x3]  ;;  %v1133_v41 = vld [vmem:[#allocation2 + $0xa8] sm:$0xff] }
 0x24a   :  { %9143 = vmatprep.mubr.f32.mxu1 %v1343_v33  ;;  %v3040_v28 = vld [vmem:[#allocation2 + $0xa0] sm:$0x3]  ;;  %v1134_v40 = vld [vmem:[#allocation2 + $0xb0] sm:$0xff]  ;;  %v1350_v18 = vsel %vm1320_vm0, %v1347_v48, %v1349_v47  ;;  %v1354_v26 = vrot.slane %v1132_v51, 1  ;;  %v1356_v30 = vrot.slane %v1133_v41, 1  ;;  %v1137_v44 = vld [vmem:[#allocation2 + $0xc8] sm:$0xff] }
 0x24b   :  { %9945 = vmatpush3.bf16.msra.mxu1 %v9942_v42  ;;  %v3705_v19 = vsel %vm1320_vm0, %v1347_v48, %v3704_v55  ;;  %v3709_v24 = vrot.slane %v3040_v28, 1  ;;  %v1353_v31 = vsel %vm1320_vm0, %v1351_v5, %v1352_v39  ;;  %v1357_v38 = vrot.slane %v1134_v40, 1  ;;  %v1135_v8 = vld [vmem:[#allocation2 + $0xb8] sm:$0x3]  ;;  %v1136_v46 = vld [vmem:[#allocation2 + $0xc0] sm:$0xff]  ;;  %v1142_v25 = vld [vmem:[#allocation2 + $0xf0] sm:$0xff] }
 0x24c   :  { %9947 = vmatprep.subr.bf16.mxu1 %v9946_v57  ;;  %8635 = vmatmul.mubr.f32.gmra.mrb[72].mxu0 %v1345_v29  ;;  %v3043_v37 = vld [vmem:[#allocation2 + $0xb8] sm:$0x3]  ;;  %v1355_v54 = vsel %vm1320_vm0, %v1352_v39, %v1354_v26  ;;  %v1359_v62 = vrot.slane %v1135_v8, 1  ;;  %v1361_v4 = vrot.slane %v1136_v46, 1  ;;  %v1362_v14 = vrot.slane %v1137_v44, 1  ;;  %v1140_v34 = vld [vmem:[#allocation2 + $0xe0] sm:$0xff] }
 0x24d   :  { %9144 = vmatmul.mubr.f32.gmra.mrb[6].mxu1 %v3700_v50  ;;  %8637 = vmatprep.mubr.f32.mxu0 %v1348_v63  ;;  %v3710_v52 = vsel %vm1320_vm0, %v1352_v39, %v3709_v24  ;;  %v3714_v60 = vrot.slane %v3043_v37, 1  ;;  %v1358_v6 = vsel %vm1320_vm0, %v1356_v30, %v1357_v38  ;;  %v1138_v12 = vld [vmem:[#allocation2 + $0xd0] sm:$0x3]  ;;  %v1139_v20 = vld [vmem:[#allocation2 + $0xd8] sm:$0xff]  ;;  %v1141_v53 = vld [vmem:[#allocation2 + $0xe8] sm:$0x3] }
 0x24e   :  { %9146 = vmatprep.mubr.f32.mxu1 %v1348_v63  ;;  %v3046_v22 = vld [vmem:[#allocation2 + $0xd0] sm:$0x3]  ;;  %v1360_v32 = vsel %vm1320_vm0, %v1357_v38, %v1359_v62  ;;  %v1364_v42 = vrot.slane %v1138_v12, 1  ;;  %v1363_v2 = vsel %vm1320_vm0, %v1361_v4, %v1362_v14  ;;  %v1366_v0 = vrot.slane %v1139_v20, 1  ;;  %v3049_v10 = vld [vmem:[#allocation2 + $0xe8] sm:$0x3] }
 0x24f   :  { %9949 = vmatpush3.bf16.msra.mxu1 %v9946_v57  ;;  %v3715_v45 = vsel %vm1320_vm0, %v1357_v38, %v3714_v60  ;;  %v3719_v56 = vrot.slane %v3046_v22, 1  ;;  %v1367_v13 = vrot.slane %v1140_v34, 1  ;;  %v1143_v21 = vld [vmem:[#allocation2 + $0xf8] sm:$0xff]  ;;  %v1369_v17 = vrot.slane %v1141_v53, 1  ;;  %v4606_v1 = vld [vmem:[#allocation9 + $0x2d0] sm:$0xff]  ;;  %v1145_v3 = vld [vmem:[#allocation2 + $0x108] sm:$0xff] }
 0x250   :  { %9951 = vmatprep.subr.bf16.mxu1 %v9950_v15  ;;  %8638 = vmatmul.mubr.f32.gmra.mrb[74].mxu0 %v1350_v18  ;;  %v1365_v43 = vsel %vm1320_vm0, %v1362_v14, %v1364_v42  ;;  %v3724_v36 = vrot.slane %v3049_v10, 1  ;;  %v4607_v57 = vld [vmem:[#allocation9 + $0x2d8] sm:$0xff]  ;;  %v1371_v11 = vrot.slane %v1142_v25, 1  ;;  %v1372_v23 = vrot.slane %v1143_v21, 1  ;;  %v1144_v9 = vld [vmem:[#allocation2 + $0x100] sm:$0x3] }
 0x251   :  { %9147 = vmatmul.mubr.f32.gmra.mrb[8].mxu1 %v3705_v19  ;;  %8640 = vmatprep.mubr.f32.mxu0 %v1353_v31  ;;  %v3720_v59 = vsel %vm1320_vm0, %v1362_v14, %v3719_v56  ;;  %v1368_v49 = vsel %vm1320_vm0, %v1366_v0, %v1367_v13  ;;  %v3052_v61 = vld [vmem:[#allocation2 + $0x100] sm:$0x3]  ;;  %v1146_v33 = vld [vmem:[#allocation2 + $0x110] sm:$0xff]  ;;  %v1370_v58 = vsel %vm1320_vm0, %v1367_v13, %v1369_v17  ;;  %v1374_v16 = vrot.slane %v1144_v9, 1  ;;  %v1147_v35 = vld [vmem:[#allocation2 + $0x118] sm:$0x3] }
 0x252   :  { %9149 = vmatprep.mubr.f32.mxu1 %v1353_v31  ;;  %v3725_v48 = vsel %vm1320_vm0, %v1367_v13, %v3724_v36  ;;  %v3729_v7 = vrot.slane %v3052_v61, 1  ;;  %v9954_v27 = vpack.c.bf16 %v4607_v57, %v4606_v1  ;;  %v1376_v29 = vrot.slane %v1145_v3, 1  ;;  %v3055_v47 = vld [vmem:[#allocation2 + $0x118] sm:$0x3]  ;;  %v1148_v55 = vld [vmem:[#allocation2 + $0x120] sm:$0xff]  ;;  %v1149_v63 = vld [vmem:[#allocation2 + $0x128] sm:$0xff] }
 0x253   :  { %9953 = vmatpush3.bf16.msra.mxu1 %v9950_v15  ;;  %v1373_v15 = vsel %vm1320_vm0, %v1371_v11, %v1372_v23  ;;  %v1377_v50 = vrot.slane %v1146_v33, 1  ;;  %v1379_v5 = vrot.slane %v1147_v35, 1  ;;  %v1208_v39 = vld [vmem:[#allocation9] sm:$0xff]  ;;  %v1209_v51 = vld [vmem:[#allocation9 + $0x8] sm:$0xff]  ;;  %v1375_v41 = vsel %vm1320_vm0, %v1372_v23, %v1374_v16  ;;  %v1210_v26 = vld [vmem:[#allocation9 + $0x10] sm:$0xff] }
 0x254   :  { %8641 = vmatmul.mubr.f32.gmra.mrb[76].mxu0 %v1355_v54  ;;  %9955 = vmatprep.subr.bf16.mxu1 %v9954_v27  ;;  %v4608_v28 = vld [vmem:[#allocation9 + $0x2e0] sm:$0xff]  ;;  %v3730_v40 = vsel %vm1320_vm0, %v1372_v23, %v3729_v7  ;;  %v3734_v18 = vrot.slane %v3055_v47, 1  ;;  %v4609_v19 = vld [vmem:[#allocation9 + $0x2e8] sm:$0xff]  ;;  %v1211_v24 = vld [vmem:[#allocation9 + $0x18] sm:$0xff]  ;;  %v1381_v30 = vrot.slane %v1148_v55, 1  ;;  %v1382_v38 = vrot.slane %v1149_v63, 1 }
 0x255   :  { %9150 = vmatmul.mubr.f32.gmra.mrb[10].mxu1 %v3710_v52  ;;  %8643 = vmatprep.mubr.f32.mxu0 %v1358_v6  ;;  %v1378_v31 = vsel %vm1320_vm0, %v1376_v29, %v1377_v50  ;;  %v1150_v8 = vld [vmem:[#allocation2 + $0x130] sm:$0x3]  ;;  %v1151_v46 = vld [vmem:[#allocation2 + $0x138] sm:$0xff]  ;;  %v1152_v44 = vld [vmem:[#allocation2 + $0x140] sm:$0xff]  ;;  %v9806_v54 = vpack.c.bf16 %v1209_v51, %v1208_v39  ;;  %v1380_v52 = vsel %vm1320_vm0, %v1377_v50, %v1379_v5 }
 0x256   :  { %9152 = vmatprep.mubr.f32.mxu1 %v1358_v6  ;;  %v3058_v37 = vld [vmem:[#allocation2 + $0x130] sm:$0x3]  ;;  %v9958_v62 = vpack.c.bf16 %v4609_v19, %v4608_v28  ;;  %v3735_v60 = vsel %vm1320_vm0, %v1377_v50, %v3734_v18  ;;  %v1384_v6 = vrot.slane %v1150_v8, 1  ;;  %v1153_v14 = vld [vmem:[#allocation2 + $0x148] sm:$0x3]  ;;  %v9810_v12 = vpack.c.bf16 %v1211_v24, %v1210_v26  ;;  %v1155_v53 = vld [vmem:[#allocation2 + $0x158] sm:$0xff] }
 0x257   :  { %9957 = vmatpush3.bf16.msra.mxu1 %v9954_v27  ;;  %v3739_v4 = vrot.slane %v3058_v37, 1  ;;  %9807 = vmatprep.subr.bf16.mxu0 %v9806_v54  ;;  %v1383_v22 = vsel %vm1320_vm0, %v1381_v30, %v1382_v38  ;;  %v1386_v20 = vrot.slane %v1151_v46, 1  ;;  %v1387_v34 = vrot.slane %v1152_v44, 1  ;;  %v1213_v42 = vld [vmem:[#allocation9 + $0x28] sm:$0xff]  ;;  %v1154_v56 = vld [vmem:[#allocation2 + $0x150] sm:$0xff]  ;;  %v4611_v11 = vld [vmem:[#allocation9 + $0x2f8] sm:$0xff] }
 0x258   :  { %8644 = vmatmul.mubr.f32.gmra.mrb[78].mxu0 %v1360_v32  ;;  %v3061_v32 = vld [vmem:[#allocation2 + $0x148] sm:$0x3]  ;;  %9959 = vmatprep.subr.bf16.mxu1 %v9958_v62  ;;  %v1385_v0 = vsel %vm1320_vm0, %v1382_v38, %v1384_v6  ;;  %v1156_v25 = vld [vmem:[#allocation2 + $0x160] sm:$0x3]  ;;  %v1214_v17 = vld [vmem:[#allocation9 + $0x30] sm:$0xff]  ;;  %v1391_v36 = vrot.slane %v1154_v56, 1 }
 0x259   :  { %9153 = vmatmul.mubr.f32.gmra.mrb[12].mxu1 %v3715_v45  ;;  %8646 = vmatprep.mubr.f32.mxu0 %v1363_v2  ;;  %v1212_v45 = vld [vmem:[#allocation9 + $0x20] sm:$0xff]  ;;  %v3740_v13 = vsel %vm1320_vm0, %v1382_v38, %v3739_v4  ;;  %v3744_v10 = vrot.slane %v3061_v32, 1  ;;  %v1392_v1 = vrot.slane %v1155_v53, 1  ;;  %v1157_v23 = vld [vmem:[#allocation2 + $0x168] sm:$0xff]  ;;  %v1158_v9 = vld [vmem:[#allocation2 + $0x170] sm:$0xff]  ;;  %v1394_v3 = vrot.slane %v1156_v25, 1 }
 0x25a   :  { %9155 = vmatprep.mubr.f32.mxu1 %v1363_v2  ;;  %v1389_v2 = vrot.slane %v1153_v14, 1  ;;  %9809 = vmatpush3.bf16.msra.mxu0 %v9806_v54  ;;  %v9814_v21 = vpack.c.bf16 %v1213_v42, %v1212_v45  ;;  %v3064_v57 = vld [vmem:[#allocation2 + $0x160] sm:$0x3]  ;;  %v1217_v35 = vld [vmem:[#allocation9 + $0x48] sm:$0xff]  ;;  %v1396_v29 = vrot.slane %v1157_v23, 1  ;;  %v1397_v50 = vrot.slane %v1158_v9, 1 }
 0x25b   :  { %9811 = vmatprep.subr.bf16.mxu0 %v9810_v12  ;;  %9961 = vmatpush3.bf16.msra.mxu1 %v9958_v62  ;;  %v3745_v33 = vsel %vm1320_vm0, %v1387_v34, %v3744_v10  ;;  %v1216_v7 = vld [vmem:[#allocation9 + $0x40] sm:$0xff]  ;;  %v1159_v47 = vld [vmem:[#allocation2 + $0x178] sm:$0x3]  ;;  %v12084_v5 = vld [vmem:[#allocation2 + $0x188] sm:$0xff]  ;;  %v1395_v39 = vsel %vm1320_vm0, %v1392_v1, %v1394_v3 }
 0x25c   :  { %8647 = vmatmul.mubr.f32.gmra.mrb[80].mxu0 %v1365_v43  ;;  %v1215_v43 = vld [vmem:[#allocation9 + $0x38] sm:$0xff]  ;;  %v1390_v61 = vsel %vm1320_vm0, %v1387_v34, %v1389_v2  ;;  %v12082_v63 = vld [vmem:[#allocation2 + $0x180] sm:$0xff]  ;;  %v9822_v19 = vpack.c.bf16 %v1217_v35, %v1216_v7  ;;  %v5160_v24 = vld [vmem:[#allocation9 + $0x308] sm:$0xff]  ;;  %v3757_v38 = vrot.slane %v12084_v5, 1 }
 0x25d   :  { %9156 = vmatmul.mubr.f32.gmra.mrb[14].mxu1 %v3720_v59  ;;  %8649 = vmatprep.mubr.f32.mxu0 %v1368_v49  ;;  %v1388_v59 = vsel %vm1320_vm0, %v1386_v20, %v1387_v34  ;;  %v9818_v16 = vpack.c.bf16 %v1215_v43, %v1214_v17  ;;  %v12080_v55 = vld [vmem:[#allocation2 + $0x178] sm:$0x3]  ;;  %v1162_v28 = vld [vmem:[#allocation2 + $0x1c0] sm:$0x3]  ;;  %v3756_v30 = vrot.slane %v12082_v63, 1  ;;  %v1218_v37 = vld [vmem:[#allocation9 + $0x50] sm:$0xff] }
 0x25e   :  { %9158 = vmatprep.mubr.f32.mxu1 %v1368_v49  ;;  %v4610_v49 = vld [vmem:[#allocation9 + $0x2f0] sm:$0xff]  ;;  %9813 = vmatpush3.bf16.msra.mxu0 %v9810_v12  ;;  %v3754_v18 = vrot.slane %v12080_v55, 1  ;;  %v5159_v26 = vld [vmem:[#allocation9 + $0x300] sm:$0xff]  ;;  %v1219_v46 = vld [vmem:[#allocation9 + $0x58] sm:$0xff]  ;;  %v1404_v44 = vrot.slane %v1162_v28, 1 }
 0x25f   :  { %9815 = vmatprep.subr.bf16.mxu0 %v9814_v21  ;;  %v9962_v27 = vpack.c.bf16 %v4611_v11, %v4610_v49  ;;  %v12092_v8 = vld [vmem:[#allocation2 + $0x190] sm:$0x3]  ;;  %v12094_v54 = vld [vmem:[#allocation2 + $0x1c8] sm:$0xff]  ;;  %v14620_v62 = vld [vmem:[#allocation24_spill] sm:$0xff]  ;;  %v12100_v6 = vpack.c.bf16 %v5160_v24, %v5159_v26  ;;  %v3758_v32 = vsel %vm1320_vm0, %v3756_v30, %v3757_v38 }
 0x260   :  { %8650 = vmatmul.mubr.f32.gmra.mrb[82].mxu0 %v1370_v58  ;;  %v3749_v58 = vrot.slane %v3064_v57, 1  ;;  %v3755_v14 = vsel %vm1320_vm0, %v1397_v50, %v3754_v18  ;;  %v3759_v12 = vrot.slane %v12092_v8, 1  ;;  %v1220_v20 = vld [vmem:[#allocation9 + $0x60] sm:$0xff]  ;;  %v1221_v34 = vld [vmem:[#allocation9 + $0x68] sm:$0xff]  ;;  %v1406_v45 = vrot.slane %v12094_v54, 1  ;;  %v1222_v49 = vld [vmem:[#allocation9 + $0x70] sm:$0xff] }
 0x261   :  { %9159 = vmatmul.mubr.f32.gmra.mrb[16].mxu1 %v3725_v48  ;;  %8652 = vmatprep.mubr.f32.mxu0 %v1373_v15  ;;  %v1160_v48 = vld [vmem:[#allocation2 + $0x1b0] sm:$0xff]  ;;  %v1165_v56 = vld [vmem:[#allocation2 + $0x1d8] sm:$0x3]  ;;  %v1405_v2 = vsel %vm1320_vm0, %v14620_v62, %v1404_v44  ;;  %v9830_v43 = vpack.c.bf16 %v1221_v34, %v1220_v20  ;;  %v12126_v9 = vld [vmem:[#allocation2 + $0x200] sm:$0xff] }
 0x262   :  { %9161 = vmatprep.mubr.f32.mxu1 %v1373_v15  ;;  %v1393_v15 = vsel %vm1320_vm0, %v1391_v36, %v1392_v1  ;;  %v1401_v51 = vrot.slane %v1160_v48, 1  ;;  %9817 = vmatpush3.bf16.msra.mxu0 %v9814_v21  ;;  %v12108_v53 = vld [vmem:[#allocation2 + $0x1d8] sm:$0x3]  ;;  %v3760_v10 = vsel %vm1320_vm0, %v3757_v38, %v3759_v12  ;;  %v1409_v25 = vrot.slane %v1165_v56, 1  ;;  %v1168_v17 = vld [vmem:[#allocation2 + $0x1f0] sm:$0x3] }
 0x263   :  { %9963 = vmatprep.subr.bf16.mxu1 %v9962_v27  ;;  %9819 = vmatprep.subr.bf16.mxu0 %v9818_v16  ;;  %v3764_v21 = vrot.slane %v12108_v53, 1  ;;  %v12122_v57 = vld [vmem:[#allocation2 + $0x1f0] sm:$0x3]  ;;  %v1223_v11 = vld [vmem:[#allocation9 + $0x78] sm:$0xff]  ;;  %v1417_v35 = vrot.slane %v12126_v9, 1  ;;  %v12148_v24 = vld [vmem:[#allocation2 + $0x228] sm:$0xff] }
 0x264   :  { %8653 = vmatmul.mubr.f32.gmra.mrb[84].mxu0 %v1375_v41  ;;  %v3750_v41 = vsel %vm1320_vm0, %v1392_v1, %v3749_v58  ;;  %9965 = vmatpush3.bf16.msra.mxu1 %v9962_v27  ;;  %v12124_v23 = vld [vmem:[#allocation2 + $0x1f8] sm:$0xff]  ;;  %v3769_v58 = vrot.slane %v12122_v57, 1  ;;  %v9834_v48 = vpack.c.bf16 %v1223_v11, %v1222_v49  ;;  %v1171_v27 = vld [vmem:[#allocation2 + $0x208] sm:$0x3]  ;;  %v12146_v26 = vld [vmem:[#allocation2 + $0x220] sm:$0x3] }
 0x265   :  { %9162 = vmatmul.mubr.f32.gmra.mrb[18].mxu1 %v3730_v40  ;;  %8655 = vmatprep.mubr.f32.mxu0 %v1378_v31  ;;  %v1399_v40 = vrot.slane %v1159_v47, 1  ;;  %v1416_v7 = vrot.slane %v12124_v23, 1  ;;  %v12160_v12 = vld [vmem:[#allocation2 + $0x240] sm:$0xff] }
 0x266   :  { %9164 = vmatprep.mubr.f32.mxu1 %v1378_v31  ;;  %v1398_v31 = vsel %vm1320_vm0, %v1396_v29, %v1397_v50  ;;  %9821 = vmatpush3.bf16.msra.mxu0 %v9818_v16  ;;  %v12136_v29 = vld [vmem:[#allocation2 + $0x210] sm:$0xff]  ;;  %v1431_v56 = vrot.slane %v12160_v12, 1 }
 0x267   :  { %v1400_v4 = vsel %vm1320_vm0, %v1397_v50, %v1399_v40  ;;  %9823 = vmatprep.subr.bf16.mxu0 %v9822_v19  ;;  %9967 = vmatprep.subr.bf16.mxu1 %v12100_v6  ;;  %v12138_v50 = vld [vmem:[#allocation2 + $0x218] sm:$0xff]  ;;  %v1421_v40 = vrot.slane %v12136_v29, 1 }
 0x268   :  { %8656 = vmatmul.mubr.f32.gmra.mrb[86].mxu0 %v1380_v52  ;;  %v12096_v52 = vld [vmem:[#allocation2 + $0x1d0] sm:$0xff]  ;;  %v1422_v18 = vrot.slane %v12138_v50, 1 }
 0x269   :  { %9165 = vmatmul.mubr.f32.gmra.mrb[20].mxu1 %v3735_v60  ;;  %8658 = vmatprep.mubr.f32.mxu0 %v1383_v22  ;;  %v1403_v60 = vsel %vm1320_vm0, %v1401_v51, %v14620_v62  ;;  %v1407_v42 = vrot.slane %v12096_v52, 1  ;;  %v1419_v51 = vrot.slane %v1171_v27, 1  ;;  %v1426_v62 = vrot.slane %v12148_v24, 1 }
 0x26a   :  { %9167 = vmatprep.mubr.f32.mxu1 %v1383_v22  ;;  %v9826_v22 = vpack.c.bf16 %v1219_v46, %v1218_v37  ;;  %9825 = vmatpush3.bf16.msra.mxu0 %v9822_v19  ;;  %v1174_v19 = vld [vmem:[#allocation2 + $0x220] sm:$0x3]  ;;  %v3779_v46 = vrot.slane %v12146_v26, 1  ;;  %v1423_v44 = vsel %vm1320_vm0, %v1421_v40, %v1422_v18  ;;  %v12196_v40 = vld [vmem:[#allocation2 + $0x288] sm:$0xff] }
 0x26b   :  { %v1410_v3 = vsel %vm1320_vm0, %v1407_v42, %v1409_v25  ;;  %v1420_v30 = vsel %vm1320_vm0, %v1417_v35, %v1419_v51  ;;  %v1424_v37 = vrot.slane %v1174_v19, 1  ;;  %v12170_v25 = vld [vmem:[#allocation2 + $0x250] sm:$0x3] }
 0x26c   :  { %8659 = vmatmul.mubr.f32.gmra.mrb[88].mxu0 %v1385_v0  ;;  %v12112_v0 = vld [vmem:[#allocation2 + $0x1e0] sm:$0xff]  ;;  %9827 = vmatprep.subr.bf16.mxu0 %v9826_v22  ;;  %v3780_v34 = vsel %vm1320_vm0, %v1422_v18, %v3779_v46 }
 0x26d   :  { %9168 = vmatmul.mubr.f32.gmra.mrb[22].mxu1 %v3740_v13  ;;  %8661 = vmatprep.mubr.f32.mxu0 %v1388_v59  ;;  %v12114_v13 = vld [vmem:[#allocation2 + $0x1e8] sm:$0xff]  ;;  %v1411_v36 = vrot.slane %v12112_v0, 1  ;;  %v1425_v20 = vsel %vm1320_vm0, %v1422_v18, %v1424_v37  ;;  %v12198_v18 = vld [vmem:[#allocation2 + $0x290] sm:$0xff] }
 0x26e   :  { %9170 = vmatprep.mubr.f32.mxu1 %v1388_v59  ;;  %v1408_v59 = vsel %vm1320_vm0, %v1406_v45, %v1407_v42  ;;  %v1412_v1 = vrot.slane %v12114_v13, 1  ;;  %9829 = vmatpush3.bf16.msra.mxu0 %v9826_v22  ;;  %v12162_v22 = vld [vmem:[#allocation2 + $0x248] sm:$0xff] }
 0x26f   :  { %9831 = vmatprep.subr.bf16.mxu0 %v9830_v43 }
 0x270   :  { %8662 = vmatmul.mubr.f32.gmra.mrb[90].mxu0 %v1390_v61  ;;  %v1414_v61 = vrot.slane %v1168_v17, 1  ;;  %v1413_v16 = vsel %vm1320_vm0, %v1411_v36, %v1412_v1  ;;  %v12174_v17 = vld [vmem:[#allocation2 + $0x260] sm:$0xff] }
 0x271   :  { %9171 = vmatmul.mubr.f32.gmra.mrb[24].mxu1 %v3745_v33  ;;  %8664 = vmatprep.mubr.f32.mxu0 %v1393_v15  ;;  %v3765_v33 = vsel %vm1320_vm0, %v1407_v42, %v3764_v21  ;;  %v12172_v21 = vld [vmem:[#allocation2 + $0x258] sm:$0xff] }
 0x272   :  { %9173 = vmatprep.mubr.f32.mxu1 %v1393_v15  ;;  %v12134_v15 = vld [vmem:[#allocation2 + $0x208] sm:$0x3]  ;;  %9833 = vmatpush3.bf16.msra.mxu0 %v9830_v43  ;;  %v1415_v47 = vsel %vm1320_vm0, %v1412_v1, %v1414_v61  ;;  %v1436_v11 = vrot.slane %v12172_v21, 1  ;;  %v1437_v61 = vrot.slane %v12174_v17, 1 }
 0x273   :  { %v3774_v28 = vrot.slane %v12134_v15, 1  ;;  %9835 = vmatprep.subr.bf16.mxu0 %v9834_v48 }
 0x274   :  { %8665 = vmatmul.mubr.f32.gmra.mrb[92].mxu0 %v1395_v39  ;;  %v3770_v39 = vsel %vm1320_vm0, %v1412_v1, %v3769_v58  ;;  %v3789_v1 = vrot.slane %v12170_v25, 1  ;;  %v12184_v58 = vld [vmem:[#allocation2 + $0x270] sm:$0xff] }
 0x275   :  { %9174 = vmatmul.mubr.f32.gmra.mrb[26].mxu1 %v3750_v41  ;;  %8667 = vmatprep.mubr.f32.mxu0 %v1398_v31  ;;  %v1418_v41 = vsel %vm1320_vm0, %v1416_v7, %v1417_v35  ;;  %v3775_v38 = vsel %vm1320_vm0, %v1417_v35, %v3774_v28  ;;  %v1186_v28 = vld [vmem:[#allocation2 + $0x280] sm:$0x3] }
 0x276   :  { %9176 = vmatprep.mubr.f32.mxu1 %v1398_v31  ;;  %v12150_v31 = vld [vmem:[#allocation2 + $0x230] sm:$0xff]  ;;  %9837 = vmatpush3.bf16.msra.mxu0 %v9834_v48  ;;  %v12186_v48 = vld [vmem:[#allocation2 + $0x278] sm:$0xff] }
 0x277   :  { %v1442_v51 = vrot.slane %v12186_v48, 1 }
 0x278   :  { %8668 = vmatmul.mubr.f32.gmra.mrb[94].mxu0 %v1400_v4  ;;  %v1177_v4 = vld [vmem:[#allocation2 + $0x238] sm:$0x3] }
 0x279   :  { %9177 = vmatmul.mubr.f32.gmra.mrb[28].mxu1 %v3755_v14  ;;  %8670 = vmatprep.mubr.f32.mxu0 %v1403_v60  ;;  %v1427_v60 = vrot.slane %v12150_v31, 1  ;;  %v12158_v14 = vld [vmem:[#allocation2 + $0x238] sm:$0x3] }
 0x27a   :  { %9179 = vmatprep.mubr.f32.mxu1 %v3758_v32  ;;  %v1429_v32 = vrot.slane %v1177_v4, 1  ;;  %v3784_v45 = vrot.slane %v12158_v14, 1  ;;  %v12206_v4 = vld [vmem:[#allocation2 + $0x298] sm:$0x3] }
 0x27b   :  { %v1428_v42 = vsel %vm1320_vm0, %v1426_v62, %v1427_v60  ;;  %v1447_v62 = vrot.slane %v12198_v18, 1 }
 0x27c   :  { %8671 = vmatmul.mubr.f32.gmra.mrb[96].mxu0 %v1405_v2  ;;  %v1432_v2 = vrot.slane %v12162_v22, 1  ;;  %v1430_v43 = vsel %vm1320_vm0, %v1427_v60, %v1429_v32 }
 0x27d   :  { %9180 = vmatmul.mubr.f32.gmra.mrb[30].mxu1 %v3760_v10  ;;  %8673 = vmatprep.mubr.f32.mxu0 %v1408_v59  ;;  %v1180_v10 = vld [vmem:[#allocation2 + $0x250] sm:$0x3] }
 0x27e   :  { %9182 = vmatprep.mubr.f32.mxu1 %v1408_v59  ;;  %v3785_v59 = vsel %vm1320_vm0, %v1427_v60, %v3784_v45  ;;  %v1434_v36 = vrot.slane %v1180_v10, 1  ;;  %v1433_v49 = vsel %vm1320_vm0, %v1431_v56, %v1432_v2  ;;  %v3790_v7 = vsel %vm1320_vm0, %v1432_v2, %v3789_v1  ;;  %v1189_v60 = vld [vmem:[#allocation2 + $0x298] sm:$0x3]  ;;  %v2558_v1 = vld [vmem:[#allocation9 + $0x100] sm:$0xff] }
 0x27f   :  { %v3804_v56 = vrot.slane %v12206_v4, 1 }
 0x280   :  { %8674 = vmatmul.mubr.f32.gmra.mrb[98].mxu0 %v1410_v3  ;;  %v1183_v3 = vld [vmem:[#allocation2 + $0x268] sm:$0x3] }
 0x281   :  { %9183 = vmatmul.mubr.f32.gmra.mrb[32].mxu1 %v3765_v33  ;;  %8676 = vmatprep.mubr.f32.mxu0 %v1413_v16  ;;  %v12182_v33 = vld [vmem:[#allocation2 + $0x268] sm:$0x3]  ;;  %v1439_v35 = vrot.slane %v1183_v3, 1 }
 0x282   :  { %9185 = vmatprep.mubr.f32.mxu1 %v1413_v16  ;;  %v1435_v16 = vsel %vm1320_vm0, %v1432_v2, %v1434_v36  ;;  %v3794_v27 = vrot.slane %v12182_v33, 1  ;;  %v1192_v2 = vld [vmem:[#allocation2 + $0x2b0] sm:$0x3] }
 0x283   :  { %v1440_v19 = vsel %vm1320_vm0, %v1437_v61, %v1439_v35  ;;  %v12218_v36 = vld [vmem:[#allocation2 + $0x2b0] sm:$0x3]  ;;  %v1454_v35 = vrot.slane %v1192_v2, 1  ;;  %v12247_v2 = vld [vmem:[#allocation2 + $0x2e8] sm:$0xff] }
 0x284   :  { %8677 = vmatmul.mubr.f32.gmra.mrb[100].mxu0 %v1415_v47  ;;  %v1438_v47 = vsel %vm1320_vm0, %v1436_v11, %v1437_v61  ;;  %v12220_v11 = vld [vmem:[#allocation2 + $0x2b8] sm:$0xff]  ;;  %14623 = vst [vmem:[#allocation37_spill] sm:$0xff] %v12247_v2 }
 0x285   :  { %9186 = vmatmul.mubr.f32.gmra.mrb[34].mxu1 %v3770_v39  ;;  %8679 = vmatprep.mubr.f32.mxu0 %v1418_v41  ;;  %v1441_v39 = vrot.slane %v12184_v58, 1 }
 0x286   :  { %9188 = vmatprep.mubr.f32.mxu1 %v1418_v41  ;;  %v12194_v41 = vld [vmem:[#allocation2 + $0x280] sm:$0x3] }
 0x287   :  { %v3799_v37 = vrot.slane %v12194_v41, 1  ;;  %v1443_v46 = vsel %vm1320_vm0, %v1441_v39, %v1442_v51  ;;  %v1456_v39 = vrot.slane %v12220_v11, 1 }
 0x288   :  { %8680 = vmatmul.mubr.f32.gmra.mrb[102].mxu0 %v1420_v30  ;;  %v3795_v30 = vsel %vm1320_vm0, %v1437_v61, %v3794_v27  ;;  %v12222_v61 = vld [vmem:[#allocation2 + $0x2c0] sm:$0xff]  ;;  %v3809_v27 = vrot.slane %v12218_v36, 1 }
 0x289   :  { %9189 = vmatmul.mubr.f32.gmra.mrb[36].mxu1 %v3775_v38  ;;  %8682 = vmatprep.mubr.f32.mxu0 %v1423_v44  ;;  %v1444_v38 = vrot.slane %v1186_v28, 1  ;;  %v3800_v45 = vsel %vm1320_vm0, %v1442_v51, %v3799_v37  ;;  %v1195_v28 = vld [vmem:[#allocation2 + $0x2c8] sm:$0x3] }
 0x28a   :  { %9191 = vmatprep.mubr.f32.mxu1 %v1423_v44  ;;  %v1446_v44 = vrot.slane %v12196_v40, 1 }
 0x28b   :  { %v1445_v32 = vsel %vm1320_vm0, %v1442_v51, %v1444_v38  ;;  %v1457_v51 = vrot.slane %v12222_v61, 1  ;;  %v12237_v38 = vld [vmem:[#allocation2 + $0x2d8] sm:$0xff] }
 0x28c   :  { %8683 = vmatmul.mubr.f32.gmra.mrb[104].mxu0 %v1425_v20  ;;  %v12208_v20 = vld [vmem:[#allocation2 + $0x2a0] sm:$0xff]  ;;  %v1448_v10 = vsel %vm1320_vm0, %v1446_v44, %v1447_v62  ;;  %14621 = vst [vmem:[#allocation35_spill] sm:$0xff] %v12237_v38  ;;  %v1459_v44 = vrot.slane %v1195_v28, 1  ;;  %v12261_v28 = vld [vmem:[#allocation2 + $0x308] sm:$0xff] }
 0x28d   :  { %9192 = vmatmul.mubr.f32.gmra.mrb[38].mxu1 %v3780_v34  ;;  %8685 = vmatprep.mubr.f32.mxu0 %v1428_v42  ;;  %v12210_v34 = vld [vmem:[#allocation2 + $0x2a8] sm:$0xff]  ;;  %14627 = vst [vmem:[#allocation41_spill] sm:$0xff] %v12261_v28 }
 0x28e   :  { %9194 = vmatprep.mubr.f32.mxu1 %v1428_v42  ;;  %v1449_v42 = vrot.slane %v1189_v60, 1  ;;  %v1458_v60 = vsel %vm1320_vm0, %v1456_v39, %v1457_v51  ;;  %v12259_v39 = vld [vmem:[#allocation2 + $0x300] sm:$0xff] }
 0x28f   :  { %14626 = vst [vmem:[#allocation38_spill] sm:$0xff] %v12259_v39 }
 0x290   :  { %8686 = vmatmul.mubr.f32.gmra.mrb[106].mxu0 %v1430_v43  ;;  %v1451_v43 = vrot.slane %v12208_v20, 1 }
 0x291   :  { %9195 = vmatmul.mubr.f32.gmra.mrb[40].mxu1 %v3785_v59  ;;  %8688 = vmatprep.mubr.f32.mxu0 %v1433_v49  ;;  %v1452_v59 = vrot.slane %v12210_v34, 1 }
 0x292   :  { %9197 = vmatprep.mubr.f32.mxu1 %v1433_v49  ;;  %v2559_v49 = vld [vmem:[#allocation9 + $0x108] sm:$0xff] }
 0x293   :  { %v12224_v3 = vpack.c.bf16 %v2559_v49, %v2558_v1  ;;  %v1455_v37 = vsel %vm1320_vm0, %v1452_v59, %v1454_v35 }
 0x294   :  { %8689 = vmatmul.mubr.f32.gmra.mrb[108].mxu0 %v1435_v16  ;;  %v1450_v16 = vsel %vm1320_vm0, %v1447_v62, %v1449_v42  ;;  %v1198_v42 = vld [vmem:[#allocation2 + $0x2e0] sm:$0x3] }
 0x295   :  { %9198 = vmatmul.mubr.f32.gmra.mrb[42].mxu1 %v3790_v7  ;;  %8691 = vmatprep.mubr.f32.mxu0 %v1438_v47  ;;  %v3805_v7 = vsel %vm1320_vm0, %v1447_v62, %v3804_v56  ;;  %v12245_v56 = vld [vmem:[#allocation2 + $0x2e0] sm:$0x3]  ;;  %v1464_v1 = vrot.slane %v1198_v42, 1  ;;  %v1204_v42 = vld [vmem:[#allocation2 + $0x310] sm:$0x3] }
 0x296   :  { %9200 = vmatprep.mubr.f32.mxu1 %v1438_v47  ;;  %9839 = vmatprep.subr.bf16.mxu0 %v12224_v3  ;;  %v1453_v47 = vsel %vm1320_vm0, %v1451_v43, %v1452_v59  ;;  %14622 = vst [vmem:[#allocation34_spill] sm:$0xff] %v12245_v56  ;;  %v1460_v43 = vsel %vm1320_vm0, %v1457_v51, %v1459_v44  ;;  %v3819_v49 = vrot.slane %v12245_v56, 1  ;;  %v5164_v56 = vld [vmem:[#allocation9 + $0x328] sm:$0xff] }
 0x298   :  { %8692 = vmatmul.mubr.f32.gmra.mrb[110].mxu0 %v1440_v19  ;;  %v12233_v19 = vld [vmem:[#allocation2 + $0x2c8] sm:$0x3] }
 0x299   :  { %9201 = vmatmul.mubr.f32.gmra.mrb[44].mxu1 %v3795_v30  ;;  %8694 = vmatprep.mubr.f32.mxu0 %v1443_v46  ;;  %v12235_v30 = vld [vmem:[#allocation2 + $0x2d0] sm:$0xff]  ;;  %v3814_v62 = vrot.slane %v12233_v19, 1 }
 0x29a   :  { %9203 = vmatprep.mubr.f32.mxu1 %v1443_v46  ;;  %v3810_v46 = vsel %vm1320_vm0, %v1452_v59, %v3809_v27  ;;  %v1201_v27 = vld [vmem:[#allocation2 + $0x2f8] sm:$0x3] }
 0x29b   :  { %v3815_v59 = vsel %vm1320_vm0, %v1457_v51, %v3814_v62 }
 0x29c   :  { %8695 = vmatmul.mubr.f32.gmra.mrb[112].mxu0 %v1445_v32  ;;  %v1461_v32 = vrot.slane %v12235_v30, 1 }
 0x29d   :  { %9204 = vmatmul.mubr.f32.gmra.mrb[46].mxu1 %v3800_v45  ;;  %8697 = vmatprep.mubr.f32.mxu0 %v1448_v10  ;;  %v1462_v45 = vrot.slane %v12237_v38, 1 }
 0x29e   :  { %9206 = vmatprep.mubr.f32.mxu1 %v1448_v10  ;;  %v12249_v10 = vld [vmem:[#allocation2 + $0x2f0] sm:$0xff] }
 0x29f   :  { %14624 = vst [vmem:[#allocation36_spill] sm:$0xff] %v12249_v10  ;;  %v1467_v35 = vrot.slane %v12249_v10, 1  ;;  %v1465_v51 = vsel %vm1320_vm0, %v1462_v45, %v1464_v1  ;;  %v12273_v1 = vld [vmem:[#allocation2 + $0x320] sm:$0xff] }
 0x2a0   :  { %8698 = vmatmul.mubr.f32.gmra.mrb[114].mxu0 %v1450_v16  ;;  %v1463_v16 = vsel %vm1320_vm0, %v1461_v32, %v1462_v45  ;;  %v1472_v32 = vrot.slane %v12261_v28, 1  ;;  %14630 = vst [vmem:[#allocation16_spill] sm:$0xff] %v12273_v1  ;;  %v12281_v28 = vld [vmem:[#allocation2 + $0x328] sm:$0x3] }
 0x2a1   :  { %9207 = vmatmul.mubr.f32.gmra.mrb[48].mxu1 %v3805_v7  ;;  %8700 = vmatprep.mubr.f32.mxu0 %v1453_v47  ;;  %v1466_v7 = vrot.slane %v12247_v2, 1  ;;  %14631 = vst [vmem:[#allocation19_spill] sm:$0xff] %v12281_v28  ;;  %v5163_v2 = vld [vmem:[#allocation9 + $0x320] sm:$0xff] }
 0x2a2   :  { %9209 = vmatprep.mubr.f32.mxu1 %v1453_v47  ;;  %v12257_v47 = vld [vmem:[#allocation2 + $0x2f8] sm:$0x3] }
 0x2a3   :  { %14625 = vst [vmem:[#allocation39_spill] sm:$0xff] %v12257_v47  ;;  %v3824_v44 = vrot.slane %v12257_v47, 1  ;;  %v1468_v62 = vsel %vm1320_vm0, %v1466_v7, %v1467_v35  ;;  %v10595_v47 = vld [vmem:[#allocation2 + $0x50] sm:$0xff] }
 0x2a4   :  { %8701 = vmatmul.mubr.f32.gmra.mrb[116].mxu0 %v1455_v37  ;;  %v3820_v37 = vsel %vm1320_vm0, %v1462_v45, %v3819_v49  ;;  %v12318_v10 = vrot.slane %v10595_v47, 2 }
 0x2a5   :  { %9210 = vmatmul.mubr.f32.gmra.mrb[50].mxu1 %v3810_v46  ;;  %8703 = vmatprep.mubr.f32.mxu0 %v1458_v60  ;;  %v1469_v46 = vrot.slane %v1201_v27, 1  ;;  %v3825_v49 = vsel %vm1320_vm0, %v1467_v35, %v3824_v44 }
 0x2a6   :  { %9212 = vmatprep.mubr.f32.mxu1 %v1458_v60  ;;  %v1471_v60 = vrot.slane %v12259_v39, 1  ;;  %v12283_v39 = vld [vmem:[#allocation2 + $0x330] sm:$0xff]  ;;  %14638 = vst [vmem:[#allocation25_spill] sm:$0xff] %v12318_v10 }
 0x2a7   :  { %v1470_v45 = vsel %vm1320_vm0, %v1467_v35, %v1469_v46  ;;  %14632 = vst [vmem:[#allocation18_spill] sm:$0xff] %v12283_v39  ;;  %v12285_v46 = vld [vmem:[#allocation2 + $0x338] sm:$0xff] }
 0x2a8   :  { %8704 = vmatmul.mubr.f32.gmra.mrb[118].mxu0 %v1460_v43  ;;  %v12269_v43 = vld [vmem:[#allocation2 + $0x310] sm:$0x3]  ;;  %v1473_v27 = vsel %vm1320_vm0, %v1471_v60, %v1472_v32  ;;  %14633 = vst [vmem:[#allocation21_spill] sm:$0xff] %v12285_v46  ;;  %v3834_v60 = vrot.slane %v12281_v28, 1  ;;  %v12301_v28 = vld [vmem:[#allocation2] sm:$0xff] }
 0x2a9   :  { %9213 = vmatmul.mubr.f32.gmra.mrb[52].mxu1 %v3815_v59  ;;  %8706 = vmatprep.mubr.f32.mxu0 %v1463_v16  ;;  %14628 = vst [vmem:[#allocation40_spill] sm:$0xff] %v12269_v43  ;;  %v12271_v59 = vld [vmem:[#allocation2 + $0x318] sm:$0xff]  ;;  %v3829_v7 = vrot.slane %v12269_v43, 1  ;;  %14636 = vst [vmem:[#allocation22_spill] sm:$0xff] %v12301_v28 }
 0x2aa   :  { %9215 = vmatprep.mubr.f32.mxu1 %v1463_v16  ;;  %14629 = vst [vmem:[#allocation17_spill] sm:$0xff] %v12271_v59  ;;  %v1474_v16 = vrot.slane %v1204_v42, 1 }
 0x2ab   :  { %v3830_v44 = vsel %vm1320_vm0, %v1472_v32, %v3829_v7 }
 0x2ac   :  { %8707 = vmatmul.mubr.f32.gmra.mrb[120].mxu0 %v1465_v51  ;;  %v1476_v51 = vrot.slane %v12271_v59, 1  ;;  %v1475_v35 = vsel %vm1320_vm0, %v1472_v32, %v1474_v16 }
 0x2ad   :  { %9216 = vmatmul.mubr.f32.gmra.mrb[54].mxu1 %v3820_v37  ;;  %8709 = vmatprep.mubr.f32.mxu0 %v1468_v62  ;;  %v1477_v37 = vrot.slane %v12273_v1, 1  ;;  %v3837_v1 = vrot.slane %v12285_v46, 1  ;;  %v2560_v46 = vld [vmem:[#allocation9 + $0x110] sm:$0xff] }
 0x2ae   :  { %9218 = vmatprep.mubr.f32.mxu1 %v1468_v62  ;;  %v1207_v62 = vld [vmem:[#allocation2 + $0x328] sm:$0x3] }
 0x2af   :  { %v1479_v42 = vrot.slane %v1207_v62, 1  ;;  %v3835_v16 = vsel %vm1320_vm0, %v1477_v37, %v3834_v60  ;;  %v10586_v62 = vld [vmem:[#allocation2 + $0x18] sm:$0xff]  ;;  %v5161_v60 = vld [vmem:[#allocation9 + $0x310] sm:$0xff] }
 0x2b0   :  { %8710 = vmatmul.mubr.f32.gmra.mrb[122].mxu0 %v1470_v45  ;;  %v1478_v45 = vsel %vm1320_vm0, %v1476_v51, %v1477_v37  ;;  %v4371_v51 = vrot.slane %v10586_v62, 2 }
 0x2b1   :  { %9219 = vmatmul.mubr.f32.gmra.mrb[56].mxu1 %v3825_v49  ;;  %8712 = vmatprep.mubr.f32.mxu0 %v1473_v27  ;;  %v3836_v49 = vrot.slane %v12283_v39, 1  ;;  %v1480_v59 = vsel %vm1320_vm0, %v1477_v37, %v1479_v42  ;;  %v2561_v39 = vld [vmem:[#allocation9 + $0x118] sm:$0xff]  ;;  %v10589_v37 = vld [vmem:[#allocation2 + $0x28] sm:$0x3] }
 0x2b2   :  { %9221 = vmatprep.mubr.f32.mxu1 %v1473_v27  ;;  %v12293_v27 = vld [vmem:[#allocation2 + $0x340] sm:$0x3]  ;;  %v4374_v42 = vrot.slane %v10589_v37, 2  ;;  %v10592_v37 = vld [vmem:[#allocation2 + $0x38] sm:$0xff] }
 0x2b3   :  { %14634 = vst [vmem:[#allocation20_spill] sm:$0xff] %v12293_v27  ;;  %v3839_v32 = vrot.slane %v12293_v27, 1  ;;  %v3838_v7 = vsel %vm1320_vm0, %v3836_v49, %v3837_v1  ;;  %v9842_v49 = vpack.c.bf16 %v2561_v39, %v2560_v46  ;;  %v10591_v27 = vld [vmem:[#allocation2 + $0x30] sm:$0xff]  ;;  %v12313_v43 = vrot.slane %v10592_v37, 2  ;;  %v10593_v46 = vld [vmem:[#allocation2 + $0x40] sm:$0x3] }
 0x2b4   :  { %8713 = vmatmul.mubr.f32.gmra.mrb[124].mxu0 %v1475_v35  ;;  %v10587_v35 = vld [vmem:[#allocation2 + $0x20] sm:$0xff] }
 0x2b5   :  { %9222 = vmatmul.mubr.f32.gmra.mrb[58].mxu1 %v3830_v44  ;;  %8715 = vmatprep.mubr.f32.mxu0 %v1478_v45  ;;  %v12299_v44 = vrot.slane %v10587_v35, 2 }
 0x2b6   :  { %9224 = vmatprep.mubr.f32.mxu1 %v1478_v45  ;;  %v5162_v45 = vld [vmem:[#allocation9 + $0x318] sm:$0xff] }
 0x2b7   :  { %14635 = vst [vmem:[#allocation23_spill] sm:$0xff] %v12299_v44  ;;  %v4375_v39 = vsel %vm2332_vm1, %v12299_v44, %v4374_v42 }
 0x2b8   :  { %8716 = vmatmul.mubr.f32.gmra.mrb[126].mxu0 %v1480_v59  ;;  %v3840_v59 = vsel %vm1320_vm0, %v3837_v1, %v3839_v32  ;;  %v9970_v1 = vpack.c.bf16 %v5162_v45, %v5161_v60  ;;  %v4379_v32 = vrot.slane %v10593_v46, 2  ;;  %v10596_v60 = vld [vmem:[#allocation2 + $0x58] sm:$0x3]  ;;  %v2564_v46 = vld [vmem:[#allocation9 + $0x130] sm:$0xff] }
 0x2b9   :  { %9225 = vmatmul.mubr.f32.gmra.mrb[60].mxu1 %v3835_v16  ;;  %8750 = vmatprep.mubr.f32.mxu0 %v12301_v28  ;;  %v12305_v16 = vld [vmem:[#allocation2 + $0x8] sm:$0xff]  ;;  %v4376_v28 = vrot.slane %v10591_v27, 2  ;;  %v4384_v45 = vrot.slane %v10596_v60, 2  ;;  %v10600_v60 = vld [vmem:[#allocation2 + $0x78] sm:$0xff] }
 0x2ba   :  { %9227 = vmatprep.mubr.f32.mxu1 %v3838_v7  ;;  %v12310_v7 = vsel %vm2332_vm1, %v4371_v51, %v12299_v44  ;;  %v2563_v51 = vld [vmem:[#allocation9 + $0x128] sm:$0xff]  ;;  %v2565_v44 = vld [vmem:[#allocation9 + $0x138] sm:$0xff] }
 0x2bb   :  { %14637 = vst [vmem:[#allocation26_spill] sm:$0xff] %v12310_v7 }
 0x2bc   :  { %8751 = vmatmul.mubr.f32.vlgmr.msra.gmra.mrb[64].mxu0 %v12305_v16 }
 0x2bd   :  { %9228 = vmatmul.mubr.f32.gmra.mrb[62].mxu1 %v3840_v59  ;;  %8753 = vmatprep.mubr.f32.mxu0 %v10586_v62  ;;  %v2562_v59 = vld [vmem:[#allocation9 + $0x120] sm:$0xff]  ;;  %v10594_v62 = vld [vmem:[#allocation2 + $0x48] sm:$0xff] }
 0x2be   :  { %9262 = vmatprep.mubr.f32.mxu1 %v12310_v7  ;;  %9841 = vmatpush3.bf16.msra.mxu0 %v12224_v3  ;;  %v4381_v7 = vrot.slane %v10594_v62, 2  ;;  %v12323_v3 = vsel %vm2332_vm1, %v4376_v28, %v12313_v43  ;;  %v9846_v42 = vpack.c.bf16 %v2563_v51, %v2562_v59  ;;  %v10597_v28 = vld [vmem:[#allocation2 + $0x60] sm:$0xff]  ;;  %v5165_v59 = vld [vmem:[#allocation9 + $0x330] sm:$0xff]  ;;  %v5166_v51 = vld [vmem:[#allocation9 + $0x338] sm:$0xff] }
 0x2bf   :  { %9843 = vmatprep.subr.bf16.mxu0 %v9842_v49  ;;  %14639 = vst [vmem:[#allocation29_spill] sm:$0xff] %v12323_v3 }
 0x2c0   :  { %8754 = vmatmul.mubr.f32.gmra.mrb[66].mxu0 %v10587_v35  ;;  %v4380_v35 = vsel %vm2332_vm1, %v12313_v43, %v4379_v32  ;;  %v2566_v32 = vld [vmem:[#allocation9 + $0x140] sm:$0xff] }
 0x2c1   :  { %9263 = vmatmul.mubr.f32.vlgmr.msra.gmra.mrb[0].mxu1 %v4375_v39  ;;  %8756 = vmatprep.mubr.f32.mxu0 %v10591_v27  ;;  %v9974_v39 = vpack.c.bf16 %v5164_v56, %v5163_v2  ;;  %v4386_v27 = vrot.slane %v10597_v28, 2  ;;  %v9850_v56 = vpack.c.bf16 %v2565_v44, %v2564_v46  ;;  %v4385_v2 = vsel %vm2332_vm1, %v12318_v10, %v4384_v45  ;;  %v5167_v46 = vld [vmem:[#allocation9 + $0x340] sm:$0xff]  ;;  %v5168_v45 = vld [vmem:[#allocation9 + $0x348] sm:$0xff] }
 0x2c2   :  { %9969 = vmatpush3.bf16.msra.mxu1 %v12100_v6  ;;  %9265 = vmatprep.mubr.f32.mxu1 %v12323_v3  ;;  %v12330_v6 = vsel %vm2332_vm1, %v4381_v7, %v12318_v10  ;;  %v10598_v3 = vld [vmem:[#allocation2 + $0x68] sm:$0xff]  ;;  %v9978_v7 = vpack.c.bf16 %v5166_v51, %v5165_v59  ;;  %v10604_v10 = vld [vmem:[#allocation2 + $0x98] sm:$0xff] }
 0x2c3   :  { %9971 = vmatprep.subr.bf16.mxu1 %v9970_v1  ;;  %9845 = vmatpush3.bf16.msra.mxu0 %v9842_v49  ;;  %14640 = vst [vmem:[#allocation28_spill] sm:$0xff] %v12330_v6  ;;  %v12332_v38 = vrot.slane %v10598_v3, 2  ;;  %v10599_v49 = vld [vmem:[#allocation2 + $0x70] sm:$0x3]  ;;  %v10602_v59 = vld [vmem:[#allocation2 + $0x88] sm:$0x3] }
 0x2c4   :  { %8757 = vmatmul.mubr.f32.gmra.mrb[68].mxu0 %v10592_v37  ;;  %9847 = vmatprep.subr.bf16.mxu0 %v9846_v42  ;;  %v4389_v37 = vrot.slane %v10599_v49, 2  ;;  %v4394_v51 = vrot.slane %v10602_v59, 2  ;;  %v2569_v49 = vld [vmem:[#allocation9 + $0x158] sm:$0xff]  ;;  %v2571_v59 = vld [vmem:[#allocation9 + $0x168] sm:$0xff] }
 0x2c5   :  { %9266 = vmatmul.mubr.f32.gmra.mrb[2].mxu1 %v4380_v35  ;;  %14641 = vst [vmem:[#allocation31_spill] sm:$0xff] %v12332_v38  ;;  %8759 = vmatprep.mubr.f32.mxu0 %v10594_v62  ;;  %v2567_v35 = vld [vmem:[#allocation9 + $0x148] sm:$0xff]  ;;  %v12339_v62 = vsel %vm2332_vm1, %v4386_v27, %v12332_v38  ;;  %v9982_v27 = vpack.c.bf16 %v5168_v45, %v5167_v46  ;;  %v10605_v46 = vld [vmem:[#allocation2 + $0xa0] sm:$0x3] }
 0x2c6   :  { %9268 = vmatprep.mubr.f32.mxu1 %v12330_v6  ;;  %9973 = vmatpush3.bf16.msra.mxu1 %v9970_v1  ;;  %14642 = vst [vmem:[#allocation30_spill] sm:$0xff] %v12339_v62  ;;  %v4391_v1 = vrot.slane %v10600_v60, 2  ;;  %v10601_v6 = vld [vmem:[#allocation2 + $0x80] sm:$0xff]  ;;  %v4399_v45 = vrot.slane %v10605_v46, 2  ;;  %v2573_v46 = vld [vmem:[#allocation9 + $0x178] sm:$0xff] }
 0x2c7   :  { %9975 = vmatprep.subr.bf16.mxu1 %v9974_v39  ;;  %9849 = vmatpush3.bf16.msra.mxu0 %v9846_v42  ;;  %v12341_v44 = vrot.slane %v10601_v6, 2  ;;  %v9854_v42 = vpack.c.bf16 %v2567_v35, %v2566_v32  ;;  %v12350_v32 = vrot.slane %v10604_v10, 2  ;;  %v5169_v35 = vld [vmem:[#allocation9 + $0x350] sm:$0xff] }
 0x2c8   :  { %8760 = vmatmul.mubr.f32.gmra.mrb[70].mxu0 %v10595_v47  ;;  %9851 = vmatprep.subr.bf16.mxu0 %v9850_v56  ;;  %v4390_v47 = vsel %vm2332_vm1, %v12332_v38, %v4389_v37  ;;  %v5170_v37 = vld [vmem:[#allocation9 + $0x358] sm:$0xff]  ;;  %v10607_v38 = vld [vmem:[#allocation2 + $0xb0] sm:$0xff] }
 0x2c9   :  { %9269 = vmatmul.mubr.f32.gmra.mrb[4].mxu1 %v4385_v2  ;;  %14643 = vst [vmem:[#allocation33_spill] sm:$0xff] %v12341_v44  ;;  %8762 = vmatprep.mubr.f32.mxu0 %v10597_v28  ;;  %v2568_v2 = vld [vmem:[#allocation9 + $0x150] sm:$0xff]  ;;  %v12348_v28 = vsel %vm2332_vm1, %v4391_v1, %v12341_v44  ;;  %v9986_v1 = vpack.c.bf16 %v5170_v37, %v5169_v35  ;;  %v10608_v35 = vld [vmem:[#allocation2 + $0xb8] sm:$0x3] }
 0x2ca   :  { %9271 = vmatprep.mubr.f32.mxu1 %v12339_v62  ;;  %9977 = vmatpush3.bf16.msra.mxu1 %v9974_v39  ;;  %14644 = vst [vmem:[#allocation32_spill] sm:$0xff] %v12348_v28  ;;  %v10603_v62 = vld [vmem:[#allocation2 + $0x90] sm:$0xff]  ;;  %v4404_v37 = vrot.slane %v10608_v35, 2 }
 0x2cb   :  { %9979 = vmatprep.subr.bf16.mxu1 %v9978_v7  ;;  %9853 = vmatpush3.bf16.msra.mxu0 %v9850_v56  ;;  %v4396_v39 = vrot.slane %v10603_v62, 2  ;;  %v9858_v56 = vpack.c.bf16 %v2569_v49, %v2568_v2  ;;  %v12359_v2 = vrot.slane %v10607_v38, 2  ;;  %v5171_v49 = vld [vmem:[#allocation9 + $0x360] sm:$0xff] }
 0x2cc   :  { %8763 = vmatmul.mubr.f32.gmra.mrb[72].mxu0 %v10598_v3  ;;  %9855 = vmatprep.subr.bf16.mxu0 %v9854_v42  ;;  %v4395_v3 = vsel %vm2332_vm1, %v12341_v44, %v4394_v51  ;;  %v5172_v51 = vld [vmem:[#allocation9 + $0x368] sm:$0xff] }
 0x2cd   :  { %9272 = vmatmul.mubr.f32.gmra.mrb[6].mxu1 %v4390_v47  ;;  %8765 = vmatprep.mubr.f32.mxu0 %v10600_v60  ;;  %v2570_v47 = vld [vmem:[#allocation9 + $0x160] sm:$0xff]  ;;  %v12357_v60 = vsel %vm2332_vm1, %v4396_v39, %v12350_v32  ;;  %v9990_v39 = vpack.c.bf16 %v5172_v51, %v5171_v49  ;;  %v10610_v44 = vld [vmem:[#allocation2 + $0xc8] sm:$0xff]  ;;  %v10611_v49 = vld [vmem:[#allocation2 + $0xd0] sm:$0x3] }
 0x2ce   :  { %9274 = vmatprep.mubr.f32.mxu1 %v12348_v28  ;;  %9981 = vmatpush3.bf16.msra.mxu1 %v9978_v7  ;;  %14645 = vst [vmem:[#allocation27_spill] sm:$0xff] %v12357_v60  ;;  %v10606_v28 = vld [vmem:[#allocation2 + $0xa8] sm:$0xff]  ;;  %v4409_v51 = vrot.slane %v10611_v49, 2  ;;  %v10617_v49 = vld [vmem:[#allocation2 + $0x100] sm:$0x3] }
 0x2cf   :  { %9983 = vmatprep.subr.bf16.mxu1 %v9982_v27  ;;  %9857 = vmatpush3.bf16.msra.mxu0 %v9854_v42  ;;  %v4401_v7 = vrot.slane %v10606_v28, 2  ;;  %v9862_v42 = vpack.c.bf16 %v2571_v59, %v2570_v47  ;;  %v12368_v47 = vrot.slane %v10610_v44, 2  ;;  %v5173_v59 = vld [vmem:[#allocation9 + $0x370] sm:$0xff] }
 0x2d0   :  { %8766 = vmatmul.mubr.f32.gmra.mrb[74].mxu0 %v10601_v6  ;;  %9859 = vmatprep.subr.bf16.mxu0 %v9858_v56  ;;  %v4400_v6 = vsel %vm2332_vm1, %v12350_v32, %v4399_v45  ;;  %v5174_v45 = vld [vmem:[#allocation9 + $0x378] sm:$0xff] }
 0x2d1   :  { %9275 = vmatmul.mubr.f32.gmra.mrb[8].mxu1 %v4395_v3  ;;  %8768 = vmatprep.mubr.f32.mxu0 %v10603_v62  ;;  %v2572_v3 = vld [vmem:[#allocation9 + $0x170] sm:$0xff]  ;;  %v12366_v62 = vsel %vm2332_vm1, %v4401_v7, %v12359_v2  ;;  %v9994_v7 = vpack.c.bf16 %v5174_v45, %v5173_v59 }
 0x2d2   :  { %9277 = vmatprep.mubr.f32.mxu1 %v12357_v60  ;;  %9985 = vmatpush3.bf16.msra.mxu1 %v9982_v27  ;;  %14646 = vst [vmem:[#allocation24_spill] sm:$0xff] %v12366_v62  ;;  %v10609_v60 = vld [vmem:[#allocation2 + $0xc0] sm:$0xff] }
 0x2d3   :  { %9987 = vmatprep.subr.bf16.mxu1 %v9986_v1  ;;  %9861 = vmatpush3.bf16.msra.mxu0 %v9858_v56  ;;  %v4406_v27 = vrot.slane %v10609_v60, 2  ;;  %v9866_v56 = vpack.c.bf16 %v2573_v46, %v2572_v3  ;;  %v5945_v3 = vld [vmem:[#allocation9 + $0x380] sm:$0xff]  ;;  %v5946_v46 = vld [vmem:[#allocation9 + $0x388] sm:$0xff] }
 0x2d4   :  { %8769 = vmatmul.mubr.f32.gmra.mrb[76].mxu0 %v10604_v10  ;;  %9863 = vmatprep.subr.bf16.mxu0 %v9862_v42  ;;  %v4405_v10 = vsel %vm2332_vm1, %v12359_v2, %v4404_v37 }
 0x2d5   :  { %9278 = vmatmul.mubr.f32.gmra.mrb[10].mxu1 %v4400_v6  ;;  %8771 = vmatprep.mubr.f32.mxu0 %v10606_v28  ;;  %v12375_v6 = vsel %vm2332_vm1, %v4406_v27, %v12368_v47  ;;  %v10612_v28 = vld [vmem:[#allocation2 + $0xd8] sm:$0xff]  ;;  %v12382_v27 = vpack.c.bf16 %v5946_v46, %v5945_v3  ;;  %v10619_v46 = vld [vmem:[#allocation2 + $0x110] sm:$0xff] }
 0x2d6   :  { %9280 = vmatprep.mubr.f32.mxu1 %v12366_v62  ;;  %9989 = vmatpush3.bf16.msra.mxu1 %v9986_v1  ;;  %v4411_v35 = vrot.slane %v10612_v28, 2  ;;  %v10613_v62 = vld [vmem:[#allocation2 + $0xe0] sm:$0xff] }
 0x2d7   :  { %9991 = vmatprep.subr.bf16.mxu1 %v9990_v39  ;;  %9865 = vmatpush3.bf16.msra.mxu0 %v9862_v42  ;;  %v12377_v1 = vrot.slane %v10613_v62, 2  ;;  %v10614_v42 = vld [vmem:[#allocation2 + $0xe8] sm:$0x3] }
 0x2d8   :  { %8772 = vmatmul.mubr.f32.gmra.mrb[78].mxu0 %v10607_v38  ;;  %9867 = vmatprep.subr.bf16.mxu0 %v9866_v56  ;;  %v4410_v38 = vsel %vm2332_vm1, %v12368_v47, %v4409_v51  ;;  %v4414_v37 = vrot.slane %v10614_v42, 2  ;;  %v4419_v51 = vrot.slane %v10617_v49, 2 }
 0x2d9   :  { %9281 = vmatmul.mubr.f32.gmra.mrb[12].mxu1 %v4405_v10  ;;  %8774 = vmatprep.mubr.f32.mxu0 %v10609_v60  ;;  %v12386_v59 = vsel %vm2332_vm1, %v4411_v35, %v12377_v1  ;;  %v10615_v60 = vld [vmem:[#allocation2 + $0xf0] sm:$0xff]  ;;  %v10616_v10 = vld [vmem:[#allocation2 + $0xf8] sm:$0xff]  ;;  %v10618_v35 = vld [vmem:[#allocation2 + $0x108] sm:$0xff] }
 0x2da   :  { %9283 = vmatprep.mubr.f32.mxu1 %v12375_v6  ;;  %9993 = vmatpush3.bf16.msra.mxu1 %v9990_v39  ;;  %v4416_v45 = vrot.slane %v10615_v60, 2  ;;  %v12388_v39 = vrot.slane %v10616_v10, 2  ;;  %v4421_v3 = vrot.slane %v10618_v35, 2 }
 0x2db   :  { %9995 = vmatprep.subr.bf16.mxu1 %v9994_v7  ;;  %9869 = vmatpush3.bf16.msra.mxu0 %v9866_v56  ;;  %v4415_v56 = vsel %vm2332_vm1, %v12377_v1, %v4414_v37  ;;  %v10621_v37 = vld [vmem:[#allocation2 + $0x120] sm:$0xff] }
 0x2dc   :  { %8775 = vmatmul.mubr.f32.gmra.mrb[80].mxu0 %v10610_v44  ;;  %14647 = vst [vmem:[#allocation43_spill] sm:$0xff] %v12388_v39  ;;  %v12396_v44 = vsel %vm2332_vm1, %v4416_v45, %v12388_v39  ;;  %v4426_v45 = vrot.slane %v10621_v37, 2 }
 0x2dd   :  { %9284 = vmatmul.mubr.f32.gmra.mrb[14].mxu1 %v4410_v38  ;;  %8777 = vmatprep.mubr.f32.mxu0 %v10612_v28  ;;  %14648 = vst [vmem:[#allocation44_spill] sm:$0xff] %v12396_v44  ;;  %v12398_v28 = vrot.slane %v10619_v46, 2  ;;  %v10620_v38 = vld [vmem:[#allocation2 + $0x118] sm:$0x3] }
 0x2de   :  { %9286 = vmatprep.mubr.f32.mxu1 %v12386_v59  ;;  %9997 = vmatpush3.bf16.msra.mxu1 %v9994_v7  ;;  %v4420_v7 = vsel %vm2332_vm1, %v12388_v39, %v4419_v51  ;;  %v4424_v42 = vrot.slane %v10620_v38, 2  ;;  %v10623_v51 = vld [vmem:[#allocation2 + $0x130] sm:$0x3]  ;;  %v10625_v38 = vld [vmem:[#allocation2 + $0x140] sm:$0xff] }
 0x2df   :  { %9999 = vmatprep.subr.bf16.mxu1 %v12382_v27  ;;  %14649 = vst [vmem:[#allocation45_spill] sm:$0xff] %v12398_v28  ;;  %v4429_v39 = vrot.slane %v10623_v51, 2  ;;  %v10628_v51 = vld [vmem:[#allocation2 + $0x158] sm:$0xff] }
 0x2e0   :  { %8778 = vmatmul.mubr.f32.gmra.mrb[82].mxu0 %v10613_v62  ;;  %v12405_v62 = vsel %vm2332_vm1, %v4421_v3, %v12398_v28  ;;  %v10624_v3 = vld [vmem:[#allocation2 + $0x138] sm:$0xff] }
 0x2e1   :  { %9287 = vmatmul.mubr.f32.gmra.mrb[16].mxu1 %v4415_v56  ;;  %8780 = vmatprep.mubr.f32.mxu0 %v10615_v60  ;;  %14650 = vst [vmem:[#allocation46_spill] sm:$0xff] %v12405_v62  ;;  %v10622_v56 = vld [vmem:[#allocation2 + $0x128] sm:$0xff]  ;;  %v4425_v60 = vsel %vm2332_vm1, %v12398_v28, %v4424_v42 }
 0x2e2   :  { %9289 = vmatprep.mubr.f32.mxu1 %v12396_v44  ;;  %v12407_v49 = vrot.slane %v10622_v56, 2  ;;  %v12416_v44 = vrot.slane %v10625_v38, 2  ;;  %v10626_v42 = vld [vmem:[#allocation2 + $0x148] sm:$0x3] }
 0x2e3   :  { %v4434_v28 = vrot.slane %v10626_v42, 2  ;;  %v10631_v42 = vld [vmem:[#allocation2 + $0x170] sm:$0xff] }
 0x2e4   :  { %8781 = vmatmul.mubr.f32.gmra.mrb[84].mxu0 %v10616_v10  ;;  %14651 = vst [vmem:[#allocation47_spill] sm:$0xff] %v12407_v49  ;;  %v12414_v10 = vsel %vm2332_vm1, %v4426_v45, %v12407_v49  ;;  %v10627_v45 = vld [vmem:[#allocation2 + $0x150] sm:$0xff] }
 0x2e5   :  { %9290 = vmatmul.mubr.f32.gmra.mrb[18].mxu1 %v4420_v7  ;;  %8783 = vmatprep.mubr.f32.mxu0 %v10618_v35  ;;  %14652 = vst [vmem:[#allocation48_spill] sm:$0xff] %v12414_v10  ;;  %v4431_v7 = vrot.slane %v10624_v3, 2  ;;  %v4430_v35 = vsel %vm2332_vm1, %v12407_v49, %v4429_v39  ;;  %v10629_v39 = vld [vmem:[#allocation2 + $0x160] sm:$0x3] }
 0x2e6   :  { %9292 = vmatprep.mubr.f32.mxu1 %v12405_v62  ;;  %v12425_v62 = vrot.slane %v10628_v51, 2  ;;  %v4439_v49 = vrot.slane %v10629_v39, 2  ;;  %v12453_v39 = vrot.slane %v12096_v52, 2 }
 0x2e8   :  { %8784 = vmatmul.mubr.f32.gmra.mrb[86].mxu0 %v10619_v46  ;;  %v12423_v46 = vsel %vm2332_vm1, %v4431_v7, %v12416_v44  ;;  %v10630_v7 = vld [vmem:[#allocation2 + $0x168] sm:$0xff] }
 0x2e9   :  { %9293 = vmatmul.mubr.f32.gmra.mrb[20].mxu1 %v4425_v60  ;;  %8786 = vmatprep.mubr.f32.mxu0 %v10621_v37  ;;  %v4436_v60 = vrot.slane %v10627_v45, 2  ;;  %v4435_v37 = vsel %vm2332_vm1, %v12416_v44, %v4434_v28  ;;  %v4444_v28 = vrot.slane %v12080_v55, 2 }
 0x2ea   :  { %9295 = vmatprep.mubr.f32.mxu1 %v12414_v10  ;;  %v12434_v10 = vrot.slane %v10631_v42, 2 }
 0x2ec   :  { %8787 = vmatmul.mubr.f32.gmra.mrb[88].mxu0 %v10622_v56  ;;  %v12432_v56 = vsel %vm2332_vm1, %v4436_v60, %v12425_v62  ;;  %v4446_v60 = vrot.slane %v12082_v63, 2  ;;  %v12455_v63 = vld [vmem:[#allocation2 + $0x1b0] sm:$0xff] }
 0x2ed   :  { %9296 = vmatmul.mubr.f32.gmra.mrb[22].mxu1 %v4430_v35  ;;  %8789 = vmatprep.mubr.f32.mxu0 %v10624_v3  ;;  %v4441_v35 = vrot.slane %v10630_v7, 2  ;;  %v4440_v3 = vsel %vm2332_vm1, %v12425_v62, %v4439_v49  ;;  %v4449_v49 = vrot.slane %v12092_v8, 2 }
 0x2ee   :  { %9298 = vmatprep.mubr.f32.mxu1 %v12423_v46 }
 0x2f0   :  { %8790 = vmatmul.mubr.f32.gmra.mrb[90].mxu0 %v10625_v38  ;;  %v12442_v38 = vsel %vm2332_vm1, %v4441_v35, %v12434_v10  ;;  %v4456_v35 = vrot.slane %v12112_v0, 2 }
 0x2f1   :  { %9299 = vmatmul.mubr.f32.gmra.mrb[24].mxu1 %v4435_v37  ;;  %8792 = vmatprep.mubr.f32.mxu0 %v10627_v45  ;;  %v4447_v37 = vrot.slane %v12084_v5, 2  ;;  %v4445_v45 = vsel %vm2332_vm1, %v12434_v10, %v4444_v28 }
 0x2f2   :  { %9301 = vmatprep.mubr.f32.mxu1 %v12432_v56 }
 0x2f3   :  { %v4448_v55 = vsel %vm2332_vm1, %v4446_v60, %v4447_v37  ;;  %v4450_v5 = vsel %vm2332_vm1, %v4447_v37, %v4449_v49  ;;  %v4461_v60 = vrot.slane %v12124_v23, 2  ;;  %v12481_v37 = vrot.slane %v12126_v9, 2 }
 0x2f4   :  { %8793 = vmatmul.mubr.f32.gmra.mrb[92].mxu0 %v10628_v51  ;;  %v4451_v51 = vrot.slane %v12094_v54, 2  ;;  %v12495_v49 = vrot.slane %v12138_v50, 2 }
 0x2f5   :  { %9302 = vmatmul.mubr.f32.gmra.mrb[26].mxu1 %v4440_v3  ;;  %8795 = vmatprep.mubr.f32.mxu0 %v10630_v7  ;;  %v4454_v7 = vrot.slane %v12108_v53, 2  ;;  %v4459_v53 = vrot.slane %v12122_v57, 2  ;;  %v4464_v57 = vrot.slane %v12134_v15, 2  ;;  %v4469_v15 = vrot.slane %v12146_v26, 2 }
 0x2f6   :  { %9304 = vmatprep.mubr.f32.mxu1 %v12442_v38  ;;  %v12463_v8 = vsel %vm2332_vm1, %v4451_v51, %v12453_v39  ;;  %v12509_v51 = vrot.slane %v12150_v31, 2  ;;  %v4474_v26 = vrot.slane %v12158_v14, 2  ;;  %v4479_v14 = vrot.slane %v12170_v25, 2 }
 0x2f7   :  { %v4455_v3 = vsel %vm2332_vm1, %v12453_v39, %v4454_v7  ;;  %v12523_v7 = vrot.slane %v12162_v22, 2  ;;  %v4484_v25 = vrot.slane %v12182_v33, 2  ;;  %v4489_v33 = vrot.slane %v12194_v41, 2 }
 0x2f8   :  { %8796 = vmatmul.mubr.f32.gmra.mrb[94].mxu0 %v10631_v42  ;;  %v12467_v42 = vrot.slane %v12114_v13, 2  ;;  %v4494_v41 = vrot.slane %v12206_v4, 2  ;;  %v4499_v4 = vrot.slane %v12218_v36, 2 }
 0x2f9   :  { %9305 = vmatmul.mubr.f32.gmra.mrb[28].mxu1 %v4445_v45  ;;  %8798 = vmatprep.mubr.f32.mxu0 %v12455_v63  ;;  %v4466_v45 = vrot.slane %v12136_v29, 2 }
 0x2fa   :  { %9307 = vmatprep.mubr.f32.mxu1 %v4448_v55  ;;  %v12477_v28 = vsel %vm2332_vm1, %v4456_v35, %v12467_v42  ;;  %v4471_v55 = vrot.slane %v12148_v24, 2  ;;  %v4481_v35 = vrot.slane %v12172_v21, 2 }
 0x2fc   :  { %8799 = vmatmul.mubr.f32.gmra.mrb[96].mxu0 %v12305_v16 }
 0x2fd   :  { %9308 = vmatmul.mubr.f32.gmra.mrb[30].mxu1 %v4450_v5  ;;  %8801 = vmatprep.mubr.f32.mxu0 %v12094_v54  ;;  %v4460_v54 = vsel %vm2332_vm1, %v12467_v42, %v4459_v53  ;;  %v4476_v5 = vrot.slane %v12160_v12, 2  ;;  %v4486_v53 = vrot.slane %v12184_v58, 2 }
 0x2fe   :  { %9310 = vmatprep.mubr.f32.mxu1 %v12463_v8 }
 0x300   :  { %8802 = vmatmul.mubr.f32.gmra.mrb[98].mxu0 %v12096_v52  ;;  %v12491_v52 = vsel %vm2332_vm1, %v4461_v60, %v12481_v37  ;;  %v12551_v60 = vrot.slane %v12186_v48, 2 }
 0x301   :  { %9311 = vmatmul.mubr.f32.gmra.mrb[32].mxu1 %v4455_v3  ;;  %8804 = vmatprep.mubr.f32.mxu0 %v12112_v0  ;;  %v4465_v0 = vsel %vm2332_vm1, %v12481_v37, %v4464_v57  ;;  %v12537_v3 = vrot.slane %v12174_v17, 2  ;;  %v4492_v57 = vrot.slane %v12198_v18, 2 }
 0x302   :  { %9313 = vmatprep.mubr.f32.mxu1 %v12477_v28 }
 0x304   :  { %8805 = vmatmul.mubr.f32.gmra.mrb[100].mxu0 %v12114_v13  ;;  %v12505_v13 = vsel %vm2332_vm1, %v4466_v45, %v12495_v49  ;;  %v4496_v45 = vrot.slane %v12208_v20, 2 }
 0x305   :  { %9314 = vmatmul.mubr.f32.gmra.mrb[34].mxu1 %v4460_v54  ;;  %8807 = vmatprep.mubr.f32.mxu0 %v12124_v23  ;;  %v4470_v23 = vsel %vm2332_vm1, %v12495_v49, %v4469_v15  ;;  %v4491_v54 = vrot.slane %v12196_v40, 2  ;;  %v3120_v15 = vld [vmem:[#allocation9 + $0x180] sm:$0xff] }
 0x306   :  { %9316 = vmatprep.mubr.f32.mxu1 %v12491_v52 }
 0x308   :  { %8808 = vmatmul.mubr.f32.gmra.mrb[102].mxu0 %v12126_v9  ;;  %v12519_v9 = vsel %vm2332_vm1, %v4471_v55, %v12509_v51  ;;  %v3121_v55 = vld [vmem:[#allocation9 + $0x188] sm:$0xff] }
 0x309   :  { %9317 = vmatmul.mubr.f32.gmra.mrb[36].mxu1 %v4465_v0  ;;  %8810 = vmatprep.mubr.f32.mxu0 %v12136_v29  ;;  %v4475_v29 = vsel %vm2332_vm1, %v12509_v51, %v4474_v26  ;;  %v4497_v0 = vrot.slane %v12210_v34, 2  ;;  %v4501_v26 = vrot.slane %v12220_v11, 2 }
 0x30a   :  { %9319 = vmatprep.mubr.f32.mxu1 %v12505_v13 }
 0x30c   :  { %8811 = vmatmul.mubr.f32.gmra.mrb[104].mxu0 %v12138_v50  ;;  %v12533_v50 = vsel %vm2332_vm1, %v4476_v5, %v12523_v7  ;;  %v4502_v5 = vrot.slane %v12222_v61, 2 }
 0x30d   :  { %9320 = vmatmul.mubr.f32.gmra.mrb[38].mxu1 %v4470_v23  ;;  %8813 = vmatprep.mubr.f32.mxu0 %v12148_v24  ;;  %v4480_v24 = vsel %vm2332_vm1, %v12523_v7, %v4479_v14  ;;  %v4495_v23 = vsel %vm2332_vm1, %v4492_v57, %v4494_v41  ;;  %v14653_v14 = vld [vmem:[#allocation35_spill] sm:$0xff] }
 0x30e   :  { %9322 = vmatprep.mubr.f32.mxu1 %v12519_v9  ;;  %v4503_v36 = vsel %vm2332_vm1, %v4501_v26, %v4502_v5 }
 0x310   :  { %8814 = vmatmul.mubr.f32.gmra.mrb[106].mxu0 %v12150_v31  ;;  %v12547_v31 = vsel %vm2332_vm1, %v4481_v35, %v12537_v3  ;;  %v4507_v35 = vrot.slane %v14653_v14, 2 }
 0x311   :  { %9323 = vmatmul.mubr.f32.gmra.mrb[40].mxu1 %v4475_v29  ;;  %8816 = vmatprep.mubr.f32.mxu0 %v12160_v12  ;;  %v4485_v12 = vsel %vm2332_vm1, %v12537_v3, %v4484_v25  ;;  %v4504_v29 = vrot.slane %v12233_v19, 2 }
 0x312   :  { %9325 = vmatprep.mubr.f32.mxu1 %v12533_v50 }
 0x314   :  { %8817 = vmatmul.mubr.f32.gmra.mrb[108].mxu0 %v12162_v22  ;;  %v12561_v22 = vsel %vm2332_vm1, %v4486_v53, %v12551_v60 }
 0x315   :  { %9326 = vmatmul.mubr.f32.gmra.mrb[42].mxu1 %v4480_v24  ;;  %8819 = vmatprep.mubr.f32.mxu0 %v12172_v21  ;;  %v4490_v21 = vsel %vm2332_vm1, %v12551_v60, %v4489_v33  ;;  %v4505_v24 = vsel %vm2332_vm1, %v4502_v5, %v4504_v29  ;;  %v14663_v5 = vld [vmem:[#allocation22_spill] sm:$0xff]  ;;  %v12615_v29 = vrot.slane %v12305_v16, 2 }
 0x316   :  { %9328 = vmatprep.mubr.f32.mxu1 %v12547_v31 }
 0x317   :  { %14664 = vst [vmem:[#allocation35_spill] sm:$0xff] %v12615_v29 }
 0x318   :  { %8820 = vmatmul.mubr.f32.gmra.mrb[110].mxu0 %v12174_v17  ;;  %v4493_v17 = vsel %vm2332_vm1, %v4491_v54, %v4492_v57 }
 0x319   :  { %9329 = vmatmul.mubr.f32.gmra.mrb[44].mxu1 %v4485_v12  ;;  %8822 = vmatprep.mubr.f32.mxu0 %v12184_v58  ;;  %v12575_v58 = vpack.c.bf16 %v3121_v55, %v3120_v15  ;;  %v14656_v12 = vld [vmem:[#allocation36_spill] sm:$0xff] }
 0x31a   :  { %9331 = vmatprep.mubr.f32.mxu1 %v12561_v22  ;;  %v4512_v33 = vrot.slane %v14656_v12, 2 }
 0x31b   :  { %9871 = vmatprep.subr.bf16.mxu0 %v12575_v58 }
 0x31c   :  { %8823 = vmatmul.mubr.f32.gmra.mrb[112].mxu0 %v12186_v48  ;;  %v4498_v48 = vsel %vm2332_vm1, %v4496_v45, %v4497_v0 }
 0x31d   :  { %9332 = vmatmul.mubr.f32.gmra.mrb[46].mxu1 %v4490_v21  ;;  %8825 = vmatprep.mubr.f32.mxu0 %v12196_v40  ;;  %v4500_v40 = vsel %vm2332_vm1, %v4497_v0, %v4499_v4 }
 0x31e   :  { %9334 = vmatprep.mubr.f32.mxu1 %v4493_v17  ;;  %v14659_v17 = vld [vmem:[#allocation41_spill] sm:$0xff] }
 0x31f   :  { %v4517_v45 = vrot.slane %v14659_v17, 2 }
 0x320   :  { %8826 = vmatmul.mubr.f32.gmra.mrb[114].mxu0 %v12198_v18  ;;  %v4506_v18 = vrot.slane %v12235_v30, 2 }
 0x321   :  { %9335 = vmatmul.mubr.f32.gmra.mrb[48].mxu1 %v4495_v23  ;;  %8828 = vmatprep.mubr.f32.mxu0 %v12208_v20  ;;  %v14654_v20 = vld [vmem:[#allocation34_spill] sm:$0xff]  ;;  %v14661_v23 = vld [vmem:[#allocation17_spill] sm:$0xff] }
 0x322   :  { %9337 = vmatprep.mubr.f32.mxu1 %v4498_v48  ;;  %v4509_v25 = vrot.slane %v14654_v20, 2  ;;  %v4508_v19 = vsel %vm2332_vm1, %v4506_v18, %v4507_v35  ;;  %v4521_v4 = vrot.slane %v14661_v23, 2  ;;  %v14662_v48 = vld [vmem:[#allocation16_spill] sm:$0xff]  ;;  %v14665_v18 = vld [vmem:[#allocation19_spill] sm:$0xff] }
 0x323   :  { %v4522_v26 = vrot.slane %v14662_v48, 2 }
 0x324   :  { %8829 = vmatmul.mubr.f32.gmra.mrb[116].mxu0 %v12210_v34  ;;  %v14655_v34 = vld [vmem:[#allocation37_spill] sm:$0xff]  ;;  %v4510_v54 = vsel %vm2332_vm1, %v4507_v35, %v4509_v25 }
 0x325   :  { %9338 = vmatmul.mubr.f32.gmra.mrb[50].mxu1 %v4500_v40  ;;  %8831 = vmatprep.mubr.f32.mxu0 %v12220_v11  ;;  %v4511_v53 = vrot.slane %v14655_v34, 2  ;;  %v14657_v11 = vld [vmem:[#allocation39_spill] sm:$0xff]  ;;  %v2333_v40 = vrot.slane %v14663_v5, 2  ;;  %v4523_v35 = vsel %vm2332_vm1, %v4521_v4, %v4522_v26  ;;  %v14667_v25 = vld [vmem:[#allocation21_spill] sm:$0xff] }
 0x326   :  { %9340 = vmatprep.mubr.f32.mxu1 %v4503_v36  ;;  %v4514_v57 = vrot.slane %v14657_v11, 2  ;;  %v12640_v5 = vld [vmem:[#allocation2 + $0x38] sm:$0xff] }
 0x327   :  { %v4513_v21 = vsel %vm2332_vm1, %v4511_v53, %v4512_v33  ;;  %v2335_v16 = vsel %vm2332_vm1, %v2333_v40, %v12615_v29  ;;  %v10635_v40 = vld [vmem:[#allocation2 + $0x40] sm:$0x3] }
 0x328   :  { %8832 = vmatmul.mubr.f32.gmra.mrb[118].mxu0 %v12222_v61  ;;  %v14658_v61 = vld [vmem:[#allocation38_spill] sm:$0xff]  ;;  %v4515_v0 = vsel %vm2332_vm1, %v4512_v33, %v4514_v57  ;;  %v14668_v33 = vld [vmem:[#allocation20_spill] sm:$0xff] }
 0x329   :  { %9341 = vmatmul.mubr.f32.gmra.mrb[52].mxu1 %v4505_v24  ;;  %8834 = vmatprep.mubr.f32.mxu0 %v12235_v30  ;;  %v4516_v41 = vrot.slane %v14658_v61, 2  ;;  %v14660_v30 = vld [vmem:[#allocation40_spill] sm:$0xff]  ;;  %v14666_v24 = vld [vmem:[#allocation18_spill] sm:$0xff] }
 0x32a   :  { %9343 = vmatprep.mubr.f32.mxu1 %v4508_v19  ;;  %v4519_v15 = vrot.slane %v14660_v30, 2  ;;  %v4526_v20 = vrot.slane %v14666_v24, 2  ;;  %v4527_v19 = vrot.slane %v14667_v25, 2  ;;  %v3122_v57 = vld [vmem:[#allocation9 + $0x190] sm:$0xff]  ;;  %v5948_v30 = vld [vmem:[#allocation9 + $0x398] sm:$0xff]  ;;  %v5950_v24 = vld [vmem:[#allocation9 + $0x3a8] sm:$0xff] }
 0x32b   :  { %v4518_v55 = vsel %vm2332_vm1, %v4516_v41, %v4517_v45 }
 0x32c   :  { %8835 = vmatmul.mubr.f32.gmra.mrb[120].mxu0 %v14653_v14  ;;  %v4520_v36 = vsel %vm2332_vm1, %v4517_v45, %v4519_v15  ;;  %v4524_v14 = vrot.slane %v14665_v18, 2  ;;  %v4528_v11 = vsel %vm2332_vm1, %v4526_v20, %v4527_v19  ;;  %v3124_v18 = vld [vmem:[#allocation9 + $0x1a0] sm:$0xff]  ;;  %v14671_v20 = vld [vmem:[#allocation29_spill] sm:$0xff] }
 0x32d   :  { %9344 = vmatmul.mubr.f32.gmra.mrb[54].mxu1 %v4510_v54  ;;  %8837 = vmatprep.mubr.f32.mxu0 %v14655_v34  ;;  %v10633_v34 = vld [vmem:[#allocation2 + $0x10] sm:$0x3]  ;;  %v4529_v54 = vrot.slane %v14668_v33, 2 }
 0x32e   :  { %9346 = vmatprep.mubr.f32.mxu1 %v4513_v21  ;;  %v2336_v53 = vrot.slane %v10633_v34, 2  ;;  %v3123_v21 = vld [vmem:[#allocation9 + $0x198] sm:$0xff]  ;;  %v12650_v34 = vld [vmem:[#allocation2 + $0x50] sm:$0xff] }
 0x32f   :  { %v4530_v41 = vsel %vm2332_vm1, %v4527_v19, %v4529_v54  ;;  %v9874_v15 = vpack.c.bf16 %v3123_v21, %v3122_v57  ;;  %v3126_v33 = vld [vmem:[#allocation9 + $0x1b0] sm:$0xff]  ;;  %v3127_v54 = vld [vmem:[#allocation9 + $0x1b8] sm:$0xff]  ;;  %v14672_v21 = vld [vmem:[#allocation28_spill] sm:$0xff] }
 0x330   :  { %8838 = vmatmul.mubr.f32.gmra.mrb[122].mxu0 %v14656_v12  ;;  %v4525_v12 = vsel %vm2332_vm1, %v4522_v26, %v4524_v14  ;;  %v3125_v14 = vld [vmem:[#allocation9 + $0x1a8] sm:$0xff]  ;;  %v5952_v57 = vld [vmem:[#allocation9 + $0x3b8] sm:$0xff] }
 0x331   :  { %9347 = vmatmul.mubr.f32.gmra.mrb[56].mxu1 %v4515_v0  ;;  %8840 = vmatprep.mubr.f32.mxu0 %v14658_v61  ;;  %v2337_v61 = vsel %vm2332_vm1, %v12615_v29, %v2336_v53  ;;  %v5947_v0 = vld [vmem:[#allocation9 + $0x390] sm:$0xff]  ;;  %v9878_v25 = vpack.c.bf16 %v3125_v14, %v3124_v18  ;;  %v10636_v53 = vld [vmem:[#allocation2 + $0x58] sm:$0x3] }
 0x332   :  { %9349 = vmatprep.mubr.f32.mxu1 %v4518_v55  ;;  %v12633_v55 = vld [vmem:[#allocation2 + $0x30] sm:$0xff]  ;;  %v10002_v4 = vpack.c.bf16 %v5948_v30, %v5947_v0  ;;  %v14675_v18 = vld [vmem:[#allocation31_spill] sm:$0xff] }
 0x334   :  { %8841 = vmatmul.mubr.f32.gmra.mrb[124].mxu0 %v14659_v17  ;;  %v10634_v17 = vld [vmem:[#allocation2 + $0x28] sm:$0x3] }
 0x335   :  { %9350 = vmatmul.mubr.f32.gmra.mrb[58].mxu1 %v4520_v36  ;;  %8843 = vmatprep.mubr.f32.mxu0 %v14661_v23  ;;  %v2341_v45 = vrot.slane %v10634_v17, 2  ;;  %v14669_v23 = vld [vmem:[#allocation26_spill] sm:$0xff]  ;;  %v2346_v36 = vrot.slane %v10635_v40, 2  ;;  %v12659_v17 = vld [vmem:[#allocation2 + $0x68] sm:$0xff] }
 0x336   :  { %9352 = vmatprep.mubr.f32.mxu1 %v4523_v35  ;;  %v5949_v35 = vld [vmem:[#allocation9 + $0x3a0] sm:$0xff]  ;;  %v14674_v40 = vld [vmem:[#allocation30_spill] sm:$0xff] }
 0x337   :  { %v2347_v19 = vsel %vm2332_vm1, %v12313_v43, %v2346_v36  ;;  %v9882_v43 = vpack.c.bf16 %v3127_v54, %v3126_v33  ;;  %v5956_v33 = vld [vmem:[#allocation9 + $0x3d8] sm:$0xff]  ;;  %v14676_v54 = vld [vmem:[#allocation32_spill] sm:$0xff] }
 0x338   :  { %8844 = vmatmul.mubr.f32.gmra.mrb[126].mxu0 %v14662_v48  ;;  %v14670_v48 = vld [vmem:[#allocation23_spill] sm:$0xff] }
 0x339   :  { %9353 = vmatmul.mubr.f32.gmra.mrb[60].mxu1 %v4525_v12  ;;  %8878 = vmatprep.mubr.f32.mxu0 %v2335_v16  ;;  %v2342_v26 = vsel %vm2332_vm1, %v14670_v48, %v2341_v45  ;;  %v2351_v16 = vrot.slane %v10636_v53, 2  ;;  %v10006_v12 = vpack.c.bf16 %v5950_v24, %v5949_v35  ;;  %v10637_v45 = vld [vmem:[#allocation2 + $0x70] sm:$0x3]  ;;  %v12662_v48 = vld [vmem:[#allocation2 + $0x78] sm:$0xff]  ;;  %v12668_v35 = vld [vmem:[#allocation2 + $0x80] sm:$0xff] }
 0x33a   :  { %9355 = vmatprep.mubr.f32.mxu1 %v4528_v11  ;;  %v5951_v11 = vld [vmem:[#allocation9 + $0x3b0] sm:$0xff]  ;;  %v2356_v0 = vrot.slane %v10637_v45, 2  ;;  %v10638_v24 = vld [vmem:[#allocation2 + $0x88] sm:$0x3]  ;;  %v3131_v53 = vld [vmem:[#allocation9 + $0x1d8] sm:$0xff] }
 0x33b   :  { %v10010_v30 = vpack.c.bf16 %v5952_v57, %v5951_v11  ;;  %v14677_v57 = vld [vmem:[#allocation33_spill] sm:$0xff] }
 0x33c   :  { %8879 = vmatmul.mubr.f32.vlgmr.msra.gmra.mrb[64].mxu0 %v2337_v61  ;;  %v14673_v61 = vld [vmem:[#allocation25_spill] sm:$0xff]  ;;  %v2357_v14 = vsel %vm2332_vm1, %v14675_v18, %v2356_v0  ;;  %v3132_v0 = vld [vmem:[#allocation9 + $0x1e0] sm:$0xff] }
 0x33d   :  { %9356 = vmatmul.mubr.f32.gmra.mrb[62].mxu1 %v4530_v41  ;;  %8881 = vmatprep.mubr.f32.mxu0 %v14669_v23  ;;  %v2352_v41 = vsel %vm2332_vm1, %v14673_v61, %v2351_v16  ;;  %v3129_v23 = vld [vmem:[#allocation9 + $0x1c8] sm:$0xff]  ;;  %v12671_v16 = vld [vmem:[#allocation2 + $0x90] sm:$0xff]  ;;  %v10639_v61 = vld [vmem:[#allocation2 + $0xa0] sm:$0x3] }
 0x33e   :  { %9390 = vmatprep.mubr.f32.mxu1 %v12633_v55  ;;  %9873 = vmatpush3.bf16.msra.mxu0 %v12575_v58  ;;  %v12645_v58 = vld [vmem:[#allocation2 + $0x48] sm:$0xff] }
 0x33f   :  { %9875 = vmatprep.subr.bf16.mxu0 %v9874_v15 }
 0x340   :  { %8882 = vmatmul.mubr.f32.gmra.mrb[66].mxu0 %v2342_v26  ;;  %v5954_v26 = vld [vmem:[#allocation9 + $0x3c8] sm:$0xff] }
 0x341   :  { %9391 = vmatmul.mubr.f32.vlgmr.msra.gmra.mrb[0].mxu1 %v12640_v5  ;;  %8884 = vmatprep.mubr.f32.mxu0 %v14671_v20  ;;  %v2361_v20 = vrot.slane %v10638_v24, 2 }
 0x342   :  { %10001 = vmatpush3.bf16.msra.mxu1 %v12382_v27  ;;  %9393 = vmatprep.mubr.f32.mxu1 %v12645_v58  ;;  %v12653_v27 = vld [vmem:[#allocation2 + $0x60] sm:$0xff] }
 0x343   :  { %10003 = vmatprep.subr.bf16.mxu1 %v10002_v4  ;;  %9877 = vmatpush3.bf16.msra.mxu0 %v9874_v15  ;;  %v3128_v15 = vld [vmem:[#allocation9 + $0x1c0] sm:$0xff] }
 0x344   :  { %8885 = vmatmul.mubr.f32.gmra.mrb[68].mxu0 %v2347_v19  ;;  %9879 = vmatprep.subr.bf16.mxu0 %v9878_v25  ;;  %v9886_v36 = vpack.c.bf16 %v3129_v23, %v3128_v15  ;;  %v3130_v19 = vld [vmem:[#allocation9 + $0x1d0] sm:$0xff]  ;;  %v3133_v15 = vld [vmem:[#allocation9 + $0x1e8] sm:$0xff] }
 0x345   :  { %9394 = vmatmul.mubr.f32.gmra.mrb[2].mxu1 %v12650_v34  ;;  %8887 = vmatprep.mubr.f32.mxu0 %v14672_v21  ;;  %v9890_v11 = vpack.c.bf16 %v3131_v53, %v3130_v19  ;;  %v2362_v21 = vsel %vm2332_vm1, %v14677_v57, %v2361_v20  ;;  %v12680_v23 = vld [vmem:[#allocation2 + $0xa8] sm:$0xff]  ;;  %v3134_v19 = vld [vmem:[#allocation9 + $0x1f0] sm:$0xff]  ;;  %v3135_v53 = vld [vmem:[#allocation9 + $0x1f8] sm:$0xff] }
 0x346   :  { %9396 = vmatprep.mubr.f32.mxu1 %v12653_v27  ;;  %10005 = vmatpush3.bf16.msra.mxu1 %v10002_v4  ;;  %v5953_v4 = vld [vmem:[#allocation9 + $0x3c0] sm:$0xff] }
 0x347   :  { %10007 = vmatprep.subr.bf16.mxu1 %v10006_v12  ;;  %9881 = vmatpush3.bf16.msra.mxu0 %v9878_v25  ;;  %v10014_v25 = vpack.c.bf16 %v5954_v26, %v5953_v4  ;;  %v5958_v4 = vld [vmem:[#allocation9 + $0x3e8] sm:$0xff]  ;;  %v14678_v26 = vld [vmem:[#allocation27_spill] sm:$0xff] }
 0x348   :  { %8888 = vmatmul.mubr.f32.gmra.mrb[70].mxu0 %v2352_v41  ;;  %9883 = vmatprep.subr.bf16.mxu0 %v9882_v43  ;;  %v2366_v41 = vrot.slane %v10639_v61, 2 }
 0x349   :  { %9397 = vmatmul.mubr.f32.gmra.mrb[4].mxu1 %v12659_v17  ;;  %8890 = vmatprep.mubr.f32.mxu0 %v14674_v40  ;;  %v9894_v40 = vpack.c.bf16 %v3133_v15, %v3132_v0  ;;  %v12698_v0 = vld [vmem:[#allocation2 + $0xd8] sm:$0xff]  ;;  %v6635_v15 = vld [vmem:[#allocation9 + $0x400] sm:$0xff] }
 0x34a   :  { %9399 = vmatprep.mubr.f32.mxu1 %v12662_v48  ;;  %10009 = vmatpush3.bf16.msra.mxu1 %v10006_v12  ;;  %v5955_v12 = vld [vmem:[#allocation9 + $0x3d0] sm:$0xff]  ;;  %v2367_v18 = vsel %vm2332_vm1, %v12350_v32, %v2366_v41  ;;  %v9898_v32 = vpack.c.bf16 %v3135_v53, %v3134_v19  ;;  %v14680_v19 = vld [vmem:[#allocation44_spill] sm:$0xff] }
 0x34b   :  { %10011 = vmatprep.subr.bf16.mxu1 %v10010_v30  ;;  %9885 = vmatpush3.bf16.msra.mxu0 %v9882_v43  ;;  %v12677_v43 = vld [vmem:[#allocation2 + $0x98] sm:$0xff]  ;;  %v10018_v45 = vpack.c.bf16 %v5956_v33, %v5955_v12  ;;  %v12689_v12 = vld [vmem:[#allocation2 + $0xc0] sm:$0xff] }
 0x34c   :  { %8891 = vmatmul.mubr.f32.gmra.mrb[72].mxu0 %v2357_v14  ;;  %9887 = vmatprep.subr.bf16.mxu0 %v9886_v36  ;;  %v10640_v14 = vld [vmem:[#allocation2 + $0xb8] sm:$0x3] }
 0x34d   :  { %9400 = vmatmul.mubr.f32.gmra.mrb[6].mxu1 %v12668_v35  ;;  %8893 = vmatprep.mubr.f32.mxu0 %v14676_v54  ;;  %v2371_v24 = vrot.slane %v10640_v14, 2  ;;  %v5960_v33 = vld [vmem:[#allocation9 + $0x3f8] sm:$0xff]  ;;  %v14679_v54 = vld [vmem:[#allocation24_spill] sm:$0xff] }
 0x34e   :  { %9402 = vmatprep.mubr.f32.mxu1 %v12671_v16  ;;  %10013 = vmatpush3.bf16.msra.mxu1 %v10010_v30  ;;  %v5957_v30 = vld [vmem:[#allocation9 + $0x3e0] sm:$0xff] }
 0x34f   :  { %10015 = vmatprep.subr.bf16.mxu1 %v10014_v25  ;;  %9889 = vmatpush3.bf16.msra.mxu0 %v9886_v36  ;;  %v12686_v36 = vld [vmem:[#allocation2 + $0xb0] sm:$0xff]  ;;  %v10022_v20 = vpack.c.bf16 %v5958_v4, %v5957_v30  ;;  %v2372_v57 = vsel %vm2332_vm1, %v12359_v2, %v2371_v24  ;;  %v6636_v30 = vld [vmem:[#allocation9 + $0x408] sm:$0xff]  ;;  %v10643_v14 = vld [vmem:[#allocation2 + $0x100] sm:$0x3] }
 0x350   :  { %8894 = vmatmul.mubr.f32.gmra.mrb[74].mxu0 %v2362_v21  ;;  %9891 = vmatprep.subr.bf16.mxu0 %v9890_v11  ;;  %v10641_v21 = vld [vmem:[#allocation2 + $0xd0] sm:$0x3]  ;;  %v10642_v4 = vld [vmem:[#allocation2 + $0xe8] sm:$0x3]  ;;  %v2386_v24 = vrot.slane %v10643_v14, 2 }
 0x351   :  { %9403 = vmatmul.mubr.f32.gmra.mrb[8].mxu1 %v12677_v43  ;;  %8896 = vmatprep.mubr.f32.mxu0 %v14678_v26  ;;  %v2376_v61 = vrot.slane %v10641_v21, 2  ;;  %v2381_v26 = vrot.slane %v10642_v4, 2  ;;  %v14685_v4 = vld [vmem:[#allocation47_spill] sm:$0xff]  ;;  %v10646_v14 = vld [vmem:[#allocation2 + $0x148] sm:$0x3] }
 0x352   :  { %9405 = vmatprep.mubr.f32.mxu1 %v12680_v23  ;;  %10017 = vmatpush3.bf16.msra.mxu1 %v10014_v25  ;;  %v5959_v25 = vld [vmem:[#allocation9 + $0x3f0] sm:$0xff] }
 0x353   :  { %10019 = vmatprep.subr.bf16.mxu1 %v10018_v45  ;;  %9893 = vmatpush3.bf16.msra.mxu0 %v9890_v11  ;;  %v12695_v11 = vld [vmem:[#allocation2 + $0xc8] sm:$0xff]  ;;  %v10026_v41 = vpack.c.bf16 %v5960_v33, %v5959_v25  ;;  %v2377_v2 = vsel %vm2332_vm1, %v12368_v47, %v2376_v61  ;;  %v2382_v47 = vsel %vm2332_vm1, %v12377_v1, %v2381_v26  ;;  %v12725_v25 = vld [vmem:[#allocation2 + $0x110] sm:$0xff]  ;;  %v10644_v1 = vld [vmem:[#allocation2 + $0x118] sm:$0x3] }
 0x354   :  { %8897 = vmatmul.mubr.f32.gmra.mrb[76].mxu0 %v2367_v18  ;;  %9895 = vmatprep.subr.bf16.mxu0 %v9894_v40  ;;  %v12709_v18 = vld [vmem:[#allocation2 + $0xf0] sm:$0xff]  ;;  %v2391_v33 = vrot.slane %v10644_v1, 2  ;;  %v12734_v61 = vld [vmem:[#allocation2 + $0x128] sm:$0xff]  ;;  %v10647_v1 = vld [vmem:[#allocation2 + $0x160] sm:$0x3] }
 0x355   :  { %9406 = vmatmul.mubr.f32.gmra.mrb[10].mxu1 %v12686_v36  ;;  %8899 = vmatprep.mubr.f32.mxu0 %v14679_v54  ;;  %v12728_v54 = vld [vmem:[#allocation2 + $0x120] sm:$0xff] }
 0x356   :  { %9408 = vmatprep.mubr.f32.mxu1 %v12689_v12  ;;  %10021 = vmatpush3.bf16.msra.mxu1 %v10018_v45  ;;  %v12704_v45 = vld [vmem:[#allocation2 + $0xe0] sm:$0xff] }
 0x357   :  { %10023 = vmatprep.subr.bf16.mxu1 %v10022_v20  ;;  %9897 = vmatpush3.bf16.msra.mxu0 %v9894_v40  ;;  %v12706_v40 = vpack.c.bf16 %v6636_v30, %v6635_v15  ;;  %v12737_v30 = vld [vmem:[#allocation2 + $0x138] sm:$0xff] }
 0x358   :  { %8900 = vmatmul.mubr.f32.gmra.mrb[78].mxu0 %v2372_v57  ;;  %9899 = vmatprep.subr.bf16.mxu0 %v9898_v32  ;;  %v14683_v57 = vld [vmem:[#allocation45_spill] sm:$0xff] }
 0x359   :  { %9409 = vmatmul.mubr.f32.gmra.mrb[12].mxu1 %v12695_v11  ;;  %8902 = vmatprep.mubr.f32.mxu0 %v12375_v6  ;;  %v12715_v6 = vld [vmem:[#allocation2 + $0xf8] sm:$0xff]  ;;  %v2392_v21 = vsel %vm2332_vm1, %v14683_v57, %v2391_v33  ;;  %v2406_v33 = vrot.slane %v10647_v1, 2  ;;  %v12784_v1 = vld [vmem:[#allocation2 + $0x1e0] sm:$0xff] }
 0x35a   :  { %9411 = vmatprep.mubr.f32.mxu1 %v12698_v0  ;;  %10025 = vmatpush3.bf16.msra.mxu1 %v10022_v20  ;;  %v12719_v20 = vld [vmem:[#allocation2 + $0x108] sm:$0xff] }
 0x35b   :  { %10027 = vmatprep.subr.bf16.mxu1 %v10026_v41  ;;  %9901 = vmatpush3.bf16.msra.mxu0 %v9898_v32  ;;  %v14682_v32 = vld [vmem:[#allocation46_spill] sm:$0xff]  ;;  %v2407_v57 = vsel %vm2332_vm1, %v12425_v62, %v2406_v33  ;;  %v12790_v33 = vld [vmem:[#allocation2 + $0x1e8] sm:$0xff] }
 0x35c   :  { %8903 = vmatmul.mubr.f32.gmra.mrb[80].mxu0 %v2377_v2  ;;  %v14684_v2 = vld [vmem:[#allocation48_spill] sm:$0xff] }
 0x35d   :  { %9412 = vmatmul.mubr.f32.gmra.mrb[14].mxu1 %v12704_v45  ;;  %8905 = vmatprep.mubr.f32.mxu0 %v12386_v59  ;;  %v14681_v59 = vld [vmem:[#allocation43_spill] sm:$0xff] }
 0x35e   :  { %9414 = vmatprep.mubr.f32.mxu1 %v12709_v18  ;;  %10029 = vmatpush3.bf16.msra.mxu1 %v10026_v41  ;;  %v2387_v53 = vsel %vm2332_vm1, %v14681_v59, %v2386_v24  ;;  %v10645_v41 = vld [vmem:[#allocation2 + $0x130] sm:$0x3]  ;;  %v2401_v24 = vrot.slane %v10646_v14, 2  ;;  %v10650_v14 = vld [vmem:[#allocation2 + $0x1d8] sm:$0x3] }
 0x35f   :  { %10031 = vmatprep.subr.bf16.mxu1 %v12706_v40  ;;  %v2396_v15 = vrot.slane %v10645_v41, 2 }
 0x360   :  { %8906 = vmatmul.mubr.f32.gmra.mrb[82].mxu0 %v2382_v47  ;;  %v12743_v47 = vld [vmem:[#allocation2 + $0x140] sm:$0xff]  ;;  %v2402_v59 = vsel %vm2332_vm1, %v12416_v44, %v2401_v24  ;;  %v10648_v44 = vld [vmem:[#allocation2 + $0x178] sm:$0x3]  ;;  %v2421_v24 = vrot.slane %v10650_v14, 2  ;;  %v12817_v14 = vld [vmem:[#allocation2 + $0x230] sm:$0xff] }
 0x361   :  { %9415 = vmatmul.mubr.f32.gmra.mrb[16].mxu1 %v12715_v6  ;;  %8908 = vmatprep.mubr.f32.mxu0 %v14680_v19  ;;  %v2397_v26 = vsel %vm2332_vm1, %v14685_v4, %v2396_v15  ;;  %v12746_v19 = vld [vmem:[#allocation2 + $0x150] sm:$0xff]  ;;  %v2411_v41 = vrot.slane %v10648_v44, 2  ;;  %v12765_v15 = vld [vmem:[#allocation2 + $0x180] sm:$0xff]  ;;  %v12771_v4 = vld [vmem:[#allocation2 + $0x198] sm:$0xff] }
 0x362   :  { %9417 = vmatprep.mubr.f32.mxu1 %v12719_v20  ;;  %v12793_v44 = vld [vmem:[#allocation2 + $0x1f8] sm:$0xff] }
 0x363   :  { %v2412_v62 = vsel %vm2332_vm1, %v12434_v10, %v2411_v41  ;;  %v2422_v10 = vsel %vm2332_vm1, %v12453_v39, %v2421_v24  ;;  %v12799_v41 = vld [vmem:[#allocation2 + $0x200] sm:$0xff]  ;;  %v10655_v24 = vld [vmem:[#allocation2 + $0x238] sm:$0x3] }
 0x364   :  { %8909 = vmatmul.mubr.f32.gmra.mrb[84].mxu0 %v2387_v53  ;;  %v12752_v53 = vld [vmem:[#allocation2 + $0x158] sm:$0xff] }
 0x365   :  { %9418 = vmatmul.mubr.f32.gmra.mrb[18].mxu1 %v12725_v25  ;;  %8911 = vmatprep.mubr.f32.mxu0 %v14682_v32  ;;  %v12755_v32 = vld [vmem:[#allocation2 + $0x168] sm:$0xff] }
 0x366   :  { %9420 = vmatprep.mubr.f32.mxu1 %v12728_v54 }
 0x368   :  { %8912 = vmatmul.mubr.f32.gmra.mrb[86].mxu0 %v2392_v21  ;;  %v12762_v21 = vld [vmem:[#allocation2 + $0x170] sm:$0xff] }
 0x369   :  { %9421 = vmatmul.mubr.f32.gmra.mrb[20].mxu1 %v12734_v61  ;;  %8914 = vmatprep.mubr.f32.mxu0 %v14684_v2 }
 0x36a   :  { %9423 = vmatprep.mubr.f32.mxu1 %v12737_v30 }
 0x36c   :  { %8915 = vmatmul.mubr.f32.gmra.mrb[88].mxu0 %v2397_v26  ;;  %v12775_v26 = vld [vmem:[#allocation2 + $0x188] sm:$0xff] }
 0x36d   :  { %9424 = vmatmul.mubr.f32.gmra.mrb[22].mxu1 %v12743_v47  ;;  %8917 = vmatprep.mubr.f32.mxu0 %v12423_v46  ;;  %v2413_v46 = vrot.slane %v12455_v63, 2 }
 0x36e   :  { %9426 = vmatprep.mubr.f32.mxu1 %v12746_v19 }
 0x36f   :  { %v2415_v63 = vsel %vm2332_vm1, %v2413_v46, %v12615_v29  ;;  %v10652_v46 = vld [vmem:[#allocation2 + $0x1f0] sm:$0x3] }
 0x370   :  { %8918 = vmatmul.mubr.f32.gmra.mrb[90].mxu0 %v2402_v59  ;;  %v12781_v59 = vld [vmem:[#allocation2 + $0x8] sm:$0xff] }
 0x371   :  { %9427 = vmatmul.mubr.f32.gmra.mrb[24].mxu1 %v12752_v53  ;;  %8920 = vmatprep.mubr.f32.mxu0 %v12432_v56  ;;  %v10649_v56 = vld [vmem:[#allocation2 + $0x1c0] sm:$0x3] }
 0x372   :  { %9429 = vmatprep.mubr.f32.mxu1 %v12755_v32  ;;  %v2416_v2 = vrot.slane %v10649_v56, 2  ;;  %v10653_v56 = vld [vmem:[#allocation2 + $0x208] sm:$0x3] }
 0x373   :  { %v2431_v39 = vrot.slane %v10653_v56, 2  ;;  %v12835_v56 = vld [vmem:[#allocation2 + $0x260] sm:$0xff] }
 0x374   :  { %8921 = vmatmul.mubr.f32.gmra.mrb[92].mxu0 %v2407_v57  ;;  %v2426_v57 = vrot.slane %v10652_v46, 2  ;;  %v12826_v46 = vld [vmem:[#allocation2 + $0x248] sm:$0xff] }
 0x375   :  { %9430 = vmatmul.mubr.f32.gmra.mrb[26].mxu1 %v12762_v21  ;;  %8923 = vmatprep.mubr.f32.mxu0 %v12442_v38  ;;  %v2417_v38 = vsel %vm2332_vm1, %v12615_v29, %v2416_v2  ;;  %v12802_v2 = vld [vmem:[#allocation2 + $0x210] sm:$0xff] }
 0x376   :  { %9432 = vmatprep.mubr.f32.mxu1 %v12765_v15 }
 0x378   :  { %8924 = vmatmul.mubr.f32.gmra.mrb[94].mxu0 %v2412_v62  ;;  %v10654_v62 = vld [vmem:[#allocation2 + $0x220] sm:$0x3] }
 0x379   :  { %9433 = vmatmul.mubr.f32.gmra.mrb[28].mxu1 %v12775_v26  ;;  %8926 = vmatprep.mubr.f32.mxu0 %v2415_v63  ;;  %v12808_v63 = vld [vmem:[#allocation2 + $0x218] sm:$0xff] }
 0x37a   :  { %9435 = vmatprep.mubr.f32.mxu1 %v12771_v4 }
 0x37c   :  { %8927 = vmatmul.mubr.f32.gmra.mrb[96].mxu0 %v2417_v38  ;;  %v12811_v38 = vld [vmem:[#allocation2 + $0x228] sm:$0xff] }
 0x37d   :  { %9436 = vmatmul.mubr.f32.gmra.mrb[30].mxu1 %v12781_v59  ;;  %8929 = vmatprep.mubr.f32.mxu0 %v12463_v8  ;;  %v2427_v8 = vsel %vm2332_vm1, %v12467_v42, %v2426_v57  ;;  %v2436_v42 = vrot.slane %v10654_v62, 2  ;;  %v10656_v57 = vld [vmem:[#allocation2 + $0x250] sm:$0x3]  ;;  %v12844_v62 = vld [vmem:[#allocation2 + $0x278] sm:$0xff] }
 0x37e   :  { %9438 = vmatprep.mubr.f32.mxu1 %v12784_v1 }
 0x380   :  { %8930 = vmatmul.mubr.f32.gmra.mrb[98].mxu0 %v2422_v10  ;;  %v12820_v10 = vld [vmem:[#allocation2 + $0x240] sm:$0xff] }
 0x381   :  { %9439 = vmatmul.mubr.f32.gmra.mrb[32].mxu1 %v12790_v33  ;;  %8932 = vmatprep.mubr.f32.mxu0 %v12477_v28  ;;  %v2432_v28 = vsel %vm2332_vm1, %v12481_v37, %v2431_v39  ;;  %v2441_v37 = vrot.slane %v10655_v24, 2  ;;  %v10657_v39 = vld [vmem:[#allocation2 + $0x268] sm:$0x3] }
 0x382   :  { %9441 = vmatprep.mubr.f32.mxu1 %v12793_v44  ;;  %v12849_v24 = vld [vmem:[#allocation2 + $0x288] sm:$0xff] }
 0x383   :  { %14686 = vst [vmem:[#allocation34_spill] sm:$0xff] %v12849_v24 }
 0x384   :  { %8933 = vmatmul.mubr.f32.gmra.mrb[100].mxu0 %v2427_v8  ;;  %v12829_v8 = vld [vmem:[#allocation2 + $0x258] sm:$0xff] }
 0x385   :  { %9442 = vmatmul.mubr.f32.gmra.mrb[34].mxu1 %v12799_v41  ;;  %8935 = vmatprep.mubr.f32.mxu0 %v12491_v52  ;;  %v2437_v52 = vsel %vm2332_vm1, %v12495_v49, %v2436_v42  ;;  %v2446_v49 = vrot.slane %v10656_v57, 2  ;;  %v10658_v42 = vld [vmem:[#allocation2 + $0x280] sm:$0x3]  ;;  %v12859_v57 = vld [vmem:[#allocation2 + $0x290] sm:$0xff] }
 0x386   :  { %9444 = vmatprep.mubr.f32.mxu1 %v12802_v2 }
 0x388   :  { %8936 = vmatmul.mubr.f32.gmra.mrb[102].mxu0 %v2432_v28  ;;  %v12838_v28 = vld [vmem:[#allocation2 + $0x270] sm:$0xff] }
 0x389   :  { %9445 = vmatmul.mubr.f32.gmra.mrb[36].mxu1 %v12808_v63  ;;  %8938 = vmatprep.mubr.f32.mxu0 %v12505_v13  ;;  %v2442_v13 = vsel %vm2332_vm1, %v12509_v51, %v2441_v37  ;;  %v2451_v51 = vrot.slane %v10657_v39, 2  ;;  %v2458_v37 = vrot.slane %v12849_v24, 2 }
 0x38a   :  { %9447 = vmatprep.mubr.f32.mxu1 %v12811_v38 }
 0x38c   :  { %8939 = vmatmul.mubr.f32.gmra.mrb[104].mxu0 %v2437_v52  ;;  %v12847_v52 = vld [vmem:[#allocation2 + $0x288] sm:$0xff] }
 0x38d   :  { %9448 = vmatmul.mubr.f32.gmra.mrb[38].mxu1 %v12817_v14  ;;  %8941 = vmatprep.mubr.f32.mxu0 %v12519_v9  ;;  %v2447_v9 = vsel %vm2332_vm1, %v12523_v7, %v2446_v49  ;;  %v2456_v7 = vrot.slane %v10658_v42, 2  ;;  %v10661_v49 = vld [vmem:[#allocation2 + $0x298] sm:$0x3]  ;;  %v12868_v42 = vld [vmem:[#allocation2 + $0x2a8] sm:$0xff] }
 0x38e   :  { %9450 = vmatprep.mubr.f32.mxu1 %v12820_v10  ;;  %14690 = vst [vmem:[#allocation38_spill] sm:$0xff] %v12868_v42  ;;  %v2464_v29 = vrot.slane %v12868_v42, 2 }
 0x390   :  { %8942 = vmatmul.mubr.f32.gmra.mrb[106].mxu0 %v2442_v13  ;;  %v12852_v13 = vld [vmem:[#allocation2 + $0x290] sm:$0xff] }
 0x391   :  { %9451 = vmatmul.mubr.f32.gmra.mrb[40].mxu1 %v12826_v46  ;;  %8944 = vmatprep.mubr.f32.mxu0 %v12533_v50  ;;  %v2452_v50 = vsel %vm2332_vm1, %v12537_v3, %v2451_v51  ;;  %14687 = vst [vmem:[#allocation37_spill] sm:$0xff] %v12852_v13  ;;  %v2457_v3 = vsel %vm2332_vm1, %v12551_v60, %v2456_v7  ;;  %v12863_v51 = vld [vmem:[#allocation2 + $0x2a0] sm:$0xff]  ;;  %v12873_v7 = vld [vmem:[#allocation2 + $0x2a8] sm:$0xff] }
 0x392   :  { %9453 = vmatprep.mubr.f32.mxu1 %v12829_v8  ;;  %14688 = vst [vmem:[#allocation36_spill] sm:$0xff] %v12863_v51  ;;  %14691 = vst [vmem:[#allocation41_spill] sm:$0xff] %v12873_v7 }
 0x394   :  { %8945 = vmatmul.mubr.f32.gmra.mrb[108].mxu0 %v2447_v9  ;;  %v2461_v9 = vrot.slane %v10661_v49, 2 }
 0x395   :  { %9454 = vmatmul.mubr.f32.gmra.mrb[42].mxu1 %v12835_v56  ;;  %8947 = vmatprep.mubr.f32.mxu0 %v12547_v31  ;;  %v2459_v31 = vrot.slane %v12852_v13, 2  ;;  %v12877_v13 = vld [vmem:[#allocation2 + $0x2b8] sm:$0xff] }
 0x396   :  { %9456 = vmatprep.mubr.f32.mxu1 %v12838_v28  ;;  %14692 = vst [vmem:[#allocation40_spill] sm:$0xff] %v12877_v13 }
 0x397   :  { %v2460_v39 = vsel %vm2332_vm1, %v2458_v37, %v2459_v31  ;;  %v2462_v60 = vsel %vm2332_vm1, %v2459_v31, %v2461_v9  ;;  %v12887_v9 = vld [vmem:[#allocation2 + $0x2c0] sm:$0xff] }
 0x398   :  { %8948 = vmatmul.mubr.f32.gmra.mrb[110].mxu0 %v2452_v50  ;;  %v12865_v50 = vld [vmem:[#allocation2 + $0x2a0] sm:$0xff]  ;;  %14695 = vst [vmem:[#allocation22_spill] sm:$0xff] %v12887_v9 }
 0x399   :  { %9457 = vmatmul.mubr.f32.gmra.mrb[44].mxu1 %v12844_v62  ;;  %8950 = vmatprep.mubr.f32.mxu0 %v12561_v22  ;;  %14689 = vst [vmem:[#allocation39_spill] sm:$0xff] %v12865_v50  ;;  %v2463_v22 = vrot.slane %v12865_v50, 2  ;;  %v12879_v50 = vld [vmem:[#allocation2 + $0x2b8] sm:$0xff] }
 0x39a   :  { %9459 = vmatprep.mubr.f32.mxu1 %v12847_v52  ;;  %14693 = vst [vmem:[#allocation17_spill] sm:$0xff] %v12879_v50  ;;  %v2468_v42 = vrot.slane %v12879_v50, 2  ;;  %v12893_v50 = vld [vmem:[#allocation2 + $0x2d0] sm:$0xff] }
 0x39b   :  { %v2465_v37 = vsel %vm2332_vm1, %v2463_v22, %v2464_v29  ;;  %14697 = vst [vmem:[#allocation18_spill] sm:$0xff] %v12893_v50 }
 0x39c   :  { %8951 = vmatmul.mubr.f32.gmra.mrb[112].mxu0 %v2457_v3  ;;  %v10664_v3 = vld [vmem:[#allocation2 + $0x2b0] sm:$0x3] }
 0x39d   :  { %9460 = vmatmul.mubr.f32.gmra.mrb[46].mxu1 %v12859_v57  ;;  %8953 = vmatprep.mubr.f32.mxu0 %v2460_v39  ;;  %v2466_v49 = vrot.slane %v10664_v3, 2  ;;  %v12882_v39 = vld [vmem:[#allocation2 + $0x2c0] sm:$0xff] }
 0x39e   :  { %9462 = vmatprep.mubr.f32.mxu1 %v12863_v51  ;;  %14694 = vst [vmem:[#allocation16_spill] sm:$0xff] %v12882_v39  ;;  %v2469_v24 = vrot.slane %v12882_v39, 2  ;;  %v2473_v39 = vrot.slane %v12893_v50, 2  ;;  %v12907_v50 = vld [vmem:[#allocation2 + $0x2e8] sm:$0xff] }
 0x39f   :  { %v2467_v31 = vsel %vm2332_vm1, %v2464_v29, %v2466_v49  ;;  %v12901_v49 = vld [vmem:[#allocation2 + $0x2d8] sm:$0xff]  ;;  %14701 = vst [vmem:[#allocation23_spill] sm:$0xff] %v12907_v50  ;;  %v6640_v51 = vld [vmem:[#allocation9 + $0x428] sm:$0xff] }
 0x3a0   :  { %8954 = vmatmul.mubr.f32.gmra.mrb[114].mxu0 %v2462_v60  ;;  %v10667_v60 = vld [vmem:[#allocation2 + $0x2c8] sm:$0x3]  ;;  %v2470_v22 = vsel %vm2332_vm1, %v2468_v42, %v2469_v24  ;;  %14699 = vst [vmem:[#allocation20_spill] sm:$0xff] %v12901_v49 }
 0x3a1   :  { %9463 = vmatmul.mubr.f32.gmra.mrb[48].mxu1 %v12873_v7  ;;  %8956 = vmatprep.mubr.f32.mxu0 %v2465_v37  ;;  %v2471_v3 = vrot.slane %v10667_v60, 2  ;;  %v12891_v7 = vld [vmem:[#allocation2 + $0x2d0] sm:$0xff]  ;;  %v12896_v37 = vld [vmem:[#allocation2 + $0x2d8] sm:$0xff] }
 0x3a2   :  { %9465 = vmatprep.mubr.f32.mxu1 %v12877_v13  ;;  %14696 = vst [vmem:[#allocation19_spill] sm:$0xff] %v12891_v7  ;;  %14698 = vst [vmem:[#allocation21_spill] sm:$0xff] %v12896_v37  ;;  %v2474_v13 = vrot.slane %v12896_v37, 2  ;;  %v2478_v37 = vrot.slane %v12907_v50, 2  ;;  %v12921_v50 = vld [vmem:[#allocation2 + $0x300] sm:$0xff] }
 0x3a3   :  { %v2472_v29 = vsel %vm2332_vm1, %v2469_v24, %v2471_v3  ;;  %v12915_v3 = vld [vmem:[#allocation2 + $0x2f0] sm:$0xff]  ;;  %14705 = vst [vmem:[#allocation30_spill] sm:$0xff] %v12921_v50 }
 0x3a4   :  { %8957 = vmatmul.mubr.f32.gmra.mrb[116].mxu0 %v2467_v31  ;;  %v10670_v31 = vld [vmem:[#allocation2 + $0x2e0] sm:$0x3]  ;;  %v2475_v42 = vsel %vm2332_vm1, %v2473_v39, %v2474_v13  ;;  %14703 = vst [vmem:[#allocation28_spill] sm:$0xff] %v12915_v3 }
 0x3a5   :  { %9466 = vmatmul.mubr.f32.gmra.mrb[50].mxu1 %v12887_v9  ;;  %8959 = vmatprep.mubr.f32.mxu0 %v2470_v22  ;;  %v2476_v60 = vrot.slane %v10670_v31, 2  ;;  %v12905_v9 = vld [vmem:[#allocation2 + $0x2e8] sm:$0xff]  ;;  %v12910_v22 = vld [vmem:[#allocation2 + $0x2f0] sm:$0xff] }
 0x3a6   :  { %9468 = vmatprep.mubr.f32.mxu1 %v12891_v7  ;;  %14700 = vst [vmem:[#allocation26_spill] sm:$0xff] %v12905_v9  ;;  %14702 = vst [vmem:[#allocation29_spill] sm:$0xff] %v12910_v22  ;;  %v2479_v7 = vrot.slane %v12910_v22, 2  ;;  %v2483_v22 = vrot.slane %v12921_v50, 2  ;;  %v12935_v50 = vld [vmem:[#allocation2 + $0x318] sm:$0xff] }
 0x3a7   :  { %v2477_v24 = vsel %vm2332_vm1, %v2474_v13, %v2476_v60  ;;  %v12929_v60 = vld [vmem:[#allocation2 + $0x308] sm:$0xff]  ;;  %14709 = vst [vmem:[#allocation27_spill] sm:$0xff] %v12935_v50 }
 0x3a8   :  { %8960 = vmatmul.mubr.f32.gmra.mrb[118].mxu0 %v2472_v29  ;;  %v10673_v29 = vld [vmem:[#allocation2 + $0x2f8] sm:$0x3]  ;;  %v2480_v39 = vsel %vm2332_vm1, %v2478_v37, %v2479_v7  ;;  %14707 = vst [vmem:[#allocation32_spill] sm:$0xff] %v12929_v60 }
 0x3a9   :  { %9469 = vmatmul.mubr.f32.gmra.mrb[52].mxu1 %v12901_v49  ;;  %8962 = vmatprep.mubr.f32.mxu0 %v2475_v42  ;;  %v2481_v31 = vrot.slane %v10673_v29, 2  ;;  %v12919_v49 = vld [vmem:[#allocation2 + $0x300] sm:$0xff]  ;;  %v12924_v42 = vld [vmem:[#allocation2 + $0x308] sm:$0xff] }
 0x3aa   :  { %9471 = vmatprep.mubr.f32.mxu1 %v12905_v9  ;;  %14704 = vst [vmem:[#allocation25_spill] sm:$0xff] %v12919_v49  ;;  %14706 = vst [vmem:[#allocation31_spill] sm:$0xff] %v12924_v42  ;;  %v2484_v9 = vrot.slane %v12924_v42, 2  ;;  %v2488_v42 = vrot.slane %v12935_v50, 2  ;;  %v12953_v50 = vld [vmem:[#allocation2 + $0x338] sm:$0xff] }
 0x3ab   :  { %v2482_v13 = vsel %vm2332_vm1, %v2479_v7, %v2481_v31  ;;  %v12943_v31 = vld [vmem:[#allocation2 + $0x320] sm:$0xff]  ;;  %14714 = vst [vmem:[#allocation45_spill] sm:$0xff] %v12953_v50 }
 0x3ac   :  { %8963 = vmatmul.mubr.f32.gmra.mrb[120].mxu0 %v2477_v24  ;;  %v10676_v24 = vld [vmem:[#allocation2 + $0x310] sm:$0x3]  ;;  %v2485_v37 = vsel %vm2332_vm1, %v2483_v22, %v2484_v9  ;;  %14711 = vst [vmem:[#allocation44_spill] sm:$0xff] %v12943_v31 }
 0x3ad   :  { %9472 = vmatmul.mubr.f32.gmra.mrb[54].mxu1 %v12915_v3  ;;  %8965 = vmatprep.mubr.f32.mxu0 %v2480_v39  ;;  %v2486_v29 = vrot.slane %v10676_v24, 2  ;;  %v12933_v3 = vld [vmem:[#allocation2 + $0x318] sm:$0xff]  ;;  %v12938_v39 = vld [vmem:[#allocation2 + $0x320] sm:$0xff] }
 0x3ae   :  { %9474 = vmatprep.mubr.f32.mxu1 %v12919_v49  ;;  %14708 = vst [vmem:[#allocation33_spill] sm:$0xff] %v12933_v3  ;;  %14710 = vst [vmem:[#allocation24_spill] sm:$0xff] %v12938_v39  ;;  %v2489_v49 = vrot.slane %v12938_v39, 2  ;;  %v12950_v39 = vld [vmem:[#allocation2 + $0x348] sm:$0xff] }
 0x3af   :  { %v2487_v7 = vsel %vm2332_vm1, %v2484_v9, %v2486_v29  ;;  %14713 = vst [vmem:[#allocation46_spill] sm:$0xff] %v12950_v39  ;;  %v5720_v9 = vrot.slane %v12633_v55, 1  ;;  %v5721_v29 = vrot.slane %v12640_v5, 1  ;;  %v5725_v5 = vrot.slane %v12645_v58, 1  ;;  %v6639_v58 = vld [vmem:[#allocation9 + $0x420] sm:$0xff] }
 0x3b0   :  { %8966 = vmatmul.mubr.f32.gmra.mrb[122].mxu0 %v2482_v13  ;;  %v10679_v13 = vld [vmem:[#allocation2 + $0x328] sm:$0x3]  ;;  %v2490_v22 = vsel %vm2332_vm1, %v2488_v42, %v2489_v49  ;;  %v10680_v42 = vld [vmem:[#allocation2 + $0x18] sm:$0xff] }
 0x3b1   :  { %9475 = vmatmul.mubr.f32.gmra.mrb[56].mxu1 %v12929_v60  ;;  %8968 = vmatprep.mubr.f32.mxu0 %v2485_v37  ;;  %v2491_v24 = vrot.slane %v10679_v13, 2  ;;  %v12947_v60 = vld [vmem:[#allocation2 + $0x330] sm:$0xff]  ;;  %v5722_v55 = vsel %vm1320_vm0, %v5720_v9, %v5721_v29 }
 0x3b2   :  { %9477 = vmatprep.mubr.f32.mxu1 %v12933_v3  ;;  %14712 = vst [vmem:[#allocation43_spill] sm:$0xff] %v12947_v60  ;;  %v10683_v3 = vld [vmem:[#allocation2 + $0x38] sm:$0xff]  ;;  %v12972_v9 = vld [vmem:[#allocation2 + $0x70] sm:$0x3] }
 0x3b3   :  { %v2492_v37 = vsel %vm2332_vm1, %v2489_v49, %v2491_v24  ;;  %v10681_v49 = vld [vmem:[#allocation2 + $0x20] sm:$0xff]  ;;  %v12964_v24 = vld [vmem:[#allocation2 + $0x58] sm:$0x3] }
 0x3b4   :  { %8969 = vmatmul.mubr.f32.gmra.mrb[124].mxu0 %v2487_v7  ;;  %v12958_v7 = vld [vmem:[#allocation2 + $0x40] sm:$0x3] }
 0x3b5   :  { %9478 = vmatmul.mubr.f32.gmra.mrb[58].mxu1 %v12943_v31  ;;  %8971 = vmatprep.mubr.f32.mxu0 %v2490_v22  ;;  %14715 = vst [vmem:[#allocation48_spill] sm:$0xff] %v12958_v7  ;;  %v5723_v13 = vrot.slane %v12958_v7, 1  ;;  %v6637_v22 = vld [vmem:[#allocation9 + $0x410] sm:$0xff]  ;;  %v5731_v31 = vrot.slane %v12659_v17, 1  ;;  %v10038_v17 = vpack.c.bf16 %v6640_v51, %v6639_v58  ;;  %v10687_v58 = vld [vmem:[#allocation2 + $0x68] sm:$0xff] }
 0x3b6   :  { %9480 = vmatprep.mubr.f32.mxu1 %v12947_v60  ;;  %v6638_v60 = vld [vmem:[#allocation9 + $0x418] sm:$0xff] }
 0x3b7   :  { %v5724_v7 = vsel %vm1320_vm0, %v5721_v29, %v5723_v13  ;;  %v5736_v29 = vrot.slane %v12668_v35, 1  ;;  %v12981_v13 = vld [vmem:[#allocation2 + $0x88] sm:$0x3]  ;;  %v5740_v35 = vrot.slane %v12671_v16, 1 }
 0x3b8   :  { %8972 = vmatmul.mubr.f32.gmra.mrb[126].mxu0 %v2492_v37  ;;  %v5726_v37 = vrot.slane %v12650_v34, 1  ;;  %v10684_v34 = vld [vmem:[#allocation2 + $0x48] sm:$0xff]  ;;  %v5738_v51 = vrot.slane %v12981_v13, 1 }
 0x3b9   :  { %9481 = vmatmul.mubr.f32.gmra.mrb[60].mxu1 %v12953_v50  ;;  %9006 = vmatprep.mubr.f32.mxu0 %v10680_v42  ;;  %v10682_v50 = vld [vmem:[#allocation2 + $0x30] sm:$0xff]  ;;  %v10034_v42 = vpack.c.bf16 %v6638_v60, %v6637_v22 }
 0x3ba   :  { %9483 = vmatprep.mubr.f32.mxu1 %v12950_v39  ;;  %v5728_v39 = vrot.slane %v12964_v24, 1  ;;  %v6641_v22 = vld [vmem:[#allocation9 + $0x430] sm:$0xff] }
 0x3bc   :  { %9007 = vmatmul.mubr.f32.vlgmr.msra.gmra.mrb[64].mxu0 %v10681_v49  ;;  %v5730_v49 = vrot.slane %v12653_v27, 1  ;;  %v5729_v60 = vsel %vm1320_vm0, %v5726_v37, %v5728_v39  ;;  %v5733_v27 = vrot.slane %v12972_v9, 1 }
 0x3bd   :  { %9484 = vmatmul.mubr.f32.gmra.mrb[62].mxu1 %v12781_v59  ;;  %9009 = vmatprep.mubr.f32.mxu0 %v10682_v50  ;;  %v5727_v50 = vsel %vm1320_vm0, %v5725_v5, %v5726_v37  ;;  %v10686_v5 = vld [vmem:[#allocation2 + $0x60] sm:$0xff]  ;;  %v5741_v37 = vrot.slane %v12677_v43, 1  ;;  %v5745_v43 = vrot.slane %v12680_v23, 1 }
 0x3be   :  { %9518 = vmatprep.mubr.f32.mxu1 %v5722_v55  ;;  %v6642_v55 = vld [vmem:[#allocation9 + $0x438] sm:$0xff]  ;;  %v5734_v39 = vsel %vm1320_vm0, %v5731_v31, %v5733_v27 }
 0x3c0   :  { %9010 = vmatmul.mubr.f32.gmra.mrb[66].mxu0 %v10683_v3  ;;  %v5735_v3 = vrot.slane %v12662_v48, 1  ;;  %v10042_v48 = vpack.c.bf16 %v6642_v55, %v6641_v22  ;;  %v12995_v22 = vld [vmem:[#allocation2 + $0xb8] sm:$0x3]  ;;  %v6645_v55 = vld [vmem:[#allocation9 + $0x450] sm:$0xff] }
 0x3c1   :  { %9519 = vmatmul.mubr.f32.vlgmr.msra.gmra.mrb[0].mxu1 %v5724_v7  ;;  %9012 = vmatprep.mubr.f32.mxu0 %v10684_v34  ;;  %v10685_v7 = vld [vmem:[#allocation2 + $0x50] sm:$0xff]  ;;  %v12988_v34 = vld [vmem:[#allocation2 + $0xa0] sm:$0x3] }
 0x3c2   :  { %10033 = vmatpush3.bf16.msra.mxu1 %v12706_v40  ;;  %9521 = vmatprep.mubr.f32.mxu1 %v5727_v50  ;;  %v5732_v40 = vsel %vm1320_vm0, %v5730_v49, %v5731_v31  ;;  %v5737_v49 = vsel %vm1320_vm0, %v5735_v3, %v5736_v29  ;;  %v6643_v50 = vld [vmem:[#allocation9 + $0x440] sm:$0xff]  ;;  %v5739_v31 = vsel %vm1320_vm0, %v5736_v29, %v5738_v51  ;;  %v5743_v27 = vrot.slane %v12988_v34, 1 }
 0x3c3   :  { %10035 = vmatprep.subr.bf16.mxu1 %v10034_v42  ;;  %v5742_v3 = vsel %vm1320_vm0, %v5740_v35, %v5741_v37  ;;  %v5751_v51 = vrot.slane %v12695_v11, 1  ;;  %v5755_v11 = vrot.slane %v12698_v0, 1 }
 0x3c4   :  { %9013 = vmatmul.mubr.f32.gmra.mrb[68].mxu0 %v10685_v7  ;;  %v5746_v7 = vrot.slane %v12686_v36, 1  ;;  %v5744_v29 = vsel %vm1320_vm0, %v5741_v37, %v5743_v27  ;;  %v5750_v36 = vrot.slane %v12689_v12, 1  ;;  %v10693_v27 = vld [vmem:[#allocation2 + $0xb0] sm:$0xff] }
 0x3c5   :  { %9522 = vmatmul.mubr.f32.gmra.mrb[2].mxu1 %v5729_v60  ;;  %9015 = vmatprep.mubr.f32.mxu0 %v10686_v5  ;;  %v6644_v60 = vld [vmem:[#allocation9 + $0x448] sm:$0xff]  ;;  %v6646_v5 = vld [vmem:[#allocation9 + $0x458] sm:$0xff] }
 0x3c6   :  { %9524 = vmatprep.mubr.f32.mxu1 %v5732_v40  ;;  %10037 = vmatpush3.bf16.msra.mxu1 %v10034_v42  ;;  %v10688_v42 = vld [vmem:[#allocation2 + $0x78] sm:$0xff]  ;;  %v10046_v16 = vpack.c.bf16 %v6644_v60, %v6643_v50  ;;  %v10689_v40 = vld [vmem:[#allocation2 + $0x80] sm:$0xff]  ;;  %v10050_v23 = vpack.c.bf16 %v6646_v5, %v6645_v55  ;;  %v5747_v35 = vsel %vm1320_vm0, %v5745_v43, %v5746_v7  ;;  %v6648_v60 = vld [vmem:[#allocation9 + $0x468] sm:$0xff] }
 0x3c7   :  { %10039 = vmatprep.subr.bf16.mxu1 %v10038_v17  ;;  %v6647_v50 = vld [vmem:[#allocation9 + $0x460] sm:$0xff]  ;;  %v5752_v43 = vsel %vm1320_vm0, %v5750_v36, %v5751_v51  ;;  %v6650_v55 = vld [vmem:[#allocation9 + $0x478] sm:$0xff] }
 0x3c8   :  { %9016 = vmatmul.mubr.f32.gmra.mrb[70].mxu0 %v10687_v58  ;;  %v10691_v58 = vld [vmem:[#allocation2 + $0x98] sm:$0xff]  ;;  %v10054_v12 = vpack.c.bf16 %v6648_v60, %v6647_v50  ;;  %v13016_v36 = vld [vmem:[#allocation2 + $0x100] sm:$0x3] }
 0x3c9   :  { %9525 = vmatmul.mubr.f32.gmra.mrb[4].mxu1 %v5734_v39  ;;  %9018 = vmatprep.mubr.f32.mxu0 %v10688_v42  ;;  %v5748_v39 = vrot.slane %v12995_v22, 1  ;;  %v13023_v60 = vld [vmem:[#allocation2 + $0x118] sm:$0x3] }
 0x3ca   :  { %9527 = vmatprep.mubr.f32.mxu1 %v5737_v49  ;;  %10041 = vmatpush3.bf16.msra.mxu1 %v10038_v17  ;;  %v10690_v17 = vld [vmem:[#allocation2 + $0x90] sm:$0xff] }
 0x3cb   :  { %10043 = vmatprep.subr.bf16.mxu1 %v10042_v48  ;;  %v13002_v49 = vld [vmem:[#allocation2 + $0xd0] sm:$0x3]  ;;  %v5749_v37 = vsel %vm1320_vm0, %v5746_v7, %v5748_v39 }
 0x3cc   :  { %9019 = vmatmul.mubr.f32.gmra.mrb[72].mxu0 %v10689_v40  ;;  %v5753_v42 = vrot.slane %v13002_v49, 1  ;;  %v13009_v40 = vld [vmem:[#allocation2 + $0xe8] sm:$0x3] }
 0x3cd   :  { %9528 = vmatmul.mubr.f32.gmra.mrb[6].mxu1 %v5739_v31  ;;  %9021 = vmatprep.mubr.f32.mxu0 %v10690_v17  ;;  %v5756_v31 = vrot.slane %v12704_v45, 1  ;;  %v5758_v5 = vrot.slane %v13009_v40, 1  ;;  %v5760_v45 = vrot.slane %v12709_v18, 1  ;;  %v5761_v17 = vrot.slane %v12715_v6, 1 }
 0x3ce   :  { %9530 = vmatprep.mubr.f32.mxu1 %v5742_v3  ;;  %10045 = vmatpush3.bf16.msra.mxu1 %v10042_v48  ;;  %v10692_v48 = vld [vmem:[#allocation2 + $0xa8] sm:$0xff]  ;;  %v6649_v3 = vld [vmem:[#allocation9 + $0x470] sm:$0xff]  ;;  %v5754_v7 = vsel %vm1320_vm0, %v5751_v51, %v5753_v42  ;;  %v5763_v51 = vrot.slane %v13016_v36, 1  ;;  %v5765_v18 = vrot.slane %v12719_v20, 1  ;;  %v5766_v6 = vrot.slane %v12725_v25, 1  ;;  %v10699_v25 = vld [vmem:[#allocation2 + $0xf8] sm:$0xff] }
 0x3cf   :  { %10047 = vmatprep.subr.bf16.mxu1 %v10046_v16  ;;  %v10058_v0 = vpack.c.bf16 %v6650_v55, %v6649_v3  ;;  %v5757_v39 = vsel %vm1320_vm0, %v5755_v11, %v5756_v31  ;;  %v5762_v50 = vsel %vm1320_vm0, %v5760_v45, %v5761_v17  ;;  %v5768_v42 = vrot.slane %v13023_v60, 1 }
 0x3d0   :  { %9022 = vmatmul.mubr.f32.gmra.mrb[74].mxu0 %v10691_v58  ;;  %v10696_v58 = vld [vmem:[#allocation2 + $0xd8] sm:$0xff]  ;;  %v5771_v20 = vrot.slane %v12734_v61, 1  ;;  %v5767_v11 = vsel %vm1320_vm0, %v5765_v18, %v5766_v6  ;;  %v5775_v55 = vrot.slane %v12737_v30, 1  ;;  %v5781_v30 = vrot.slane %v12752_v53, 1 }
 0x3d1   :  { %9531 = vmatmul.mubr.f32.gmra.mrb[8].mxu1 %v5744_v29  ;;  %9024 = vmatprep.mubr.f32.mxu0 %v10692_v48  ;;  %v10695_v29 = vld [vmem:[#allocation2 + $0xc8] sm:$0xff]  ;;  %v10698_v48 = vld [vmem:[#allocation2 + $0xf0] sm:$0xff]  ;;  %v5785_v18 = vrot.slane %v12755_v32, 1  ;;  %v5791_v32 = vrot.slane %v12775_v26, 1 }
 0x3d2   :  { %9533 = vmatprep.mubr.f32.mxu1 %v5747_v35  ;;  %10049 = vmatpush3.bf16.msra.mxu1 %v10046_v16  ;;  %v10694_v16 = vld [vmem:[#allocation2 + $0xc0] sm:$0xff] }
 0x3d3   :  { %10051 = vmatprep.subr.bf16.mxu1 %v10050_v23  ;;  %v10697_v35 = vld [vmem:[#allocation2 + $0xe0] sm:$0xff] }
 0x3d4   :  { %9025 = vmatmul.mubr.f32.gmra.mrb[76].mxu0 %v10693_v27  ;;  %v10700_v27 = vld [vmem:[#allocation2 + $0x108] sm:$0xff] }
 0x3d5   :  { %9534 = vmatmul.mubr.f32.gmra.mrb[10].mxu1 %v5749_v37  ;;  %9027 = vmatprep.mubr.f32.mxu0 %v10694_v16  ;;  %v5764_v37 = vsel %vm1320_vm0, %v5761_v17, %v5763_v51  ;;  %v10701_v16 = vld [vmem:[#allocation2 + $0x110] sm:$0xff]  ;;  %v5780_v17 = vrot.slane %v12746_v19, 1  ;;  %v5786_v19 = vrot.slane %v12762_v21, 1 }
 0x3d6   :  { %9536 = vmatprep.mubr.f32.mxu1 %v5752_v43  ;;  %10053 = vmatpush3.bf16.msra.mxu1 %v10050_v23  ;;  %v5759_v23 = vsel %vm1320_vm0, %v5756_v31, %v5758_v5  ;;  %v13030_v31 = vld [vmem:[#allocation2 + $0x130] sm:$0x3]  ;;  %v5769_v43 = vsel %vm1320_vm0, %v5766_v6, %v5768_v42  ;;  %v10702_v5 = vld [vmem:[#allocation2 + $0x120] sm:$0xff]  ;;  %v5790_v42 = vrot.slane %v12765_v15, 1 }
 0x3d7   :  { %10055 = vmatprep.subr.bf16.mxu1 %v10054_v12  ;;  %v5773_v3 = vrot.slane %v13030_v31, 1  ;;  %v10705_v6 = vld [vmem:[#allocation2 + $0x140] sm:$0xff]  ;;  %v5782_v53 = vsel %vm1320_vm0, %v5780_v17, %v5781_v30  ;;  %v5787_v21 = vsel %vm1320_vm0, %v5785_v18, %v5786_v19  ;;  %v10712_v17 = vld [vmem:[#allocation2 + $0x1c8] sm:$0xff] }
 0x3d8   :  { %9028 = vmatmul.mubr.f32.gmra.mrb[78].mxu0 %v10695_v29  ;;  %v10703_v29 = vld [vmem:[#allocation2 + $0x128] sm:$0xff] }
 0x3d9   :  { %9537 = vmatmul.mubr.f32.gmra.mrb[12].mxu1 %v5754_v7  ;;  %9030 = vmatprep.mubr.f32.mxu0 %v10696_v58  ;;  %v13037_v7 = vld [vmem:[#allocation2 + $0x148] sm:$0x3]  ;;  %v10704_v58 = vld [vmem:[#allocation2 + $0x138] sm:$0xff] }
 0x3da   :  { %9539 = vmatprep.mubr.f32.mxu1 %v5757_v39  ;;  %10057 = vmatpush3.bf16.msra.mxu1 %v10054_v12  ;;  %v5770_v12 = vrot.slane %v12728_v54, 1  ;;  %v5776_v54 = vrot.slane %v12743_v47, 1  ;;  %v5778_v45 = vrot.slane %v13037_v7, 1  ;;  %v13044_v39 = vld [vmem:[#allocation2 + $0x160] sm:$0x3] }
 0x3db   :  { %10059 = vmatprep.subr.bf16.mxu1 %v10058_v0  ;;  %v5783_v51 = vrot.slane %v13044_v39, 1 }
 0x3dc   :  { %9031 = vmatmul.mubr.f32.gmra.mrb[80].mxu0 %v10697_v35  ;;  %v5772_v61 = vsel %vm1320_vm0, %v5770_v12, %v5771_v20  ;;  %v5777_v47 = vsel %vm1320_vm0, %v5775_v55, %v5776_v54  ;;  %v13051_v35 = vld [vmem:[#allocation2 + $0x178] sm:$0x3]  ;;  %v5792_v55 = vsel %vm1320_vm0, %v5790_v42, %v5791_v32 }
 0x3dd   :  { %9540 = vmatmul.mubr.f32.gmra.mrb[14].mxu1 %v5759_v23  ;;  %9033 = vmatprep.mubr.f32.mxu0 %v10698_v48  ;;  %v5779_v23 = vsel %vm1320_vm0, %v5776_v54, %v5778_v45  ;;  %v5784_v48 = vsel %vm1320_vm0, %v5781_v30, %v5783_v51  ;;  %v10707_v12 = vld [vmem:[#allocation2 + $0x158] sm:$0xff]  ;;  %v10710_v54 = vld [vmem:[#allocation2 + $0x180] sm:$0xff]  ;;  %v13075_v45 = vld [vmem:[#allocation2 + $0x1f0] sm:$0x3] }
 0x3de   :  { %9542 = vmatprep.mubr.f32.mxu1 %v5762_v50  ;;  %10061 = vmatpush3.bf16.msra.mxu1 %v10058_v0  ;;  %v5774_v0 = vsel %vm1320_vm0, %v5771_v20, %v5773_v3  ;;  %v10706_v50 = vld [vmem:[#allocation2 + $0x150] sm:$0xff]  ;;  %v10714_v51 = vld [vmem:[#allocation2 + $0x1e0] sm:$0xff] }
 0x3df   :  { %v13058_v20 = vld [vmem:[#allocation2 + $0x190] sm:$0x3] }
 0x3e0   :  { %9034 = vmatmul.mubr.f32.gmra.mrb[82].mxu0 %v10699_v25  ;;  %v10708_v25 = vld [vmem:[#allocation2 + $0x168] sm:$0xff]  ;;  %v5793_v26 = vrot.slane %v13058_v20, 1  ;;  %v10709_v3 = vld [vmem:[#allocation2 + $0x170] sm:$0xff] }
 0x3e1   :  { %9543 = vmatmul.mubr.f32.gmra.mrb[16].mxu1 %v5764_v37  ;;  %9036 = vmatprep.mubr.f32.mxu0 %v10700_v27  ;;  %v5788_v37 = vrot.slane %v13051_v35, 1  ;;  %v13062_v27 = vrot.slane %v12781_v59, 1 }
 0x3e2   :  { %9545 = vmatprep.mubr.f32.mxu1 %v5767_v11  ;;  %v5795_v11 = vrot.slane %v12771_v4, 1  ;;  %v5794_v59 = vsel %vm1320_vm0, %v5791_v32, %v5793_v26  ;;  %v5815_v32 = vrot.slane %v12811_v38, 1  ;;  %v5820_v26 = vrot.slane %v12820_v10, 1 }
 0x3e3   :  { %v5789_v15 = vsel %vm1320_vm0, %v5786_v19, %v5788_v37  ;;  %v5821_v38 = vrot.slane %v12826_v46, 1  ;;  %v5826_v10 = vrot.slane %v12835_v56, 1 }
 0x3e4   :  { %9037 = vmatmul.mubr.f32.gmra.mrb[84].mxu0 %v10701_v16  ;;  %v5797_v4 = vsel %vm1320_vm0, %v5795_v11, %v13062_v27 }
 0x3e5   :  { %9546 = vmatmul.mubr.f32.gmra.mrb[18].mxu1 %v5769_v43  ;;  %9039 = vmatprep.mubr.f32.mxu0 %v10702_v5  ;;  %v13064_v43 = vld [vmem:[#allocation2 + $0x1a8] sm:$0x3]  ;;  %v5801_v5 = vrot.slane %v12790_v33, 1  ;;  %v5822_v46 = vsel %vm1320_vm0, %v5820_v26, %v5821_v38  ;;  %v14720_v26 = vld [vmem:[#allocation22_spill] sm:$0xff] }
 0x3e6   :  { %9548 = vmatprep.mubr.f32.mxu1 %v5772_v61  ;;  %v5798_v16 = vrot.slane %v13064_v43, 1  ;;  %v5800_v61 = vrot.slane %v12784_v1, 1  ;;  %v10713_v1 = vld [vmem:[#allocation2 + $0x1d0] sm:$0xff] }
 0x3e8   :  { %9040 = vmatmul.mubr.f32.gmra.mrb[86].mxu0 %v10703_v29  ;;  %v5799_v30 = vsel %vm1320_vm0, %v13062_v27, %v5798_v16  ;;  %v5803_v29 = vrot.slane %v13075_v45, 1  ;;  %v5802_v33 = vsel %vm1320_vm0, %v5800_v61, %v5801_v5  ;;  %v10721_v61 = vld [vmem:[#allocation2 + $0x230] sm:$0xff] }
 0x3e9   :  { %9549 = vmatmul.mubr.f32.gmra.mrb[20].mxu1 %v5774_v0  ;;  %9042 = vmatprep.mubr.f32.mxu0 %v10704_v58  ;;  %v10711_v0 = vld [vmem:[#allocation2 + $0x188] sm:$0xff]  ;;  %v5806_v58 = vrot.slane %v12799_v41, 1 }
 0x3ea   :  { %9551 = vmatprep.mubr.f32.mxu1 %v5777_v47  ;;  %v5805_v47 = vrot.slane %v12793_v44, 1  ;;  %v5804_v18 = vsel %vm1320_vm0, %v5801_v5, %v5803_v29  ;;  %v5811_v44 = vrot.slane %v12808_v63, 1  ;;  %v13111_v5 = vld [vmem:[#allocation2 + $0x268] sm:$0x3]  ;;  %v5830_v29 = vrot.slane %v12838_v28, 1 }
 0x3eb   :  { %v5836_v28 = vrot.slane %v12859_v57, 1 }
 0x3ec   :  { %9043 = vmatmul.mubr.f32.gmra.mrb[88].mxu0 %v10705_v6  ;;  %v5810_v6 = vrot.slane %v12802_v2, 1  ;;  %v5807_v41 = vsel %vm1320_vm0, %v5805_v47, %v5806_v58  ;;  %v5816_v2 = vrot.slane %v12817_v14, 1  ;;  %v10723_v47 = vld [vmem:[#allocation2 + $0x248] sm:$0xff] }
 0x3ed   :  { %9552 = vmatmul.mubr.f32.gmra.mrb[22].mxu1 %v5779_v23  ;;  %9045 = vmatprep.mubr.f32.mxu0 %v10706_v50  ;;  %v13083_v23 = vld [vmem:[#allocation2 + $0x208] sm:$0x3]  ;;  %v13090_v50 = vld [vmem:[#allocation2 + $0x220] sm:$0x3] }
 0x3ee   :  { %9554 = vmatprep.mubr.f32.mxu1 %v5782_v53  ;;  %v5808_v19 = vrot.slane %v13083_v23, 1  ;;  %v10715_v53 = vld [vmem:[#allocation2 + $0x1e8] sm:$0xff]  ;;  %v5813_v42 = vrot.slane %v13090_v50, 1  ;;  %v5812_v63 = vsel %vm1320_vm0, %v5810_v6, %v5811_v44  ;;  %v5817_v14 = vsel %vm1320_vm0, %v5815_v32, %v5816_v2  ;;  %v13125_v6 = vld [vmem:[#allocation2 + $0x298] sm:$0x3] }
 0x3ef   :  { %v10727_v32 = vld [vmem:[#allocation2 + $0x278] sm:$0xff] }
 0x3f0   :  { %9046 = vmatmul.mubr.f32.gmra.mrb[90].mxu0 %v10707_v12  ;;  %v5809_v37 = vsel %vm1320_vm0, %v5806_v58, %v5808_v19  ;;  %v10717_v12 = vld [vmem:[#allocation2 + $0x200] sm:$0xff]  ;;  %v5814_v11 = vsel %vm1320_vm0, %v5811_v44, %v5813_v42  ;;  %v10726_v44 = vld [vmem:[#allocation2 + $0x270] sm:$0xff]  ;;  %v14717_v42 = vld [vmem:[#allocation41_spill] sm:$0xff] }
 0x3f1   :  { %9555 = vmatmul.mubr.f32.gmra.mrb[24].mxu1 %v5784_v48  ;;  %9048 = vmatprep.mubr.f32.mxu0 %v10708_v25  ;;  %v10716_v48 = vld [vmem:[#allocation2 + $0x1f8] sm:$0xff]  ;;  %v10718_v25 = vld [vmem:[#allocation2 + $0x210] sm:$0xff]  ;;  %v13118_v58 = vld [vmem:[#allocation2 + $0x280] sm:$0x3] }
 0x3f2   :  { %9557 = vmatprep.mubr.f32.mxu1 %v5787_v21  ;;  %v13097_v21 = vld [vmem:[#allocation2 + $0x238] sm:$0x3]  ;;  %v10725_v19 = vld [vmem:[#allocation2 + $0x260] sm:$0xff] }
 0x3f4   :  { %9049 = vmatmul.mubr.f32.gmra.mrb[92].mxu0 %v10709_v3  ;;  %v10719_v3 = vld [vmem:[#allocation2 + $0x218] sm:$0xff] }
 0x3f5   :  { %9558 = vmatmul.mubr.f32.gmra.mrb[26].mxu1 %v5789_v15  ;;  %9051 = vmatprep.mubr.f32.mxu0 %v10710_v54  ;;  %v5818_v15 = vrot.slane %v13097_v21, 1  ;;  %v10720_v54 = vld [vmem:[#allocation2 + $0x228] sm:$0xff] }
 0x3f6   :  { %9560 = vmatprep.mubr.f32.mxu1 %v5792_v55  ;;  %v13104_v55 = vld [vmem:[#allocation2 + $0x250] sm:$0x3] }
 0x3f7   :  { %v5819_v16 = vsel %vm1320_vm0, %v5816_v2, %v5818_v15  ;;  %v13132_v2 = vld [vmem:[#allocation2 + $0x2b0] sm:$0x3] }
 0x3f8   :  { %9052 = vmatmul.mubr.f32.gmra.mrb[94].mxu0 %v10711_v0  ;;  %v10722_v0 = vld [vmem:[#allocation2 + $0x240] sm:$0xff] }
 0x3f9   :  { %9561 = vmatmul.mubr.f32.gmra.mrb[28].mxu1 %v5794_v59  ;;  %9054 = vmatprep.mubr.f32.mxu0 %v10712_v17  ;;  %v5825_v59 = vrot.slane %v12829_v8, 1  ;;  %v5831_v8 = vrot.slane %v12844_v62, 1 }
 0x3fa   :  { %9563 = vmatprep.mubr.f32.mxu1 %v5797_v4  ;;  %v5823_v4 = vrot.slane %v13104_v55, 1 }
 0x3fb   :  { %v5827_v56 = vsel %vm1320_vm0, %v5825_v59, %v5826_v10  ;;  %v5832_v62 = vsel %vm1320_vm0, %v5830_v29, %v5831_v8  ;;  %v13150_v29 = vld [vmem:[#allocation2 + $0x2e0] sm:$0x3] }
 0x3fc   :  { %9055 = vmatmul.mubr.f32.gmra.mrb[96].mxu0 %v10713_v1  ;;  %v5824_v17 = vsel %vm1320_vm0, %v5821_v38, %v5823_v4  ;;  %v10724_v1 = vld [vmem:[#allocation2 + $0x258] sm:$0xff]  ;;  %v5846_v38 = vrot.slane %v14720_v26, 1 }
 0x3fd   :  { %9564 = vmatmul.mubr.f32.gmra.mrb[30].mxu1 %v5799_v30  ;;  %9057 = vmatprep.mubr.f32.mxu0 %v10714_v51  ;;  %v5828_v30 = vrot.slane %v13111_v5, 1  ;;  %v5833_v51 = vrot.slane %v13118_v58, 1 }
 0x3fe   :  { %9566 = vmatprep.mubr.f32.mxu1 %v5802_v33 }
 0x3ff   :  { %v5829_v33 = vsel %vm1320_vm0, %v5826_v10, %v5828_v30  ;;  %v14723_v10 = vld [vmem:[#allocation19_spill] sm:$0xff] }
 0x400   :  { %9058 = vmatmul.mubr.f32.gmra.mrb[98].mxu0 %v10715_v53  ;;  %v5834_v53 = vsel %vm1320_vm0, %v5831_v8, %v5833_v51  ;;  %v14726_v8 = vld [vmem:[#allocation17_spill] sm:$0xff]  ;;  %v14728_v51 = vld [vmem:[#allocation28_spill] sm:$0xff] }
 0x401   :  { %9567 = vmatmul.mubr.f32.gmra.mrb[32].mxu1 %v5804_v18  ;;  %9060 = vmatprep.mubr.f32.mxu0 %v10716_v48  ;;  %v5835_v18 = vrot.slane %v12847_v52, 1  ;;  %v14716_v48 = vld [vmem:[#allocation36_spill] sm:$0xff]  ;;  %v5841_v52 = vrot.slane %v14717_v42, 1 }
 0x402   :  { %9569 = vmatprep.mubr.f32.mxu1 %v5807_v41  ;;  %v5838_v41 = vrot.slane %v13125_v6, 1  ;;  %v14732_v42 = vld [vmem:[#allocation32_spill] sm:$0xff] }
 0x403   :  { %v5837_v57 = vsel %vm1320_vm0, %v5835_v18, %v5836_v28  ;;  %v5856_v18 = vrot.slane %v14728_v51, 1 }
 0x404   :  { %9061 = vmatmul.mubr.f32.gmra.mrb[100].mxu0 %v10717_v12  ;;  %v14718_v12 = vld [vmem:[#allocation34_spill] sm:$0xff] }
 0x405   :  { %9570 = vmatmul.mubr.f32.gmra.mrb[34].mxu1 %v5809_v37  ;;  %9063 = vmatprep.mubr.f32.mxu0 %v10718_v25  ;;  %v5840_v37 = vrot.slane %v14716_v48, 1  ;;  %v5843_v25 = vrot.slane %v13132_v2, 1  ;;  %v14731_v48 = vld [vmem:[#allocation25_spill] sm:$0xff] }
 0x406   :  { %9572 = vmatprep.mubr.f32.mxu1 %v5812_v63  ;;  %v5839_v63 = vsel %vm1320_vm0, %v5836_v28, %v5838_v41  ;;  %v14729_v28 = vld [vmem:[#allocation16_spill] sm:$0xff] }
 0x407   :  { %v5844_v4 = vsel %vm1320_vm0, %v5841_v52, %v5843_v25 }
 0x408   :  { %9064 = vmatmul.mubr.f32.gmra.mrb[102].mxu0 %v10719_v3  ;;  %v14721_v3 = vld [vmem:[#allocation37_spill] sm:$0xff] }
 0x409   :  { %9573 = vmatmul.mubr.f32.gmra.mrb[36].mxu1 %v5814_v11  ;;  %9066 = vmatprep.mubr.f32.mxu0 %v10720_v54  ;;  %v14719_v11 = vld [vmem:[#allocation40_spill] sm:$0xff]  ;;  %v13141_v54 = vld [vmem:[#allocation2 + $0x2c8] sm:$0x3] }
 0x40a   :  { %9575 = vmatprep.mubr.f32.mxu1 %v5817_v14  ;;  %v5845_v15 = vrot.slane %v14719_v11, 1  ;;  %v5842_v14 = vsel %vm1320_vm0, %v5840_v37, %v5841_v52  ;;  %v5848_v59 = vrot.slane %v13141_v54, 1  ;;  %v5860_v37 = vrot.slane %v14731_v48, 1 }
 0x40b   :  { %v5861_v52 = vrot.slane %v14732_v42, 1 }
 0x40c   :  { %9067 = vmatmul.mubr.f32.gmra.mrb[104].mxu0 %v10721_v61  ;;  %v5850_v61 = vrot.slane %v14723_v10, 1  ;;  %v5847_v30 = vsel %vm1320_vm0, %v5845_v15, %v5846_v38  ;;  %v14735_v15 = vld [vmem:[#allocation33_spill] sm:$0xff] }
 0x40d   :  { %9576 = vmatmul.mubr.f32.gmra.mrb[38].mxu1 %v5819_v16  ;;  %9069 = vmatprep.mubr.f32.mxu0 %v10722_v0  ;;  %v14722_v16 = vld [vmem:[#allocation39_spill] sm:$0xff]  ;;  %v5865_v26 = vrot.slane %v14735_v15, 1  ;;  %v14745_v15 = vld [vmem:[#allocation48_spill] sm:$0xff] }
 0x40e   :  { %9578 = vmatprep.mubr.f32.mxu1 %v5822_v46  ;;  %v14724_v46 = vld [vmem:[#allocation20_spill] sm:$0xff] }
 0x40f   :  { %v5851_v0 = vrot.slane %v14724_v46, 1  ;;  %v14739_v46 = vld [vmem:[#allocation43_spill] sm:$0xff] }
 0x410   :  { %9070 = vmatmul.mubr.f32.gmra.mrb[106].mxu0 %v10723_v47  ;;  %v5849_v47 = vsel %vm1320_vm0, %v5846_v38, %v5848_v59  ;;  %v14736_v38 = vld [vmem:[#allocation44_spill] sm:$0xff]  ;;  %v14738_v59 = vld [vmem:[#allocation30_spill] sm:$0xff] }
 0x411   :  { %9579 = vmatmul.mubr.f32.gmra.mrb[40].mxu1 %v5824_v17  ;;  %9072 = vmatprep.mubr.f32.mxu0 %v10724_v1  ;;  %v14725_v17 = vld [vmem:[#allocation38_spill] sm:$0xff] }
 0x412   :  { %9581 = vmatprep.mubr.f32.mxu1 %v5827_v56  ;;  %v5853_v56 = vrot.slane %v13150_v29, 1  ;;  %v14727_v1 = vld [vmem:[#allocation26_spill] sm:$0xff] }
 0x414   :  { %9073 = vmatmul.mubr.f32.gmra.mrb[108].mxu0 %v10725_v19  ;;  %v5852_v19 = vsel %vm1320_vm0, %v5850_v61, %v5851_v0 }
 0x415   :  { %9582 = vmatmul.mubr.f32.gmra.mrb[42].mxu1 %v5829_v33  ;;  %9075 = vmatprep.mubr.f32.mxu0 %v10726_v44  ;;  %v5855_v33 = vrot.slane %v14727_v1, 1  ;;  %v14730_v44 = vld [vmem:[#allocation18_spill] sm:$0xff]  ;;  %v14742_v1 = vld [vmem:[#allocation27_spill] sm:$0xff] }
 0x416   :  { %9584 = vmatprep.mubr.f32.mxu1 %v5832_v62  ;;  %v13159_v62 = vld [vmem:[#allocation2 + $0x2f8] sm:$0x3] }
 0x417   :  { %v5858_v41 = vrot.slane %v13159_v62, 1 }
 0x418   :  { %9076 = vmatmul.mubr.f32.gmra.mrb[110].mxu0 %v10727_v32  ;;  %v14733_v32 = vld [vmem:[#allocation21_spill] sm:$0xff] }
 0x419   :  { %9585 = vmatmul.mubr.f32.gmra.mrb[44].mxu1 %v5834_v53  ;;  %9078 = vmatprep.mubr.f32.mxu0 %v14718_v12  ;;  %v5854_v53 = vsel %vm1320_vm0, %v5851_v0, %v5853_v56  ;;  %v13168_v12 = vld [vmem:[#allocation2 + $0x310] sm:$0x3]  ;;  %v5859_v25 = vsel %vm1320_vm0, %v5856_v18, %v5858_v41  ;;  %v5870_v0 = vrot.slane %v14739_v46, 1  ;;  %v13186_v56 = vld [vmem:[#allocation2 + $0x340] sm:$0x3] }
 0x41a   :  { %9587 = vmatprep.mubr.f32.mxu1 %v5837_v57  ;;  %v5857_v57 = vsel %vm1320_vm0, %v5855_v33, %v5856_v18  ;;  %v5863_v11 = vrot.slane %v13168_v12, 1  ;;  %v14743_v33 = vld [vmem:[#allocation46_spill] sm:$0xff]  ;;  %v13190_v18 = vld [vmem:[#allocation2 + $0x358] sm:$0x3]  ;;  %v10734_v46 = vld [vmem:[#allocation2 + $0x60] sm:$0xff] }
 0x41b   :  { %v5875_v51 = vrot.slane %v14743_v33, 1  ;;  %v10728_v41 = vld [vmem:[#allocation2 + $0x330] sm:$0xff]  ;;  %v5878_v48 = vrot.slane %v13190_v18, 1 }
 0x41c   :  { %9079 = vmatmul.mubr.f32.gmra.mrb[112].mxu0 %v14721_v3  ;;  %v5866_v3 = vrot.slane %v14736_v38, 1  ;;  %v5864_v10 = vsel %vm1320_vm0, %v5861_v52, %v5863_v11  ;;  %v10732_v38 = vld [vmem:[#allocation2 + $0x48] sm:$0xff] }
 0x41d   :  { %9588 = vmatmul.mubr.f32.gmra.mrb[46].mxu1 %v5839_v63  ;;  %9081 = vmatprep.mubr.f32.mxu0 %v14722_v16  ;;  %v14734_v63 = vld [vmem:[#allocation23_spill] sm:$0xff]  ;;  %v5862_v16 = vsel %vm1320_vm0, %v5860_v37, %v5861_v52  ;;  %v5877_v37 = vsel %vm1320_vm0, %v5875_v51, %v13062_v27  ;;  %v10729_v52 = vld [vmem:[#allocation2 + $0x30] sm:$0xff]  ;;  %v5879_v11 = vsel %vm1320_vm0, %v13062_v27, %v5878_v48  ;;  %v10737_v51 = vld [vmem:[#allocation2 + $0x80] sm:$0xff] }
 0x41e   :  { %9590 = vmatprep.mubr.f32.mxu1 %v5842_v14  ;;  %v14737_v14 = vld [vmem:[#allocation29_spill] sm:$0xff]  ;;  %v10739_v48 = vld [vmem:[#allocation2 + $0x98] sm:$0xff] }
 0x420   :  { %9082 = vmatmul.mubr.f32.gmra.mrb[114].mxu0 %v14725_v17  ;;  %v14740_v17 = vld [vmem:[#allocation45_spill] sm:$0xff] }
 0x421   :  { %9591 = vmatmul.mubr.f32.gmra.mrb[48].mxu1 %v5844_v4  ;;  %9084 = vmatprep.mubr.f32.mxu0 %v14726_v8  ;;  %v13177_v4 = vld [vmem:[#allocation2 + $0x328] sm:$0x3]  ;;  %v14741_v8 = vld [vmem:[#allocation31_spill] sm:$0xff] }
 0x422   :  { %9593 = vmatprep.mubr.f32.mxu1 %v5847_v30  ;;  %v5868_v61 = vrot.slane %v13177_v4, 1  ;;  %v5871_v30 = vrot.slane %v14740_v17, 1  ;;  %v10735_v17 = vld [vmem:[#allocation2 + $0x68] sm:$0xff] }
 0x424   :  { %9085 = vmatmul.mubr.f32.gmra.mrb[116].mxu0 %v14729_v28  ;;  %v5869_v28 = vsel %vm1320_vm0, %v5866_v3, %v5868_v61  ;;  %v6418_v61 = vrot.slane %v12964_v24, 2 }
 0x425   :  { %9594 = vmatmul.mubr.f32.gmra.mrb[50].mxu1 %v5849_v47  ;;  %9087 = vmatprep.mubr.f32.mxu0 %v14730_v44  ;;  %v5867_v47 = vsel %vm1320_vm0, %v5865_v26, %v5866_v3  ;;  %v14744_v44 = vld [vmem:[#allocation24_spill] sm:$0xff]  ;;  %v6413_v26 = vrot.slane %v14745_v15, 2  ;;  %v6415_v3 = vrot.slane %v10732_v38, 2  ;;  %v6438_v15 = vrot.slane %v12995_v22, 2 }
 0x426   :  { %9596 = vmatprep.mubr.f32.mxu1 %v5852_v19  ;;  %v5873_v19 = vrot.slane %v13186_v56, 1 }
 0x428   :  { %9088 = vmatmul.mubr.f32.gmra.mrb[118].mxu0 %v14733_v32  ;;  %v5874_v42 = vsel %vm1320_vm0, %v5871_v30, %v5873_v19  ;;  %v6410_v32 = vrot.slane %v10729_v52, 2  ;;  %v6433_v52 = vrot.slane %v12988_v34, 2 }
 0x429   :  { %9597 = vmatmul.mubr.f32.gmra.mrb[52].mxu1 %v5854_v53  ;;  %9090 = vmatprep.mubr.f32.mxu0 %v14734_v63  ;;  %v5872_v53 = vsel %vm1320_vm0, %v5870_v0, %v5871_v30  ;;  %v10731_v63 = vld [vmem:[#allocation2 + $0x38] sm:$0xff]  ;;  %v6420_v0 = vrot.slane %v10734_v46, 2  ;;  %v6421_v30 = vrot.slane %v10735_v17, 2  ;;  %v10745_v46 = vld [vmem:[#allocation2 + $0xe0] sm:$0xff] }
 0x42a   :  { %9599 = vmatprep.mubr.f32.mxu1 %v5857_v57  ;;  %v10730_v57 = vld [vmem:[#allocation2 + $0x338] sm:$0xff] }
 0x42b   :  { %v6422_v19 = vsel %vm2332_vm1, %v6420_v0, %v6421_v30  ;;  %v6446_v0 = vrot.slane %v10745_v46, 2 }
 0x42c   :  { %9091 = vmatmul.mubr.f32.gmra.mrb[120].mxu0 %v14737_v14  ;;  %v10733_v14 = vld [vmem:[#allocation2 + $0x50] sm:$0xff] }
 0x42d   :  { %9600 = vmatmul.mubr.f32.gmra.mrb[54].mxu1 %v5859_v25  ;;  %9093 = vmatprep.mubr.f32.mxu0 %v14738_v59  ;;  %v6411_v25 = vrot.slane %v10731_v63, 2  ;;  %v10741_v63 = vld [vmem:[#allocation2 + $0xb0] sm:$0xff] }
 0x42e   :  { %9602 = vmatprep.mubr.f32.mxu1 %v5862_v16  ;;  %v6416_v16 = vrot.slane %v10733_v14, 2 }
 0x42f   :  { %v6412_v59 = vsel %vm2332_vm1, %v6410_v32, %v6411_v25  ;;  %v10740_v32 = vld [vmem:[#allocation2 + $0xa8] sm:$0xff] }
 0x430   :  { %9094 = vmatmul.mubr.f32.gmra.mrb[122].mxu0 %v14741_v8  ;;  %v6417_v27 = vsel %vm2332_vm1, %v6415_v3, %v6416_v16  ;;  %v6419_v8 = vsel %vm2332_vm1, %v6416_v16, %v6418_v61  ;;  %v10743_v3 = vld [vmem:[#allocation2 + $0xc8] sm:$0xff] }
 0x431   :  { %9603 = vmatmul.mubr.f32.gmra.mrb[56].mxu1 %v5864_v10  ;;  %9096 = vmatprep.mubr.f32.mxu0 %v14742_v1  ;;  %v6414_v10 = vsel %vm2332_vm1, %v6411_v25, %v6413_v26  ;;  %v10736_v1 = vld [vmem:[#allocation2 + $0x78] sm:$0xff]  ;;  %v6436_v25 = vrot.slane %v10741_v63, 2  ;;  %v10742_v26 = vld [vmem:[#allocation2 + $0xc0] sm:$0xff]  ;;  %v6441_v14 = vrot.slane %v10743_v3, 2 }
 0x432   :  { %9605 = vmatprep.mubr.f32.mxu1 %v5867_v47  ;;  %v6423_v47 = vrot.slane %v12972_v9, 2  ;;  %v6425_v33 = vrot.slane %v10736_v1, 2  ;;  %v6440_v38 = vrot.slane %v10742_v26, 2  ;;  %v10754_v26 = vld [vmem:[#allocation2 + $0x150] sm:$0xff]  ;;  %v10755_v3 = vld [vmem:[#allocation2 + $0x158] sm:$0xff] }
 0x433   :  { %v6439_v34 = vsel %vm2332_vm1, %v6436_v25, %v6438_v15  ;;  %v6468_v15 = vrot.slane %v13037_v7, 2 }
 0x434   :  { %9097 = vmatmul.mubr.f32.gmra.mrb[124].mxu0 %v14744_v44  ;;  %v6424_v24 = vsel %vm2332_vm1, %v6421_v30, %v6423_v47  ;;  %v6428_v44 = vrot.slane %v12981_v13, 2  ;;  %v6442_v17 = vsel %vm2332_vm1, %v6440_v38, %v6441_v14  ;;  %v6448_v30 = vrot.slane %v13009_v40, 2  ;;  %v10747_v47 = vld [vmem:[#allocation2 + $0xf8] sm:$0xff] }
 0x435   :  { %9606 = vmatmul.mubr.f32.gmra.mrb[58].mxu1 %v5869_v28  ;;  %9099 = vmatprep.mubr.f32.mxu0 %v10728_v41  ;;  %v6426_v28 = vrot.slane %v10737_v51, 2  ;;  %v6451_v1 = vrot.slane %v10747_v47, 2  ;;  %v6453_v51 = vrot.slane %v13016_v36, 2  ;;  %v6470_v38 = vrot.slane %v10754_v26, 2 }
 0x436   :  { %9608 = vmatprep.mubr.f32.mxu1 %v5872_v53  ;;  %v10738_v53 = vld [vmem:[#allocation2 + $0x90] sm:$0xff] }
 0x437   :  { %v6430_v41 = vrot.slane %v10738_v53, 2  ;;  %v6429_v9 = vsel %vm2332_vm1, %v6426_v28, %v6428_v44  ;;  %v6454_v40 = vsel %vm2332_vm1, %v6451_v1, %v6453_v51 }
 0x438   :  { %9100 = vmatmul.mubr.f32.gmra.mrb[126].mxu0 %v10730_v57  ;;  %v6435_v57 = vrot.slane %v10740_v32, 2  ;;  %v6463_v32 = vrot.slane %v13030_v31, 2 }
 0x439   :  { %9609 = vmatmul.mubr.f32.gmra.mrb[60].mxu1 %v5874_v42  ;;  %v6427_v42 = vsel %vm2332_vm1, %v6425_v33, %v6426_v28  ;;  %v10748_v28 = vld [vmem:[#allocation2 + $0x108] sm:$0xff] }
 0x43a   :  { %9611 = vmatprep.mubr.f32.mxu1 %v5877_v37  ;;  %v6431_v37 = vrot.slane %v10739_v48, 2  ;;  %v6437_v16 = vsel %vm2332_vm1, %v6435_v57, %v6436_v25  ;;  %v10750_v48 = vld [vmem:[#allocation2 + $0x120] sm:$0xff]  ;;  %v10752_v57 = vld [vmem:[#allocation2 + $0x138] sm:$0xff] }
 0x43b   :  { %v6465_v63 = vrot.slane %v10752_v57, 2  ;;  %v10753_v25 = vld [vmem:[#allocation2 + $0x140] sm:$0xff]  ;;  %v10765_v57 = vld [vmem:[#allocation2 + $0x210] sm:$0xff] }
 0x43c   :  { %v6434_v13 = vsel %vm2332_vm1, %v6431_v37, %v6433_v52 }
 0x43d   :  { %9612 = vmatmul.mubr.f32.gmra.mrb[62].mxu1 %v5879_v11  ;;  %v6432_v11 = vsel %vm2332_vm1, %v6430_v41, %v6431_v37  ;;  %v6458_v41 = vrot.slane %v13023_v60, 2  ;;  %v6460_v37 = vrot.slane %v10750_v48, 2  ;;  %v6493_v48 = vrot.slane %v13075_v45, 2 }
 0x43e   :  { %9646 = vmatprep.mubr.f32.mxu1 %v6412_v59  ;;  %v6443_v59 = vrot.slane %v13002_v49, 2  ;;  %v6449_v49 = vsel %vm2332_vm1, %v6446_v0, %v6448_v30 }
 0x440   :  { %v6444_v22 = vsel %vm2332_vm1, %v6441_v14, %v6443_v59  ;;  %v6471_v14 = vrot.slane %v10755_v3, 2  ;;  %v10756_v59 = vld [vmem:[#allocation2 + $0x168] sm:$0xff] }
 0x441   :  { %9647 = vmatmul.mubr.f32.vlgmr.msra.gmra.mrb[0].mxu1 %v6414_v10  ;;  %v10744_v10 = vld [vmem:[#allocation2 + $0xd8] sm:$0xff] }
 0x442   :  { %9649 = vmatprep.mubr.f32.mxu1 %v6417_v27  ;;  %v6445_v61 = vrot.slane %v10744_v10, 2  ;;  %v10746_v27 = vld [vmem:[#allocation2 + $0xf0] sm:$0xff]  ;;  %v6475_v10 = vrot.slane %v10756_v59, 2  ;;  %v10770_v59 = vld [vmem:[#allocation2 + $0x248] sm:$0xff] }
 0x444   :  { %v6447_v33 = vsel %vm2332_vm1, %v6445_v61, %v6446_v0  ;;  %v10757_v61 = vld [vmem:[#allocation2 + $0x170] sm:$0xff]  ;;  %v6472_v0 = vsel %vm2332_vm1, %v6470_v38, %v6471_v14 }
 0x445   :  { %9650 = vmatmul.mubr.f32.gmra.mrb[2].mxu1 %v6419_v8  ;;  %v6450_v8 = vrot.slane %v10746_v27, 2  ;;  %v6476_v46 = vrot.slane %v10757_v61, 2  ;;  %v10759_v27 = vld [vmem:[#allocation2 + $0x188] sm:$0xff]  ;;  %v10768_v38 = vld [vmem:[#allocation2 + $0x230] sm:$0xff] }
 0x446   :  { %9652 = vmatprep.mubr.f32.mxu1 %v6422_v19  ;;  %v6455_v19 = vrot.slane %v10748_v28, 2  ;;  %v14746_v28 = vld [vmem:[#allocation35_spill] sm:$0xff]  ;;  %v6506_v3 = vrot.slane %v10768_v38, 2  ;;  %v10781_v38 = vld [vmem:[#allocation2 + $0x2d0] sm:$0xff] }
 0x447   :  { %v6452_v53 = vsel %vm2332_vm1, %v6450_v8, %v6451_v1  ;;  %v6481_v8 = vrot.slane %v10759_v27, 2  ;;  %v6477_v47 = vsel %vm2332_vm1, %v6475_v10, %v6476_v46  ;;  %v6511_v10 = vrot.slane %v10770_v59, 2 }
 0x448   :  { %v6543_v59 = vrot.slane %v13150_v29, 2 }
 0x449   :  { %9653 = vmatmul.mubr.f32.gmra.mrb[4].mxu1 %v6424_v24  ;;  %v10749_v24 = vld [vmem:[#allocation2 + $0x110] sm:$0xff] }
 0x44a   :  { %9655 = vmatprep.mubr.f32.mxu1 %v6427_v42  ;;  %v6456_v44 = vrot.slane %v10749_v24, 2  ;;  %v10751_v42 = vld [vmem:[#allocation2 + $0x128] sm:$0xff] }
 0x44c   :  { %v6457_v52 = vsel %vm2332_vm1, %v6455_v19, %v6456_v44  ;;  %v6459_v36 = vsel %vm2332_vm1, %v6456_v44, %v6458_v41  ;;  %v10761_v44 = vld [vmem:[#allocation2 + $0x1e0] sm:$0xff] }
 0x44d   :  { %9656 = vmatmul.mubr.f32.gmra.mrb[6].mxu1 %v6429_v9  ;;  %v6461_v9 = vrot.slane %v10751_v42, 2 }
 0x44e   :  { %9658 = vmatprep.mubr.f32.mxu1 %v6432_v11  ;;  %v6466_v11 = vrot.slane %v10753_v25, 2  ;;  %v10766_v25 = vld [vmem:[#allocation2 + $0x218] sm:$0xff] }
 0x44f   :  { %v6464_v60 = vsel %vm2332_vm1, %v6461_v9, %v6463_v32  ;;  %v6498_v32 = vrot.slane %v13083_v23, 2 }
 0x450   :  { %v6469_v31 = vsel %vm2332_vm1, %v6466_v11, %v6468_v15  ;;  %v10767_v15 = vld [vmem:[#allocation2 + $0x228] sm:$0xff] }
 0x451   :  { %9659 = vmatmul.mubr.f32.gmra.mrb[8].mxu1 %v6434_v13  ;;  %v6462_v13 = vsel %vm2332_vm1, %v6460_v37, %v6461_v9  ;;  %v10763_v37 = vld [vmem:[#allocation2 + $0x1f8] sm:$0xff]  ;;  %v10764_v9 = vld [vmem:[#allocation2 + $0x200] sm:$0xff]  ;;  %v6505_v26 = vrot.slane %v10767_v15, 2 }
 0x452   :  { %9661 = vmatprep.mubr.f32.mxu1 %v6437_v16  ;;  %v6467_v16 = vsel %vm2332_vm1, %v6465_v63, %v6466_v11  ;;  %v6495_v42 = vrot.slane %v10763_v37, 2  ;;  %v6500_v63 = vrot.slane %v10765_v57, 2  ;;  %v6501_v11 = vrot.slane %v10766_v25, 2  ;;  %v10777_v37 = vld [vmem:[#allocation2 + $0x2a0] sm:$0xff] }
 0x453   :  { %v6507_v61 = vsel %vm2332_vm1, %v6505_v26, %v6506_v3  ;;  %v6533_v57 = vrot.slane %v13132_v2, 2  ;;  %v6538_v26 = vrot.slane %v13141_v54, 2 }
 0x455   :  { %9662 = vmatmul.mubr.f32.gmra.mrb[10].mxu1 %v6439_v34  ;;  %v6473_v34 = vrot.slane %v13044_v39, 2  ;;  %v10760_v39 = vld [vmem:[#allocation2 + $0x198] sm:$0xff] }
 0x456   :  { %9664 = vmatprep.mubr.f32.mxu1 %v6442_v17  ;;  %v6478_v17 = vrot.slane %v13051_v35, 2  ;;  %v6485_v1 = vrot.slane %v10760_v39, 2  ;;  %v6488_v35 = vrot.slane %v13064_v43, 2  ;;  %v6496_v43 = vrot.slane %v10764_v9, 2  ;;  %v10778_v9 = vld [vmem:[#allocation2 + $0x2a8] sm:$0xff] }
 0x457   :  { %v6474_v7 = vsel %vm2332_vm1, %v6471_v14, %v6473_v34  ;;  %v6502_v14 = vsel %vm2332_vm1, %v6500_v63, %v6501_v11  ;;  %v10779_v63 = vld [vmem:[#allocation2 + $0x2b8] sm:$0xff] }
 0x458   :  { %v6487_v19 = vsel %vm2332_vm1, %v6485_v1, %v14746_v28  ;;  %v6499_v45 = vsel %vm2332_vm1, %v6496_v43, %v6498_v32  ;;  %v10774_v1 = vld [vmem:[#allocation2 + $0x278] sm:$0xff]  ;;  %v6535_v25 = vrot.slane %v10779_v63, 2 }
 0x459   :  { %9665 = vmatmul.mubr.f32.gmra.mrb[12].mxu1 %v6444_v22  ;;  %v10758_v22 = vld [vmem:[#allocation2 + $0x180] sm:$0xff] }
 0x45a   :  { %9667 = vmatprep.mubr.f32.mxu1 %v6447_v33  ;;  %v6480_v30 = vrot.slane %v10758_v22, 2  ;;  %v6479_v33 = vsel %vm2332_vm1, %v6476_v46, %v6478_v17  ;;  %v6513_v46 = vrot.slane %v13104_v55, 2  ;;  %v10772_v17 = vld [vmem:[#allocation2 + $0x260] sm:$0xff] }
 0x45b   :  { %v6516_v22 = vrot.slane %v10772_v17, 2 }
 0x45c   :  { %v6482_v51 = vsel %vm2332_vm1, %v6480_v30, %v6481_v8  ;;  %v6514_v27 = vsel %vm2332_vm1, %v6511_v10, %v6513_v46 }
 0x45d   :  { %9668 = vmatmul.mubr.f32.gmra.mrb[14].mxu1 %v6449_v49  ;;  %v6483_v49 = vrot.slane %v13058_v20, 2  ;;  %v6489_v20 = vsel %vm2332_vm1, %v14746_v28, %v6488_v35  ;;  %v6523_v28 = vrot.slane %v13118_v58, 2  ;;  %v6531_v58 = vrot.slane %v10778_v9, 2 }
 0x45e   :  { %9670 = vmatprep.mubr.f32.mxu1 %v6452_v53  ;;  %v6490_v53 = vrot.slane %v10761_v44, 2  ;;  %v10776_v44 = vld [vmem:[#allocation2 + $0x290] sm:$0xff] }
 0x45f   :  { %v6484_v24 = vsel %vm2332_vm1, %v6481_v8, %v6483_v49  ;;  %v6518_v8 = vrot.slane %v13111_v5, 2  ;;  %v6526_v5 = vrot.slane %v10776_v44, 2  ;;  %v6534_v15 = vsel %vm2332_vm1, %v6531_v58, %v6533_v57  ;;  %v10792_v57 = vld [vmem:[#allocation2 + $0x8] sm:$0xff] }
 0x460   :  { %v6566_v63 = vrot.slane %v10792_v57, 2 }
 0x461   :  { %9671 = vmatmul.mubr.f32.gmra.mrb[16].mxu1 %v6454_v40  ;;  %v10762_v40 = vld [vmem:[#allocation2 + $0x1e8] sm:$0xff]  ;;  %v6519_v35 = vsel %vm2332_vm1, %v6516_v22, %v6518_v8 }
 0x462   :  { %9673 = vmatprep.mubr.f32.mxu1 %v6457_v52  ;;  %v6491_v41 = vrot.slane %v10762_v40, 2  ;;  %v10786_v8 = vld [vmem:[#allocation2 + $0x308] sm:$0xff] }
 0x463   :  { %v6551_v29 = vrot.slane %v10786_v8, 2 }
 0x464   :  { %v6492_v52 = vsel %vm2332_vm1, %v6490_v53, %v6491_v41 }
 0x465   :  { %9674 = vmatmul.mubr.f32.gmra.mrb[18].mxu1 %v6459_v36  ;;  %v6494_v36 = vsel %vm2332_vm1, %v6491_v41, %v6493_v48  ;;  %v6528_v48 = vrot.slane %v13125_v6, 2 }
 0x466   :  { %9676 = vmatprep.mubr.f32.mxu1 %v6462_v13  ;;  %v6497_v13 = vsel %vm2332_vm1, %v6495_v42, %v6496_v43  ;;  %v6530_v42 = vrot.slane %v10777_v37, 2 }
 0x467   :  { %v6529_v32 = vsel %vm2332_vm1, %v6526_v5, %v6528_v48  ;;  %v10789_v48 = vld [vmem:[#allocation2 + $0x330] sm:$0xff] }
 0x468   :  { %v6560_v37 = vrot.slane %v10789_v48, 2 }
 0x469   :  { %9677 = vmatmul.mubr.f32.gmra.mrb[20].mxu1 %v6464_v60  ;;  %v6503_v60 = vrot.slane %v13090_v50, 2 }
 0x46a   :  { %9679 = vmatprep.mubr.f32.mxu1 %v6467_v16  ;;  %v6508_v16 = vrot.slane %v13097_v21, 2 }
 0x46b   :  { %v6504_v23 = vsel %vm2332_vm1, %v6501_v11, %v6503_v60  ;;  %v10780_v11 = vld [vmem:[#allocation2 + $0x2c0] sm:$0xff] }
 0x46c   :  { %v6509_v50 = vsel %vm2332_vm1, %v6506_v3, %v6508_v16  ;;  %v6536_v6 = vrot.slane %v10780_v11, 2  ;;  %v6540_v3 = vrot.slane %v10781_v38, 2 }
 0x46d   :  { %9680 = vmatmul.mubr.f32.gmra.mrb[22].mxu1 %v6469_v31  ;;  %v10769_v31 = vld [vmem:[#allocation2 + $0x240] sm:$0xff] }
 0x46e   :  { %9682 = vmatprep.mubr.f32.mxu1 %v6472_v0  ;;  %v6510_v34 = vrot.slane %v10769_v31, 2  ;;  %v10771_v0 = vld [vmem:[#allocation2 + $0x258] sm:$0xff]  ;;  %v6537_v16 = vsel %vm2332_vm1, %v6535_v25, %v6536_v6 }
 0x470   :  { %v6512_v30 = vsel %vm2332_vm1, %v6510_v34, %v6511_v10  ;;  %v6539_v34 = vsel %vm2332_vm1, %v6536_v6, %v6538_v26  ;;  %v10783_v10 = vld [vmem:[#allocation2 + $0x2e8] sm:$0xff] }
 0x471   :  { %9683 = vmatmul.mubr.f32.gmra.mrb[24].mxu1 %v6474_v7  ;;  %v6515_v7 = vrot.slane %v10771_v0, 2 }
 0x472   :  { %9685 = vmatprep.mubr.f32.mxu1 %v6477_v47  ;;  %v10773_v47 = vld [vmem:[#allocation2 + $0x270] sm:$0xff] }
 0x473   :  { %v6520_v39 = vrot.slane %v10773_v47, 2  ;;  %v6517_v55 = vsel %vm2332_vm1, %v6515_v7, %v6516_v22  ;;  %v6548_v22 = vrot.slane %v13159_v62, 2 }
 0x475   :  { %9686 = vmatmul.mubr.f32.gmra.mrb[26].mxu1 %v6479_v33  ;;  %v6521_v33 = vrot.slane %v10774_v1, 2 }
 0x476   :  { %9688 = vmatprep.mubr.f32.mxu1 %v6482_v51 }
 0x477   :  { %v6522_v40 = vsel %vm2332_vm1, %v6520_v39, %v6521_v33 }
 0x479   :  { %9689 = vmatmul.mubr.f32.gmra.mrb[28].mxu1 %v6484_v24 }
 0x47a   :  { %9691 = vmatprep.mubr.f32.mxu1 %v6487_v19  ;;  %v10775_v19 = vld [vmem:[#allocation2 + $0x288] sm:$0xff] }
 0x47b   :  { %v6525_v24 = vrot.slane %v10775_v19, 2  ;;  %v10788_v19 = vld [vmem:[#allocation2 + $0x320] sm:$0xff] }
 0x47c   :  { %v6556_v62 = vrot.slane %v10788_v19, 2 }
 0x47d   :  { %9692 = vmatmul.mubr.f32.gmra.mrb[30].mxu1 %v6489_v20  ;;  %v6524_v20 = vsel %vm2332_vm1, %v6521_v33, %v6523_v28 }
 0x47e   :  { %9694 = vmatprep.mubr.f32.mxu1 %v6492_v52  ;;  %v6527_v52 = vsel %vm2332_vm1, %v6525_v24, %v6526_v5 }
 0x481   :  { %9695 = vmatmul.mubr.f32.gmra.mrb[32].mxu1 %v6494_v36 }
 0x482   :  { %9697 = vmatprep.mubr.f32.mxu1 %v6497_v13 }
 0x485   :  { %9698 = vmatmul.mubr.f32.gmra.mrb[34].mxu1 %v6499_v45  ;;  %v6532_v45 = vsel %vm2332_vm1, %v6530_v42, %v6531_v58  ;;  %v10790_v42 = vld [vmem:[#allocation2 + $0x338] sm:$0xff] }
 0x486   :  { %9700 = vmatprep.mubr.f32.mxu1 %v6502_v14  ;;  %v10782_v14 = vld [vmem:[#allocation2 + $0x2d8] sm:$0xff] }
 0x487   :  { %v6541_v2 = vrot.slane %v10782_v14, 2 }
 0x489   :  { %9701 = vmatmul.mubr.f32.gmra.mrb[36].mxu1 %v6504_v23  ;;  %v6542_v0 = vsel %vm2332_vm1, %v6540_v3, %v6541_v2  ;;  %v6544_v17 = vsel %vm2332_vm1, %v6541_v2, %v6543_v59 }
 0x48a   :  { %9703 = vmatprep.mubr.f32.mxu1 %v6507_v61  ;;  %v6545_v61 = vrot.slane %v10783_v10, 2 }
 0x48d   :  { %9704 = vmatmul.mubr.f32.gmra.mrb[38].mxu1 %v6509_v50  ;;  %v10784_v50 = vld [vmem:[#allocation2 + $0x2f0] sm:$0xff] }
 0x48e   :  { %9706 = vmatprep.mubr.f32.mxu1 %v6512_v30  ;;  %v6546_v54 = vrot.slane %v10784_v50, 2  ;;  %v10785_v30 = vld [vmem:[#allocation2 + $0x300] sm:$0xff] }
 0x48f   :  { %v13266_v21 = vpop.f32.mrb[64].mxu0 }
 0x490   :  { %v13270_v49 = vpop.f32.mrb[65].mxu0  ;;  %v6547_v39 = vsel %vm2332_vm1, %v6545_v61, %v6546_v54  ;;  %v6549_v33 = vsel %vm2332_vm1, %v6546_v54, %v6548_v22 }
 0x491   :  { %9707 = vmatmul.mubr.f32.gmra.mrb[40].mxu1 %v6514_v27  ;;  %v6550_v27 = vrot.slane %v10785_v30, 2 }
 0x492   :  { %9709 = vmatprep.mubr.f32.mxu1 %v6517_v55  ;;  %v6553_v55 = vrot.slane %v13168_v12, 2  ;;  %v6561_v12 = vrot.slane %v10790_v42, 2 }
 0x493   :  { %v13273_v51 = vpop.f32.mrb[66].mxu0  ;;  %v6552_v44 = vsel %vm2332_vm1, %v6550_v27, %v6551_v29 }
 0x494   :  { %v13277_v53 = vpop.f32.mrb[67].mxu0 }
 0x495   :  { %9710 = vmatmul.mubr.f32.gmra.mrb[42].mxu1 %v6519_v35  ;;  %v10787_v35 = vld [vmem:[#allocation2 + $0x318] sm:$0xff] }
 0x496   :  { %9712 = vmatprep.mubr.f32.mxu1 %v6522_v40  ;;  %v6555_v28 = vrot.slane %v10787_v35, 2  ;;  %v6554_v40 = vsel %vm2332_vm1, %v6551_v29, %v6553_v55 }
 0x497   :  { %v13280_v41 = vpop.f32.mrb[68].mxu0 }
 0x498   :  { %v13284_v43 = vpop.f32.mrb[69].mxu0  ;;  %v6557_v58 = vsel %vm2332_vm1, %v6555_v28, %v6556_v62 }
 0x499   :  { %9713 = vmatmul.mubr.f32.gmra.mrb[44].mxu1 %v6524_v20  ;;  %v6558_v20 = vrot.slane %v13177_v4, 2  ;;  %v6563_v4 = vrot.slane %v13186_v56, 2 }
 0x49a   :  { %9715 = vmatprep.mubr.f32.mxu1 %v6527_v52  ;;  %v10791_v52 = vld [vmem:[#allocation2 + $0x348] sm:$0xff] }
 0x49b   :  { %v13287_v36 = vpop.f32.mrb[70].mxu0  ;;  %v6559_v11 = vsel %vm2332_vm1, %v6556_v62, %v6558_v20  ;;  %v6564_v3 = vsel %vm2332_vm1, %v6561_v12, %v6563_v4 }
 0x49c   :  { %v13291_v13 = vpop.f32.mrb[71].mxu0 }
 0x49d   :  { %9716 = vmatmul.mubr.f32.gmra.mrb[46].mxu1 %v6529_v32  ;;  %v6565_v32 = vrot.slane %v10791_v52, 2 }
 0x49e   :  { %9718 = vmatprep.mubr.f32.mxu1 %v6532_v45  ;;  %v6562_v45 = vsel %vm2332_vm1, %v6560_v37, %v6561_v12 }
 0x49f   :  { %v13294_v60 = vpop.f32.mrb[72].mxu0  ;;  %v6567_v26 = vsel %vm2332_vm1, %v6565_v32, %v6566_v63 }
 0x4a0   :  { %v13298_v23 = vpop.f32.mrb[73].mxu0 }
 0x4a1   :  { %9719 = vmatmul.mubr.f32.gmra.mrb[48].mxu1 %v6534_v15  ;;  %v6568_v15 = vrot.slane %v13190_v18, 2 }
 0x4a2   :  { %9721 = vmatprep.mubr.f32.mxu1 %v6537_v16 }
 0x4a3   :  { %v13301_v31 = vpop.f32.mrb[74].mxu0  ;;  %v6569_v56 = vsel %vm2332_vm1, %v6566_v63, %v6568_v15 }
 0x4a4   :  { %v13305_v46 = vpop.f32.mrb[75].mxu0 }
 0x4a5   :  { %9722 = vmatmul.mubr.f32.gmra.mrb[50].mxu1 %v6539_v34 }
 0x4a6   :  { %9724 = vmatprep.mubr.f32.mxu1 %v6542_v0 }
 0x4a7   :  { %v13308_v7 = vpop.f32.mrb[76].mxu0 }
 0x4a8   :  { %v13312_v47 = vpop.f32.mrb[77].mxu0 }
 0x4a9   :  { %9725 = vmatmul.mubr.f32.gmra.mrb[52].mxu1 %v6544_v17 }
 0x4aa   :  { %9727 = vmatprep.mubr.f32.mxu1 %v6547_v39 }
 0x4ab   :  { %v13315_v1 = vpop.f32.mrb[78].mxu0 }
 0x4ac   :  { %v13319_v24 = vpop.f32.mrb[79].mxu0 }
 0x4ad   :  { %9728 = vmatmul.mubr.f32.gmra.mrb[54].mxu1 %v6549_v33 }
 0x4ae   :  { %9730 = vmatprep.mubr.f32.mxu1 %v6552_v44 }
 0x4af   :  { %v13322_v5 = vpop.f32.mrb[80].mxu0 }
 0x4b0   :  { %v13326_v9 = vpop.f32.mrb[81].mxu0 }
 0x4b1   :  { %9731 = vmatmul.mubr.f32.gmra.mrb[56].mxu1 %v6554_v40 }
 0x4b2   :  { %9733 = vmatprep.mubr.f32.mxu1 %v6557_v58 }
 0x4b3   :  { %v13329_v25 = vpop.f32.mrb[82].mxu0 }
 0x4b4   :  { %v13333_v6 = vpop.f32.mrb[83].mxu0 }
 0x4b5   :  { %9734 = vmatmul.mubr.f32.gmra.mrb[58].mxu1 %v6559_v11 }
 0x4b6   :  { %9736 = vmatprep.mubr.f32.mxu1 %v6562_v45 }
 0x4b7   :  { %v13338_v38 = vpop.f32.mrb[84].mxu0 }
 0x4b8   :  { %v13341_v14 = vpop.f32.mrb[85].mxu0 }
 0x4b9   :  { %9737 = vmatmul.mubr.f32.gmra.mrb[60].mxu1 %v6564_v3 }
 0x4ba   :  { %9739 = vmatprep.mubr.f32.mxu1 %v6567_v26 }
 0x4bb   :  { %v13344_v2 = vpop.f32.mrb[86].mxu0 }
 0x4bc   :  { %v13346_v16 = vpop.f32.mrb[87].mxu0 }
 0x4bd   :  { %9740 = vmatmul.mubr.f32.gmra.mrb[62].mxu1 %v6569_v56 }
 0x4bf   :  { %v13348_v34 = vpop.f32.mrb[88].mxu0 }
 0x4c0   :  { %v13350_v18 = vpop.f32.mrb[89].mxu0 }
 0x4c3   :  { %v13352_v59 = vpop.f32.mrb[90].mxu0 }
 0x4c4   :  { %v13354_v10 = vpop.f32.mrb[91].mxu0 }
 0x4c7   :  { %v13356_v61 = vpop.f32.mrb[92].mxu0 }
 0x4c8   :  { %v13358_v50 = vpop.f32.mrb[93].mxu0 }
 0x4cb   :  { %v13360_v54 = vpop.f32.mrb[94].mxu0 }
 0x4cc   :  { %v13362_v0 = vpop.f32.mrb[95].mxu0 }
 0x4cf   :  { %v13364_v17 = vpop.f32.mrb[96].mxu0 }
 0x4d0   :  { %v13366_v22 = vpop.f32.mrb[97].mxu0 }
 0x4d3   :  { %v13368_v30 = vpop.f32.mrb[98].mxu0 }
 0x4d4   :  { %v13370_v27 = vpop.f32.mrb[99].mxu0 }
 0x4d7   :  { %v13372_v8 = vpop.f32.mrb[100].mxu0 }
 0x4d8   :  { %v13374_v29 = vpop.f32.mrb[101].mxu0 }
 0x4db   :  { %v13376_v39 = vpop.f32.mrb[102].mxu0 }
 0x4dc   :  { %v13378_v33 = vpop.f32.mrb[103].mxu0 }
 0x4df   :  { %v13380_v55 = vpop.f32.mrb[104].mxu0 }
 0x4e0   :  { %v13382_v35 = vpop.f32.mrb[105].mxu0 }
 0x4e3   :  { %v13384_v28 = vpop.f32.mrb[106].mxu0 }
 0x4e4   :  { %v13386_v19 = vpop.f32.mrb[107].mxu0 }
 0x4e7   :  { %v13388_v62 = vpop.f32.mrb[108].mxu0 }
 0x4e8   :  { %v13390_v44 = vpop.f32.mrb[109].mxu0 }
 0x4eb   :  { %v13392_v40 = vpop.f32.mrb[110].mxu0 }
 0x4ec   :  { %v13394_v20 = vpop.f32.mrb[111].mxu0 }
 0x4ef   :  { %v13396_v48 = vpop.f32.mrb[112].mxu0 }
 0x4f0   :  { %v13398_v37 = vpop.f32.mrb[113].mxu0 }
 0x4f3   :  { %v13400_v42 = vpop.f32.mrb[114].mxu0 }
 0x4f4   :  { %v13402_v12 = vpop.f32.mrb[115].mxu0 }
 0x4f5   :  { %14747 = vst [vmem:[#allocation47_spill] sm:$0xff] %v13402_v12 }
 0x4f7   :  { %v13404_v58 = vpop.f32.mrb[116].mxu0 }
 0x4f8   :  { %14748 = vst [vmem:[#allocation36_spill] sm:$0xff] %v13404_v58  ;;  %v13406_v52 = vpop.f32.mrb[117].mxu0 }
 0x4f9   :  { %14749 = vst [vmem:[#allocation41_spill] sm:$0xff] %v13406_v52 }
 0x4fb   :  { %v13408_v32 = vpop.f32.mrb[118].mxu0 }
 0x4fc   :  { %14750 = vst [vmem:[#allocation34_spill] sm:$0xff] %v13408_v32  ;;  %v13410_v57 = vpop.f32.mrb[119].mxu0 }
 0x4fd   :  { %14751 = vst [vmem:[#allocation40_spill] sm:$0xff] %v13410_v57 }
 0x4ff   :  { %v13412_v63 = vpop.f32.mrb[120].mxu0 }
 0x500   :  { %14752 = vst [vmem:[#allocation22_spill] sm:$0xff] %v13412_v63  ;;  %v13414_v11 = vpop.f32.mrb[121].mxu0 }
 0x501   :  { %14753 = vst [vmem:[#allocation37_spill] sm:$0xff] %v13414_v11 }
 0x503   :  { %v13416_v4 = vpop.f32.mrb[122].mxu0 }
 0x504   :  { %14754 = vst [vmem:[#allocation39_spill] sm:$0xff] %v13416_v4  ;;  %v13418_v45 = vpop.f32.mrb[123].mxu0 }
 0x505   :  { %14755 = vst [vmem:[#allocation19_spill] sm:$0xff] %v13418_v45 }
 0x507   :  { %v13420_v15 = vpop.f32.mrb[124].mxu0 }
 0x508   :  { %14756 = vst [vmem:[#allocation20_spill] sm:$0xff] %v13420_v15  ;;  %v13422_v26 = vpop.f32.mrb[125].mxu0 }
 0x509   :  { %14757 = vst [vmem:[#allocation38_spill] sm:$0xff] %v13422_v26 }
 0x50b   :  { %v13424_v3 = vpop.f32.mrb[126].mxu0 }
 0x50c   :  { %14758 = vst [vmem:[#allocation17_spill] sm:$0xff] %v13424_v3  ;;  %v13426_v56 = vpop.f32.mrb[127].mxu0 }
 0x50d   :  { %14759 = vst [vmem:[#allocation26_spill] sm:$0xff] %v13426_v56 }
 0x514   :  { %v9648_v52 = vpop.f32.mrb[0].mxu1 }
 0x515   :  { %v13429_v32 = vadd.f32 %v9648_v52, %v13266_v21  ;;  %v6717_v57 = vpop.f32.mrb[1].mxu1 }
 0x516   :  { %v13432_v63 = vadd.f32 %v6717_v57, %v13270_v49 }
 0x517   :  { %14760 = vst [vmem:[#allocation28_spill] sm:$0xff] %v13429_v32  ;;  %v7171_v4 = vmul.f32 %v13429_v32, %v13429_v32 }
 0x518   :  { %14761 = vst [vmem:[#allocation16_spill] sm:$0xff] %v13432_v63  ;;  %v7170_v15 = vmul.f32 %v13432_v63, %v13432_v63  ;;  %v9651_v45 = vpop.f32.mrb[2].mxu1  ;;  %v7100_v56 = vadd.f32 %v13432_v63, %v13429_v32 }
 0x519   :  { %v13439_v26 = vadd.f32 %v9651_v45, %v13273_v51  ;;  %v6727_v3 = vpop.f32.mrb[3].mxu1 }
 0x51a   :  { %v13444_v21 = vadd.f32 %v6727_v3, %v13277_v53  ;;  %v7234_v52 = vadd.f32 %v7171_v4, %v7170_v15 }
 0x51b   :  { %v7173_v51 = vmul.f32 %v13439_v26, %v13439_v26 }
 0x51c   :  { %14762 = vst [vmem:[#allocation18_spill] sm:$0xff] %v13444_v21  ;;  %v7101_v49 = vadd.f32 %v13444_v21, %v7100_v56  ;;  %v7172_v57 = vmul.f32 %v13444_v21, %v13444_v21  ;;  %v9654_v11 = vpop.f32.mrb[4].mxu1 }
 0x51d   :  { %v13450_v58 = vadd.f32 %v9654_v11, %v13280_v41  ;;  %v6737_v12 = vpop.f32.mrb[5].mxu1 }
 0x51e   :  { %v7102_v45 = vadd.f32 %v13439_v26, %v7101_v49  ;;  %v7235_v32 = vadd.f32 %v7234_v52, %v7172_v57  ;;  %v13456_v53 = vadd.f32 %v6737_v12, %v13284_v43 }
 0x51f   :  { %v7175_v21 = vmul.f32 %v13450_v58, %v13450_v58 }
 0x520   :  { %v7236_v4 = vadd.f32 %v7235_v32, %v7173_v51  ;;  %v7103_v15 = vadd.f32 %v13456_v53, %v7102_v45  ;;  %v7174_v3 = vmul.f32 %v13456_v53, %v13456_v53  ;;  %v9657_v56 = vpop.f32.mrb[6].mxu1 }
 0x521   :  { %v13462_v41 = vadd.f32 %v9657_v56, %v13287_v36  ;;  %v6747_v11 = vpop.f32.mrb[7].mxu1 }
 0x522   :  { %v7237_v63 = vadd.f32 %v7236_v4, %v7174_v3  ;;  %v13467_v52 = vadd.f32 %v6747_v11, %v13291_v13  ;;  %v7104_v43 = vadd.f32 %v13450_v58, %v7103_v15 }
 0x523   :  { %v7177_v45 = vmul.f32 %v13462_v41, %v13462_v41 }
 0x524   :  { %v7105_v12 = vadd.f32 %v13467_v52, %v7104_v43  ;;  %v7176_v32 = vmul.f32 %v13467_v52, %v13467_v52  ;;  %v7238_v49 = vadd.f32 %v7237_v63, %v7175_v21  ;;  %v9660_v57 = vpop.f32.mrb[8].mxu1 }
 0x525   :  { %v13474_v36 = vadd.f32 %v9660_v57, %v13294_v60  ;;  %v6757_v51 = vpop.f32.mrb[9].mxu1 }
 0x526   :  { %v7239_v4 = vadd.f32 %v7238_v49, %v7176_v32  ;;  %v13479_v13 = vadd.f32 %v6757_v51, %v13298_v23  ;;  %v7106_v15 = vadd.f32 %v13462_v41, %v7105_v12 }
 0x527   :  { %v7179_v43 = vmul.f32 %v13474_v36, %v13474_v36 }
 0x528   :  { %v7107_v3 = vadd.f32 %v13479_v13, %v7106_v15  ;;  %v7178_v56 = vmul.f32 %v13479_v13, %v13479_v13  ;;  %v7240_v63 = vadd.f32 %v7239_v4, %v7177_v45  ;;  %v9663_v21 = vpop.f32.mrb[10].mxu1 }
 0x529   :  { %v13486_v60 = vadd.f32 %v9663_v21, %v13301_v31  ;;  %v6767_v11 = vpop.f32.mrb[11].mxu1 }
 0x52a   :  { %v7241_v32 = vadd.f32 %v7240_v63, %v7178_v56  ;;  %v13491_v23 = vadd.f32 %v6767_v11, %v13305_v46  ;;  %v7108_v12 = vadd.f32 %v13474_v36, %v7107_v3 }
 0x52b   :  { %v7181_v15 = vmul.f32 %v13486_v60, %v13486_v60 }
 0x52c   :  { %v7109_v49 = vadd.f32 %v13491_v23, %v7108_v12  ;;  %v7180_v57 = vmul.f32 %v13491_v23, %v13491_v23  ;;  %v7242_v51 = vadd.f32 %v7241_v32, %v7179_v43  ;;  %v9666_v45 = vpop.f32.mrb[12].mxu1 }
 0x52d   :  { %v13498_v31 = vadd.f32 %v9666_v45, %v13308_v7  ;;  %v6777_v4 = vpop.f32.mrb[13].mxu1 }
 0x52e   :  { %v7243_v56 = vadd.f32 %v7242_v51, %v7180_v57  ;;  %v13503_v46 = vadd.f32 %v6777_v4, %v13312_v47  ;;  %v7110_v3 = vadd.f32 %v13486_v60, %v7109_v49 }
 0x52f   :  { %v7183_v12 = vmul.f32 %v13498_v31, %v13498_v31 }
 0x530   :  { %v7111_v63 = vadd.f32 %v13503_v46, %v7110_v3  ;;  %v7182_v21 = vmul.f32 %v13503_v46, %v13503_v46  ;;  %v7244_v11 = vadd.f32 %v7243_v56, %v7181_v15  ;;  %v9669_v43 = vpop.f32.mrb[14].mxu1 }
 0x531   :  { %v13510_v7 = vadd.f32 %v9669_v43, %v13315_v1  ;;  %v6787_v32 = vpop.f32.mrb[15].mxu1 }
 0x532   :  { %v7245_v57 = vadd.f32 %v7244_v11, %v7182_v21  ;;  %v13515_v47 = vadd.f32 %v6787_v32, %v13319_v24  ;;  %v7112_v49 = vadd.f32 %v13498_v31, %v7111_v63 }
 0x533   :  { %v7185_v3 = vmul.f32 %v13510_v7, %v13510_v7 }
 0x534   :  { %v7113_v51 = vadd.f32 %v13515_v47, %v7112_v49  ;;  %v7184_v45 = vmul.f32 %v13515_v47, %v13515_v47  ;;  %v7246_v4 = vadd.f32 %v7245_v57, %v7183_v12  ;;  %v9672_v15 = vpop.f32.mrb[16].mxu1 }
 0x535   :  { %v13522_v1 = vadd.f32 %v9672_v15, %v13322_v5  ;;  %v6797_v56 = vpop.f32.mrb[17].mxu1 }
 0x536   :  { %v7247_v21 = vadd.f32 %v7246_v4, %v7184_v45  ;;  %v13527_v24 = vadd.f32 %v6797_v56, %v13326_v9  ;;  %v7114_v63 = vadd.f32 %v13510_v7, %v7113_v51 }
 0x537   :  { %v7187_v49 = vmul.f32 %v13522_v1, %v13522_v1 }
 0x538   :  { %v7115_v11 = vadd.f32 %v13527_v24, %v7114_v63  ;;  %v7186_v43 = vmul.f32 %v13527_v24, %v13527_v24  ;;  %v7248_v32 = vadd.f32 %v7247_v21, %v7185_v3  ;;  %v9675_v12 = vpop.f32.mrb[18].mxu1 }
 0x539   :  { %v13534_v5 = vadd.f32 %v9675_v12, %v13329_v25  ;;  %v6807_v57 = vpop.f32.mrb[19].mxu1 }
 0x53a   :  { %v7249_v45 = vadd.f32 %v7248_v32, %v7186_v43  ;;  %v13539_v9 = vadd.f32 %v6807_v57, %v13333_v6  ;;  %v7116_v51 = vadd.f32 %v13522_v1, %v7115_v11 }
 0x53b   :  { %v7189_v63 = vmul.f32 %v13534_v5, %v13534_v5 }
 0x53c   :  { %v7117_v4 = vadd.f32 %v13539_v9, %v7116_v51  ;;  %v7188_v15 = vmul.f32 %v13539_v9, %v13539_v9  ;;  %v7250_v56 = vadd.f32 %v7249_v45, %v7187_v49  ;;  %v9678_v3 = vpop.f32.mrb[20].mxu1 }
 0x53d   :  { %v13546_v25 = vadd.f32 %v9678_v3, %v13338_v38  ;;  %v6817_v21 = vpop.f32.mrb[21].mxu1 }
 0x53e   :  { %v7251_v43 = vadd.f32 %v7250_v56, %v7188_v15  ;;  %v13551_v6 = vadd.f32 %v6817_v21, %v13341_v14  ;;  %v7118_v11 = vadd.f32 %v13534_v5, %v7117_v4 }
 0x53f   :  { %v7191_v51 = vmul.f32 %v13546_v25, %v13546_v25 }
 0x540   :  { %v7119_v32 = vadd.f32 %v13551_v6, %v7118_v11  ;;  %v7190_v12 = vmul.f32 %v13551_v6, %v13551_v6  ;;  %v7252_v57 = vadd.f32 %v7251_v43, %v7189_v63  ;;  %v9681_v49 = vpop.f32.mrb[22].mxu1 }
 0x541   :  { %v13558_v38 = vadd.f32 %v9681_v49, %v13344_v2  ;;  %v6827_v45 = vpop.f32.mrb[23].mxu1 }
 0x542   :  { %v7253_v15 = vadd.f32 %v7252_v57, %v7190_v12  ;;  %v13563_v14 = vadd.f32 %v6827_v45, %v13346_v16  ;;  %v7120_v4 = vadd.f32 %v13546_v25, %v7119_v32 }
 0x543   :  { %v7193_v11 = vmul.f32 %v13558_v38, %v13558_v38 }
 0x544   :  { %v7121_v56 = vadd.f32 %v13563_v14, %v7120_v4  ;;  %v7192_v3 = vmul.f32 %v13563_v14, %v13563_v14  ;;  %v7254_v21 = vadd.f32 %v7253_v15, %v7191_v51  ;;  %v9684_v63 = vpop.f32.mrb[24].mxu1 }
 0x545   :  { %v13570_v2 = vadd.f32 %v9684_v63, %v13348_v34  ;;  %v6837_v43 = vpop.f32.mrb[25].mxu1 }
 0x546   :  { %v7255_v12 = vadd.f32 %v7254_v21, %v7192_v3  ;;  %v13575_v16 = vadd.f32 %v6837_v43, %v13350_v18  ;;  %v7122_v32 = vadd.f32 %v13558_v38, %v7121_v56 }
 0x547   :  { %v7195_v4 = vmul.f32 %v13570_v2, %v13570_v2 }
 0x548   :  { %v7123_v57 = vadd.f32 %v13575_v16, %v7122_v32  ;;  %v7194_v49 = vmul.f32 %v13575_v16, %v13575_v16  ;;  %v7256_v45 = vadd.f32 %v7255_v12, %v7193_v11  ;;  %v9687_v51 = vpop.f32.mrb[26].mxu1 }
 0x549   :  { %v13582_v34 = vadd.f32 %v9687_v51, %v13352_v59  ;;  %v6847_v15 = vpop.f32.mrb[27].mxu1 }
 0x54a   :  { %v7257_v3 = vadd.f32 %v7256_v45, %v7194_v49  ;;  %v13587_v18 = vadd.f32 %v6847_v15, %v13354_v10  ;;  %v7124_v56 = vadd.f32 %v13570_v2, %v7123_v57 }
 0x54b   :  { %v7197_v32 = vmul.f32 %v13582_v34, %v13582_v34 }
 0x54c   :  { %v7125_v21 = vadd.f32 %v13587_v18, %v7124_v56  ;;  %v7196_v63 = vmul.f32 %v13587_v18, %v13587_v18  ;;  %v7258_v43 = vadd.f32 %v7257_v3, %v7195_v4  ;;  %v9690_v11 = vpop.f32.mrb[28].mxu1 }
 0x54d   :  { %v13594_v59 = vadd.f32 %v9690_v11, %v13356_v61  ;;  %v6857_v12 = vpop.f32.mrb[29].mxu1 }
 0x54e   :  { %v7259_v49 = vadd.f32 %v7258_v43, %v7196_v63  ;;  %v13599_v10 = vadd.f32 %v6857_v12, %v13358_v50  ;;  %v7126_v57 = vadd.f32 %v13582_v34, %v7125_v21 }
 0x54f   :  { %v7199_v56 = vmul.f32 %v13594_v59, %v13594_v59 }
 0x550   :  { %v7127_v45 = vadd.f32 %v13599_v10, %v7126_v57  ;;  %v7198_v51 = vmul.f32 %v13599_v10, %v13599_v10  ;;  %v7260_v15 = vadd.f32 %v7259_v49, %v7197_v32  ;;  %v9693_v4 = vpop.f32.mrb[30].mxu1 }
 0x551   :  { %v13606_v61 = vadd.f32 %v9693_v4, %v13360_v54  ;;  %v6867_v3 = vpop.f32.mrb[31].mxu1 }
 0x552   :  { %v7261_v63 = vadd.f32 %v7260_v15, %v7198_v51  ;;  %v13611_v50 = vadd.f32 %v6867_v3, %v13362_v0  ;;  %v7128_v21 = vadd.f32 %v13594_v59, %v7127_v45 }
 0x553   :  { %v7201_v57 = vmul.f32 %v13606_v61, %v13606_v61 }
 0x554   :  { %v7129_v43 = vadd.f32 %v13611_v50, %v7128_v21  ;;  %v7200_v11 = vmul.f32 %v13611_v50, %v13611_v50  ;;  %v7262_v12 = vadd.f32 %v7261_v63, %v7199_v56  ;;  %v9696_v32 = vpop.f32.mrb[32].mxu1 }
 0x555   :  { %v13618_v54 = vadd.f32 %v9696_v32, %v13364_v17  ;;  %v6877_v49 = vpop.f32.mrb[33].mxu1 }
 0x556   :  { %v7263_v51 = vadd.f32 %v7262_v12, %v7200_v11  ;;  %v13623_v0 = vadd.f32 %v6877_v49, %v13366_v22  ;;  %v7130_v45 = vadd.f32 %v13606_v61, %v7129_v43 }
 0x557   :  { %v7203_v21 = vmul.f32 %v13618_v54, %v13618_v54 }
 0x558   :  { %v7131_v15 = vadd.f32 %v13623_v0, %v7130_v45  ;;  %v7202_v4 = vmul.f32 %v13623_v0, %v13623_v0  ;;  %v7264_v3 = vadd.f32 %v7263_v51, %v7201_v57  ;;  %v9699_v56 = vpop.f32.mrb[34].mxu1 }
 0x559   :  { %v13630_v17 = vadd.f32 %v9699_v56, %v13368_v30  ;;  %v6887_v63 = vpop.f32.mrb[35].mxu1 }
 0x55a   :  { %v7265_v11 = vadd.f32 %v7264_v3, %v7202_v4  ;;  %v13635_v22 = vadd.f32 %v6887_v63, %v13370_v27  ;;  %v7132_v43 = vadd.f32 %v13618_v54, %v7131_v15 }
 0x55b   :  { %v7205_v45 = vmul.f32 %v13630_v17, %v13630_v17 }
 0x55c   :  { %v7133_v12 = vadd.f32 %v13635_v22, %v7132_v43  ;;  %v7204_v32 = vmul.f32 %v13635_v22, %v13635_v22  ;;  %v7266_v49 = vadd.f32 %v7265_v11, %v7203_v21  ;;  %v9702_v57 = vpop.f32.mrb[36].mxu1 }
 0x55d   :  { %v13642_v30 = vadd.f32 %v9702_v57, %v13372_v8  ;;  %v6897_v51 = vpop.f32.mrb[37].mxu1 }
 0x55e   :  { %v7267_v4 = vadd.f32 %v7266_v49, %v7204_v32  ;;  %v13647_v27 = vadd.f32 %v6897_v51, %v13374_v29  ;;  %v7134_v15 = vadd.f32 %v13630_v17, %v7133_v12 }
 0x55f   :  { %v7207_v43 = vmul.f32 %v13642_v30, %v13642_v30 }
 0x560   :  { %v7135_v3 = vadd.f32 %v13647_v27, %v7134_v15  ;;  %v7206_v56 = vmul.f32 %v13647_v27, %v13647_v27  ;;  %v7268_v63 = vadd.f32 %v7267_v4, %v7205_v45  ;;  %v9705_v21 = vpop.f32.mrb[38].mxu1 }
 0x561   :  { %v13654_v8 = vadd.f32 %v9705_v21, %v13376_v39  ;;  %v6907_v11 = vpop.f32.mrb[39].mxu1 }
 0x562   :  { %v7269_v32 = vadd.f32 %v7268_v63, %v7206_v56  ;;  %v13659_v29 = vadd.f32 %v6907_v11, %v13378_v33  ;;  %v7136_v12 = vadd.f32 %v13642_v30, %v7135_v3 }
 0x563   :  { %v7209_v15 = vmul.f32 %v13654_v8, %v13654_v8 }
 0x564   :  { %v7137_v49 = vadd.f32 %v13659_v29, %v7136_v12  ;;  %v7208_v57 = vmul.f32 %v13659_v29, %v13659_v29  ;;  %v7270_v51 = vadd.f32 %v7269_v32, %v7207_v43  ;;  %v9708_v45 = vpop.f32.mrb[40].mxu1 }
 0x565   :  { %v13666_v39 = vadd.f32 %v9708_v45, %v13380_v55  ;;  %v6917_v4 = vpop.f32.mrb[41].mxu1 }
 0x566   :  { %v7271_v56 = vadd.f32 %v7270_v51, %v7208_v57  ;;  %v13671_v33 = vadd.f32 %v6917_v4, %v13382_v35  ;;  %v7138_v3 = vadd.f32 %v13654_v8, %v7137_v49 }
 0x567   :  { %14763 = vst [vmem:[#allocation25_spill] sm:$0xff] %v13666_v39  ;;  %v7211_v12 = vmul.f32 %v13666_v39, %v13666_v39 }
 0x568   :  { %v7139_v63 = vadd.f32 %v13671_v33, %v7138_v3  ;;  %v7210_v21 = vmul.f32 %v13671_v33, %v13671_v33  ;;  %v7272_v11 = vadd.f32 %v7271_v56, %v7209_v15  ;;  %v9711_v43 = vpop.f32.mrb[42].mxu1 }
 0x569   :  { %v13678_v55 = vadd.f32 %v9711_v43, %v13384_v28  ;;  %v6927_v32 = vpop.f32.mrb[43].mxu1 }
 0x56a   :  { %v7273_v57 = vadd.f32 %v7272_v11, %v7210_v21  ;;  %v13683_v35 = vadd.f32 %v6927_v32, %v13386_v19  ;;  %v7140_v49 = vadd.f32 %v13666_v39, %v7139_v63 }
 0x56b   :  { %14764 = vst [vmem:[#allocation32_spill] sm:$0xff] %v13678_v55  ;;  %v7213_v3 = vmul.f32 %v13678_v55, %v13678_v55 }
 0x56c   :  { %14765 = vst [vmem:[#allocation21_spill] sm:$0xff] %v13683_v35  ;;  %v7141_v51 = vadd.f32 %v13683_v35, %v7140_v49  ;;  %v7212_v45 = vmul.f32 %v13683_v35, %v13683_v35  ;;  %v7274_v4 = vadd.f32 %v7273_v57, %v7211_v12  ;;  %v9714_v15 = vpop.f32.mrb[44].mxu1 }
 0x56d   :  { %v13690_v28 = vadd.f32 %v9714_v15, %v13388_v62  ;;  %v6937_v56 = vpop.f32.mrb[45].mxu1 }
 0x56e   :  { %v7275_v21 = vadd.f32 %v7274_v4, %v7212_v45  ;;  %v13695_v19 = vadd.f32 %v6937_v56, %v13390_v44  ;;  %v7142_v63 = vadd.f32 %v13678_v55, %v7141_v51 }
 0x56f   :  { %14766 = vst [vmem:[#allocation23_spill] sm:$0xff] %v13690_v28  ;;  %v7215_v49 = vmul.f32 %v13690_v28, %v13690_v28 }
 0x570   :  { %14767 = vst [vmem:[#allocation33_spill] sm:$0xff] %v13695_v19  ;;  %v7143_v11 = vadd.f32 %v13695_v19, %v7142_v63  ;;  %v7214_v43 = vmul.f32 %v13695_v19, %v13695_v19  ;;  %v7276_v32 = vadd.f32 %v7275_v21, %v7213_v3  ;;  %v9717_v12 = vpop.f32.mrb[46].mxu1 }
 0x571   :  { %v13702_v62 = vadd.f32 %v9717_v12, %v13392_v40  ;;  %v6947_v57 = vpop.f32.mrb[47].mxu1 }
 0x572   :  { %v7277_v45 = vadd.f32 %v7276_v32, %v7214_v43  ;;  %v13707_v44 = vadd.f32 %v6947_v57, %v13394_v20  ;;  %v7144_v51 = vadd.f32 %v13690_v28, %v7143_v11 }
 0x573   :  { %14768 = vst [vmem:[#allocation44_spill] sm:$0xff] %v13702_v62  ;;  %v7217_v63 = vmul.f32 %v13702_v62, %v13702_v62 }
 0x574   :  { %14769 = vst [vmem:[#allocation29_spill] sm:$0xff] %v13707_v44  ;;  %v7145_v4 = vadd.f32 %v13707_v44, %v7144_v51  ;;  %v7216_v15 = vmul.f32 %v13707_v44, %v13707_v44  ;;  %v7278_v56 = vadd.f32 %v7277_v45, %v7215_v49  ;;  %v9720_v3 = vpop.f32.mrb[48].mxu1 }
 0x575   :  { %v13714_v40 = vadd.f32 %v9720_v3, %v13396_v48  ;;  %v6957_v21 = vpop.f32.mrb[49].mxu1 }
 0x576   :  { %v7279_v43 = vadd.f32 %v7278_v56, %v7216_v15  ;;  %v13719_v20 = vadd.f32 %v6957_v21, %v13398_v37  ;;  %v7146_v11 = vadd.f32 %v13702_v62, %v7145_v4  ;;  %v14773_v56 = vld [vmem:[#allocation47_spill] sm:$0xff] }
 0x577   :  { %14770 = vst [vmem:[#allocation30_spill] sm:$0xff] %v13714_v40  ;;  %v7219_v51 = vmul.f32 %v13714_v40, %v13714_v40 }
 0x578   :  { %14771 = vst [vmem:[#allocation43_spill] sm:$0xff] %v13719_v20  ;;  %v7147_v32 = vadd.f32 %v13719_v20, %v7146_v11  ;;  %v7218_v12 = vmul.f32 %v13719_v20, %v13719_v20  ;;  %v7280_v57 = vadd.f32 %v7279_v43, %v7217_v63  ;;  %v9723_v49 = vpop.f32.mrb[50].mxu1  ;;  %v14775_v11 = vld [vmem:[#allocation36_spill] sm:$0xff] }
 0x579   :  { %v13726_v48 = vadd.f32 %v9723_v49, %v13400_v42  ;;  %v6967_v45 = vpop.f32.mrb[51].mxu1 }
 0x57a   :  { %v7281_v15 = vadd.f32 %v7280_v57, %v7218_v12  ;;  %v13731_v37 = vadd.f32 %v6967_v45, %v14773_v56  ;;  %v7148_v4 = vadd.f32 %v13714_v40, %v7147_v32  ;;  %v14777_v57 = vld [vmem:[#allocation41_spill] sm:$0xff] }
 0x57b   :  { %14772 = vst [vmem:[#allocation45_spill] sm:$0xff] %v13726_v48  ;;  %v7221_v20 = vmul.f32 %v13726_v48, %v13726_v48 }
 0x57c   :  { %14774 = vst [vmem:[#allocation31_spill] sm:$0xff] %v13731_v37  ;;  %v7149_v3 = vadd.f32 %v13731_v37, %v7148_v4  ;;  %v7220_v21 = vmul.f32 %v13731_v37, %v13731_v37  ;;  %v7282_v63 = vadd.f32 %v7281_v15, %v7219_v51  ;;  %v9726_v43 = vpop.f32.mrb[52].mxu1  ;;  %v14779_v37 = vld [vmem:[#allocation34_spill] sm:$0xff] }
 0x57d   :  { %v13738_v42 = vadd.f32 %v9726_v43, %v14775_v11  ;;  %v6977_v49 = vpop.f32.mrb[53].mxu1 }
 0x57e   :  { %v7283_v12 = vadd.f32 %v7282_v63, %v7220_v21  ;;  %v13743_v45 = vadd.f32 %v6977_v49, %v14777_v57  ;;  %v7150_v32 = vadd.f32 %v13726_v48, %v7149_v3  ;;  %v14781_v63 = vld [vmem:[#allocation40_spill] sm:$0xff] }
 0x57f   :  { %14776 = vst [vmem:[#allocation27_spill] sm:$0xff] %v13738_v42  ;;  %v7223_v40 = vmul.f32 %v13738_v42, %v13738_v42 }
 0x580   :  { %14778 = vst [vmem:[#allocation46_spill] sm:$0xff] %v13743_v45  ;;  %v7151_v56 = vadd.f32 %v13743_v45, %v7150_v32  ;;  %v7222_v4 = vmul.f32 %v13743_v45, %v13743_v45  ;;  %v7284_v51 = vadd.f32 %v7283_v12, %v7221_v20  ;;  %v9729_v15 = vpop.f32.mrb[54].mxu1  ;;  %v14783_v45 = vld [vmem:[#allocation22_spill] sm:$0xff] }
 0x581   :  { %v13750_v43 = vadd.f32 %v9729_v15, %v14779_v37  ;;  %v6987_v11 = vpop.f32.mrb[55].mxu1 }
 0x582   :  { %v7285_v21 = vadd.f32 %v7284_v51, %v7222_v4  ;;  %v13755_v49 = vadd.f32 %v6987_v11, %v14781_v63  ;;  %v7152_v3 = vadd.f32 %v13738_v42, %v7151_v56  ;;  %v14785_v51 = vld [vmem:[#allocation37_spill] sm:$0xff] }
 0x583   :  { %14780 = vst [vmem:[#allocation24_spill] sm:$0xff] %v13750_v43  ;;  %v7225_v48 = vmul.f32 %v13750_v43, %v13750_v43 }
 0x584   :  { %14782 = vst [vmem:[#allocation48_spill] sm:$0xff] %v13755_v49  ;;  %v7153_v57 = vadd.f32 %v13755_v49, %v7152_v3  ;;  %v7224_v32 = vmul.f32 %v13755_v49, %v13755_v49  ;;  %v7286_v20 = vadd.f32 %v7285_v21, %v7223_v40  ;;  %v9732_v12 = vpop.f32.mrb[56].mxu1  ;;  %v14787_v49 = vld [vmem:[#allocation39_spill] sm:$0xff] }
 0x585   :  { %v13762_v37 = vadd.f32 %v9732_v12, %v14783_v45  ;;  %v6997_v15 = vpop.f32.mrb[57].mxu1 }
 0x586   :  { %v7287_v4 = vadd.f32 %v7286_v20, %v7224_v32  ;;  %v13767_v11 = vadd.f32 %v6997_v15, %v14785_v51  ;;  %v7154_v56 = vadd.f32 %v13750_v43, %v7153_v57  ;;  %v14789_v20 = vld [vmem:[#allocation19_spill] sm:$0xff] }
 0x587   :  { %14784 = vst [vmem:[#allocation35_spill] sm:$0xff] %v13762_v37  ;;  %v7227_v42 = vmul.f32 %v13762_v37, %v13762_v37 }
 0x588   :  { %14786 = vst [vmem:[#allocation47_spill] sm:$0xff] %v13767_v11  ;;  %v7155_v63 = vadd.f32 %v13767_v11, %v7154_v56  ;;  %v7226_v3 = vmul.f32 %v13767_v11, %v13767_v11  ;;  %v7288_v40 = vadd.f32 %v7287_v4, %v7225_v48  ;;  %v9735_v21 = vpop.f32.mrb[58].mxu1  ;;  %v14791_v11 = vld [vmem:[#allocation20_spill] sm:$0xff] }
 0x589   :  { %v13774_v45 = vadd.f32 %v9735_v21, %v14787_v49  ;;  %v7007_v12 = vpop.f32.mrb[59].mxu1 }
 0x58a   :  { %v7289_v32 = vadd.f32 %v7288_v40, %v7226_v3  ;;  %v13779_v15 = vadd.f32 %v7007_v12, %v14789_v20  ;;  %v7156_v57 = vadd.f32 %v13762_v37, %v7155_v63  ;;  %v14793_v40 = vld [vmem:[#allocation38_spill] sm:$0xff] }
 0x58b   :  { %14788 = vst [vmem:[#allocation36_spill] sm:$0xff] %v13774_v45  ;;  %v7229_v43 = vmul.f32 %v13774_v45, %v13774_v45 }
 0x58c   :  { %14790 = vst [vmem:[#allocation41_spill] sm:$0xff] %v13779_v15  ;;  %v7157_v51 = vadd.f32 %v13779_v15, %v7156_v57  ;;  %v7228_v56 = vmul.f32 %v13779_v15, %v13779_v15  ;;  %v7290_v48 = vadd.f32 %v7289_v32, %v7227_v42  ;;  %v9738_v4 = vpop.f32.mrb[60].mxu1  ;;  %v14795_v15 = vld [vmem:[#allocation17_spill] sm:$0xff] }
 0x58d   :  { %v13786_v49 = vadd.f32 %v9738_v4, %v14791_v11  ;;  %v7017_v21 = vpop.f32.mrb[61].mxu1 }
 0x58e   :  { %v7291_v3 = vadd.f32 %v7290_v48, %v7228_v56  ;;  %v13791_v12 = vadd.f32 %v7017_v21, %v14793_v40  ;;  %v7158_v63 = vadd.f32 %v13774_v45, %v7157_v51  ;;  %v14796_v48 = vld [vmem:[#allocation26_spill] sm:$0xff] }
 0x58f   :  { %14792 = vst [vmem:[#allocation34_spill] sm:$0xff] %v13786_v49  ;;  %v7231_v37 = vmul.f32 %v13786_v49, %v13786_v49 }
 0x590   :  { %14794 = vst [vmem:[#allocation40_spill] sm:$0xff] %v13791_v12  ;;  %v7159_v20 = vadd.f32 %v13791_v12, %v7158_v63  ;;  %v7230_v57 = vmul.f32 %v13791_v12, %v13791_v12  ;;  %v7292_v42 = vadd.f32 %v7291_v3, %v7229_v43  ;;  %v9741_v32 = vpop.f32.mrb[62].mxu1 }
 0x591   :  { %v13798_v11 = vadd.f32 %v9741_v32, %v14795_v15  ;;  %v7027_v4 = vpop.f32.mrb[63].mxu1 }
 0x592   :  { %v7293_v56 = vadd.f32 %v7292_v42, %v7230_v57  ;;  %v10125_v21 = vadd.f32 %v7027_v4, %v14796_v48  ;;  %v7160_v40 = vadd.f32 %v13786_v49, %v7159_v20 }
 0x593   :  { %v7233_v12 = vmul.f32 %v13798_v11, %v13798_v11 }
 0x594   :  { %v7161_v51 = vadd.f32 %v10125_v21, %v7160_v40  ;;  %v7232_v45 = vmul.f32 %v10125_v21, %v10125_v21  ;;  %v7294_v63 = vadd.f32 %v7293_v56, %v7231_v37 }
 0x596   :  { %v7162_v43 = vadd.f32 %v13798_v11, %v7161_v51  ;;  %v7295_v3 = vadd.f32 %v7294_v63, %v7232_v45 }
 0x598   :  { %v7163_v15 = vrot.slane %v7162_v43, 4  ;;  %v7296_v32 = vadd.f32 %v7295_v3, %v7233_v12  ;;  %v10793_v12 = vld [vmem:[%s14407_s4] sm:$0x1]  ;;  %s10920_s4 = smov [#allocation11]  }
 0x59a   :  { %v7164_v62 = vadd.f32 %v7163_v15, %v7162_v43  ;;  %v7297_v44 = vrot.slane %v7296_v32, 4 }
 0x59c   :  { %v7165_v28 = vrot.slane %v7164_v62, 2  ;;  %v7298_v19 = vadd.f32 %v7297_v44, %v7296_v32 }
 0x59e   :  { %v7166_v57 = vadd.f32 %v7165_v28, %v7164_v62  ;;  %v7299_v42 = vrot.slane %v7298_v19, 2  ;;  %v14797_v28 = vld [vmem:[#allocation42_spill] sm:$0xff] }
 0x5a0   :  { %v7167_v4 = vrot.slane %v7166_v57, 1  ;;  %v7300_v48 = vadd.f32 %v7299_v42, %v7298_v19  ;;  %v10794_v19 = vld [vmem:[%s14408_s5] sm:$0x1]  ;;  %s7648_s5 = sshll.u32 %s10920_s4, 4  ;;  %s7649_s5 = int_to_ptr.vmem [resolvable:$true] %s7648_s5 }
 0x5a1   :  { %s10883_s29 = scalar_lea.vmem %s7649_s5, 8192  ;;  %p10888_p5 = scmp.lt.s32.totalorder %s7649_s5, %s7649_s5 }
 0x5a2   :  { %v7168_v20 = vadd.f32 %v7167_v4, %v7166_v57  ;;  %v7301_v40 = vrot.slane %v7300_v48, 1  ;;  %p10884_p4 = scmp.ne.s32.totalorder %s7649_s5, %s10883_s29  ;;  %p10889_p6 = scmp.lt.s32.totalorder %s10883_s29, %s10883_s29 }
 0x5a4   :  { %v7169_v49 = vmul.f32 0.001953125, %v7168_v20  ;;  %v7302_v37 = vadd.f32 %v7301_v40, %v7300_v48  ;;  %p10890_p7 = por %p10889_p6, %p10888_p5 }
 0x5a6   :  { %v7303_v56 = vmul.f32 0.001953125, %v7302_v37  ;;  %v7304_v55 = vmul.f32 %v7169_v49, %v7169_v49  ;;  %p10891_p8 = pnand %p10890_p7, %p10884_p4 }
 0x5a8   :  { %v7305_v35 = vsub.f32 %v7303_v56, %v7304_v55  ;;  %v14798_v55 = vld [vmem:[#allocation16_spill] sm:$0xff]  ;;  %v14801_v56 = vld [vmem:[#allocation25_spill] sm:$0xff] }
 0x5aa   :  { %v7306_v39 = vadd.f32 1e-05, %v7305_v35  ;;  %v14799_v35 = vld [vmem:[#allocation28_spill] sm:$0xff] }
 0x5ac   :  { %10584 = vrsqrt.f32 %v7306_v39 }
 0x5b6   :  { %v10585_v45 = vpop.eup %10584 }
 0x5b7   :  { %v7308_v51 = vmul.f32 %v10793_v12, %v10585_v45  ;;  %v14802_v45 = vld [vmem:[#allocation21_spill] sm:$0xff]  ;;  %v14803_v12 = vld [vmem:[#allocation32_spill] sm:$0xff] }
 0x5b9   :  { %v7309_v44 = vmul.f32 %v7308_v51, %v7169_v49  ;;  %v13811_v62 = vrot.slane %v7308_v51, %v14797_v28  ;;  %v14800_v49 = vld [vmem:[#allocation18_spill] sm:$0xff]  ;;  %v14804_v51 = vld [vmem:[#allocation33_spill] sm:$0xff] }
 0x5bb   :  { %v7310_v63 = vsub.f32 %v10794_v19, %v7309_v44  ;;  %v7379_v43 = vmul.f32 %v10125_v21, %v13811_v62  ;;  %v13819_v39 = vmul.f32 %v14798_v55, %v13811_v62  ;;  %v13823_v3 = vmul.f32 %v14799_v35, %v13811_v62  ;;  %v14805_v44 = vld [vmem:[#allocation23_spill] sm:$0xff] }
 0x5bc   :  { %v13827_v15 = vmul.f32 %v14800_v49, %v13811_v62  ;;  %v13831_v32 = vmul.f32 %v13439_v26, %v13811_v62  ;;  %v13835_v57 = vmul.f32 %v13456_v53, %v13811_v62  ;;  %v13839_v21 = vmul.f32 %v13450_v58, %v13811_v62  ;;  %v7513_v53 = vld [vmem:[#allocation6 + $0x1f0] sm:$0xff]  ;;  %v14808_v55 = vld [vmem:[#allocation43_spill] sm:$0xff] }
 0x5bd   :  { %v13842_v42 = vrot.slane %v7310_v63, %v14797_v28  ;;  %v13846_v4 = vmul.f32 %v13467_v52, %v13811_v62  ;;  %v13850_v48 = vmul.f32 %v13462_v41, %v13811_v62  ;;  %v13854_v26 = vmul.f32 %v13479_v13, %v13811_v62  ;;  %v14806_v28 = vld [vmem:[#allocation29_spill] sm:$0xff]  ;;  %v14807_v63 = vld [vmem:[#allocation44_spill] sm:$0xff]  ;;  %v14809_v49 = vld [vmem:[#allocation30_spill] sm:$0xff] }
 0x5be   :  { %v13858_v58 = vmul.f32 %v13474_v36, %v13811_v62  ;;  %v13862_v20 = vmul.f32 %v13491_v23, %v13811_v62  ;;  %v13866_v52 = vmul.f32 %v13486_v60, %v13811_v62  ;;  %v13870_v41 = vmul.f32 %v13503_v46, %v13811_v62 }
 0x5bf   :  { %v7449_v13 = vadd.f32 %v13842_v42, %v7379_v43  ;;  %v13875_v40 = vmul.f32 %v13498_v31, %v13811_v62  ;;  %v13879_v36 = vmul.f32 %v13515_v47, %v13811_v62  ;;  %v13883_v23 = vmul.f32 %v13510_v7, %v13811_v62 }
 0x5c0   :  { %v13887_v60 = vmul.f32 %v13527_v24, %v13811_v62  ;;  %v13891_v46 = vmul.f32 %v13522_v1, %v13811_v62  ;;  %v13895_v31 = vmul.f32 %v13539_v9, %v13811_v62  ;;  %v13899_v47 = vmul.f32 %v13534_v5, %v13811_v62 }
 0x5c1   :  { %v7577_v37 = vadd.f32 %v7513_v53, %v7449_v13  ;;  %v13903_v7 = vmul.f32 %v13551_v6, %v13811_v62  ;;  %v13907_v24 = vmul.f32 %v13546_v25, %v13811_v62  ;;  %v13911_v1 = vmul.f32 %v13563_v14, %v13811_v62  ;;  %v14810_v13 = vld [vmem:[#allocation31_spill] sm:$0xff] }
 0x5c2   :  { %v13915_v9 = vmul.f32 %v13558_v38, %v13811_v62  ;;  %v13919_v5 = vmul.f32 %v13575_v16, %v13811_v62  ;;  %v13923_v6 = vmul.f32 %v13570_v2, %v13811_v62  ;;  %v13927_v25 = vmul.f32 %v13587_v18, %v13811_v62 }
 0x5c3   :  { %7641 = vst [vmem:[#allocation11 + $0x1f0] sm:$0xff] %v7577_v37  ;;  %v13931_v14 = vmul.f32 %v13582_v34, %v13811_v62  ;;  %v13935_v38 = vmul.f32 %v13599_v10, %v13811_v62  ;;  %v13939_v16 = vmul.f32 %v13594_v59, %v13811_v62  ;;  %v13943_v2 = vmul.f32 %v13611_v50, %v13811_v62 }
 0x5c4   :  { %v13947_v18 = vmul.f32 %v13606_v61, %v13811_v62  ;;  %v13951_v34 = vmul.f32 %v13623_v0, %v13811_v62  ;;  %v13955_v10 = vmul.f32 %v13618_v54, %v13811_v62  ;;  %v13959_v59 = vmul.f32 %v13635_v22, %v13811_v62 }
 0x5c5   :  { %v13963_v50 = vmul.f32 %v13630_v17, %v13811_v62  ;;  %v13967_v61 = vmul.f32 %v13647_v27, %v13811_v62  ;;  %v13971_v0 = vmul.f32 %v13642_v30, %v13811_v62  ;;  %v13975_v54 = vmul.f32 %v13659_v29, %v13811_v62 }
 0x5c6   :  { %v13979_v22 = vmul.f32 %v13654_v8, %v13811_v62  ;;  %v13983_v17 = vmul.f32 %v13671_v33, %v13811_v62  ;;  %v13987_v27 = vmul.f32 %v14801_v56, %v13811_v62  ;;  %v13991_v30 = vmul.f32 %v14802_v45, %v13811_v62  ;;  %v14812_v56 = vld [vmem:[#allocation45_spill] sm:$0xff] }
 0x5c7   :  { %v13995_v29 = vmul.f32 %v14803_v12, %v13811_v62  ;;  %v13999_v8 = vmul.f32 %v14804_v51, %v13811_v62  ;;  %v14003_v33 = vmul.f32 %v14805_v44, %v13811_v62  ;;  %v14007_v19 = vmul.f32 %v14806_v28, %v13811_v62  ;;  %v14814_v12 = vld [vmem:[#allocation46_spill] sm:$0xff]  ;;  %v14816_v44 = vld [vmem:[#allocation27_spill] sm:$0xff] }
 0x5c8   :  { %v14011_v43 = vmul.f32 %v14807_v63, %v13811_v62  ;;  %v14015_v35 = vmul.f32 %v14808_v55, %v13811_v62  ;;  %v14019_v53 = vmul.f32 %v14809_v49, %v13811_v62  ;;  %v14023_v37 = vmul.f32 %v14810_v13, %v13811_v62  ;;  %v14818_v63 = vld [vmem:[#allocation48_spill] sm:$0xff] }
 0x5c9   :  { %v14027_v45 = vmul.f32 %v14812_v56, %v13811_v62  ;;  %v14031_v51 = vmul.f32 %v14814_v12, %v13811_v62  ;;  %v14035_v28 = vmul.f32 %v14816_v44, %v13811_v62  ;;  %v14039_v55 = vmul.f32 %v14818_v63, %v13811_v62  ;;  %v14820_v49 = vld [vmem:[#allocation24_spill] sm:$0xff] }
 0x5ca   :  { %14811 = vst [vmem:[#allocation22_spill] sm:$0xff] %v14023_v37  ;;  %v14043_v13 = vmul.f32 %v14820_v49, %v13811_v62  ;;  %v14822_v37 = vld [vmem:[#allocation47_spill] sm:$0xff] }
 0x5cb   :  { %14813 = vst [vmem:[#allocation37_spill] sm:$0xff] %v14027_v45  ;;  %14815 = vst [vmem:[#allocation39_spill] sm:$0xff] %v14031_v51  ;;  %v14047_v56 = vmul.f32 %v14822_v37, %v13811_v62  ;;  %v14823_v45 = vld [vmem:[#allocation35_spill] sm:$0xff]  ;;  %v14824_v51 = vld [vmem:[#allocation41_spill] sm:$0xff] }
 0x5cc   :  { %14817 = vst [vmem:[#allocation19_spill] sm:$0xff] %v14035_v28  ;;  %14819 = vst [vmem:[#allocation20_spill] sm:$0xff] %v14039_v55  ;;  %v14051_v12 = vmul.f32 %v14823_v45, %v13811_v62  ;;  %v14055_v44 = vmul.f32 %v14824_v51, %v13811_v62  ;;  %v14825_v28 = vld [vmem:[#allocation36_spill] sm:$0xff]  ;;  %v14071_v45 = vmul.f32 %v13798_v11, %v13811_v62 }
 0x5cd   :  { %14821 = vst [vmem:[#allocation38_spill] sm:$0xff] %v14043_v13  ;;  %v14059_v63 = vmul.f32 %v14825_v28, %v13811_v62  ;;  %v14826_v55 = vld [vmem:[#allocation40_spill] sm:$0xff]  ;;  %v14827_v13 = vld [vmem:[#allocation34_spill] sm:$0xff]  ;;  %v14075_v51 = vadd.f32 %v13842_v42, %v13819_v39  ;;  %v14079_v28 = vadd.f32 %v13842_v42, %v13823_v3  ;;  %v14091_v11 = vadd.f32 %v13842_v42, %v13835_v57 }
 0x5ce   :  { %v14063_v49 = vmul.f32 %v14826_v55, %v13811_v62  ;;  %v14067_v37 = vmul.f32 %v14827_v13, %v13811_v62  ;;  %v14083_v55 = vadd.f32 %v13842_v42, %v13827_v15  ;;  %v14087_v13 = vadd.f32 %v13842_v42, %v13831_v32 }
 0x5cf   :  { %v14095_v62 = vadd.f32 %v13842_v42, %v13839_v21  ;;  %v14099_v39 = vadd.f32 %v13842_v42, %v13846_v4  ;;  %v14103_v3 = vadd.f32 %v13842_v42, %v13850_v48  ;;  %v14107_v15 = vadd.f32 %v13842_v42, %v13854_v26 }
 0x5d0   :  { %v14111_v32 = vadd.f32 %v13842_v42, %v13858_v58  ;;  %v14115_v57 = vadd.f32 %v13842_v42, %v13862_v20  ;;  %v14119_v21 = vadd.f32 %v13842_v42, %v13866_v52  ;;  %v14123_v4 = vadd.f32 %v13842_v42, %v13870_v41 }
 0x5d1   :  { %v14127_v48 = vadd.f32 %v13842_v42, %v13875_v40  ;;  %v14131_v26 = vadd.f32 %v13842_v42, %v13879_v36  ;;  %v14135_v58 = vadd.f32 %v13842_v42, %v13883_v23  ;;  %v14139_v20 = vadd.f32 %v13842_v42, %v13887_v60 }
 0x5d2   :  { %v14143_v52 = vadd.f32 %v13842_v42, %v13891_v46  ;;  %v14147_v41 = vadd.f32 %v13842_v42, %v13895_v31  ;;  %v14151_v40 = vadd.f32 %v13842_v42, %v13899_v47  ;;  %v14155_v36 = vadd.f32 %v13842_v42, %v13903_v7 }
 0x5d3   :  { %v14159_v23 = vadd.f32 %v13842_v42, %v13907_v24  ;;  %v14163_v60 = vadd.f32 %v13842_v42, %v13911_v1  ;;  %v14167_v46 = vadd.f32 %v13842_v42, %v13915_v9  ;;  %v14171_v31 = vadd.f32 %v13842_v42, %v13919_v5 }
 0x5d4   :  { %v14175_v47 = vadd.f32 %v13842_v42, %v13923_v6  ;;  %v14179_v7 = vadd.f32 %v13842_v42, %v13927_v25  ;;  %v14183_v24 = vadd.f32 %v13842_v42, %v13931_v14  ;;  %v14187_v1 = vadd.f32 %v13842_v42, %v13935_v38 }
 0x5d5   :  { %v14191_v9 = vadd.f32 %v13842_v42, %v13939_v16  ;;  %v14195_v5 = vadd.f32 %v13842_v42, %v13943_v2  ;;  %v14199_v6 = vadd.f32 %v13842_v42, %v13947_v18  ;;  %v14203_v25 = vadd.f32 %v13842_v42, %v13951_v34 }
 0x5d6   :  { %14828 = vst [vmem:[#allocation17_spill] sm:$0xff] %v14187_v1  ;;  %v14207_v14 = vadd.f32 %v13842_v42, %v13955_v10  ;;  %v14211_v38 = vadd.f32 %v13842_v42, %v13959_v59  ;;  %v14215_v16 = vadd.f32 %v13842_v42, %v13963_v50  ;;  %v14219_v2 = vadd.f32 %v13842_v42, %v13967_v61  ;;  %v7477_v1 = vld [vmem:[#allocation6 + $0xd0] sm:$0xff] }
 0x5d7   :  { %14829 = vst [vmem:[#allocation26_spill] sm:$0xff] %v14191_v9  ;;  %14830 = vst [vmem:[#allocation42_spill] sm:$0xff] %v14195_v5  ;;  %v14223_v18 = vadd.f32 %v13842_v42, %v13971_v0  ;;  %v14227_v34 = vadd.f32 %v13842_v42, %v13975_v54  ;;  %v14231_v10 = vadd.f32 %v13842_v42, %v13979_v22  ;;  %v7452_v54 = vld [vmem:[#allocation6 + $0x8] sm:$0xff]  ;;  %v7454_v22 = vld [vmem:[#allocation6 + $0x18] sm:$0xff] }
 0x5d8   :  { %14831 = vst [vmem:[#allocation16_spill] sm:$0xff] %v14199_v6  ;;  %14832 = vst [vmem:[#allocation28_spill] sm:$0xff] %v14203_v25  ;;  %v14235_v59 = vadd.f32 %v13842_v42, %v13983_v17  ;;  %v14239_v50 = vadd.f32 %v13842_v42, %v13987_v27  ;;  %v14243_v61 = vadd.f32 %v13842_v42, %v13991_v30  ;;  %v7465_v25 = vld [vmem:[#allocation6 + $0x70] sm:$0xff]  ;;  %v7478_v9 = vld [vmem:[#allocation6 + $0xd8] sm:$0xff] }
 0x5d9   :  { %14833 = vst [vmem:[#allocation18_spill] sm:$0xff] %v14207_v14  ;;  %14834 = vst [vmem:[#allocation25_spill] sm:$0xff] %v14211_v38  ;;  %v14247_v0 = vadd.f32 %v13842_v42, %v13995_v29  ;;  %v14251_v17 = vadd.f32 %v13842_v42, %v13999_v8  ;;  %v14255_v27 = vadd.f32 %v13842_v42, %v14003_v33  ;;  %v7463_v38 = vld [vmem:[#allocation6 + $0x60] sm:$0xff]  ;;  %v7466_v14 = vld [vmem:[#allocation6 + $0x78] sm:$0xff] }
 0x5da   :  { %14835 = vst [vmem:[#allocation21_spill] sm:$0xff] %v14215_v16  ;;  %14836 = vst [vmem:[#allocation32_spill] sm:$0xff] %v14219_v2  ;;  %v14259_v30 = vadd.f32 %v13842_v42, %v14007_v19  ;;  %v14263_v29 = vadd.f32 %v13842_v42, %v14011_v43  ;;  %v14267_v8 = vadd.f32 %v13842_v42, %v14015_v35  ;;  %v7461_v2 = vld [vmem:[#allocation6 + $0x50] sm:$0xff]  ;;  %v14854_v16 = vld [vmem:[#allocation39_spill] sm:$0xff] }
 0x5db   :  { %14837 = vst [vmem:[#allocation33_spill] sm:$0xff] %v14223_v18  ;;  %14838 = vst [vmem:[#allocation23_spill] sm:$0xff] %v14227_v34  ;;  %v7451_v34 = vld [vmem:[#allocation6] sm:$0xff]  ;;  %v14271_v33 = vadd.f32 %v13842_v42, %v14019_v53  ;;  %v7462_v18 = vld [vmem:[#allocation6 + $0x58] sm:$0xff]  ;;  %v14283_v35 = vadd.f32 %v13842_v42, %v14854_v16  ;;  %v14299_v16 = vadd.f32 %v13842_v42, %v14047_v56 }
 0x5dc   :  { %14839 = vst [vmem:[#allocation29_spill] sm:$0xff] %v14231_v10  ;;  %14840 = vst [vmem:[#allocation44_spill] sm:$0xff] %v14235_v59  ;;  %v7453_v10 = vld [vmem:[#allocation6 + $0x10] sm:$0xff]  ;;  %v14315_v56 = vadd.f32 %v13842_v42, %v14063_v49  ;;  %v7516_v6 = vadd.f32 %v7452_v54, %v14079_v28  ;;  %v7518_v49 = vadd.f32 %v7454_v22, %v14087_v13  ;;  %v7480_v28 = vld [vmem:[#allocation6 + $0xe8] sm:$0xff] }
 0x5dd   :  { %14841 = vst [vmem:[#allocation43_spill] sm:$0xff] %v14239_v50  ;;  %14842 = vst [vmem:[#allocation30_spill] sm:$0xff] %v14243_v61  ;;  %v7455_v61 = vld [vmem:[#allocation6 + $0x20] sm:$0xff]  ;;  %v7458_v50 = vld [vmem:[#allocation6 + $0x38] sm:$0xff]  ;;  %v7517_v5 = vadd.f32 %v7453_v10, %v14083_v55  ;;  %v7527_v22 = vadd.f32 %v7463_v38, %v14123_v4 }
 0x5de   :  { %14843 = vst [vmem:[#allocation31_spill] sm:$0xff] %v14247_v0  ;;  %14844 = vst [vmem:[#allocation45_spill] sm:$0xff] %v14251_v17  ;;  %v7456_v0 = vld [vmem:[#allocation6 + $0x28] sm:$0xff]  ;;  %v7457_v59 = vld [vmem:[#allocation6 + $0x30] sm:$0xff] }
 0x5df   :  { %14845 = vst [vmem:[#allocation46_spill] sm:$0xff] %v14255_v27  ;;  %14846 = vst [vmem:[#allocation27_spill] sm:$0xff] %v14259_v30  ;;  %v14850_v27 = vld [vmem:[#allocation22_spill] sm:$0xff]  ;;  %v14852_v30 = vld [vmem:[#allocation37_spill] sm:$0xff] }
 0x5e0   :  { %14847 = vst [vmem:[#allocation48_spill] sm:$0xff] %v14263_v29  ;;  %14848 = vst [vmem:[#allocation24_spill] sm:$0xff] %v14267_v8  ;;  %v14275_v19 = vadd.f32 %v13842_v42, %v14850_v27  ;;  %v14279_v43 = vadd.f32 %v13842_v42, %v14852_v30  ;;  %v7460_v29 = vld [vmem:[#allocation6 + $0x48] sm:$0xff]  ;;  %v7459_v17 = vld [vmem:[#allocation6 + $0x40] sm:$0xff] }
 0x5e1   :  { %14849 = vst [vmem:[#allocation47_spill] sm:$0xff] %v14271_v33  ;;  %14855 = vst [vmem:[#allocation36_spill] sm:$0xff] %v14283_v35  ;;  %v14856_v8 = vld [vmem:[#allocation19_spill] sm:$0xff]  ;;  %v14858_v33 = vld [vmem:[#allocation20_spill] sm:$0xff]  ;;  %v7524_v13 = vadd.f32 %v7460_v29, %v14111_v32  ;;  %v7530_v32 = vadd.f32 %v7466_v14, %v14135_v58  ;;  %v7541_v29 = vadd.f32 %v7477_v1, %v14179_v7 }
 0x5e2   :  { %14851 = vst [vmem:[#allocation35_spill] sm:$0xff] %v14275_v19  ;;  %14853 = vst [vmem:[#allocation41_spill] sm:$0xff] %v14279_v43  ;;  %v14287_v53 = vadd.f32 %v13842_v42, %v14856_v8  ;;  %v14291_v27 = vadd.f32 %v13842_v42, %v14858_v33  ;;  %v14860_v19 = vld [vmem:[#allocation38_spill] sm:$0xff]  ;;  %v7464_v43 = vld [vmem:[#allocation6 + $0x68] sm:$0xff]  ;;  %v14303_v8 = vadd.f32 %v13842_v42, %v14051_v12 }
 0x5e3   :  { %v14295_v30 = vadd.f32 %v13842_v42, %v14860_v19  ;;  %14862 = vst [vmem:[#allocation37_spill] sm:$0xff] %v14299_v16  ;;  %v14307_v33 = vadd.f32 %v13842_v42, %v14055_v44  ;;  %v14311_v19 = vadd.f32 %v13842_v42, %v14059_v63  ;;  %v7469_v35 = vld [vmem:[#allocation6 + $0x90] sm:$0xff]  ;;  %14866 = vst [vmem:[#allocation38_spill] sm:$0xff] %v14315_v56  ;;  %v7472_v63 = vld [vmem:[#allocation6 + $0xa8] sm:$0xff] }
 0x5e4   :  { %14857 = vst [vmem:[#allocation40_spill] sm:$0xff] %v14287_v53  ;;  %14859 = vst [vmem:[#allocation34_spill] sm:$0xff] %v14291_v27  ;;  %v7467_v27 = vld [vmem:[#allocation6 + $0x80] sm:$0xff]  ;;  %v7470_v53 = vld [vmem:[#allocation6 + $0x98] sm:$0xff]  ;;  %v14319_v12 = vadd.f32 %v13842_v42, %v14067_v37  ;;  %v14323_v44 = vadd.f32 %v13842_v42, %v14071_v45  ;;  %v7519_v56 = vadd.f32 %v7455_v61, %v14091_v11 }
 0x5e5   :  { %14861 = vst [vmem:[#allocation22_spill] sm:$0xff] %v14295_v30  ;;  %14863 = vst [vmem:[#allocation39_spill] sm:$0xff] %v14303_v8  ;;  %v7468_v30 = vld [vmem:[#allocation6 + $0x88] sm:$0xff]  ;;  %v7474_v8 = vld [vmem:[#allocation6 + $0xb8] sm:$0xff]  ;;  %v7520_v42 = vadd.f32 %v7456_v0, %v14095_v62  ;;  %v7521_v45 = vadd.f32 %v7457_v59, %v14099_v39  ;;  %v7525_v11 = vadd.f32 %v7461_v2, %v14115_v57 }
 0x5e6   :  { %14864 = vst [vmem:[#allocation19_spill] sm:$0xff] %v14307_v33  ;;  %14865 = vst [vmem:[#allocation20_spill] sm:$0xff] %v14311_v19  ;;  %v7515_v33 = vadd.f32 %v7451_v34, %v14075_v51  ;;  %v7471_v19 = vld [vmem:[#allocation6 + $0xa0] sm:$0xff]  ;;  %v7473_v16 = vld [vmem:[#allocation6 + $0xb0] sm:$0xff]  ;;  %v7522_v51 = vadd.f32 %v7458_v50, %v14103_v3  ;;  %v7523_v34 = vadd.f32 %v7459_v17, %v14107_v15 }
 0x5e7   :  { %14867 = vst [vmem:[#allocation49_spill] sm:$0xff] %v14319_v12  ;;  %v7476_v37 = vld [vmem:[#allocation6 + $0xc8] sm:$0xff]  ;;  %v7475_v12 = vld [vmem:[#allocation6 + $0xc0] sm:$0xff]  ;;  %v7482_v55 = vld [vmem:[#allocation6 + $0xf8] sm:$0xff]  ;;  %v7526_v61 = vadd.f32 %v7462_v18, %v14119_v21  ;;  %v7528_v59 = vadd.f32 %v7464_v43, %v14127_v48  ;;  %v7529_v50 = vadd.f32 %v7465_v25, %v14131_v26  ;;  %v7531_v57 = vadd.f32 %v7467_v27, %v14139_v20 }
 0x5e8   :  { %7579 = vst [vmem:[#allocation11] sm:$0xff] %v7515_v33  ;;  %v7479_v54 = vld [vmem:[#allocation6 + $0xe0] sm:$0xff]  ;;  %v7481_v10 = vld [vmem:[#allocation6 + $0xf0] sm:$0xff]  ;;  %7580 = vst [vmem:[#allocation11 + $0x8] sm:$0xff] %v7516_v6  ;;  %v7532_v38 = vadd.f32 %v7468_v30, %v14143_v52  ;;  %v7533_v2 = vadd.f32 %v7469_v35, %v14147_v41  ;;  %v7534_v48 = vadd.f32 %v7470_v53, %v14151_v40 }
 0x5e9   :  { %7581 = vst [vmem:[#allocation11 + $0x10] sm:$0xff] %v7517_v5  ;;  %7582 = vst [vmem:[#allocation11 + $0x18] sm:$0xff] %v7518_v49  ;;  %v7484_v62 = vld [vmem:[#allocation6 + $0x108] sm:$0xff]  ;;  %v7483_v39 = vld [vmem:[#allocation6 + $0x100] sm:$0xff]  ;;  %v7535_v26 = vadd.f32 %v7471_v19, %v14155_v36  ;;  %v7536_v14 = vadd.f32 %v7472_v63, %v14159_v23  ;;  %v7537_v18 = vadd.f32 %v7473_v16, %v14163_v60 }
 0x5ea   :  { %7583 = vst [vmem:[#allocation11 + $0x20] sm:$0xff] %v7519_v56  ;;  %v7486_v3 = vld [vmem:[#allocation6 + $0x118] sm:$0xff]  ;;  %v7485_v15 = vld [vmem:[#allocation6 + $0x110] sm:$0xff]  ;;  %7584 = vst [vmem:[#allocation11 + $0x28] sm:$0xff] %v7520_v42  ;;  %v7538_v0 = vadd.f32 %v7474_v8, %v14167_v46  ;;  %v7539_v52 = vadd.f32 %v7475_v12, %v14171_v31  ;;  %v7540_v17 = vadd.f32 %v7476_v37, %v14175_v47 }
 0x5eb   :  { %7585 = vst [vmem:[#allocation11 + $0x30] sm:$0xff] %v7521_v45  ;;  %7586 = vst [vmem:[#allocation11 + $0x38] sm:$0xff] %v7522_v51  ;;  %v7488_v21 = vld [vmem:[#allocation6 + $0x128] sm:$0xff]  ;;  %v7487_v4 = vld [vmem:[#allocation6 + $0x120] sm:$0xff]  ;;  %v7542_v43 = vadd.f32 %v7478_v9, %v14183_v24 }
 0x5ec   :  { %7587 = vst [vmem:[#allocation11 + $0x40] sm:$0xff] %v7523_v34  ;;  %v7490_v5 = vld [vmem:[#allocation6 + $0x138] sm:$0xff]  ;;  %v7489_v6 = vld [vmem:[#allocation6 + $0x130] sm:$0xff]  ;;  %7588 = vst [vmem:[#allocation11 + $0x48] sm:$0xff] %v7524_v13 }
 0x5ed   :  { %7589 = vst [vmem:[#allocation11 + $0x50] sm:$0xff] %v7525_v11  ;;  %7590 = vst [vmem:[#allocation11 + $0x58] sm:$0xff] %v7526_v61  ;;  %v7492_v58 = vld [vmem:[#allocation6 + $0x148] sm:$0xff]  ;;  %v7491_v20 = vld [vmem:[#allocation6 + $0x140] sm:$0xff] }
 0x5ee   :  { %7591 = vst [vmem:[#allocation11 + $0x60] sm:$0xff] %v7527_v22  ;;  %v7494_v25 = vld [vmem:[#allocation6 + $0x158] sm:$0xff]  ;;  %7592 = vst [vmem:[#allocation11 + $0x68] sm:$0xff] %v7528_v59  ;;  %v7493_v41 = vld [vmem:[#allocation6 + $0x150] sm:$0xff] }
 0x5ef   :  { %7593 = vst [vmem:[#allocation11 + $0x70] sm:$0xff] %v7529_v50  ;;  %7594 = vst [vmem:[#allocation11 + $0x78] sm:$0xff] %v7530_v32  ;;  %v7496_v40 = vld [vmem:[#allocation6 + $0x168] sm:$0xff]  ;;  %v7495_v36 = vld [vmem:[#allocation6 + $0x160] sm:$0xff] }
 0x5f0   :  { %7595 = vst [vmem:[#allocation11 + $0x80] sm:$0xff] %v7531_v57  ;;  %v14868_v23 = vld [vmem:[#allocation17_spill] sm:$0xff]  ;;  %7596 = vst [vmem:[#allocation11 + $0x88] sm:$0xff] %v7532_v38  ;;  %v7498_v60 = vld [vmem:[#allocation6 + $0x178] sm:$0xff] }
 0x5f1   :  { %v7543_v35 = vadd.f32 %v7479_v54, %v14868_v23  ;;  %7597 = vst [vmem:[#allocation11 + $0x90] sm:$0xff] %v7533_v2  ;;  %7598 = vst [vmem:[#allocation11 + $0x98] sm:$0xff] %v7534_v48  ;;  %v7497_v46 = vld [vmem:[#allocation6 + $0x170] sm:$0xff]  ;;  %v7500_v31 = vld [vmem:[#allocation6 + $0x188] sm:$0xff] }
 0x5f2   :  { %7599 = vst [vmem:[#allocation11 + $0xa0] sm:$0xff] %v7535_v26  ;;  %v14869_v53 = vld [vmem:[#allocation26_spill] sm:$0xff]  ;;  %v14871_v8 = vld [vmem:[#allocation16_spill] sm:$0xff]  ;;  %7600 = vst [vmem:[#allocation11 + $0xa8] sm:$0xff] %v7536_v14 }
 0x5f3   :  { %v7544_v27 = vadd.f32 %v7480_v28, %v14869_v53  ;;  %v14870_v30 = vld [vmem:[#allocation42_spill] sm:$0xff]  ;;  %v7546_v33 = vadd.f32 %v7482_v55, %v14871_v8  ;;  %v14872_v47 = vld [vmem:[#allocation28_spill] sm:$0xff]  ;;  %7601 = vst [vmem:[#allocation11 + $0xb0] sm:$0xff] %v7537_v18  ;;  %7602 = vst [vmem:[#allocation11 + $0xb8] sm:$0xff] %v7538_v0 }
 0x5f4   :  { %v7545_v16 = vadd.f32 %v7481_v10, %v14870_v30  ;;  %v7547_v19 = vadd.f32 %v7483_v39, %v14872_v47  ;;  %7603 = vst [vmem:[#allocation11 + $0xc0] sm:$0xff] %v7539_v52  ;;  %v7499_v7 = vld [vmem:[#allocation6 + $0x180] sm:$0xff]  ;;  %v7502_v24 = vld [vmem:[#allocation6 + $0x198] sm:$0xff]  ;;  %v7501_v1 = vld [vmem:[#allocation6 + $0x190] sm:$0xff] }
 0x5f5   :  { %v14873_v9 = vld [vmem:[#allocation18_spill] sm:$0xff]  ;;  %v14874_v12 = vld [vmem:[#allocation25_spill] sm:$0xff]  ;;  %v14876_v42 = vld [vmem:[#allocation32_spill] sm:$0xff]  ;;  %7604 = vst [vmem:[#allocation11 + $0xc8] sm:$0xff] %v7540_v17 }
 0x5f6   :  { %v7548_v56 = vadd.f32 %v7484_v62, %v14873_v9  ;;  %v7549_v63 = vadd.f32 %v7485_v15, %v14874_v12  ;;  %v14875_v49 = vld [vmem:[#allocation21_spill] sm:$0xff]  ;;  %v7551_v45 = vadd.f32 %v7487_v4, %v14876_v42  ;;  %7605 = vst [vmem:[#allocation11 + $0xd0] sm:$0xff] %v7541_v29  ;;  %7606 = vst [vmem:[#allocation11 + $0xd8] sm:$0xff] %v7542_v43  ;;  %v7503_v34 = vld [vmem:[#allocation6 + $0x1a0] sm:$0xff] }
 0x5f7   :  { %v7550_v37 = vadd.f32 %v7486_v3, %v14875_v49  ;;  %7607 = vst [vmem:[#allocation11 + $0xe0] sm:$0xff] %v7543_v35  ;;  %v7504_v51 = vld [vmem:[#allocation6 + $0x1a8] sm:$0xff]  ;;  %v7506_v28 = vld [vmem:[#allocation6 + $0x1b8] sm:$0xff]  ;;  %v14880_v22 = vld [vmem:[#allocation44_spill] sm:$0xff] }
 0x5f8   :  { %v14877_v54 = vld [vmem:[#allocation33_spill] sm:$0xff]  ;;  %v14878_v10 = vld [vmem:[#allocation23_spill] sm:$0xff]  ;;  %v7555_v62 = vadd.f32 %v7491_v20, %v14880_v22  ;;  %7608 = vst [vmem:[#allocation11 + $0xe8] sm:$0xff] %v7544_v27  ;;  %7609 = vst [vmem:[#allocation11 + $0xf0] sm:$0xff] %v7545_v16 }
 0x5f9   :  { %v7552_v55 = vadd.f32 %v7488_v21, %v14877_v54  ;;  %v7553_v13 = vadd.f32 %v7489_v6, %v14878_v10  ;;  %v14879_v11 = vld [vmem:[#allocation29_spill] sm:$0xff]  ;;  %7610 = vst [vmem:[#allocation11 + $0xf8] sm:$0xff] %v7546_v33  ;;  %7611 = vst [vmem:[#allocation11 + $0x100] sm:$0xff] %v7547_v19  ;;  %v7505_v39 = vld [vmem:[#allocation6 + $0x1b0] sm:$0xff] }
 0x5fa   :  { %v7554_v61 = vadd.f32 %v7490_v5, %v14879_v11  ;;  %v7508_v3 = vld [vmem:[#allocation6 + $0x1c8] sm:$0xff]  ;;  %v7507_v15 = vld [vmem:[#allocation6 + $0x1c0] sm:$0xff]  ;;  %v14881_v59 = vld [vmem:[#allocation43_spill] sm:$0xff]  ;;  %7612 = vst [vmem:[#allocation11 + $0x108] sm:$0xff] %v7548_v56 }
 0x5fb   :  { %v7556_v50 = vadd.f32 %v7492_v58, %v14881_v59  ;;  %v14882_v32 = vld [vmem:[#allocation30_spill] sm:$0xff]  ;;  %v14883_v4 = vld [vmem:[#allocation31_spill] sm:$0xff]  ;;  %v14884_v21 = vld [vmem:[#allocation45_spill] sm:$0xff]  ;;  %7613 = vst [vmem:[#allocation11 + $0x110] sm:$0xff] %v7549_v63 }
 0x5fc   :  { %v7557_v57 = vadd.f32 %v7493_v41, %v14882_v32  ;;  %v7558_v38 = vadd.f32 %v7494_v25, %v14883_v4  ;;  %v7559_v2 = vadd.f32 %v7495_v36, %v14884_v21  ;;  %7614 = vst [vmem:[#allocation11 + $0x118] sm:$0xff] %v7550_v37  ;;  %7615 = vst [vmem:[#allocation11 + $0x120] sm:$0xff] %v7551_v45  ;;  %v7510_v5 = vld [vmem:[#allocation6 + $0x1d8] sm:$0xff]  ;;  %v7509_v6 = vld [vmem:[#allocation6 + $0x1d0] sm:$0xff] }
 0x5fd   :  { %v7511_v48 = vld [vmem:[#allocation6 + $0x1e0] sm:$0xff]  ;;  %v14885_v26 = vld [vmem:[#allocation46_spill] sm:$0xff]  ;;  %v14886_v14 = vld [vmem:[#allocation27_spill] sm:$0xff]  ;;  %7616 = vst [vmem:[#allocation11 + $0x128] sm:$0xff] %v7552_v55 }
 0x5fe   :  { %v7560_v20 = vadd.f32 %v7496_v40, %v14885_v26  ;;  %v7561_v18 = vadd.f32 %v7497_v46, %v14886_v14  ;;  %v14887_v0 = vld [vmem:[#allocation48_spill] sm:$0xff]  ;;  %7617 = vst [vmem:[#allocation11 + $0x130] sm:$0xff] %v7553_v13  ;;  %7618 = vst [vmem:[#allocation11 + $0x138] sm:$0xff] %v7554_v61  ;;  %v7512_v25 = vld [vmem:[#allocation6 + $0x1e8] sm:$0xff] }
 0x5ff   :  { %v7562_v52 = vadd.f32 %v7498_v60, %v14887_v0  ;;  %v14888_v58 = vld [vmem:[#allocation24_spill] sm:$0xff]  ;;  %7619 = vst [vmem:[#allocation11 + $0x140] sm:$0xff] %v7555_v62  ;;  %v7514_v41 = vld [vmem:[#allocation6 + $0x1f8] sm:$0xff]  ;;  %v14891_v35 = vld [vmem:[#allocation41_spill] sm:$0xff] }
 0x600   :  { %v7563_v17 = vadd.f32 %v7499_v7, %v14888_v58  ;;  %v14889_v36 = vld [vmem:[#allocation47_spill] sm:$0xff]  ;;  %v7566_v53 = vadd.f32 %v7502_v24, %v14891_v35  ;;  %v14892_v27 = vld [vmem:[#allocation36_spill] sm:$0xff]  ;;  %7620 = vst [vmem:[#allocation11 + $0x148] sm:$0xff] %v7556_v50  ;;  %7621 = vst [vmem:[#allocation11 + $0x150] sm:$0xff] %v7557_v57  ;;  %v7578_v42 = vadd.f32 %v7514_v41, %v14323_v44 }
 0x601   :  { %v7564_v29 = vadd.f32 %v7500_v31, %v14889_v36  ;;  %v14890_v43 = vld [vmem:[#allocation35_spill] sm:$0xff]  ;;  %v7567_v40 = vadd.f32 %v7503_v34, %v14892_v27  ;;  %7622 = vst [vmem:[#allocation11 + $0x158] sm:$0xff] %v7558_v38  ;;  %7623 = vst [vmem:[#allocation11 + $0x160] sm:$0xff] %v7559_v2  ;;  %v14893_v60 = vld [vmem:[#allocation40_spill] sm:$0xff] }
 0x602   :  { %v7565_v23 = vadd.f32 %v7501_v1, %v14890_v43  ;;  %v7568_v46 = vadd.f32 %v7504_v51, %v14893_v60  ;;  %v14894_v30 = vld [vmem:[#allocation34_spill] sm:$0xff]  ;;  %v14896_v47 = vld [vmem:[#allocation37_spill] sm:$0xff]  ;;  %7624 = vst [vmem:[#allocation11 + $0x168] sm:$0xff] %v7560_v20  ;;  %7625 = vst [vmem:[#allocation11 + $0x170] sm:$0xff] %v7561_v18 }
 0x603   :  { %v7569_v16 = vadd.f32 %v7505_v39, %v14894_v30  ;;  %v14895_v8 = vld [vmem:[#allocation22_spill] sm:$0xff]  ;;  %v7571_v31 = vadd.f32 %v7507_v15, %v14896_v47  ;;  %7626 = vst [vmem:[#allocation11 + $0x178] sm:$0xff] %v7562_v52  ;;  %7627 = vst [vmem:[#allocation11 + $0x180] sm:$0xff] %v7563_v17  ;;  %v14897_v19 = vld [vmem:[#allocation39_spill] sm:$0xff] }
 0x604   :  { %v7570_v33 = vadd.f32 %v7506_v28, %v14895_v8  ;;  %v7572_v7 = vadd.f32 %v7508_v3, %v14897_v19  ;;  %v14898_v24 = vld [vmem:[#allocation19_spill] sm:$0xff]  ;;  %v14899_v9 = vld [vmem:[#allocation20_spill] sm:$0xff]  ;;  %v14900_v12 = vld [vmem:[#allocation38_spill] sm:$0xff]  ;;  %7628 = vst [vmem:[#allocation11 + $0x188] sm:$0xff] %v7564_v29 }
 0x605   :  { %v7573_v1 = vadd.f32 %v7509_v6, %v14898_v24  ;;  %v7574_v56 = vadd.f32 %v7510_v5, %v14899_v9  ;;  %v7575_v63 = vadd.f32 %v7511_v48, %v14900_v12  ;;  %7629 = vst [vmem:[#allocation11 + $0x190] sm:$0xff] %v7565_v23  ;;  %7630 = vst [vmem:[#allocation11 + $0x198] sm:$0xff] %v7566_v53  ;;  %v14901_v49 = vld [vmem:[#allocation49_spill] sm:$0xff] }
 0x606   :  { %7631 = vst [vmem:[#allocation11 + $0x1a0] sm:$0xff] %v7567_v40  ;;  %v7576_v37 = vadd.f32 %v7512_v25, %v14901_v49  ;;  %7632 = vst [vmem:[#allocation11 + $0x1a8] sm:$0xff] %v7568_v46 }
 0x607   :  { %7633 = vst [vmem:[#allocation11 + $0x1b0] sm:$0xff] %v7569_v16  ;;  %7634 = vst [vmem:[#allocation11 + $0x1b8] sm:$0xff] %v7570_v33 }
 0x608   :  { %7635 = vst [vmem:[#allocation11 + $0x1c0] sm:$0xff] %v7571_v31  ;;  %7636 = vst [vmem:[#allocation11 + $0x1c8] sm:$0xff] %v7572_v7 }
 0x609   :  { %7637 = vst [vmem:[#allocation11 + $0x1d0] sm:$0xff] %v7573_v1  ;;  %7638 = vst [vmem:[#allocation11 + $0x1d8] sm:$0xff] %v7574_v56 }
 0x60a   :  { %7639 = vst [vmem:[#allocation11 + $0x1e0] sm:$0xff] %v7575_v63  ;;  %7640 = vst [vmem:[#allocation11 + $0x1e8] sm:$0xff] %v7576_v37 }
 0x60b   :  { %7642 = vst [vmem:[#allocation11 + $0x1f8] sm:$0xff] %v7578_v42 }
 0x60c   :  { %10894 = shalt.err (!%p10891_p8)
}
 0x60d   :  { %s10895_s8 = scalar_lea.hbm %s14409_s6, 8192 }
 0x60e   :  { %p10896_p9 = scmp.ne.s32.totalorder %s14409_s6, %s10895_s8  ;;  %p10899_p10 = scmp.lt.u32.totalorder %s10895_s8, %s14409_s6 }
 0x610   :  { %p10901_p11 = pnand %p10899_p10, %p10896_p9 }
 0x612   :  { %10904 = shalt.err (!%p10901_p11)
}
 0x613   :  { %7654 = dma.vmem_to_hbm [thread:$0]  %s7649_s5, 8192, %s14409_s6, [#allocation5], %s10915_s9, %s10915_s9, %s10916_s10  }
 0x614   :  { %10911 = dma.done.wait [#allocation5], 8192  }
 0x615   :  { %10912 = vsyncadd [#allocation5], 4294959104 }
 0x616   :  { %7658 = vsyncpa [#allocation4], 1 }
 0x617   :  { %7659 = vsyncpa [#allocation7], 1 }
 0x618   :  { %7660 = vsyncpa [#allocation10], 1 }
 0x619   :  { %7661 = vsyncpa [#allocation5], 1 }

</bundles_post_ra>
